<compile_context>
chip_gen: v7x
topology: tpu7x:2x2x1
jax: 0.10.0
libtpu: 0.0.40
codegen_flags: <defaults>
</compile_context>

<pallas_src>
import functools
import math

import jax
import jax.numpy as jnp
from jax.experimental import pallas as pl
from jax.experimental.pallas import tpu as pltpu


# ----------------------------------------------------------------------------
# Small helpers
# ----------------------------------------------------------------------------
def _round_up(x, m):
    return ((x + m - 1) // m) * m


def _vmem_limit_bytes():
    """Generation-aware scoped-VMEM limit (v7x: 64 MiB physical, v5e/v6e: 128 MiB)."""
    cap = 64 * 1024 * 1024
    try:
        info = pltpu.get_tpu_info()
        cap = int(getattr(info, "vmem_capacity_bytes", cap))
    except Exception:
        pass
    return max(32 * 1024 * 1024, min((cap * 3) // 4, 100 * 1024 * 1024))


def _erf_approx(z):
    """Abramowitz & Stegun 7.1.26 erf approximation, |err| <= 1.5e-7 (exp + VPU only)."""
    a1, a2, a3, a4, a5 = (0.254829592, -0.284496736, 1.421413741,
                          -1.453152027, 1.061405429)
    p = 0.3275911
    az = jnp.abs(z)
    t = 1.0 / (1.0 + p * az)
    poly = ((((a5 * t + a4) * t + a3) * t + a2) * t + a1) * t
    y = 1.0 - poly * jnp.exp(-az * az)
    return jnp.where(z < 0.0, -y, y)


def _gelu(x):
    return 0.5 * x * (1.0 + _erf_approx(x * 0.7071067811865476))


def _build_interp_matrix(L_in, L_out):
    """(L_in, L_out) matrix M such that interp(v, L_out) == v @ M.

    Matches F.interpolate(mode='linear', align_corners=False) exactly: it is a
    linear map of the input samples (2 non-zeros per output column, summing to 1,
    so folding the conv bias / '+1' before interpolation is exact).
    """
    scale = L_in / L_out
    i = jnp.arange(L_out, dtype=jnp.float32)
    src = jnp.maximum(scale * (i + 0.5) - 0.5, 0.0)
    i0 = jnp.clip(jnp.floor(src).astype(jnp.int32), 0, L_in - 1)
    i1 = jnp.minimum(i0 + 1, L_in - 1)
    w1 = src - i0.astype(jnp.float32)
    m = (jax.nn.one_hot(i0, L_in, dtype=jnp.float32) * (1.0 - w1)[:, None]
         + jax.nn.one_hot(i1, L_in, dtype=jnp.float32) * w1[:, None])
    return m.T                                                   # (L_in, L_out)


def _pick_t_tile(T, *, bytes_per_col, vmem_budget, cap=8192):
    """Largest 128-multiple T tile that fits the VMEM budget (prefers divisors of T)."""
    t128 = _round_up(max(T, 1), 128)
    fit = max(128, (vmem_budget // max(bytes_per_col, 1)) // 128 * 128)
    cap = max(128, (cap // 128) * 128)
    tt = min(t128, fit, cap)
    for cand in range(tt, 127, -128):
        if t128 % cand == 0:
            if cand >= max(256, tt // 4) or cand == tt:
                return cand
            break
    return tt


# ----------------------------------------------------------------------------
# The single fused kernel
# ----------------------------------------------------------------------------
def _fused_filter_block_kernel(x_ref, ss_ref, m_ref, w_in_ref, b_in_ref,
                               wc_ref, bc_ref, o_ref, halo_ref,
                               *, K, dils, C, t_tile, halo_w):
    """One (batch, T-tile) step of the whole FilterBlock.

    halo_ref: (L, C, halo_w) f32 scratch carrying each layer's causal halo across
    T tiles.  Correctness requires the T grid axis to be the innermost axis and to
    stay "arbitrary" (sequential); the batch axis may be "parallel".
    """
    t = pl.program_id(1)

    @pl.when(t == 0)
    def _():
        # Reset causal halos at the start of every batch's T sweep; this is exactly
        # CausalConv1d's left zero-padding of the modulated input.
        halo_ref[...] = jnp.zeros_like(halo_ref)

    # ---- input 1x1 conv (bf16 MXU, f32 accumulation) -------------------------
    xb = x_ref[...].astype(jnp.bfloat16)                         # (Cin, tt)
    h = (jnp.dot(w_in_ref[...], xb, preferred_element_type=jnp.float32)
         + b_in_ref[...])                                        # (C, tt) f32

    # ---- all FiLM scale/shift rows of this tile in ONE interpolation matmul ---
    # ss_ref: (2*L*C, Tc) bf16 (to_scale/to_shift conv outputs, '+1' folded into
    # the scale bias); m_ref: (Tc, tt) bf16 linear-interpolation matrix.
    ss_tile = jnp.dot(ss_ref[...], m_ref[...],
                      preferred_element_type=jnp.float32)        # (2*L*C, tt) f32

    res = h
    for l, d in enumerate(dils):
        pad = (K - 1) * d
        if l % 2 == 0:
            res = h                                              # FilterResBlock entry
        scale = ss_tile[(2 * l) * C:(2 * l + 1) * C, :]
        shift = ss_tile[(2 * l + 1) * C:(2 * l + 2) * C, :]
        xm32 = _gelu(h) * scale + shift                          # (C, tt) f32
        xm = xm32.astype(jnp.bfloat16)

        # [halo slab | modulated tile]; both pieces are 128-lane-aligned, so the
        # concat is tile-aligned and only the tap slices below need lane shifts.
        halo = halo_ref[l].astype(jnp.bfloat16)                  # (C, halo_w)
        xfull = jnp.concatenate([halo, xm], axis=-1)             # (C, halo_w + tt)

        # Causal dilated conv as K accumulated (C, C) @ (C, tt) bf16 MXU matmuls
        # over lane-shifted taps (no im2col buffer, no sublane repacking).
        acc = None
        for k in range(K):
            off = halo_w - pad + k * d
            tap = xfull[:, off:off + t_tile]                     # (C, tt) bf16
            dk = jnp.dot(wc_ref[l * K + k], tap,
                         preferred_element_type=jnp.float32)
            acc = dk if acc is None else acc + dk
        h = acc + bc_ref[l]
        if l % 2 == 1:
            h = h + res                                          # FilterResBlock exit

        # Carry the last halo_w modulated columns (lane-aligned, unmasked store).
        halo_ref[l] = xm32[:, t_tile - halo_w:]

    o_ref[...] = h.astype(o_ref.dtype)


# ----------------------------------------------------------------------------
# Wrapper: whole FilterBlock forward in one pallas_call
# ----------------------------------------------------------------------------
def filter_block_forward(x, c, packed, *, kernel_size, dilations,
                         t_tile=None, t_tile_cap=8192):
    """FilterBlock.forward.  x:(B,Cin,T) f32, c:(B,cond,Tc) f32 -> (B,C,T) f32."""
    B, Cin, T = x.shape
    Tc = c.shape[-1]
    C = packed["w_in"].shape[0]
    K = kernel_size
    n_layers = 2 * dilations
    dils = tuple(2 ** (i // 2) for i in range(n_layers))
    pad_max = (K - 1) * max(dils)
    halo_w = max(128, _round_up(pad_max, 128))
    n2lc = 2 * n_layers * C
    assert packed["w_ss"].shape[0] == n2lc
    assert packed["w_convs"].shape[0] == n_layers * K

    vmem_limit = _vmem_limit_bytes()
    if t_tile is None:
        bytes_per_col = (2 * Cin * 4 + 2 * Tc * 2 + 2 * C * 4
                         + n2lc * 4 + C * 28)
        t_tile = _pick_t_tile(T, bytes_per_col=bytes_per_col,
                              vmem_budget=vmem_limit // 2, cap=t_tile_cap)
    tt = max(int(t_tile), halo_w)
    assert tt % 128 == 0, "t_tile must be a multiple of 128"
    T_pad = _round_up(T, tt)
    nt = T_pad // tt

    # Tiny to_scale/to_shift 1x1 convs on c in plain XLA ('+1' folded into bias).
    ss_small = (jnp.einsum("oc,bct->bot", packed["w_ss"], c.astype(jnp.float32))
                + packed["b_ss"][None, :, :]).astype(jnp.bfloat16)  # (B, 2LC, Tc)

    # Linear interpolation as a (Tc, T) matrix; right-padded columns are zero so
    # padded T positions (>= T, dropped at the end) never poison real outputs
    # (the conv stack is causal, so they cannot affect t < T anyway).
    interp = _build_interp_matrix(Tc, T)
    if T_pad > T:
        interp = jnp.pad(interp, ((0, 0), (0, T_pad - T)))
    interp = interp.astype(jnp.bfloat16)

    x_p = x.astype(jnp.float32)
    if T_pad > T:
        x_p = jnp.pad(x_p, ((0, 0), (0, 0), (0, T_pad - T)))

    kernel = functools.partial(_fused_filter_block_kernel, K=K, dils=dils, C=C,
                               t_tile=tt, halo_w=halo_w)

    y = pl.pallas_call(
        kernel,
        out_shape=jax.ShapeDtypeStruct((B, C, T_pad), jnp.float32),
        grid=(B, nt),
        in_specs=[
            pl.BlockSpec((None, Cin, tt), lambda b, t: (b, 0, t)),        # x
            pl.BlockSpec((None, n2lc, Tc), lambda b, t: (b, 0, 0)),       # ss_small
            pl.BlockSpec((Tc, tt), lambda b, t: (0, t)),                  # interp
            pl.BlockSpec((C, Cin), lambda b, t: (0, 0)),                  # w_in
            pl.BlockSpec((C, 1), lambda b, t: (0, 0)),                    # b_in
            pl.BlockSpec((n_layers * K, C, C), lambda b, t: (0, 0, 0)),   # conv taps
            pl.BlockSpec((n_layers, C, 1), lambda b, t: (0, 0, 0)),       # conv biases
        ],
        out_specs=pl.BlockSpec((None, C, tt), lambda b, t: (b, 0, t)),
        scratch_shapes=[pltpu.VMEM((n_layers, C, halo_w), jnp.float32)],
        compiler_params=pltpu.CompilerParams(
            # The halo carry requires the T axis to stay innermost + sequential.
            dimension_semantics=("parallel", "arbitrary"),
            vmem_limit_bytes=vmem_limit),
    )(x_p, ss_small, interp, packed["w_in"], packed["b_in"],
      packed["w_convs"], packed["b_convs"])

    return y if T_pad == T else y[:, :, :T]


# ----------------------------------------------------------------------------
# Parameter packing (PyTorch layout -> kernel layout)
# ----------------------------------------------------------------------------
def pack_params(params, kernel_size, dilations):
    C = params["input_conv"]["w"].shape[0]
    w_in = params["input_conv"]["w"][:, :, 0].astype(jnp.bfloat16)        # (C, Cin)
    b_in = params["input_conv"]["b"].reshape(-1, 1).astype(jnp.float32)   # (C, 1)
    ws, bs, wcs, bcs = [], [], [], []
    for d in range(dilations):
        bp = params["blocks"][d]
        for name in ("c1", "c2"):
            cp = bp[name]
            ws.append(cp["to_scale"]["w"][:, :, 0])          # (C, cond)
            bs.append(cp["to_scale"]["b"] + 1.0)             # '+1' folded into bias
            ws.append(cp["to_shift"]["w"][:, :, 0])
            bs.append(cp["to_shift"]["b"])
            wcs.append(jnp.transpose(cp["conv"]["w"], (2, 0, 1)))   # (K, Cout, Cin)
            bcs.append(cp["conv"]["b"].reshape(C, 1))
    return {
        "w_in": w_in, "b_in": b_in,
        "w_ss": jnp.concatenate(ws, axis=0).astype(jnp.float32),          # (2LC, cond)
        "b_ss": jnp.concatenate(bs, axis=0).reshape(-1, 1).astype(jnp.float32),
        "w_convs": jnp.concatenate(wcs, axis=0).astype(jnp.bfloat16),     # (L*K, C, C)
        "b_convs": jnp.stack(bcs, axis=0).astype(jnp.float32),            # (L, C, 1)
    }


# ----------------------------------------------------------------------------
# Plain-JAX f32 reference (for a loose numerical sanity check)
# ----------------------------------------------------------------------------
def _linear_interp_ref(x, L_out):
    L_in = x.shape[-1]
    if L_in == L_out:
        return x
    scale = L_in / L_out
    i = jnp.arange(L_out, dtype=jnp.float32)
    src = jnp.maximum(scale * (i + 0.5) - 0.5, 0.0)
    i0 = jnp.clip(jnp.floor(src).astype(jnp.int32), 0, L_in - 1)
    i1 = jnp.minimum(i0 + 1, L_in - 1)
    w1 = (src - i0.astype(jnp.float32))[None, None, :]
    return x[..., i0] * (1.0 - w1) + x[..., i1] * w1


def _conv1d_ref(x, w, b, *, dilation=1, left_pad=0):
    if left_pad:
        x = jnp.pad(x, ((0, 0), (0, 0), (left_pad, 0)))
    y = jax.lax.conv_general_dilated(
        x, w, window_strides=(1,), padding="VALID", rhs_dilation=(dilation,),
        dimension_numbers=("NCH", "OIH", "NCH"))
    return y + b[None, :, None]


def filter_block_reference(x, c, params, *, kernel_size, dilations):
    h = _conv1d_ref(x, params["input_conv"]["w"], params["input_conv"]["b"])
    for d in range(dilations):
        bp = params["blocks"][d]
        dilation = 2 ** d
        res = h
        for name in ("c1", "c2"):
            cp = bp[name]
            h = jax.nn.gelu(h, approximate=False)
            scale = _conv1d_ref(c, cp["to_scale"]["w"], cp["to_scale"]["b"]) + 1.0
            shift = _conv1d_ref(c, cp["to_shift"]["w"], cp["to_shift"]["b"])
            scale = _linear_interp_ref(scale, h.shape[2])
            shift = _linear_interp_ref(shift, h.shape[2])
            h = h * scale + shift
            h = _conv1d_ref(h, cp["conv"]["w"], cp["conv"]["b"],
                            dilation=dilation, left_pad=(kernel_size - 1) * dilation)
        h = h + res
    return h


# ----------------------------------------------------------------------------
# Deterministic parameter init (shapes mirror the PyTorch module)
# ----------------------------------------------------------------------------
def init_filterblock_params(key, input_channels, output_channels, condition_channels,
                            kernel_size, dilations):
    keys = iter(jax.random.split(key, 64))

    def conv_p(cin, cout, k):
        bound = 1.0 / math.sqrt(cin * k)
        return {"w": jax.random.uniform(next(keys), (cout, cin, k), jnp.float32,
                                        -bound, bound),
                "b": jax.random.uniform(next(keys), (cout,), jnp.float32,
                                        -bound, bound)}

    def modconv_p(ch, cond, k):
        return {"conv": conv_p(ch, ch, k),
                "to_scale": conv_p(cond, ch, 1),
                "to_shift": conv_p(cond, ch, 1)}

    return {
        "input_conv": conv_p(input_channels, output_channels, 1),
        "blocks": [{"c1": modconv_p(output_channels, condition_channels, kernel_size),
                    "c2": modconv_p(output_channels, condition_channels, kernel_size)}
                   for _ in range(dilations)],
    }


# ----------------------------------------------------------------------------
if __name__ == "__main__":
    key = jax.random.PRNGKey(0)
    kx, kc, kp = jax.random.split(key, 3)

    B = 2
    input_channels = 4
    output_channels = 8          # `channels` of the FilterResBlocks
    condition_channels = 32
    kernel_size = 5
    dilations = 3                # dilation 1, 2, 4 (module default)
    T, Tc = 2048, 16
    t_tile = 1024                # 2 T tiles -> exercises the causal-halo carry

    x = jax.random.normal(kx, (B, input_channels, T), dtype=jnp.float32)
    c = jax.random.normal(kc, (B, condition_channels, Tc), dtype=jnp.float32)

    params = init_filterblock_params(kp, input_channels, output_channels,
                                     condition_channels, kernel_size, dilations)
    packed = pack_params(params, kernel_size, dilations)

    fwd = jax.jit(functools.partial(filter_block_forward,
                                    kernel_size=kernel_size, dilations=dilations,
                                    t_tile=t_tile))
    y = jax.block_until_ready(fwd(x, c, packed))
    assert y.shape == (B, output_channels, T), y.shape
    assert bool(jnp.all(jnp.isfinite(y)))

    # Loose sanity check against a plain-JAX f32 reference (kernel MXU runs bf16).
    y_ref = filter_block_reference(x, c, params, kernel_size=kernel_size,
                                   dilations=dilations)
    err = float(jnp.max(jnp.abs(y - y_ref)))
    ref_scale = float(jnp.max(jnp.abs(y_ref)))
    assert err <= 0.05 * ref_scale + 0.05, (err, ref_scale)

    print("KERNEL_OK")
</pallas_src>

<mosaic_0001>
module attributes {stable_mosaic.version = 11 : i64} {
  func.func @_fused_filter_block_kernel(%arg0: i32, %arg1: i32, %arg2: memref<1x4x1024xf32, #tpu.memory_space<vmem>>, %arg3: memref<1x96x16xbf16, #tpu.memory_space<vmem>>, %arg4: memref<16x1024xbf16, #tpu.memory_space<vmem>>, %arg5: memref<8x4xbf16, #tpu.memory_space<vmem>>, %arg6: memref<8x1xf32, #tpu.memory_space<vmem>>, %arg7: memref<30x8x8xbf16, #tpu.memory_space<vmem>>, %arg8: memref<6x8x1xf32, #tpu.memory_space<vmem>>, %arg9: memref<1x8x1024xf32, #tpu.memory_space<vmem>>, %arg10: memref<6x8x128xf32, #tpu.memory_space<vmem>>) attributes {dimension_semantics = [#tpu.dimension_semantics<parallel>, #tpu.dimension_semantics<arbitrary>], iteration_bounds = array<i64: 2, 2>, scalar_prefetch = 0 : i64, scratch_operands = 1 : i64, tpu.core_type = #tpu.core_type<tc>, window_params = [{transform_indices = @transform_0, window_bounds = array<i64: 1, 4, 1024>}, {transform_indices = @transform_1, window_bounds = array<i64: 1, 96, 16>}, {transform_indices = @transform_2, window_bounds = array<i64: 16, 1024>}, {pipeline_mode = #tpu.pipeline_mode<synchronous>, transform_indices = @transform_3, window_bounds = array<i64: 8, 4>}, {pipeline_mode = #tpu.pipeline_mode<synchronous>, transform_indices = @transform_4, window_bounds = array<i64: 8, 1>}, {pipeline_mode = #tpu.pipeline_mode<synchronous>, transform_indices = @transform_5, window_bounds = array<i64: 30, 8, 8>}, {pipeline_mode = #tpu.pipeline_mode<synchronous>, transform_indices = @transform_6, window_bounds = array<i64: 6, 8, 1>}, {transform_indices = @transform_7, window_bounds = array<i64: 1, 8, 1024>}]} {
    %c0_i32 = arith.constant 0 : i32
    %0 = arith.cmpi eq, %arg1, %c0_i32 : i32
    %1 = arith.extui %0 : i1 to i32
    %c0_i32_0 = arith.constant 0 : i32
    %2 = arith.cmpi ne, %1, %c0_i32_0 : i32
    scf.if %2 {
      %cst_251 = arith.constant 0.000000e+00 : f32
      %507 = vector.broadcast %cst_251 : f32 to vector<6x8x128xf32>
      %c0_252 = arith.constant 0 : index
      %c0_253 = arith.constant 0 : index
      %c0_254 = arith.constant 0 : index
      %508 = vector.load %arg10[%c0_252, %c0_253, %c0_254] : memref<6x8x128xf32, #tpu.memory_space<vmem>>, vector<6x8x128xf32>
      tpu.vector_store %arg10[%c0_252, %c0_253, %c0_254], %507 {strides = array<i32>} : memref<6x8x128xf32, #tpu.memory_space<vmem>>, vector<6x8x128xf32>,
    } else {
    }
    %c0 = arith.constant 0 : index
    %c0_1 = arith.constant 0 : index
    %c0_2 = arith.constant 0 : index
    %3 = vector.load %arg2[%c0, %c0_1, %c0_2] : memref<1x4x1024xf32, #tpu.memory_space<vmem>>, vector<1x4x1024xf32>
    %4 = vector.shape_cast %3 : vector<1x4x1024xf32> to vector<4x1024xf32>
    %5 = arith.truncf %4 : vector<4x1024xf32> to vector<4x1024xbf16>
    %c0_3 = arith.constant 0 : index
    %c0_4 = arith.constant 0 : index
    %6 = vector.load %arg5[%c0_3, %c0_4] : memref<8x4xbf16, #tpu.memory_space<vmem>>, vector<8x4xbf16>
    %cst = arith.constant dense<0.000000e+00> : vector<8x1024xf32>
    %7 = tpu.matmul %6, %5, %cst {dimension_numbers = #tpu.dot_dimension_numbers<[1], [0], [0], [1], [0, 0, 1, 1], [], []>} : vector<8x4xbf16>, vector<4x1024xbf16>, vector<8x1024xf32> -> vector<8x1024xf32>
    %c0_5 = arith.constant 0 : index
    %c0_6 = arith.constant 0 : index
    %8 = vector.load %arg6[%c0_5, %c0_6] : memref<8x1xf32, #tpu.memory_space<vmem>>, vector<8x1xf32>
    %9 = vector.broadcast %8 : vector<8x1xf32> to vector<8x1024xf32>
    %10 = arith.addf %7, %9 : vector<8x1024xf32>
    %c0_7 = arith.constant 0 : index
    %c0_8 = arith.constant 0 : index
    %c0_9 = arith.constant 0 : index
    %11 = vector.load %arg3[%c0_7, %c0_8, %c0_9] : memref<1x96x16xbf16, #tpu.memory_space<vmem>>, vector<1x96x16xbf16>
    %12 = vector.shape_cast %11 : vector<1x96x16xbf16> to vector<96x16xbf16>
    %c0_10 = arith.constant 0 : index
    %c0_11 = arith.constant 0 : index
    %13 = vector.load %arg4[%c0_10, %c0_11] : memref<16x1024xbf16, #tpu.memory_space<vmem>>, vector<16x1024xbf16>
    %cst_12 = arith.constant dense<0.000000e+00> : vector<96x1024xf32>
    %14 = tpu.matmul %12, %13, %cst_12 {dimension_numbers = #tpu.dot_dimension_numbers<[1], [0], [0], [1], [0, 0, 1, 1], [], []>} : vector<96x16xbf16>, vector<16x1024xbf16>, vector<96x1024xf32> -> vector<96x1024xf32>
    %15 = vector.extract_strided_slice %14 {offsets = [0, 0], sizes = [8, 1024], strides = [1, 1]} : vector<96x1024xf32> to vector<8x1024xf32>
    %16 = vector.extract_strided_slice %14 {offsets = [8, 0], sizes = [8, 1024], strides = [1, 1]} : vector<96x1024xf32> to vector<8x1024xf32>
    %cst_13 = arith.constant 5.000000e-01 : f32
    %17 = vector.broadcast %cst_13 : f32 to vector<8x1024xf32>
    %18 = arith.mulf %17, %10 : vector<8x1024xf32>
    %cst_14 = arith.constant 0.707106769 : f32
    %19 = vector.broadcast %cst_14 : f32 to vector<8x1024xf32>
    %20 = arith.mulf %10, %19 : vector<8x1024xf32>
    %21 = math.absf %20 : vector<8x1024xf32>
    %cst_15 = arith.constant 0.327591091 : f32
    %22 = vector.broadcast %cst_15 : f32 to vector<8x1024xf32>
    %23 = arith.mulf %22, %21 : vector<8x1024xf32>
    %cst_16 = arith.constant 1.000000e+00 : f32
    %24 = vector.broadcast %cst_16 : f32 to vector<8x1024xf32>
    %25 = arith.addf %24, %23 : vector<8x1024xf32>
    %cst_17 = arith.constant 1.000000e+00 : f32
    %26 = vector.broadcast %cst_17 : f32 to vector<8x1024xf32>
    %27 = arith.divf %26, %25 : vector<8x1024xf32>
    %cst_18 = arith.constant 1.06140542 : f32
    %28 = vector.broadcast %cst_18 : f32 to vector<8x1024xf32>
    %29 = arith.mulf %28, %27 : vector<8x1024xf32>
    %cst_19 = arith.constant -1.45315206 : f32
    %30 = vector.broadcast %cst_19 : f32 to vector<8x1024xf32>
    %31 = arith.addf %29, %30 : vector<8x1024xf32>
    %32 = arith.mulf %31, %27 : vector<8x1024xf32>
    %cst_20 = arith.constant 1.42141378 : f32
    %33 = vector.broadcast %cst_20 : f32 to vector<8x1024xf32>
    %34 = arith.addf %32, %33 : vector<8x1024xf32>
    %35 = arith.mulf %34, %27 : vector<8x1024xf32>
    %cst_21 = arith.constant -0.284496725 : f32
    %36 = vector.broadcast %cst_21 : f32 to vector<8x1024xf32>
    %37 = arith.addf %35, %36 : vector<8x1024xf32>
    %38 = arith.mulf %37, %27 : vector<8x1024xf32>
    %cst_22 = arith.constant 0.254829586 : f32
    %39 = vector.broadcast %cst_22 : f32 to vector<8x1024xf32>
    %40 = arith.addf %38, %39 : vector<8x1024xf32>
    %41 = arith.mulf %40, %27 : vector<8x1024xf32>
    %cst_23 = arith.constant 0.000000e+00 : f32
    %42 = vector.broadcast %cst_23 : f32 to vector<8x1024xf32>
    %43 = arith.subf %42, %21 : vector<8x1024xf32>
    %44 = arith.mulf %43, %21 : vector<8x1024xf32>
    %45 = math.exp %44 : vector<8x1024xf32>
    %46 = arith.mulf %41, %45 : vector<8x1024xf32>
    %cst_24 = arith.constant 1.000000e+00 : f32
    %47 = vector.broadcast %cst_24 : f32 to vector<8x1024xf32>
    %48 = arith.subf %47, %46 : vector<8x1024xf32>
    %cst_25 = arith.constant 0.000000e+00 : f32
    %49 = vector.broadcast %cst_25 : f32 to vector<8x1024xf32>
    %50 = arith.cmpf olt, %20, %49 : vector<8x1024xf32>
    %cst_26 = arith.constant 0.000000e+00 : f32
    %51 = vector.broadcast %cst_26 : f32 to vector<8x1024xf32>
    %52 = arith.subf %51, %48 : vector<8x1024xf32>
    %53 = arith.select %50, %52, %48 : vector<8x1024xi1>, vector<8x1024xf32>
    %cst_27 = arith.constant 1.000000e+00 : f32
    %54 = vector.broadcast %cst_27 : f32 to vector<8x1024xf32>
    %55 = arith.addf %54, %53 : vector<8x1024xf32>
    %56 = arith.mulf %18, %55 : vector<8x1024xf32>
    %57 = arith.mulf %56, %15 : vector<8x1024xf32>
    %58 = arith.addf %57, %16 : vector<8x1024xf32>
    %59 = arith.truncf %58 : vector<8x1024xf32> to vector<8x1024xbf16>
    %c0_28 = arith.constant 0 : index
    %c0_29 = arith.constant 0 : index
    %c0_30 = arith.constant 0 : index
    %60 = vector.load %arg10[%c0_28, %c0_29, %c0_30] : memref<6x8x128xf32, #tpu.memory_space<vmem>>, vector<1x8x128xf32>
    %61 = vector.shape_cast %60 : vector<1x8x128xf32> to vector<8x128xf32>
    %62 = arith.truncf %61 : vector<8x128xf32> to vector<8x128xbf16>
    %63 = tpu.concatenate %62, %59 in 1 : vector<8x128xbf16>, vector<8x1024xbf16> -> vector<8x1152xbf16>
    %64 = vector.extract_strided_slice %63 {offsets = [0, 124], sizes = [8, 1024], strides = [1, 1]} : vector<8x1152xbf16> to vector<8x1024xbf16>
    %c0_31 = arith.constant 0 : index
    %c0_32 = arith.constant 0 : index
    %c0_33 = arith.constant 0 : index
    %65 = vector.load %arg7[%c0_31, %c0_32, %c0_33] : memref<30x8x8xbf16, #tpu.memory_space<vmem>>, vector<1x8x8xbf16>
    %66 = vector.shape_cast %65 : vector<1x8x8xbf16> to vector<8x8xbf16>
    %cst_34 = arith.constant dense<0.000000e+00> : vector<8x1024xf32>
    %67 = tpu.matmul %66, %64, %cst_34 {dimension_numbers = #tpu.dot_dimension_numbers<[1], [0], [0], [1], [0, 0, 1, 1], [], []>} : vector<8x8xbf16>, vector<8x1024xbf16>, vector<8x1024xf32> -> vector<8x1024xf32>
    %68 = vector.extract_strided_slice %63 {offsets = [0, 125], sizes = [8, 1024], strides = [1, 1]} : vector<8x1152xbf16> to vector<8x1024xbf16>
    %c1 = arith.constant 1 : index
    %c0_35 = arith.constant 0 : index
    %c0_36 = arith.constant 0 : index
    %69 = vector.load %arg7[%c1, %c0_35, %c0_36] : memref<30x8x8xbf16, #tpu.memory_space<vmem>>, vector<1x8x8xbf16>
    %70 = vector.shape_cast %69 : vector<1x8x8xbf16> to vector<8x8xbf16>
    %cst_37 = arith.constant dense<0.000000e+00> : vector<8x1024xf32>
    %71 = tpu.matmul %70, %68, %cst_37 {dimension_numbers = #tpu.dot_dimension_numbers<[1], [0], [0], [1], [0, 0, 1, 1], [], []>} : vector<8x8xbf16>, vector<8x1024xbf16>, vector<8x1024xf32> -> vector<8x1024xf32>
    %72 = arith.addf %67, %71 : vector<8x1024xf32>
    %73 = vector.extract_strided_slice %63 {offsets = [0, 126], sizes = [8, 1024], strides = [1, 1]} : vector<8x1152xbf16> to vector<8x1024xbf16>
    %c2 = arith.constant 2 : index
    %c0_38 = arith.constant 0 : index
    %c0_39 = arith.constant 0 : index
    %74 = vector.load %arg7[%c2, %c0_38, %c0_39] : memref<30x8x8xbf16, #tpu.memory_space<vmem>>, vector<1x8x8xbf16>
    %75 = vector.shape_cast %74 : vector<1x8x8xbf16> to vector<8x8xbf16>
    %cst_40 = arith.constant dense<0.000000e+00> : vector<8x1024xf32>
    %76 = tpu.matmul %75, %73, %cst_40 {dimension_numbers = #tpu.dot_dimension_numbers<[1], [0], [0], [1], [0, 0, 1, 1], [], []>} : vector<8x8xbf16>, vector<8x1024xbf16>, vector<8x1024xf32> -> vector<8x1024xf32>
    %77 = arith.addf %72, %76 : vector<8x1024xf32>
    %78 = vector.extract_strided_slice %63 {offsets = [0, 127], sizes = [8, 1024], strides = [1, 1]} : vector<8x1152xbf16> to vector<8x1024xbf16>
    %c3 = arith.constant 3 : index
    %c0_41 = arith.constant 0 : index
    %c0_42 = arith.constant 0 : index
    %79 = vector.load %arg7[%c3, %c0_41, %c0_42] : memref<30x8x8xbf16, #tpu.memory_space<vmem>>, vector<1x8x8xbf16>
    %80 = vector.shape_cast %79 : vector<1x8x8xbf16> to vector<8x8xbf16>
    %cst_43 = arith.constant dense<0.000000e+00> : vector<8x1024xf32>
    %81 = tpu.matmul %80, %78, %cst_43 {dimension_numbers = #tpu.dot_dimension_numbers<[1], [0], [0], [1], [0, 0, 1, 1], [], []>} : vector<8x8xbf16>, vector<8x1024xbf16>, vector<8x1024xf32> -> vector<8x1024xf32>
    %82 = arith.addf %77, %81 : vector<8x1024xf32>
    %83 = vector.extract_strided_slice %63 {offsets = [0, 128], sizes = [8, 1024], strides = [1, 1]} : vector<8x1152xbf16> to vector<8x1024xbf16>
    %c4 = arith.constant 4 : index
    %c0_44 = arith.constant 0 : index
    %c0_45 = arith.constant 0 : index
    %84 = vector.load %arg7[%c4, %c0_44, %c0_45] : memref<30x8x8xbf16, #tpu.memory_space<vmem>>, vector<1x8x8xbf16>
    %85 = vector.shape_cast %84 : vector<1x8x8xbf16> to vector<8x8xbf16>
    %cst_46 = arith.constant dense<0.000000e+00> : vector<8x1024xf32>
    %86 = tpu.matmul %85, %83, %cst_46 {dimension_numbers = #tpu.dot_dimension_numbers<[1], [0], [0], [1], [0, 0, 1, 1], [], []>} : vector<8x8xbf16>, vector<8x1024xbf16>, vector<8x1024xf32> -> vector<8x1024xf32>
    %87 = arith.addf %82, %86 : vector<8x1024xf32>
    %c0_47 = arith.constant 0 : index
    %c0_48 = arith.constant 0 : index
    %c0_49 = arith.constant 0 : index
    %88 = vector.load %arg8[%c0_47, %c0_48, %c0_49] : memref<6x8x1xf32, #tpu.memory_space<vmem>>, vector<1x8x1xf32>
    %89 = vector.shape_cast %88 : vector<1x8x1xf32> to vector<8x1xf32>
    %90 = vector.broadcast %89 : vector<8x1xf32> to vector<8x1024xf32>
    %91 = arith.addf %87, %90 : vector<8x1024xf32>
    %92 = vector.extract_strided_slice %58 {offsets = [0, 896], sizes = [8, 128], strides = [1, 1]} : vector<8x1024xf32> to vector<8x128xf32>
    %c0_50 = arith.constant 0 : index
    %c0_51 = arith.constant 0 : index
    %c0_52 = arith.constant 0 : index
    %93 = vector.load %arg10[%c0_50, %c0_51, %c0_52] : memref<6x8x128xf32, #tpu.memory_space<vmem>>, vector<1x8x128xf32>
    %94 = vector.shape_cast %93 : vector<1x8x128xf32> to vector<8x128xf32>
    %95 = vector.shape_cast %92 : vector<8x128xf32> to vector<1x8x128xf32>
    tpu.vector_store %arg10[%c0_50, %c0_51, %c0_52], %95 {strides = array<i32>} : memref<6x8x128xf32, #tpu.memory_space<vmem>>, vector<1x8x128xf32>,
    %96 = vector.extract_strided_slice %14 {offsets = [16, 0], sizes = [8, 1024], strides = [1, 1]} : vector<96x1024xf32> to vector<8x1024xf32>
    %97 = vector.extract_strided_slice %14 {offsets = [24, 0], sizes = [8, 1024], strides = [1, 1]} : vector<96x1024xf32> to vector<8x1024xf32>
    %cst_53 = arith.constant 5.000000e-01 : f32
    %98 = vector.broadcast %cst_53 : f32 to vector<8x1024xf32>
    %99 = arith.mulf %98, %91 : vector<8x1024xf32>
    %cst_54 = arith.constant 0.707106769 : f32
    %100 = vector.broadcast %cst_54 : f32 to vector<8x1024xf32>
    %101 = arith.mulf %91, %100 : vector<8x1024xf32>
    %102 = math.absf %101 : vector<8x1024xf32>
    %cst_55 = arith.constant 0.327591091 : f32
    %103 = vector.broadcast %cst_55 : f32 to vector<8x1024xf32>
    %104 = arith.mulf %103, %102 : vector<8x1024xf32>
    %cst_56 = arith.constant 1.000000e+00 : f32
    %105 = vector.broadcast %cst_56 : f32 to vector<8x1024xf32>
    %106 = arith.addf %105, %104 : vector<8x1024xf32>
    %cst_57 = arith.constant 1.000000e+00 : f32
    %107 = vector.broadcast %cst_57 : f32 to vector<8x1024xf32>
    %108 = arith.divf %107, %106 : vector<8x1024xf32>
    %cst_58 = arith.constant 1.06140542 : f32
    %109 = vector.broadcast %cst_58 : f32 to vector<8x1024xf32>
    %110 = arith.mulf %109, %108 : vector<8x1024xf32>
    %cst_59 = arith.constant -1.45315206 : f32
    %111 = vector.broadcast %cst_59 : f32 to vector<8x1024xf32>
    %112 = arith.addf %110, %111 : vector<8x1024xf32>
    %113 = arith.mulf %112, %108 : vector<8x1024xf32>
    %cst_60 = arith.constant 1.42141378 : f32
    %114 = vector.broadcast %cst_60 : f32 to vector<8x1024xf32>
    %115 = arith.addf %113, %114 : vector<8x1024xf32>
    %116 = arith.mulf %115, %108 : vector<8x1024xf32>
    %cst_61 = arith.constant -0.284496725 : f32
    %117 = vector.broadcast %cst_61 : f32 to vector<8x1024xf32>
    %118 = arith.addf %116, %117 : vector<8x1024xf32>
    %119 = arith.mulf %118, %108 : vector<8x1024xf32>
    %cst_62 = arith.constant 0.254829586 : f32
    %120 = vector.broadcast %cst_62 : f32 to vector<8x1024xf32>
    %121 = arith.addf %119, %120 : vector<8x1024xf32>
    %122 = arith.mulf %121, %108 : vector<8x1024xf32>
    %cst_63 = arith.constant 0.000000e+00 : f32
    %123 = vector.broadcast %cst_63 : f32 to vector<8x1024xf32>
    %124 = arith.subf %123, %102 : vector<8x1024xf32>
    %125 = arith.mulf %124, %102 : vector<8x1024xf32>
    %126 = math.exp %125 : vector<8x1024xf32>
    %127 = arith.mulf %122, %126 : vector<8x1024xf32>
    %cst_64 = arith.constant 1.000000e+00 : f32
    %128 = vector.broadcast %cst_64 : f32 to vector<8x1024xf32>
    %129 = arith.subf %128, %127 : vector<8x1024xf32>
    %cst_65 = arith.constant 0.000000e+00 : f32
    %130 = vector.broadcast %cst_65 : f32 to vector<8x1024xf32>
    %131 = arith.cmpf olt, %101, %130 : vector<8x1024xf32>
    %cst_66 = arith.constant 0.000000e+00 : f32
    %132 = vector.broadcast %cst_66 : f32 to vector<8x1024xf32>
    %133 = arith.subf %132, %129 : vector<8x1024xf32>
    %134 = arith.select %131, %133, %129 : vector<8x1024xi1>, vector<8x1024xf32>
    %cst_67 = arith.constant 1.000000e+00 : f32
    %135 = vector.broadcast %cst_67 : f32 to vector<8x1024xf32>
    %136 = arith.addf %135, %134 : vector<8x1024xf32>
    %137 = arith.mulf %99, %136 : vector<8x1024xf32>
    %138 = arith.mulf %137, %96 : vector<8x1024xf32>
    %139 = arith.addf %138, %97 : vector<8x1024xf32>
    %140 = arith.truncf %139 : vector<8x1024xf32> to vector<8x1024xbf16>
    %c1_68 = arith.constant 1 : index
    %c0_69 = arith.constant 0 : index
    %c0_70 = arith.constant 0 : index
    %141 = vector.load %arg10[%c1_68, %c0_69, %c0_70] : memref<6x8x128xf32, #tpu.memory_space<vmem>>, vector<1x8x128xf32>
    %142 = vector.shape_cast %141 : vector<1x8x128xf32> to vector<8x128xf32>
    %143 = arith.truncf %142 : vector<8x128xf32> to vector<8x128xbf16>
    %144 = tpu.concatenate %143, %140 in 1 : vector<8x128xbf16>, vector<8x1024xbf16> -> vector<8x1152xbf16>
    %145 = vector.extract_strided_slice %144 {offsets = [0, 124], sizes = [8, 1024], strides = [1, 1]} : vector<8x1152xbf16> to vector<8x1024xbf16>
    %c5 = arith.constant 5 : index
    %c0_71 = arith.constant 0 : index
    %c0_72 = arith.constant 0 : index
    %146 = vector.load %arg7[%c5, %c0_71, %c0_72] : memref<30x8x8xbf16, #tpu.memory_space<vmem>>, vector<1x8x8xbf16>
    %147 = vector.shape_cast %146 : vector<1x8x8xbf16> to vector<8x8xbf16>
    %cst_73 = arith.constant dense<0.000000e+00> : vector<8x1024xf32>
    %148 = tpu.matmul %147, %145, %cst_73 {dimension_numbers = #tpu.dot_dimension_numbers<[1], [0], [0], [1], [0, 0, 1, 1], [], []>} : vector<8x8xbf16>, vector<8x1024xbf16>, vector<8x1024xf32> -> vector<8x1024xf32>
    %149 = vector.extract_strided_slice %144 {offsets = [0, 125], sizes = [8, 1024], strides = [1, 1]} : vector<8x1152xbf16> to vector<8x1024xbf16>
    %c6 = arith.constant 6 : index
    %c0_74 = arith.constant 0 : index
    %c0_75 = arith.constant 0 : index
    %150 = vector.load %arg7[%c6, %c0_74, %c0_75] : memref<30x8x8xbf16, #tpu.memory_space<vmem>>, vector<1x8x8xbf16>
    %151 = vector.shape_cast %150 : vector<1x8x8xbf16> to vector<8x8xbf16>
    %cst_76 = arith.constant dense<0.000000e+00> : vector<8x1024xf32>
    %152 = tpu.matmul %151, %149, %cst_76 {dimension_numbers = #tpu.dot_dimension_numbers<[1], [0], [0], [1], [0, 0, 1, 1], [], []>} : vector<8x8xbf16>, vector<8x1024xbf16>, vector<8x1024xf32> -> vector<8x1024xf32>
    %153 = arith.addf %148, %152 : vector<8x1024xf32>
    %154 = vector.extract_strided_slice %144 {offsets = [0, 126], sizes = [8, 1024], strides = [1, 1]} : vector<8x1152xbf16> to vector<8x1024xbf16>
    %c7 = arith.constant 7 : index
    %c0_77 = arith.constant 0 : index
    %c0_78 = arith.constant 0 : index
    %155 = vector.load %arg7[%c7, %c0_77, %c0_78] : memref<30x8x8xbf16, #tpu.memory_space<vmem>>, vector<1x8x8xbf16>
    %156 = vector.shape_cast %155 : vector<1x8x8xbf16> to vector<8x8xbf16>
    %cst_79 = arith.constant dense<0.000000e+00> : vector<8x1024xf32>
    %157 = tpu.matmul %156, %154, %cst_79 {dimension_numbers = #tpu.dot_dimension_numbers<[1], [0], [0], [1], [0, 0, 1, 1], [], []>} : vector<8x8xbf16>, vector<8x1024xbf16>, vector<8x1024xf32> -> vector<8x1024xf32>
    %158 = arith.addf %153, %157 : vector<8x1024xf32>
    %159 = vector.extract_strided_slice %144 {offsets = [0, 127], sizes = [8, 1024], strides = [1, 1]} : vector<8x1152xbf16> to vector<8x1024xbf16>
    %c8 = arith.constant 8 : index
    %c0_80 = arith.constant 0 : index
    %c0_81 = arith.constant 0 : index
    %160 = vector.load %arg7[%c8, %c0_80, %c0_81] : memref<30x8x8xbf16, #tpu.memory_space<vmem>>, vector<1x8x8xbf16>
    %161 = vector.shape_cast %160 : vector<1x8x8xbf16> to vector<8x8xbf16>
    %cst_82 = arith.constant dense<0.000000e+00> : vector<8x1024xf32>
    %162 = tpu.matmul %161, %159, %cst_82 {dimension_numbers = #tpu.dot_dimension_numbers<[1], [0], [0], [1], [0, 0, 1, 1], [], []>} : vector<8x8xbf16>, vector<8x1024xbf16>, vector<8x1024xf32> -> vector<8x1024xf32>
    %163 = arith.addf %158, %162 : vector<8x1024xf32>
    %164 = vector.extract_strided_slice %144 {offsets = [0, 128], sizes = [8, 1024], strides = [1, 1]} : vector<8x1152xbf16> to vector<8x1024xbf16>
    %c9 = arith.constant 9 : index
    %c0_83 = arith.constant 0 : index
    %c0_84 = arith.constant 0 : index
    %165 = vector.load %arg7[%c9, %c0_83, %c0_84] : memref<30x8x8xbf16, #tpu.memory_space<vmem>>, vector<1x8x8xbf16>
    %166 = vector.shape_cast %165 : vector<1x8x8xbf16> to vector<8x8xbf16>
    %cst_85 = arith.constant dense<0.000000e+00> : vector<8x1024xf32>
    %167 = tpu.matmul %166, %164, %cst_85 {dimension_numbers = #tpu.dot_dimension_numbers<[1], [0], [0], [1], [0, 0, 1, 1], [], []>} : vector<8x8xbf16>, vector<8x1024xbf16>, vector<8x1024xf32> -> vector<8x1024xf32>
    %168 = arith.addf %163, %167 : vector<8x1024xf32>
    %c1_86 = arith.constant 1 : index
    %c0_87 = arith.constant 0 : index
    %c0_88 = arith.constant 0 : index
    %169 = vector.load %arg8[%c1_86, %c0_87, %c0_88] : memref<6x8x1xf32, #tpu.memory_space<vmem>>, vector<1x8x1xf32>
    %170 = vector.shape_cast %169 : vector<1x8x1xf32> to vector<8x1xf32>
    %171 = vector.broadcast %170 : vector<8x1xf32> to vector<8x1024xf32>
    %172 = arith.addf %168, %171 : vector<8x1024xf32>
    %173 = arith.addf %172, %10 : vector<8x1024xf32>
    %174 = vector.extract_strided_slice %139 {offsets = [0, 896], sizes = [8, 128], strides = [1, 1]} : vector<8x1024xf32> to vector<8x128xf32>
    %c1_89 = arith.constant 1 : index
    %c0_90 = arith.constant 0 : index
    %c0_91 = arith.constant 0 : index
    %175 = vector.load %arg10[%c1_89, %c0_90, %c0_91] : memref<6x8x128xf32, #tpu.memory_space<vmem>>, vector<1x8x128xf32>
    %176 = vector.shape_cast %175 : vector<1x8x128xf32> to vector<8x128xf32>
    %177 = vector.shape_cast %174 : vector<8x128xf32> to vector<1x8x128xf32>
    tpu.vector_store %arg10[%c1_89, %c0_90, %c0_91], %177 {strides = array<i32>} : memref<6x8x128xf32, #tpu.memory_space<vmem>>, vector<1x8x128xf32>,
    %178 = vector.extract_strided_slice %14 {offsets = [32, 0], sizes = [8, 1024], strides = [1, 1]} : vector<96x1024xf32> to vector<8x1024xf32>
    %179 = vector.extract_strided_slice %14 {offsets = [40, 0], sizes = [8, 1024], strides = [1, 1]} : vector<96x1024xf32> to vector<8x1024xf32>
    %cst_92 = arith.constant 5.000000e-01 : f32
    %180 = vector.broadcast %cst_92 : f32 to vector<8x1024xf32>
    %181 = arith.mulf %180, %173 : vector<8x1024xf32>
    %cst_93 = arith.constant 0.707106769 : f32
    %182 = vector.broadcast %cst_93 : f32 to vector<8x1024xf32>
    %183 = arith.mulf %173, %182 : vector<8x1024xf32>
    %184 = math.absf %183 : vector<8x1024xf32>
    %cst_94 = arith.constant 0.327591091 : f32
    %185 = vector.broadcast %cst_94 : f32 to vector<8x1024xf32>
    %186 = arith.mulf %185, %184 : vector<8x1024xf32>
    %cst_95 = arith.constant 1.000000e+00 : f32
    %187 = vector.broadcast %cst_95 : f32 to vector<8x1024xf32>
    %188 = arith.addf %187, %186 : vector<8x1024xf32>
    %cst_96 = arith.constant 1.000000e+00 : f32
    %189 = vector.broadcast %cst_96 : f32 to vector<8x1024xf32>
    %190 = arith.divf %189, %188 : vector<8x1024xf32>
    %cst_97 = arith.constant 1.06140542 : f32
    %191 = vector.broadcast %cst_97 : f32 to vector<8x1024xf32>
    %192 = arith.mulf %191, %190 : vector<8x1024xf32>
    %cst_98 = arith.constant -1.45315206 : f32
    %193 = vector.broadcast %cst_98 : f32 to vector<8x1024xf32>
    %194 = arith.addf %192, %193 : vector<8x1024xf32>
    %195 = arith.mulf %194, %190 : vector<8x1024xf32>
    %cst_99 = arith.constant 1.42141378 : f32
    %196 = vector.broadcast %cst_99 : f32 to vector<8x1024xf32>
    %197 = arith.addf %195, %196 : vector<8x1024xf32>
    %198 = arith.mulf %197, %190 : vector<8x1024xf32>
    %cst_100 = arith.constant -0.284496725 : f32
    %199 = vector.broadcast %cst_100 : f32 to vector<8x1024xf32>
    %200 = arith.addf %198, %199 : vector<8x1024xf32>
    %201 = arith.mulf %200, %190 : vector<8x1024xf32>
    %cst_101 = arith.constant 0.254829586 : f32
    %202 = vector.broadcast %cst_101 : f32 to vector<8x1024xf32>
    %203 = arith.addf %201, %202 : vector<8x1024xf32>
    %204 = arith.mulf %203, %190 : vector<8x1024xf32>
    %cst_102 = arith.constant 0.000000e+00 : f32
    %205 = vector.broadcast %cst_102 : f32 to vector<8x1024xf32>
    %206 = arith.subf %205, %184 : vector<8x1024xf32>
    %207 = arith.mulf %206, %184 : vector<8x1024xf32>
    %208 = math.exp %207 : vector<8x1024xf32>
    %209 = arith.mulf %204, %208 : vector<8x1024xf32>
    %cst_103 = arith.constant 1.000000e+00 : f32
    %210 = vector.broadcast %cst_103 : f32 to vector<8x1024xf32>
    %211 = arith.subf %210, %209 : vector<8x1024xf32>
    %cst_104 = arith.constant 0.000000e+00 : f32
    %212 = vector.broadcast %cst_104 : f32 to vector<8x1024xf32>
    %213 = arith.cmpf olt, %183, %212 : vector<8x1024xf32>
    %cst_105 = arith.constant 0.000000e+00 : f32
    %214 = vector.broadcast %cst_105 : f32 to vector<8x1024xf32>
    %215 = arith.subf %214, %211 : vector<8x1024xf32>
    %216 = arith.select %213, %215, %211 : vector<8x1024xi1>, vector<8x1024xf32>
    %cst_106 = arith.constant 1.000000e+00 : f32
    %217 = vector.broadcast %cst_106 : f32 to vector<8x1024xf32>
    %218 = arith.addf %217, %216 : vector<8x1024xf32>
    %219 = arith.mulf %181, %218 : vector<8x1024xf32>
    %220 = arith.mulf %219, %178 : vector<8x1024xf32>
    %221 = arith.addf %220, %179 : vector<8x1024xf32>
    %222 = arith.truncf %221 : vector<8x1024xf32> to vector<8x1024xbf16>
    %c2_107 = arith.constant 2 : index
    %c0_108 = arith.constant 0 : index
    %c0_109 = arith.constant 0 : index
    %223 = vector.load %arg10[%c2_107, %c0_108, %c0_109] : memref<6x8x128xf32, #tpu.memory_space<vmem>>, vector<1x8x128xf32>
    %224 = vector.shape_cast %223 : vector<1x8x128xf32> to vector<8x128xf32>
    %225 = arith.truncf %224 : vector<8x128xf32> to vector<8x128xbf16>
    %226 = tpu.concatenate %225, %222 in 1 : vector<8x128xbf16>, vector<8x1024xbf16> -> vector<8x1152xbf16>
    %227 = vector.extract_strided_slice %226 {offsets = [0, 120], sizes = [8, 1024], strides = [1, 1]} : vector<8x1152xbf16> to vector<8x1024xbf16>
    %c10 = arith.constant 10 : index
    %c0_110 = arith.constant 0 : index
    %c0_111 = arith.constant 0 : index
    %228 = vector.load %arg7[%c10, %c0_110, %c0_111] : memref<30x8x8xbf16, #tpu.memory_space<vmem>>, vector<1x8x8xbf16>
    %229 = vector.shape_cast %228 : vector<1x8x8xbf16> to vector<8x8xbf16>
    %cst_112 = arith.constant dense<0.000000e+00> : vector<8x1024xf32>
    %230 = tpu.matmul %229, %227, %cst_112 {dimension_numbers = #tpu.dot_dimension_numbers<[1], [0], [0], [1], [0, 0, 1, 1], [], []>} : vector<8x8xbf16>, vector<8x1024xbf16>, vector<8x1024xf32> -> vector<8x1024xf32>
    %231 = vector.extract_strided_slice %226 {offsets = [0, 122], sizes = [8, 1024], strides = [1, 1]} : vector<8x1152xbf16> to vector<8x1024xbf16>
    %c11 = arith.constant 11 : index
    %c0_113 = arith.constant 0 : index
    %c0_114 = arith.constant 0 : index
    %232 = vector.load %arg7[%c11, %c0_113, %c0_114] : memref<30x8x8xbf16, #tpu.memory_space<vmem>>, vector<1x8x8xbf16>
    %233 = vector.shape_cast %232 : vector<1x8x8xbf16> to vector<8x8xbf16>
    %cst_115 = arith.constant dense<0.000000e+00> : vector<8x1024xf32>
    %234 = tpu.matmul %233, %231, %cst_115 {dimension_numbers = #tpu.dot_dimension_numbers<[1], [0], [0], [1], [0, 0, 1, 1], [], []>} : vector<8x8xbf16>, vector<8x1024xbf16>, vector<8x1024xf32> -> vector<8x1024xf32>
    %235 = arith.addf %230, %234 : vector<8x1024xf32>
    %236 = vector.extract_strided_slice %226 {offsets = [0, 124], sizes = [8, 1024], strides = [1, 1]} : vector<8x1152xbf16> to vector<8x1024xbf16>
    %c12 = arith.constant 12 : index
    %c0_116 = arith.constant 0 : index
    %c0_117 = arith.constant 0 : index
    %237 = vector.load %arg7[%c12, %c0_116, %c0_117] : memref<30x8x8xbf16, #tpu.memory_space<vmem>>, vector<1x8x8xbf16>
    %238 = vector.shape_cast %237 : vector<1x8x8xbf16> to vector<8x8xbf16>
    %cst_118 = arith.constant dense<0.000000e+00> : vector<8x1024xf32>
    %239 = tpu.matmul %238, %236, %cst_118 {dimension_numbers = #tpu.dot_dimension_numbers<[1], [0], [0], [1], [0, 0, 1, 1], [], []>} : vector<8x8xbf16>, vector<8x1024xbf16>, vector<8x1024xf32> -> vector<8x1024xf32>
    %240 = arith.addf %235, %239 : vector<8x1024xf32>
    %241 = vector.extract_strided_slice %226 {offsets = [0, 126], sizes = [8, 1024], strides = [1, 1]} : vector<8x1152xbf16> to vector<8x1024xbf16>
    %c13 = arith.constant 13 : index
    %c0_119 = arith.constant 0 : index
    %c0_120 = arith.constant 0 : index
    %242 = vector.load %arg7[%c13, %c0_119, %c0_120] : memref<30x8x8xbf16, #tpu.memory_space<vmem>>, vector<1x8x8xbf16>
    %243 = vector.shape_cast %242 : vector<1x8x8xbf16> to vector<8x8xbf16>
    %cst_121 = arith.constant dense<0.000000e+00> : vector<8x1024xf32>
    %244 = tpu.matmul %243, %241, %cst_121 {dimension_numbers = #tpu.dot_dimension_numbers<[1], [0], [0], [1], [0, 0, 1, 1], [], []>} : vector<8x8xbf16>, vector<8x1024xbf16>, vector<8x1024xf32> -> vector<8x1024xf32>
    %245 = arith.addf %240, %244 : vector<8x1024xf32>
    %246 = vector.extract_strided_slice %226 {offsets = [0, 128], sizes = [8, 1024], strides = [1, 1]} : vector<8x1152xbf16> to vector<8x1024xbf16>
    %c14 = arith.constant 14 : index
    %c0_122 = arith.constant 0 : index
    %c0_123 = arith.constant 0 : index
    %247 = vector.load %arg7[%c14, %c0_122, %c0_123] : memref<30x8x8xbf16, #tpu.memory_space<vmem>>, vector<1x8x8xbf16>
    %248 = vector.shape_cast %247 : vector<1x8x8xbf16> to vector<8x8xbf16>
    %cst_124 = arith.constant dense<0.000000e+00> : vector<8x1024xf32>
    %249 = tpu.matmul %248, %246, %cst_124 {dimension_numbers = #tpu.dot_dimension_numbers<[1], [0], [0], [1], [0, 0, 1, 1], [], []>} : vector<8x8xbf16>, vector<8x1024xbf16>, vector<8x1024xf32> -> vector<8x1024xf32>
    %250 = arith.addf %245, %249 : vector<8x1024xf32>
    %c2_125 = arith.constant 2 : index
    %c0_126 = arith.constant 0 : index
    %c0_127 = arith.constant 0 : index
    %251 = vector.load %arg8[%c2_125, %c0_126, %c0_127] : memref<6x8x1xf32, #tpu.memory_space<vmem>>, vector<1x8x1xf32>
    %252 = vector.shape_cast %251 : vector<1x8x1xf32> to vector<8x1xf32>
    %253 = vector.broadcast %252 : vector<8x1xf32> to vector<8x1024xf32>
    %254 = arith.addf %250, %253 : vector<8x1024xf32>
    %255 = vector.extract_strided_slice %221 {offsets = [0, 896], sizes = [8, 128], strides = [1, 1]} : vector<8x1024xf32> to vector<8x128xf32>
    %c2_128 = arith.constant 2 : index
    %c0_129 = arith.constant 0 : index
    %c0_130 = arith.constant 0 : index
    %256 = vector.load %arg10[%c2_128, %c0_129, %c0_130] : memref<6x8x128xf32, #tpu.memory_space<vmem>>, vector<1x8x128xf32>
    %257 = vector.shape_cast %256 : vector<1x8x128xf32> to vector<8x128xf32>
    %258 = vector.shape_cast %255 : vector<8x128xf32> to vector<1x8x128xf32>
    tpu.vector_store %arg10[%c2_128, %c0_129, %c0_130], %258 {strides = array<i32>} : memref<6x8x128xf32, #tpu.memory_space<vmem>>, vector<1x8x128xf32>,
    %259 = vector.extract_strided_slice %14 {offsets = [48, 0], sizes = [8, 1024], strides = [1, 1]} : vector<96x1024xf32> to vector<8x1024xf32>
    %260 = vector.extract_strided_slice %14 {offsets = [56, 0], sizes = [8, 1024], strides = [1, 1]} : vector<96x1024xf32> to vector<8x1024xf32>
    %cst_131 = arith.constant 5.000000e-01 : f32
    %261 = vector.broadcast %cst_131 : f32 to vector<8x1024xf32>
    %262 = arith.mulf %261, %254 : vector<8x1024xf32>
    %cst_132 = arith.constant 0.707106769 : f32
    %263 = vector.broadcast %cst_132 : f32 to vector<8x1024xf32>
    %264 = arith.mulf %254, %263 : vector<8x1024xf32>
    %265 = math.absf %264 : vector<8x1024xf32>
    %cst_133 = arith.constant 0.327591091 : f32
    %266 = vector.broadcast %cst_133 : f32 to vector<8x1024xf32>
    %267 = arith.mulf %266, %265 : vector<8x1024xf32>
    %cst_134 = arith.constant 1.000000e+00 : f32
    %268 = vector.broadcast %cst_134 : f32 to vector<8x1024xf32>
    %269 = arith.addf %268, %267 : vector<8x1024xf32>
    %cst_135 = arith.constant 1.000000e+00 : f32
    %270 = vector.broadcast %cst_135 : f32 to vector<8x1024xf32>
    %271 = arith.divf %270, %269 : vector<8x1024xf32>
    %cst_136 = arith.constant 1.06140542 : f32
    %272 = vector.broadcast %cst_136 : f32 to vector<8x1024xf32>
    %273 = arith.mulf %272, %271 : vector<8x1024xf32>
    %cst_137 = arith.constant -1.45315206 : f32
    %274 = vector.broadcast %cst_137 : f32 to vector<8x1024xf32>
    %275 = arith.addf %273, %274 : vector<8x1024xf32>
    %276 = arith.mulf %275, %271 : vector<8x1024xf32>
    %cst_138 = arith.constant 1.42141378 : f32
    %277 = vector.broadcast %cst_138 : f32 to vector<8x1024xf32>
    %278 = arith.addf %276, %277 : vector<8x1024xf32>
    %279 = arith.mulf %278, %271 : vector<8x1024xf32>
    %cst_139 = arith.constant -0.284496725 : f32
    %280 = vector.broadcast %cst_139 : f32 to vector<8x1024xf32>
    %281 = arith.addf %279, %280 : vector<8x1024xf32>
    %282 = arith.mulf %281, %271 : vector<8x1024xf32>
    %cst_140 = arith.constant 0.254829586 : f32
    %283 = vector.broadcast %cst_140 : f32 to vector<8x1024xf32>
    %284 = arith.addf %282, %283 : vector<8x1024xf32>
    %285 = arith.mulf %284, %271 : vector<8x1024xf32>
    %cst_141 = arith.constant 0.000000e+00 : f32
    %286 = vector.broadcast %cst_141 : f32 to vector<8x1024xf32>
    %287 = arith.subf %286, %265 : vector<8x1024xf32>
    %288 = arith.mulf %287, %265 : vector<8x1024xf32>
    %289 = math.exp %288 : vector<8x1024xf32>
    %290 = arith.mulf %285, %289 : vector<8x1024xf32>
    %cst_142 = arith.constant 1.000000e+00 : f32
    %291 = vector.broadcast %cst_142 : f32 to vector<8x1024xf32>
    %292 = arith.subf %291, %290 : vector<8x1024xf32>
    %cst_143 = arith.constant 0.000000e+00 : f32
    %293 = vector.broadcast %cst_143 : f32 to vector<8x1024xf32>
    %294 = arith.cmpf olt, %264, %293 : vector<8x1024xf32>
    %cst_144 = arith.constant 0.000000e+00 : f32
    %295 = vector.broadcast %cst_144 : f32 to vector<8x1024xf32>
    %296 = arith.subf %295, %292 : vector<8x1024xf32>
    %297 = arith.select %294, %296, %292 : vector<8x1024xi1>, vector<8x1024xf32>
    %cst_145 = arith.constant 1.000000e+00 : f32
    %298 = vector.broadcast %cst_145 : f32 to vector<8x1024xf32>
    %299 = arith.addf %298, %297 : vector<8x1024xf32>
    %300 = arith.mulf %262, %299 : vector<8x1024xf32>
    %301 = arith.mulf %300, %259 : vector<8x1024xf32>
    %302 = arith.addf %301, %260 : vector<8x1024xf32>
    %303 = arith.truncf %302 : vector<8x1024xf32> to vector<8x1024xbf16>
    %c3_146 = arith.constant 3 : index
    %c0_147 = arith.constant 0 : index
    %c0_148 = arith.constant 0 : index
    %304 = vector.load %arg10[%c3_146, %c0_147, %c0_148] : memref<6x8x128xf32, #tpu.memory_space<vmem>>, vector<1x8x128xf32>
    %305 = vector.shape_cast %304 : vector<1x8x128xf32> to vector<8x128xf32>
    %306 = arith.truncf %305 : vector<8x128xf32> to vector<8x128xbf16>
    %307 = tpu.concatenate %306, %303 in 1 : vector<8x128xbf16>, vector<8x1024xbf16> -> vector<8x1152xbf16>
    %308 = vector.extract_strided_slice %307 {offsets = [0, 120], sizes = [8, 1024], strides = [1, 1]} : vector<8x1152xbf16> to vector<8x1024xbf16>
    %c15 = arith.constant 15 : index
    %c0_149 = arith.constant 0 : index
    %c0_150 = arith.constant 0 : index
    %309 = vector.load %arg7[%c15, %c0_149, %c0_150] : memref<30x8x8xbf16, #tpu.memory_space<vmem>>, vector<1x8x8xbf16>
    %310 = vector.shape_cast %309 : vector<1x8x8xbf16> to vector<8x8xbf16>
    %cst_151 = arith.constant dense<0.000000e+00> : vector<8x1024xf32>
    %311 = tpu.matmul %310, %308, %cst_151 {dimension_numbers = #tpu.dot_dimension_numbers<[1], [0], [0], [1], [0, 0, 1, 1], [], []>} : vector<8x8xbf16>, vector<8x1024xbf16>, vector<8x1024xf32> -> vector<8x1024xf32>
    %312 = vector.extract_strided_slice %307 {offsets = [0, 122], sizes = [8, 1024], strides = [1, 1]} : vector<8x1152xbf16> to vector<8x1024xbf16>
    %c16 = arith.constant 16 : index
    %c0_152 = arith.constant 0 : index
    %c0_153 = arith.constant 0 : index
    %313 = vector.load %arg7[%c16, %c0_152, %c0_153] : memref<30x8x8xbf16, #tpu.memory_space<vmem>>, vector<1x8x8xbf16>
    %314 = vector.shape_cast %313 : vector<1x8x8xbf16> to vector<8x8xbf16>
    %cst_154 = arith.constant dense<0.000000e+00> : vector<8x1024xf32>
    %315 = tpu.matmul %314, %312, %cst_154 {dimension_numbers = #tpu.dot_dimension_numbers<[1], [0], [0], [1], [0, 0, 1, 1], [], []>} : vector<8x8xbf16>, vector<8x1024xbf16>, vector<8x1024xf32> -> vector<8x1024xf32>
    %316 = arith.addf %311, %315 : vector<8x1024xf32>
    %317 = vector.extract_strided_slice %307 {offsets = [0, 124], sizes = [8, 1024], strides = [1, 1]} : vector<8x1152xbf16> to vector<8x1024xbf16>
    %c17 = arith.constant 17 : index
    %c0_155 = arith.constant 0 : index
    %c0_156 = arith.constant 0 : index
    %318 = vector.load %arg7[%c17, %c0_155, %c0_156] : memref<30x8x8xbf16, #tpu.memory_space<vmem>>, vector<1x8x8xbf16>
    %319 = vector.shape_cast %318 : vector<1x8x8xbf16> to vector<8x8xbf16>
    %cst_157 = arith.constant dense<0.000000e+00> : vector<8x1024xf32>
    %320 = tpu.matmul %319, %317, %cst_157 {dimension_numbers = #tpu.dot_dimension_numbers<[1], [0], [0], [1], [0, 0, 1, 1], [], []>} : vector<8x8xbf16>, vector<8x1024xbf16>, vector<8x1024xf32> -> vector<8x1024xf32>
    %321 = arith.addf %316, %320 : vector<8x1024xf32>
    %322 = vector.extract_strided_slice %307 {offsets = [0, 126], sizes = [8, 1024], strides = [1, 1]} : vector<8x1152xbf16> to vector<8x1024xbf16>
    %c18 = arith.constant 18 : index
    %c0_158 = arith.constant 0 : index
    %c0_159 = arith.constant 0 : index
    %323 = vector.load %arg7[%c18, %c0_158, %c0_159] : memref<30x8x8xbf16, #tpu.memory_space<vmem>>, vector<1x8x8xbf16>
    %324 = vector.shape_cast %323 : vector<1x8x8xbf16> to vector<8x8xbf16>
    %cst_160 = arith.constant dense<0.000000e+00> : vector<8x1024xf32>
    %325 = tpu.matmul %324, %322, %cst_160 {dimension_numbers = #tpu.dot_dimension_numbers<[1], [0], [0], [1], [0, 0, 1, 1], [], []>} : vector<8x8xbf16>, vector<8x1024xbf16>, vector<8x1024xf32> -> vector<8x1024xf32>
    %326 = arith.addf %321, %325 : vector<8x1024xf32>
    %327 = vector.extract_strided_slice %307 {offsets = [0, 128], sizes = [8, 1024], strides = [1, 1]} : vector<8x1152xbf16> to vector<8x1024xbf16>
    %c19 = arith.constant 19 : index
    %c0_161 = arith.constant 0 : index
    %c0_162 = arith.constant 0 : index
    %328 = vector.load %arg7[%c19, %c0_161, %c0_162] : memref<30x8x8xbf16, #tpu.memory_space<vmem>>, vector<1x8x8xbf16>
    %329 = vector.shape_cast %328 : vector<1x8x8xbf16> to vector<8x8xbf16>
    %cst_163 = arith.constant dense<0.000000e+00> : vector<8x1024xf32>
    %330 = tpu.matmul %329, %327, %cst_163 {dimension_numbers = #tpu.dot_dimension_numbers<[1], [0], [0], [1], [0, 0, 1, 1], [], []>} : vector<8x8xbf16>, vector<8x1024xbf16>, vector<8x1024xf32> -> vector<8x1024xf32>
    %331 = arith.addf %326, %330 : vector<8x1024xf32>
    %c3_164 = arith.constant 3 : index
    %c0_165 = arith.constant 0 : index
    %c0_166 = arith.constant 0 : index
    %332 = vector.load %arg8[%c3_164, %c0_165, %c0_166] : memref<6x8x1xf32, #tpu.memory_space<vmem>>, vector<1x8x1xf32>
    %333 = vector.shape_cast %332 : vector<1x8x1xf32> to vector<8x1xf32>
    %334 = vector.broadcast %333 : vector<8x1xf32> to vector<8x1024xf32>
    %335 = arith.addf %331, %334 : vector<8x1024xf32>
    %336 = arith.addf %335, %173 : vector<8x1024xf32>
    %337 = vector.extract_strided_slice %302 {offsets = [0, 896], sizes = [8, 128], strides = [1, 1]} : vector<8x1024xf32> to vector<8x128xf32>
    %c3_167 = arith.constant 3 : index
    %c0_168 = arith.constant 0 : index
    %c0_169 = arith.constant 0 : index
    %338 = vector.load %arg10[%c3_167, %c0_168, %c0_169] : memref<6x8x128xf32, #tpu.memory_space<vmem>>, vector<1x8x128xf32>
    %339 = vector.shape_cast %338 : vector<1x8x128xf32> to vector<8x128xf32>
    %340 = vector.shape_cast %337 : vector<8x128xf32> to vector<1x8x128xf32>
    tpu.vector_store %arg10[%c3_167, %c0_168, %c0_169], %340 {strides = array<i32>} : memref<6x8x128xf32, #tpu.memory_space<vmem>>, vector<1x8x128xf32>,
    %341 = vector.extract_strided_slice %14 {offsets = [64, 0], sizes = [8, 1024], strides = [1, 1]} : vector<96x1024xf32> to vector<8x1024xf32>
    %342 = vector.extract_strided_slice %14 {offsets = [72, 0], sizes = [8, 1024], strides = [1, 1]} : vector<96x1024xf32> to vector<8x1024xf32>
    %cst_170 = arith.constant 5.000000e-01 : f32
    %343 = vector.broadcast %cst_170 : f32 to vector<8x1024xf32>
    %344 = arith.mulf %343, %336 : vector<8x1024xf32>
    %cst_171 = arith.constant 0.707106769 : f32
    %345 = vector.broadcast %cst_171 : f32 to vector<8x1024xf32>
    %346 = arith.mulf %336, %345 : vector<8x1024xf32>
    %347 = math.absf %346 : vector<8x1024xf32>
    %cst_172 = arith.constant 0.327591091 : f32
    %348 = vector.broadcast %cst_172 : f32 to vector<8x1024xf32>
    %349 = arith.mulf %348, %347 : vector<8x1024xf32>
    %cst_173 = arith.constant 1.000000e+00 : f32
    %350 = vector.broadcast %cst_173 : f32 to vector<8x1024xf32>
    %351 = arith.addf %350, %349 : vector<8x1024xf32>
    %cst_174 = arith.constant 1.000000e+00 : f32
    %352 = vector.broadcast %cst_174 : f32 to vector<8x1024xf32>
    %353 = arith.divf %352, %351 : vector<8x1024xf32>
    %cst_175 = arith.constant 1.06140542 : f32
    %354 = vector.broadcast %cst_175 : f32 to vector<8x1024xf32>
    %355 = arith.mulf %354, %353 : vector<8x1024xf32>
    %cst_176 = arith.constant -1.45315206 : f32
    %356 = vector.broadcast %cst_176 : f32 to vector<8x1024xf32>
    %357 = arith.addf %355, %356 : vector<8x1024xf32>
    %358 = arith.mulf %357, %353 : vector<8x1024xf32>
    %cst_177 = arith.constant 1.42141378 : f32
    %359 = vector.broadcast %cst_177 : f32 to vector<8x1024xf32>
    %360 = arith.addf %358, %359 : vector<8x1024xf32>
    %361 = arith.mulf %360, %353 : vector<8x1024xf32>
    %cst_178 = arith.constant -0.284496725 : f32
    %362 = vector.broadcast %cst_178 : f32 to vector<8x1024xf32>
    %363 = arith.addf %361, %362 : vector<8x1024xf32>
    %364 = arith.mulf %363, %353 : vector<8x1024xf32>
    %cst_179 = arith.constant 0.254829586 : f32
    %365 = vector.broadcast %cst_179 : f32 to vector<8x1024xf32>
    %366 = arith.addf %364, %365 : vector<8x1024xf32>
    %367 = arith.mulf %366, %353 : vector<8x1024xf32>
    %cst_180 = arith.constant 0.000000e+00 : f32
    %368 = vector.broadcast %cst_180 : f32 to vector<8x1024xf32>
    %369 = arith.subf %368, %347 : vector<8x1024xf32>
    %370 = arith.mulf %369, %347 : vector<8x1024xf32>
    %371 = math.exp %370 : vector<8x1024xf32>
    %372 = arith.mulf %367, %371 : vector<8x1024xf32>
    %cst_181 = arith.constant 1.000000e+00 : f32
    %373 = vector.broadcast %cst_181 : f32 to vector<8x1024xf32>
    %374 = arith.subf %373, %372 : vector<8x1024xf32>
    %cst_182 = arith.constant 0.000000e+00 : f32
    %375 = vector.broadcast %cst_182 : f32 to vector<8x1024xf32>
    %376 = arith.cmpf olt, %346, %375 : vector<8x1024xf32>
    %cst_183 = arith.constant 0.000000e+00 : f32
    %377 = vector.broadcast %cst_183 : f32 to vector<8x1024xf32>
    %378 = arith.subf %377, %374 : vector<8x1024xf32>
    %379 = arith.select %376, %378, %374 : vector<8x1024xi1>, vector<8x1024xf32>
    %cst_184 = arith.constant 1.000000e+00 : f32
    %380 = vector.broadcast %cst_184 : f32 to vector<8x1024xf32>
    %381 = arith.addf %380, %379 : vector<8x1024xf32>
    %382 = arith.mulf %344, %381 : vector<8x1024xf32>
    %383 = arith.mulf %382, %341 : vector<8x1024xf32>
    %384 = arith.addf %383, %342 : vector<8x1024xf32>
    %385 = arith.truncf %384 : vector<8x1024xf32> to vector<8x1024xbf16>
    %c4_185 = arith.constant 4 : index
    %c0_186 = arith.constant 0 : index
    %c0_187 = arith.constant 0 : index
    %386 = vector.load %arg10[%c4_185, %c0_186, %c0_187] : memref<6x8x128xf32, #tpu.memory_space<vmem>>, vector<1x8x128xf32>
    %387 = vector.shape_cast %386 : vector<1x8x128xf32> to vector<8x128xf32>
    %388 = arith.truncf %387 : vector<8x128xf32> to vector<8x128xbf16>
    %389 = tpu.concatenate %388, %385 in 1 : vector<8x128xbf16>, vector<8x1024xbf16> -> vector<8x1152xbf16>
    %390 = vector.extract_strided_slice %389 {offsets = [0, 112], sizes = [8, 1024], strides = [1, 1]} : vector<8x1152xbf16> to vector<8x1024xbf16>
    %c20 = arith.constant 20 : index
    %c0_188 = arith.constant 0 : index
    %c0_189 = arith.constant 0 : index
    %391 = vector.load %arg7[%c20, %c0_188, %c0_189] : memref<30x8x8xbf16, #tpu.memory_space<vmem>>, vector<1x8x8xbf16>
    %392 = vector.shape_cast %391 : vector<1x8x8xbf16> to vector<8x8xbf16>
    %cst_190 = arith.constant dense<0.000000e+00> : vector<8x1024xf32>
    %393 = tpu.matmul %392, %390, %cst_190 {dimension_numbers = #tpu.dot_dimension_numbers<[1], [0], [0], [1], [0, 0, 1, 1], [], []>} : vector<8x8xbf16>, vector<8x1024xbf16>, vector<8x1024xf32> -> vector<8x1024xf32>
    %394 = vector.extract_strided_slice %389 {offsets = [0, 116], sizes = [8, 1024], strides = [1, 1]} : vector<8x1152xbf16> to vector<8x1024xbf16>
    %c21 = arith.constant 21 : index
    %c0_191 = arith.constant 0 : index
    %c0_192 = arith.constant 0 : index
    %395 = vector.load %arg7[%c21, %c0_191, %c0_192] : memref<30x8x8xbf16, #tpu.memory_space<vmem>>, vector<1x8x8xbf16>
    %396 = vector.shape_cast %395 : vector<1x8x8xbf16> to vector<8x8xbf16>
    %cst_193 = arith.constant dense<0.000000e+00> : vector<8x1024xf32>
    %397 = tpu.matmul %396, %394, %cst_193 {dimension_numbers = #tpu.dot_dimension_numbers<[1], [0], [0], [1], [0, 0, 1, 1], [], []>} : vector<8x8xbf16>, vector<8x1024xbf16>, vector<8x1024xf32> -> vector<8x1024xf32>
    %398 = arith.addf %393, %397 : vector<8x1024xf32>
    %399 = vector.extract_strided_slice %389 {offsets = [0, 120], sizes = [8, 1024], strides = [1, 1]} : vector<8x1152xbf16> to vector<8x1024xbf16>
    %c22 = arith.constant 22 : index
    %c0_194 = arith.constant 0 : index
    %c0_195 = arith.constant 0 : index
    %400 = vector.load %arg7[%c22, %c0_194, %c0_195] : memref<30x8x8xbf16, #tpu.memory_space<vmem>>, vector<1x8x8xbf16>
    %401 = vector.shape_cast %400 : vector<1x8x8xbf16> to vector<8x8xbf16>
    %cst_196 = arith.constant dense<0.000000e+00> : vector<8x1024xf32>
    %402 = tpu.matmul %401, %399, %cst_196 {dimension_numbers = #tpu.dot_dimension_numbers<[1], [0], [0], [1], [0, 0, 1, 1], [], []>} : vector<8x8xbf16>, vector<8x1024xbf16>, vector<8x1024xf32> -> vector<8x1024xf32>
    %403 = arith.addf %398, %402 : vector<8x1024xf32>
    %404 = vector.extract_strided_slice %389 {offsets = [0, 124], sizes = [8, 1024], strides = [1, 1]} : vector<8x1152xbf16> to vector<8x1024xbf16>
    %c23 = arith.constant 23 : index
    %c0_197 = arith.constant 0 : index
    %c0_198 = arith.constant 0 : index
    %405 = vector.load %arg7[%c23, %c0_197, %c0_198] : memref<30x8x8xbf16, #tpu.memory_space<vmem>>, vector<1x8x8xbf16>
    %406 = vector.shape_cast %405 : vector<1x8x8xbf16> to vector<8x8xbf16>
    %cst_199 = arith.constant dense<0.000000e+00> : vector<8x1024xf32>
    %407 = tpu.matmul %406, %404, %cst_199 {dimension_numbers = #tpu.dot_dimension_numbers<[1], [0], [0], [1], [0, 0, 1, 1], [], []>} : vector<8x8xbf16>, vector<8x1024xbf16>, vector<8x1024xf32> -> vector<8x1024xf32>
    %408 = arith.addf %403, %407 : vector<8x1024xf32>
    %409 = vector.extract_strided_slice %389 {offsets = [0, 128], sizes = [8, 1024], strides = [1, 1]} : vector<8x1152xbf16> to vector<8x1024xbf16>
    %c24 = arith.constant 24 : index
    %c0_200 = arith.constant 0 : index
    %c0_201 = arith.constant 0 : index
    %410 = vector.load %arg7[%c24, %c0_200, %c0_201] : memref<30x8x8xbf16, #tpu.memory_space<vmem>>, vector<1x8x8xbf16>
    %411 = vector.shape_cast %410 : vector<1x8x8xbf16> to vector<8x8xbf16>
    %cst_202 = arith.constant dense<0.000000e+00> : vector<8x1024xf32>
    %412 = tpu.matmul %411, %409, %cst_202 {dimension_numbers = #tpu.dot_dimension_numbers<[1], [0], [0], [1], [0, 0, 1, 1], [], []>} : vector<8x8xbf16>, vector<8x1024xbf16>, vector<8x1024xf32> -> vector<8x1024xf32>
    %413 = arith.addf %408, %412 : vector<8x1024xf32>
    %c4_203 = arith.constant 4 : index
    %c0_204 = arith.constant 0 : index
    %c0_205 = arith.constant 0 : index
    %414 = vector.load %arg8[%c4_203, %c0_204, %c0_205] : memref<6x8x1xf32, #tpu.memory_space<vmem>>, vector<1x8x1xf32>
    %415 = vector.shape_cast %414 : vector<1x8x1xf32> to vector<8x1xf32>
    %416 = vector.broadcast %415 : vector<8x1xf32> to vector<8x1024xf32>
    %417 = arith.addf %413, %416 : vector<8x1024xf32>
    %418 = vector.extract_strided_slice %384 {offsets = [0, 896], sizes = [8, 128], strides = [1, 1]} : vector<8x1024xf32> to vector<8x128xf32>
    %c4_206 = arith.constant 4 : index
    %c0_207 = arith.constant 0 : index
    %c0_208 = arith.constant 0 : index
    %419 = vector.load %arg10[%c4_206, %c0_207, %c0_208] : memref<6x8x128xf32, #tpu.memory_space<vmem>>, vector<1x8x128xf32>
    %420 = vector.shape_cast %419 : vector<1x8x128xf32> to vector<8x128xf32>
    %421 = vector.shape_cast %418 : vector<8x128xf32> to vector<1x8x128xf32>
    tpu.vector_store %arg10[%c4_206, %c0_207, %c0_208], %421 {strides = array<i32>} : memref<6x8x128xf32, #tpu.memory_space<vmem>>, vector<1x8x128xf32>,
    %422 = vector.extract_strided_slice %14 {offsets = [80, 0], sizes = [8, 1024], strides = [1, 1]} : vector<96x1024xf32> to vector<8x1024xf32>
    %423 = vector.extract_strided_slice %14 {offsets = [88, 0], sizes = [8, 1024], strides = [1, 1]} : vector<96x1024xf32> to vector<8x1024xf32>
    %cst_209 = arith.constant 5.000000e-01 : f32
    %424 = vector.broadcast %cst_209 : f32 to vector<8x1024xf32>
    %425 = arith.mulf %424, %417 : vector<8x1024xf32>
    %cst_210 = arith.constant 0.707106769 : f32
    %426 = vector.broadcast %cst_210 : f32 to vector<8x1024xf32>
    %427 = arith.mulf %417, %426 : vector<8x1024xf32>
    %428 = math.absf %427 : vector<8x1024xf32>
    %cst_211 = arith.constant 0.327591091 : f32
    %429 = vector.broadcast %cst_211 : f32 to vector<8x1024xf32>
    %430 = arith.mulf %429, %428 : vector<8x1024xf32>
    %cst_212 = arith.constant 1.000000e+00 : f32
    %431 = vector.broadcast %cst_212 : f32 to vector<8x1024xf32>
    %432 = arith.addf %431, %430 : vector<8x1024xf32>
    %cst_213 = arith.constant 1.000000e+00 : f32
    %433 = vector.broadcast %cst_213 : f32 to vector<8x1024xf32>
    %434 = arith.divf %433, %432 : vector<8x1024xf32>
    %cst_214 = arith.constant 1.06140542 : f32
    %435 = vector.broadcast %cst_214 : f32 to vector<8x1024xf32>
    %436 = arith.mulf %435, %434 : vector<8x1024xf32>
    %cst_215 = arith.constant -1.45315206 : f32
    %437 = vector.broadcast %cst_215 : f32 to vector<8x1024xf32>
    %438 = arith.addf %436, %437 : vector<8x1024xf32>
    %439 = arith.mulf %438, %434 : vector<8x1024xf32>
    %cst_216 = arith.constant 1.42141378 : f32
    %440 = vector.broadcast %cst_216 : f32 to vector<8x1024xf32>
    %441 = arith.addf %439, %440 : vector<8x1024xf32>
    %442 = arith.mulf %441, %434 : vector<8x1024xf32>
    %cst_217 = arith.constant -0.284496725 : f32
    %443 = vector.broadcast %cst_217 : f32 to vector<8x1024xf32>
    %444 = arith.addf %442, %443 : vector<8x1024xf32>
    %445 = arith.mulf %444, %434 : vector<8x1024xf32>
    %cst_218 = arith.constant 0.254829586 : f32
    %446 = vector.broadcast %cst_218 : f32 to vector<8x1024xf32>
    %447 = arith.addf %445, %446 : vector<8x1024xf32>
    %448 = arith.mulf %447, %434 : vector<8x1024xf32>
    %cst_219 = arith.constant 0.000000e+00 : f32
    %449 = vector.broadcast %cst_219 : f32 to vector<8x1024xf32>
    %450 = arith.subf %449, %428 : vector<8x1024xf32>
    %451 = arith.mulf %450, %428 : vector<8x1024xf32>
    %452 = math.exp %451 : vector<8x1024xf32>
    %453 = arith.mulf %448, %452 : vector<8x1024xf32>
    %cst_220 = arith.constant 1.000000e+00 : f32
    %454 = vector.broadcast %cst_220 : f32 to vector<8x1024xf32>
    %455 = arith.subf %454, %453 : vector<8x1024xf32>
    %cst_221 = arith.constant 0.000000e+00 : f32
    %456 = vector.broadcast %cst_221 : f32 to vector<8x1024xf32>
    %457 = arith.cmpf olt, %427, %456 : vector<8x1024xf32>
    %cst_222 = arith.constant 0.000000e+00 : f32
    %458 = vector.broadcast %cst_222 : f32 to vector<8x1024xf32>
    %459 = arith.subf %458, %455 : vector<8x1024xf32>
    %460 = arith.select %457, %459, %455 : vector<8x1024xi1>, vector<8x1024xf32>
    %cst_223 = arith.constant 1.000000e+00 : f32
    %461 = vector.broadcast %cst_223 : f32 to vector<8x1024xf32>
    %462 = arith.addf %461, %460 : vector<8x1024xf32>
    %463 = arith.mulf %425, %462 : vector<8x1024xf32>
    %464 = arith.mulf %463, %422 : vector<8x1024xf32>
    %465 = arith.addf %464, %423 : vector<8x1024xf32>
    %466 = arith.truncf %465 : vector<8x1024xf32> to vector<8x1024xbf16>
    %c5_224 = arith.constant 5 : index
    %c0_225 = arith.constant 0 : index
    %c0_226 = arith.constant 0 : index
    %467 = vector.load %arg10[%c5_224, %c0_225, %c0_226] : memref<6x8x128xf32, #tpu.memory_space<vmem>>, vector<1x8x128xf32>
    %468 = vector.shape_cast %467 : vector<1x8x128xf32> to vector<8x128xf32>
    %469 = arith.truncf %468 : vector<8x128xf32> to vector<8x128xbf16>
    %470 = tpu.concatenate %469, %466 in 1 : vector<8x128xbf16>, vector<8x1024xbf16> -> vector<8x1152xbf16>
    %471 = vector.extract_strided_slice %470 {offsets = [0, 112], sizes = [8, 1024], strides = [1, 1]} : vector<8x1152xbf16> to vector<8x1024xbf16>
    %c25 = arith.constant 25 : index
    %c0_227 = arith.constant 0 : index
    %c0_228 = arith.constant 0 : index
    %472 = vector.load %arg7[%c25, %c0_227, %c0_228] : memref<30x8x8xbf16, #tpu.memory_space<vmem>>, vector<1x8x8xbf16>
    %473 = vector.shape_cast %472 : vector<1x8x8xbf16> to vector<8x8xbf16>
    %cst_229 = arith.constant dense<0.000000e+00> : vector<8x1024xf32>
    %474 = tpu.matmul %473, %471, %cst_229 {dimension_numbers = #tpu.dot_dimension_numbers<[1], [0], [0], [1], [0, 0, 1, 1], [], []>} : vector<8x8xbf16>, vector<8x1024xbf16>, vector<8x1024xf32> -> vector<8x1024xf32>
    %475 = vector.extract_strided_slice %470 {offsets = [0, 116], sizes = [8, 1024], strides = [1, 1]} : vector<8x1152xbf16> to vector<8x1024xbf16>
    %c26 = arith.constant 26 : index
    %c0_230 = arith.constant 0 : index
    %c0_231 = arith.constant 0 : index
    %476 = vector.load %arg7[%c26, %c0_230, %c0_231] : memref<30x8x8xbf16, #tpu.memory_space<vmem>>, vector<1x8x8xbf16>
    %477 = vector.shape_cast %476 : vector<1x8x8xbf16> to vector<8x8xbf16>
    %cst_232 = arith.constant dense<0.000000e+00> : vector<8x1024xf32>
    %478 = tpu.matmul %477, %475, %cst_232 {dimension_numbers = #tpu.dot_dimension_numbers<[1], [0], [0], [1], [0, 0, 1, 1], [], []>} : vector<8x8xbf16>, vector<8x1024xbf16>, vector<8x1024xf32> -> vector<8x1024xf32>
    %479 = arith.addf %474, %478 : vector<8x1024xf32>
    %480 = vector.extract_strided_slice %470 {offsets = [0, 120], sizes = [8, 1024], strides = [1, 1]} : vector<8x1152xbf16> to vector<8x1024xbf16>
    %c27 = arith.constant 27 : index
    %c0_233 = arith.constant 0 : index
    %c0_234 = arith.constant 0 : index
    %481 = vector.load %arg7[%c27, %c0_233, %c0_234] : memref<30x8x8xbf16, #tpu.memory_space<vmem>>, vector<1x8x8xbf16>
    %482 = vector.shape_cast %481 : vector<1x8x8xbf16> to vector<8x8xbf16>
    %cst_235 = arith.constant dense<0.000000e+00> : vector<8x1024xf32>
    %483 = tpu.matmul %482, %480, %cst_235 {dimension_numbers = #tpu.dot_dimension_numbers<[1], [0], [0], [1], [0, 0, 1, 1], [], []>} : vector<8x8xbf16>, vector<8x1024xbf16>, vector<8x1024xf32> -> vector<8x1024xf32>
    %484 = arith.addf %479, %483 : vector<8x1024xf32>
    %485 = vector.extract_strided_slice %470 {offsets = [0, 124], sizes = [8, 1024], strides = [1, 1]} : vector<8x1152xbf16> to vector<8x1024xbf16>
    %c28 = arith.constant 28 : index
    %c0_236 = arith.constant 0 : index
    %c0_237 = arith.constant 0 : index
    %486 = vector.load %arg7[%c28, %c0_236, %c0_237] : memref<30x8x8xbf16, #tpu.memory_space<vmem>>, vector<1x8x8xbf16>
    %487 = vector.shape_cast %486 : vector<1x8x8xbf16> to vector<8x8xbf16>
    %cst_238 = arith.constant dense<0.000000e+00> : vector<8x1024xf32>
    %488 = tpu.matmul %487, %485, %cst_238 {dimension_numbers = #tpu.dot_dimension_numbers<[1], [0], [0], [1], [0, 0, 1, 1], [], []>} : vector<8x8xbf16>, vector<8x1024xbf16>, vector<8x1024xf32> -> vector<8x1024xf32>
    %489 = arith.addf %484, %488 : vector<8x1024xf32>
    %490 = vector.extract_strided_slice %470 {offsets = [0, 128], sizes = [8, 1024], strides = [1, 1]} : vector<8x1152xbf16> to vector<8x1024xbf16>
    %c29 = arith.constant 29 : index
    %c0_239 = arith.constant 0 : index
    %c0_240 = arith.constant 0 : index
    %491 = vector.load %arg7[%c29, %c0_239, %c0_240] : memref<30x8x8xbf16, #tpu.memory_space<vmem>>, vector<1x8x8xbf16>
    %492 = vector.shape_cast %491 : vector<1x8x8xbf16> to vector<8x8xbf16>
    %cst_241 = arith.constant dense<0.000000e+00> : vector<8x1024xf32>
    %493 = tpu.matmul %492, %490, %cst_241 {dimension_numbers = #tpu.dot_dimension_numbers<[1], [0], [0], [1], [0, 0, 1, 1], [], []>} : vector<8x8xbf16>, vector<8x1024xbf16>, vector<8x1024xf32> -> vector<8x1024xf32>
    %494 = arith.addf %489, %493 : vector<8x1024xf32>
    %c5_242 = arith.constant 5 : index
    %c0_243 = arith.constant 0 : index
    %c0_244 = arith.constant 0 : index
    %495 = vector.load %arg8[%c5_242, %c0_243, %c0_244] : memref<6x8x1xf32, #tpu.memory_space<vmem>>, vector<1x8x1xf32>
    %496 = vector.shape_cast %495 : vector<1x8x1xf32> to vector<8x1xf32>
    %497 = vector.broadcast %496 : vector<8x1xf32> to vector<8x1024xf32>
    %498 = arith.addf %494, %497 : vector<8x1024xf32>
    %499 = arith.addf %498, %336 : vector<8x1024xf32>
    %500 = vector.extract_strided_slice %465 {offsets = [0, 896], sizes = [8, 128], strides = [1, 1]} : vector<8x1024xf32> to vector<8x128xf32>
    %c5_245 = arith.constant 5 : index
    %c0_246 = arith.constant 0 : index
    %c0_247 = arith.constant 0 : index
    %501 = vector.load %arg10[%c5_245, %c0_246, %c0_247] : memref<6x8x128xf32, #tpu.memory_space<vmem>>, vector<1x8x128xf32>
    %502 = vector.shape_cast %501 : vector<1x8x128xf32> to vector<8x128xf32>
    %503 = vector.shape_cast %500 : vector<8x128xf32> to vector<1x8x128xf32>
    tpu.vector_store %arg10[%c5_245, %c0_246, %c0_247], %503 {strides = array<i32>} : memref<6x8x128xf32, #tpu.memory_space<vmem>>, vector<1x8x128xf32>,
    %c0_248 = arith.constant 0 : index
    %c0_249 = arith.constant 0 : index
    %c0_250 = arith.constant 0 : index
    %504 = vector.load %arg9[%c0_248, %c0_249, %c0_250] : memref<1x8x1024xf32, #tpu.memory_space<vmem>>, vector<1x8x1024xf32>
    %505 = vector.shape_cast %504 : vector<1x8x1024xf32> to vector<8x1024xf32>
    %506 = vector.shape_cast %499 : vector<8x1024xf32> to vector<1x8x1024xf32>
    tpu.vector_store %arg9[%c0_248, %c0_249, %c0_250], %506 {strides = array<i32>} : memref<1x8x1024xf32, #tpu.memory_space<vmem>>, vector<1x8x1024xf32>,
    return
  }
  func.func @transform_0(%arg0: i32, %arg1: i32) -> (i32, i32, i32) {
    %c0_i32 = arith.constant 0 : i32
    %c0_i32_0 = arith.constant 0 : i32
    return %arg0, %c0_i32, %arg1 : i32, i32, i32
  }
  func.func @transform_1(%arg0: i32, %arg1: i32) -> (i32, i32, i32) {
    %c0_i32 = arith.constant 0 : i32
    %c0_i32_0 = arith.constant 0 : i32
    %c0_i32_1 = arith.constant 0 : i32
    return %arg0, %c0_i32, %c0_i32_0 : i32, i32, i32
  }
  func.func @transform_2(%arg0: i32, %arg1: i32) -> (i32, i32) {
    %c0_i32 = arith.constant 0 : i32
    %c0_i32_0 = arith.constant 0 : i32
    return %c0_i32, %arg1 : i32, i32
  }
  func.func @transform_3(%arg0: i32, %arg1: i32) -> (i32, i32) {
    %c0_i32 = arith.constant 0 : i32
    %c0_i32_0 = arith.constant 0 : i32
    %c0_i32_1 = arith.constant 0 : i32
    return %c0_i32, %c0_i32_0 : i32, i32
  }
  func.func @transform_4(%arg0: i32, %arg1: i32) -> (i32, i32) {
    %c0_i32 = arith.constant 0 : i32
    %c0_i32_0 = arith.constant 0 : i32
    %c0_i32_1 = arith.constant 0 : i32
    return %c0_i32, %c0_i32_0 : i32, i32
  }
  func.func @transform_5(%arg0: i32, %arg1: i32) -> (i32, i32, i32) {
    %c0_i32 = arith.constant 0 : i32
    %c0_i32_0 = arith.constant 0 : i32
    %c0_i32_1 = arith.constant 0 : i32
    %c0_i32_2 = arith.constant 0 : i32
    return %c0_i32, %c0_i32_0, %c0_i32_1 : i32, i32, i32
  }
  func.func @transform_6(%arg0: i32, %arg1: i32) -> (i32, i32, i32) {
    %c0_i32 = arith.constant 0 : i32
    %c0_i32_0 = arith.constant 0 : i32
    %c0_i32_1 = arith.constant 0 : i32
    %c0_i32_2 = arith.constant 0 : i32
    return %c0_i32, %c0_i32_0, %c0_i32_1 : i32, i32, i32
  }
  func.func @transform_7(%arg0: i32, %arg1: i32) -> (i32, i32, i32) {
    %c0_i32 = arith.constant 0 : i32
    %c0_i32_0 = arith.constant 0 : i32
    return %arg0, %c0_i32, %arg1 : i32, i32, i32
  }
}

</mosaic_0001>

<bundles_post_ra>
// kernel: filter_block_forward.1
= control target key start
LH: loop header
LB: loop body
LE: loop exit
PB: predicated region body
PF: predicated region fallthrough
CT: control target
= control target key end

     0   :  { %s13035_s0 = inlined_call_operand.vmem [shape: f32[2,4,2048], index: 0, kind: input, shape index: {}]   ;;  %s13036_s1 = inlined_call_operand.vmem [shape: bf16[2,96,16], index: 1, kind: input, shape index: {}]   ;;  %s13037_s2 = inlined_call_operand.vmem [shape: bf16[16,2048], index: 2, kind: input, shape index: {}]   ;;  %s13038_s3 = inlined_call_operand.vmem [shape: bf16[8,4], index: 3, kind: input, shape index: {}]   ;;  %s13039_s4 = inlined_call_operand.vmem [shape: f32[8,1], index: 4, kind: input, shape index: {}]   ;;  %s13040_s5 = inlined_call_operand.vmem [shape: bf16[30,8,8], index: 5, kind: input, shape index: {}]   ;;  %s13041_s6 = inlined_call_operand.vmem [shape: f32[6,8,1], index: 6, kind: input, shape index: {}]   ;;  %s13042_s7 = inlined_call_operand.hbm [shape: f32[2,8,2048], index: 7, kind: output, shape index: {}]  }
   0x1   :  { %13061 = sst [smem:[#allocation88_spill]] %s13037_s2 }
   0x2   :  { %12 = vsyncpa [#allocation5], 0 }
   0x3   :  { %14 = vsyncpa [#allocation5 + $0x1], 0  ;;  %s10237_s24 = smov 0   ;;  %s10239_s25 = smov 0  }
   0x4   :  { %s10241_s26 = smov 0   ;;  %s10243_s27 = smov 0  }
   0x5   :  { %s10245_s28 = smov 0   ;;  %s10247_s29 = smov 0  }
   0x6   :  { %s10249_s30 = smov 0   ;;  %s10251_s8 = smov 0  }
   0x7   :  { %s10253_s9 = smov 0   ;;  %s10255_s10 = smov 0  }
   0x8 LB: > { %13062 = sst [smem:[#allocation7_spill]] %s10156_s26  ;;  %s9430_s11 = sadd.s32 4294967295, %s10184_s10   ;;  %s10184_s10 = sphi %s10255_s10, %s20_s10   ;;  %s10180_s9 = sphi %s10253_s9, %s13230_s9   ;;  %s10176_s8 = sphi %s10251_s8, %s13229_s8   ;;  %s10172_s30 = sphi %s10249_s30, %s13233_s30   ;;  %s10168_s29 = sphi %s10247_s29, %s13227_s29   ;;  %s10164_s28 = sphi %s10245_s28, %s13226_s28   ;;  %s10160_s27 = sphi %s10243_s27, %s13225_s27   ;;  %s10156_s26 = sphi %s10241_s26, %s13224_s26   ;;  %s10152_s25 = sphi %s10239_s25, %s13232_s25   ;;  %s10148_s24 = sphi %s10237_s24, %s13231_s24  }
   0x9   : > { %13063 = sst [smem:[#allocation8_spill]] %s10164_s28  ;;  %s9431_s12 = sadd.s32 4294967294, %s10184_s10  }
   0xa   : > { %13064 = sst [smem:[#allocation9_spill]] %s10176_s8  ;;  %s29_s13 = sadd.s32 1, %s10176_s8 }
   0xb   : > { %13065 = sst [smem:[#allocation10_spill]] %s10180_s9  ;;  %s32_s14 = sadd.s32 1, %s10180_s9 }
   0xc   : > { %p30_p0 = scmp.ge.s32.totalorder %s29_s13, 2  ;;  %s93_s15 = sadd.s32 1, %s10164_s28 }
   0xd   : > { %p100_p1 = scmp.ne.s32.totalorder %s10164_s28, %s10160_s27  ;;  %p101_p2 = scmp.eq.s32.totalorder %s10184_s10, 0 }
   0xe   : > { %s13235_s13 = smov (%p30_p0, %s29_s13), 0  ;;  %s13237_s14 = smov (!%p30_p0, %s32_s14), %s10180_s9 }
   0xf   : > { %13066 = sst [smem:[#allocation11_spill]] %s13235_s13  ;;  %s90_s16 = ssub.s32 %s10176_s8, %s13235_s13 }
  0x10   : > { %p10300_p3 = por %p101_p2, %p100_p1  ;;  %p34_p4 = scmp.ge.s32.totalorder %s13237_s14, 2 }
  0x11   : > { %p91_p5 = scmp.eq.s32.totalorder %s90_s16, 0  ;;  %s205_s18 = sadd.s32 1, %s10156_s26 }
  0x12   : > { %p215_p6 = scmp.ne.s32.totalorder %s10156_s26, %s10152_s25  ;;  %s13239_s14 = smov (%p34_p4, %s13237_s14), 0 }
  0x13   : > { %13068 = sst [smem:[#allocation12_spill]] %s13239_s14  ;;  %s200_s20 = ssub.s32 %s10180_s9, %s13239_s14 }
  0x14   : > { %s10310_s19 = scalar_select %p91_p5, %s10164_s28, %s93_s15  }
  0x15   : > { %p216_p7 = scmp.eq.s32.totalorder %s9430_s11, 3  ;;  %s202_s21 = sor.u32 %s200_s20, %s90_s16 }
  0x16   : > { %13069 = sst [smem:[#allocation13_spill]] %s10310_s19  ;;  %p221_p8 = scmp.ne.s32.totalorder %s10152_s25, %s10148_s24 }
  0x17   : > { %p203_p9 = scmp.eq.s32.totalorder %s202_s21, 0  ;;  %p10316_p10 = por %p216_p7, %p215_p6 }
  0x18   : > { %p222_p11 = scmp.eq.s32.totalorder %s9431_s12, 3  ;;  %p9433_p13 = scmp.ge.s32.totalorder %s10184_s10, 4 }
  0x19   : > { %s10321_s23 = scalar_select %p203_p9, %s10156_s26, %s205_s18  }
  0x1a   : > { %p10323_p12 = por %p222_p11, %p221_p8  ;;  %250 = sbr.rel (%p9433_p13) target bundleno = 47 (0x2f), region = 32 }
  0x1b   : > { %13071 = sst [smem:[#allocation14_spill]] %s10321_s23 }
  0x21   : > { %274 = sbr.rel (!%p10300_p3) target bundleno = 47 (0x2f), region = 44  ;;  %s276_s11 = sand.u32 (%p10300_p3), 1, %s10164_s28  }
  0x22   : > { %s9771_s15 = sshll.u32 (%p10300_p3), %s10176_s8, 5  ;;  %s9434_s16 = sshll.u32 (%p10300_p3), %s276_s11, 6 }
  0x23   : > { %s13073_s2 = sld [smem:[#allocation88_spill]] (%p10300_p3)  ;;  %s278_s18 = scalar_lea.vmem (%p10300_p3), [#allocation3], %s9434_s16 }
  0x29   : > { %s281_s12 = scalar_lea.vmem %s13073_s2, %s9771_s15 }
  0x2a   : > { %v294_v0 = vld [vmem:[%s281_s12] sm:$0xff]  ;;  %v296_v1 = vld [vmem:[%s281_s12 + $0x8] sm:$0xff]  ;;  %v298_v2 = vld [vmem:[%s281_s12 + $0x10] sm:$0xff] }
  0x2b   : > { %295 = vst [vmem:[%s278_s18] sm:$0xff] %v294_v0  ;;  %297 = vst [vmem:[%s278_s18 + $0x8] sm:$0xff] %v296_v1  ;;  %v300_v3 = vld [vmem:[%s281_s12 + $0x18] sm:$0xff]  ;;  %v302_v4 = vld [vmem:[%s281_s12 + $0x40] sm:$0xff] }
  0x2c   : > { %299 = vst [vmem:[%s278_s18 + $0x10] sm:$0xff] %v298_v2  ;;  %v304_v5 = vld [vmem:[%s281_s12 + $0x48] sm:$0xff]  ;;  %301 = vst [vmem:[%s278_s18 + $0x18] sm:$0xff] %v300_v3  ;;  %v306_v6 = vld [vmem:[%s281_s12 + $0x50] sm:$0xff] }
  0x2d   : > { %303 = vst [vmem:[%s278_s18 + $0x20] sm:$0xff] %v302_v4  ;;  %305 = vst [vmem:[%s278_s18 + $0x28] sm:$0xff] %v304_v5  ;;  %v308_v7 = vld [vmem:[%s281_s12 + $0x58] sm:$0xff] }
  0x2e   : > { %307 = vst [vmem:[%s278_s18 + $0x30] sm:$0xff] %v306_v6  ;;  %309 = vst [vmem:[%s278_s18 + $0x38] sm:$0xff] %v308_v7 }
  0x2f PF: > { %p9437_p0 = scmp.ge.s32.totalorder %s10184_s10, 1  ;;  %p314_p1 = scmp.lt.s32.totalorder %s10184_s10, 5 }
  0x31   : > { %p315_p2 = pnand %p9437_p0, %p314_p1 }
  0x33   : > { %318 = sbr.rel (%p315_p2) target bundleno = 3136 (0xc40), region = 67 }
  0x3a   : > { %s321_s17 = sand.u32 1, %s10160_s27   ;;  %s13048_s11 = sand.u32 1, %s10152_s25  }
  0x3b   : > { %s9438_s15 = sshll.u32 %s321_s17, 6  ;;  %s9439_s16 = sshll.u32 %s13048_s11, 6 }
  0x3c   : > { %s10342_s20 = sshll.u32 %s10168_s29, 3  ;;  %p367_p3 = scmp.lt.s32.totalorder %s10172_s30, 1 }
  0x3d   : > { %p369_p4 = scmp.lt.s32.totalorder %s10342_s20, 15  ;;  %s10356_s23 = scalar_lea.vmem [#allocation3], %s9438_s15 }
  0x3e   : > { %s368_s21 = scalar_select %p367_p3, %s10172_s30, 1 }
  0x3f   : > { %s370_s12 = scalar_select %p369_p4, %s10342_s20, 15 }
  0x40   : > { %s9441_s18 = sshll.u32 %s368_s21, 4  ;;  %s9772_s2 = smul.u32 48, %s368_s21 }
  0x41   : > { %s372_s14 = sadd.s32 %s9441_s18, %s370_s12  ;;  %s10358_s26 = scalar_lea.vmem [#allocation4], %s9439_s16 }
  0x42   : > { %s9442_s9 = sshll.u32 %s372_s14, 2  ;;  %s10351_s27 = scalar_lea.vmem %s13036_s1, %s9772_s2 }
  0x43   : > { %s374_s11 = scalar_lea.vmem %s13035_s0, %s9442_s9  ;;  %p9444_p5 = scmp.ne.s32.totalorder %s10168_s29, 0 }
  0x44   : > { %v10186_v8 = vmov (!%p9444_p5), 0.0  }
  0x45   : > { %387 = sbr.rel (%p9444_p5) target bundleno = 76 (0x4c), region = 75  ;;  %388 = vst [vmem:[#allocation2] sm:$0xff] (!%p9444_p5), %v10186_v8  ;;  %389 = vst [vmem:[#allocation2 + $0x8] sm:$0xff] (!%p9444_p5), %v10186_v8 }
  0x46   : > { %390 = vst [vmem:[#allocation2 + $0x10] sm:$0xff] (!%p9444_p5), %v10186_v8  ;;  %391 = vst [vmem:[#allocation2 + $0x18] sm:$0xff] (!%p9444_p5), %v10186_v8 }
  0x47   : > { %392 = vst [vmem:[#allocation2 + $0x20] sm:$0xff] (!%p9444_p5), %v10186_v8  ;;  %393 = vst [vmem:[#allocation2 + $0x28] sm:$0xff] (!%p9444_p5), %v10186_v8 }
  0x4c PF: > { %v394_v9 = vld [vmem:[%s374_s11] sm:$0xff]  ;;  %vm429_vm0 = vcmask 1041408   ;;  %v395_v10 = vld [vmem:[%s374_s11 + $0x8] sm:$0xff]  ;;  %v13050_v15 = vmov 0   ;;  %v396_v16 = vld [vmem:[%s374_s11 + $0x10] sm:$0xff]  ;;  %vm425_vm1 = vcmask 31744  }
  0x4d   : > { %v402_v11 = vcombine.high %v394_v9, %v394_v9  ;;  %v403_v12 = vcombine.high %v395_v10, %v395_v10  ;;  %v410_v13 = vpack.c.bf16 %v394_v9, %v394_v9  ;;  %v412_v14 = vpack.c.bf16 %v395_v10, %v395_v10  ;;  %486 = vmatprep.mubr.bf16.mxu0 %v13050_v15  ;;  %v397_v17 = vld [vmem:[%s374_s11 + $0x18] sm:$0xff]  ;;  %v630_v25 = vld [vmem:[%s10356_s23] sm:$0xff]  ;;  %v418_v27 = vld [vmem:[%s13038_s3] sm:$0xf]  ;;  %s10188_s9 = smov 3   ;;  %s10189_s14 = smov 4  }
  0x4e   : > { %527 = vmatprep.mubr.bf16.mxu1 %v13050_v15  ;;  %v404_v18 = vcombine.high %v396_v16, %v396_v16  ;;  %v405_v19 = vcombine.high %v397_v17, %v397_v17  ;;  %v414_v20 = vpack.c.bf16 %v396_v16, %v396_v16  ;;  %9870 = vset.pattern.permute.xlu0 %v13050_v15  ;;  %v634_v26 = vld [vmem:[%s10356_s23 + $0x20] sm:$0xff]  ;;  %v631_v31 = vld [vmem:[%s10356_s23 + $0x8] sm:$0xff]  ;;  %v419_v37 = vld [vmem:[%s13039_s4] sm:$0xff]  ;;  %vm708_vm2 = vcmask 130048   ;;  %s10190_s19 = smov 2   ;;  %s10192_s29 = smov 6  }
  0x4f   : > { %v411_v21 = vpack.c.bf16 %v402_v11, %v402_v11  ;;  %v413_v22 = vpack.c.bf16 %v403_v12, %v403_v12  ;;  %v431_v23 = vsel %vm429_vm0, %v410_v13, 0  ;;  %v437_v24 = vsel %vm429_vm0, %v412_v14, 0  ;;  %9871 = vset.pattern.permute.xlu1 %v13050_v15  ;;  %v635_v32 = vld [vmem:[%s10356_s23 + $0x28] sm:$0xff]  ;;  %v632_v38 = vld [vmem:[%s10356_s23 + $0x10] sm:$0xff]  ;;  %v633_v40 = vld [vmem:[%s10356_s23 + $0x18] sm:$0xff]  ;;  %422 = vperm.xlu0 %9870, %v419_v37   ;;  %s10193_s8 = smov 8  }
  0x50   : > { %v415_v28 = vpack.c.bf16 %v404_v18, %v404_v18  ;;  %v417_v29 = vpack.c.bf16 %v405_v19, %v405_v19  ;;  %v416_v30 = vpack.c.bf16 %v397_v17, %v397_v17  ;;  %v443_v33 = vsel %vm429_vm0, %v414_v20, 0  ;;  %v636_v39 = vld [vmem:[%s10356_s23 + $0x30] sm:$0xff]  ;;  %v637_v41 = vld [vmem:[%s10356_s23 + $0x38] sm:$0xff]  ;;  %v9878_v50 = vld [vmem:[%s10351_s27 + $0x10] sm:$0xff]   ;;  %s10191_s23 = smov 1   ;;  %s10194_s2 = smov 12  }
  0x51   : > { %9445 = vmatprep.subr.msk.bf16.mxu0 %vm429_vm0, %v411_v21  ;;  %9447 = vmatprep.subr.msk.bf16.mxu1 %vm429_vm0, %v413_v22  ;;  %v9460_v35 = vcombine.high %v630_v25, %v634_v26  ;;  %v9462_v36 = vcombine.high %v631_v31, %v635_v32  ;;  %v9459_v42 = vcombine.low %v630_v25, %v634_v26  ;;  %v9876_v46 = vld [vmem:[%s10351_s27] sm:$0xff]   ;;  %v9877_v49 = vld [vmem:[%s10351_s27 + $0x8] sm:$0xff]   ;;  %v9879_v51 = vld [vmem:[%s10351_s27 + $0x18] sm:$0xff]   ;;  %vm1371_vm11 = vcmask 23552   ;;  %s10195_s28 = smov 16   ;;  %s9767_s12 = sshll.u32 %s10172_s30, 4 }
  0x52   : > { %455 = vmatpush1.bf16.msra.mxu0 %v431_v23  ;;  %496 = vmatpush1.bf16.msra.mxu1 %v437_v24  ;;  %v449_v34 = vsel %vm429_vm0, %v416_v30, 0  ;;  %v9461_v43 = vcombine.low %v631_v31, %v635_v32  ;;  %v9464_v44 = vcombine.high %v632_v38, %v636_v39  ;;  %v9466_v45 = vcombine.high %v633_v40, %v637_v41  ;;  %v9880_v52 = vld [vmem:[%s10351_s27 + $0x20] sm:$0xff]   ;;  %v9881_v53 = vld [vmem:[%s10351_s27 + $0x28] sm:$0xff]   ;;  %s9317_s18 = sadd.s32 %s9767_s12, %s10342_s20  ;;  %s9321_s27 = sshll.u32 %s10358_s26, 4  ;;  %s12974_s27 = int_to_ptr.vmem [resolvable:$true] %s9321_s27 }
  0x53   : > { %9449 = vmatprep.subr.msk.bf16.mxu0 %vm429_vm0, %v415_v28  ;;  %9451 = vmatprep.subr.msk.bf16.mxu1 %vm429_vm0, %v417_v29  ;;  %v9463_v47 = vcombine.low %v632_v38, %v636_v39  ;;  %v9465_v48 = vcombine.low %v633_v40, %v637_v41  ;;  %v1339_v54 = vld [vmem:[#allocation2] sm:$0xff]  ;;  %vm1384_vm12 = vcmask 1043456   ;;  %vm1380_vm13 = vcmask 64512   ;;  %s9768_s30 = sshll.u32 %s9317_s18, 7 }
  0x54   : > { %v10449_v55 = vpack.c.bf16 %v1339_v54, %v1339_v54  ;;  %vm1811_vm14 = vcmask 15360   ;;  %vm2039_vm15 = vcmask 7168  }
  0x55   : > { %9446 = vmatmul.mubr.msk.bf16.vlgmr.msra.gmra.mrb[0].mxu0 %vm425_vm1, %v418_v27  ;;  %9448 = vmatmul.mubr.msk.bf16.vlgmr.msra.gmra.mrb[0].mxu1 %vm425_vm1, %v418_v27 }
  0x56   : > { %537 = vmatpush1.bf16.msra.mxu0 %v443_v33  ;;  %578 = vmatpush1.bf16.msra.mxu1 %v449_v34 }
  0x57   : > { %568 = vmatprep.mubr.bf16.mxu0 %v13050_v15  ;;  %609 = vmatprep.mubr.bf16.mxu1 %v13050_v15 }
  0x58   : > { %727 = vmatprep.subr.bf16.mxu0 %v9460_v35  ;;  %820 = vmatprep.subr.bf16.mxu1 %v9462_v36 }
  0x59   : > { %1353 = vrot.lane.b32.xlu0 %v10449_v55, %s10188_s9 }
  0x5d   : > { %9450 = vmatmul.mubr.msk.bf16.vlgmr.msra.gmra.mrb[4].mxu0 %vm425_vm1, %v418_v27  ;;  %9452 = vmatmul.mubr.msk.bf16.vlgmr.msra.gmra.mrb[4].mxu1 %vm425_vm1, %v418_v27 }
  0x5e   : > { %728 = vmatpush1.bf16.msra.mxu0 %v9459_v42  ;;  %821 = vmatpush1.bf16.msra.mxu1 %v9461_v43 }
  0x5f   : > { %759 = vmatprep.mubr.bf16.mxu0 %v13050_v15  ;;  %852 = vmatprep.mubr.bf16.mxu1 %v13050_v15 }
  0x60   : > { %913 = vmatprep.subr.bf16.mxu0 %v9464_v44  ;;  %1006 = vmatprep.subr.bf16.mxu1 %v9466_v45 }
  0x61   : > { %1573 = vrot.lane.b32.xlu0 %v10449_v55, %s10189_s14 }
  0x65   : > { %9467 = vmatmul.mubr.msk.bf16.vlgmr.msra.gmra.mrb[8].mxu0 %vm708_vm2, %v9876_v46  ;;  %9473 = vmatmul.mubr.msk.bf16.vlgmr.msra.gmra.mrb[8].mxu1 %vm708_vm2, %v9876_v46 }
  0x66   : > { %769 = vmatprep.mubr.bf16.mxu0 %v13050_v15  ;;  %862 = vmatprep.mubr.bf16.mxu1 %v13050_v15 }
  0x67   : > { %914 = vmatpush1.bf16.msra.mxu0 %v9463_v47  ;;  %1007 = vmatpush1.bf16.msra.mxu1 %v9465_v48 }
  0x6d   : > { %9468 = vmatmul.mubr.msk.bf16.gmra.mrb[12].mxu0 %vm708_vm2, %v9877_v49  ;;  %9474 = vmatmul.mubr.msk.bf16.gmra.mrb[12].mxu1 %vm708_vm2, %v9877_v49 }
  0x6e   : > { %779 = vmatprep.mubr.bf16.mxu0 %v13050_v15  ;;  %872 = vmatprep.mubr.bf16.mxu1 %v13050_v15 }
  0x75   : > { %9469 = vmatmul.mubr.msk.bf16.gmra.mrb[16].mxu0 %vm708_vm2, %v9878_v50  ;;  %9475 = vmatmul.mubr.msk.bf16.gmra.mrb[16].mxu1 %vm708_vm2, %v9878_v50 }
  0x76   : > { %789 = vmatprep.mubr.bf16.mxu0 %v13050_v15  ;;  %882 = vmatprep.mubr.bf16.mxu1 %v13050_v15 }
  0x7d   : > { %9470 = vmatmul.mubr.msk.bf16.gmra.mrb[20].mxu0 %vm708_vm2, %v9879_v51  ;;  %9476 = vmatmul.mubr.msk.bf16.gmra.mrb[20].mxu1 %vm708_vm2, %v9879_v51 }
  0x7e   : > { %799 = vmatprep.mubr.bf16.mxu0 %v13050_v15  ;;  %892 = vmatprep.mubr.bf16.mxu1 %v13050_v15 }
  0x85   : > { %9471 = vmatmul.mubr.msk.bf16.gmra.mrb[24].mxu0 %vm708_vm2, %v9880_v52  ;;  %9477 = vmatmul.mubr.msk.bf16.gmra.mrb[24].mxu1 %vm708_vm2, %v9880_v52 }
  0x86   : > { %809 = vmatprep.mubr.bf16.mxu0 %v13050_v15  ;;  %902 = vmatprep.mubr.bf16.mxu1 %v13050_v15 }
  0x8d   : > { %9472 = vmatmul.mubr.msk.bf16.gmra.mrb[28].mxu0 %vm708_vm2, %v9881_v53  ;;  %9478 = vmatmul.mubr.msk.bf16.gmra.mrb[28].mxu1 %vm708_vm2, %v9881_v53 }
  0x8e   : > { %945 = vmatprep.mubr.bf16.mxu0 %v13050_v15  ;;  %1038 = vmatprep.mubr.bf16.mxu1 %v13050_v15 }
  0x95   : > { %9479 = vmatmul.mubr.msk.bf16.vlgmr.msra.gmra.mrb[32].mxu0 %vm708_vm2, %v9876_v46  ;;  %9485 = vmatmul.mubr.msk.bf16.vlgmr.msra.gmra.mrb[32].mxu1 %vm708_vm2, %v9876_v46 }
  0x96   : > { %955 = vmatprep.mubr.bf16.mxu0 %v13050_v15  ;;  %1048 = vmatprep.mubr.bf16.mxu1 %v13050_v15 }
  0x9d   : > { %9480 = vmatmul.mubr.msk.bf16.gmra.mrb[36].mxu0 %vm708_vm2, %v9877_v49  ;;  %9486 = vmatmul.mubr.msk.bf16.gmra.mrb[36].mxu1 %vm708_vm2, %v9877_v49 }
  0x9e   : > { %965 = vmatprep.mubr.bf16.mxu0 %v13050_v15  ;;  %1058 = vmatprep.mubr.bf16.mxu1 %v13050_v15 }
  0xa5   : > { %9481 = vmatmul.mubr.msk.bf16.gmra.mrb[40].mxu0 %vm708_vm2, %v9878_v50  ;;  %9487 = vmatmul.mubr.msk.bf16.gmra.mrb[40].mxu1 %vm708_vm2, %v9878_v50 }
  0xa6   : > { %975 = vmatprep.mubr.bf16.mxu0 %v13050_v15  ;;  %1068 = vmatprep.mubr.bf16.mxu1 %v13050_v15 }
  0xad   : > { %9482 = vmatmul.mubr.msk.bf16.gmra.mrb[44].mxu0 %vm708_vm2, %v9879_v51  ;;  %9488 = vmatmul.mubr.msk.bf16.gmra.mrb[44].mxu1 %vm708_vm2, %v9879_v51 }
  0xae   : > { %985 = vmatprep.mubr.bf16.mxu0 %v13050_v15  ;;  %1078 = vmatprep.mubr.bf16.mxu1 %v13050_v15 }
  0xb5   : > { %9483 = vmatmul.mubr.msk.bf16.gmra.mrb[48].mxu0 %vm708_vm2, %v9880_v52  ;;  %9489 = vmatmul.mubr.msk.bf16.gmra.mrb[48].mxu1 %vm708_vm2, %v9880_v52 }
  0xb6   : > { %995 = vmatprep.mubr.bf16.mxu0 %v13050_v15  ;;  %1088 = vmatprep.mubr.bf16.mxu1 %v13050_v15 }
  0xbd   : > { %9484 = vmatmul.mubr.msk.bf16.gmra.mrb[52].mxu0 %vm708_vm2, %v9881_v53  ;;  %9490 = vmatmul.mubr.msk.bf16.gmra.mrb[52].mxu1 %vm708_vm2, %v9881_v53 }
  0xbe   : > { %1441 = vmatprep.mubr.bf16.mxu0 %v13050_v15  ;;  %1482 = vmatprep.mubr.bf16.mxu1 %v13050_v15 }
  0xce   : > { %v423_v56 = vpop.permute.xlu0 %422 }
 0x128   : > { %v488_v57 = vpop.f32.mrb[0].mxu0  ;;  %v529_v58 = vpop.f32.mrb[0].mxu1 }
 0x129   : > { %v10455_v59 = vadd.f32 %v488_v57, %v423_v56  ;;  %v10457_v60 = vadd.f32 %v529_v58, %v423_v56  ;;  %v490_v61 = vpop.f32.mrb[1].mxu0  ;;  %v531_v62 = vpop.f32.mrb[1].mxu1 }
 0x12a   : > { %v10459_v63 = vadd.f32 %v490_v61, %v423_v56  ;;  %v10461_v0 = vadd.f32 %v531_v62, %v423_v56  ;;  %v492_v1 = vpop.f32.mrb[2].mxu0  ;;  %v533_v2 = vpop.f32.mrb[2].mxu1 }
 0x12b   : > { %13074 = vst [vmem:[#allocation15_spill] sm:$0xff] %v10455_v59  ;;  %13075 = vst [vmem:[#allocation16_spill] sm:$0xff] %v10457_v60  ;;  %v10464_v3 = vmul.f32 0.70710677, %v10455_v59  ;;  %v10467_v4 = vmul.f32 0.70710677, %v10457_v60 }
 0x12c   : > { %13076 = vst [vmem:[#allocation17_spill] sm:$0xff] %v10459_v63  ;;  %13077 = vst [vmem:[#allocation18_spill] sm:$0xff] %v10461_v0  ;;  %v493_v5 = vpop.f32.mrb[3].mxu0  ;;  %v534_v6 = vpop.f32.mrb[3].mxu1  ;;  %v10470_v7 = vmul.f32 0.70710677, %v10459_v63 }
 0x12d   : > { %v10473_v8 = vmul.f32 0.70710677, %v10461_v0  ;;  %v1115_v9 = vand.u32 2147483647, %v10464_v3  ;;  %v1117_v10 = vand.u32 2147483647, %v10467_v4 }
 0x12e   : > { %v1116_v11 = vand.u32 2147483647, %v10470_v7  ;;  %v10514_v57 = vmul.f32 0.5, %v10455_v59  ;;  %vm1275_vm3 = vcmp.lt.f32.partialorder %v10464_v3, 0.0  ;;  %vm1277_vm4 = vcmp.lt.f32.partialorder %v10467_v4, 0.0 }
 0x12f   : > { %v1118_v12 = vand.u32 2147483647, %v10473_v8  ;;  %v1123_v13 = vmul.f32 0.3275911, %v1115_v9  ;;  %v1125_v14 = vmul.f32 0.3275911, %v1117_v10 }
 0x130   : > { %v1124_v16 = vmul.f32 0.3275911, %v1116_v11  ;;  %v570_v20 = vpop.f32.mrb[4].mxu0  ;;  %v611_v21 = vpop.f32.mrb[4].mxu1  ;;  %v1227_v35 = vsub.f32 0.0, %v1115_v9  ;;  %v1229_v36 = vsub.f32 0.0, %v1117_v10 }
 0x131   : > { %v1131_v17 = vadd.f32 1.0, %v1123_v13  ;;  %v1133_v18 = vadd.f32 1.0, %v1125_v14  ;;  %v1126_v19 = vmul.f32 0.3275911, %v1118_v12  ;;  %v572_v22 = vpop.f32.mrb[5].mxu0  ;;  %v613_v23 = vpop.f32.mrb[5].mxu1  ;;  %v10479_v25 = vadd.f32 %v570_v20, %v423_v56 }
 0x132   : > { %v1132_v24 = vadd.f32 1.0, %v1124_v16  ;;  %v574_v26 = vpop.f32.mrb[6].mxu0  ;;  %v615_v27 = vpop.f32.mrb[6].mxu1  ;;  %v10481_v28 = vadd.f32 %v611_v21, %v423_v56  ;;  %v10486_v33 = vadd.f32 %v572_v22, %v423_v56  ;;  %v10488_v34 = vadd.f32 %v613_v23, %v423_v56 }
 0x133   : > { %9882 = vrcp.f32 %v1131_v17  ;;  %13078 = vst [vmem:[#allocation19_spill] sm:$0xff] %v10479_v25  ;;  %v575_v29 = vpop.f32.mrb[7].mxu0  ;;  %v616_v30 = vpop.f32.mrb[7].mxu1  ;;  %v1134_v31 = vadd.f32 1.0, %v1126_v19  ;;  %v10484_v32 = vmul.f32 0.70710677, %v10479_v25  ;;  %v1235_v49 = vmul.f32 %v1227_v35, %v1115_v9 }
 0x134   : > { %9884 = vrcp.f32 %v1133_v18  ;;  %13079 = vst [vmem:[#allocation20_spill] sm:$0xff] %v10481_v28  ;;  %13080 = vst [vmem:[#allocation21_spill] sm:$0xff] %v10486_v33  ;;  %v10491_v37 = vmul.f32 0.70710677, %v10481_v28  ;;  %v10495_v39 = vmul.f32 0.70710677, %v10486_v33  ;;  %v1237_v50 = vmul.f32 %v1229_v36, %v1117_v10 }
 0x135   : > { %13081 = vst [vmem:[#allocation22_spill] sm:$0xff] %v10488_v34  ;;  %9886 = vrcp.f32 %v1132_v24  ;;  %v1119_v38 = vand.u32 2147483647, %v10484_v32  ;;  %v10498_v40 = vmul.f32 0.70710677, %v10488_v34  ;;  %v1228_v41 = vsub.f32 0.0, %v1116_v11 }
 0x136   : > { %v1230_v42 = vsub.f32 0.0, %v1118_v12  ;;  %v1121_v43 = vand.u32 2147483647, %v10491_v37  ;;  %9888 = vrcp.f32 %v1134_v31  ;;  %v1120_v47 = vand.u32 2147483647, %v10495_v39 }
 0x137   : > { %v1127_v46 = vmul.f32 0.3275911, %v1119_v38  ;;  %v10509_v52 = vand.u32 2147483647, %v10498_v40  ;;  %v1236_v62 = vmul.f32 %v1228_v41, %v1116_v11  ;;  %v1231_v13 = vsub.f32 0.0, %v1119_v38 }
 0x138   : > { %v10501_v44 = vpop.f32.mrb[8].mxu0  ;;  %v10503_v45 = vpop.f32.mrb[8].mxu1  ;;  %v1129_v51 = vmul.f32 0.3275911, %v1121_v43  ;;  %v1128_v56 = vmul.f32 0.3275911, %v1120_v47  ;;  %v1238_v1 = vmul.f32 %v1230_v42, %v1118_v12 }
 0x139   : > { %v10506_v48 = vpop.f32.mrb[9].mxu0  ;;  %v10511_v53 = vpop.f32.mrb[9].mxu1  ;;  %v1135_v54 = vadd.f32 1.0, %v1127_v46  ;;  %v1130_v5 = vmul.f32 0.3275911, %v10509_v52  ;;  %v10528_v16 = vmul.f32 0.5, %v10457_v60  ;;  %v1239_v30 = vmul.f32 %v1231_v13, %v1119_v38 }
 0x13a   : > { %v10516_v58 = vpop.f32.mrb[10].mxu0  ;;  %v10518_v61 = vpop.f32.mrb[10].mxu1  ;;  %v1137_v2 = vadd.f32 1.0, %v1129_v51  ;;  %v1136_v14 = vadd.f32 1.0, %v1128_v56  ;;  %v1243_v18 = vmul.f32 1.442695, %v1235_v49 }
 0x13b   : > { %v10521_v6 = vpop.f32.mrb[11].mxu0  ;;  %v10523_v9 = vpop.f32.mrb[11].mxu1  ;;  %9890 = vrcp.f32 %v1135_v54  ;;  %v1247_v11 = vmul.f32 1.442695, %v1237_v50  ;;  %v1233_v12 = vsub.f32 0.0, %v1121_v43  ;;  %v1232_v19 = vsub.f32 0.0, %v1120_v47 }
 0x13c   : > { %9892 = vrcp.f32 %v1137_v2  ;;  %v1138_v20 = vadd.f32 1.0, %v1130_v5  ;;  %v1245_v23 = vmul.f32 1.442695, %v1236_v62  ;;  %v1249_v24 = vmul.f32 1.442695, %v1238_v1 }
 0x13d   : > { %v10525_v10 = vpop.eup %9882  ;;  %9894 = vrcp.f32 %v1136_v14  ;;  %v1241_v42 = vmul.f32 %v1233_v12, %v1121_v43  ;;  %v1234_v46 = vsub.f32 0.0, %v10509_v52  ;;  %v10546_v49 = vmul.f32 0.5, %v10459_v63 }
 0x13e   : > { %v10530_v17 = vpop.eup %9884  ;;  %v1155_v21 = vmul.f32 1.0614054, %v10525_v10  ;;  %v1240_v56 = vmul.f32 %v1232_v19, %v1120_v47  ;;  %9896 = vrcp.f32 %v1138_v20  ;;  %v10562_v13 = vmul.f32 0.5, %v10461_v0 }
 0x13f   : > { %v1157_v22 = vmul.f32 1.0614054, %v10530_v17  ;;  %v10538_v29 = vpop.eup %9886  ;;  %9898 = vpow2.f32 %v1243_v18  ;;  %v1251_v12 = vmul.f32 1.442695, %v1239_v30  ;;  %v1255_v19 = vmul.f32 1.442695, %v1241_v42 }
 0x140   : > { %v10534_v26 = vpop.f32.mrb[12].mxu0  ;;  %v10536_v27 = vpop.f32.mrb[12].mxu1  ;;  %v1163_v31 = vadd.f32 -1.4531521, %v1155_v21  ;;  %v1156_v50 = vmul.f32 1.0614054, %v10538_v29  ;;  %9900 = vpow2.f32 %v1247_v11  ;;  %v1242_v18 = vmul.f32 %v1234_v46, %v10509_v52 }
 0x141   : > { %v1165_v35 = vadd.f32 -1.4531521, %v1157_v22  ;;  %v10540_v36 = vpop.f32.mrb[13].mxu0  ;;  %v10542_v41 = vpop.f32.mrb[13].mxu1  ;;  %9902 = vpow2.f32 %v1245_v23  ;;  %vm1276_vm5 = vcmp.lt.f32.partialorder %v10470_v7, 0.0  ;;  %vm1278_vm6 = vcmp.lt.f32.partialorder %v10473_v8, 0.0 }
 0x142   : > { %v10549_v51 = vpop.f32.mrb[14].mxu0  ;;  %v10551_v54 = vpop.f32.mrb[14].mxu1  ;;  %v1171_v62 = vmul.f32 %v10525_v10, %v1163_v31  ;;  %v1164_v5 = vadd.f32 -1.4531521, %v1156_v50  ;;  %9904 = vpow2.f32 %v1249_v24  ;;  %vm1279_vm7 = vcmp.lt.f32.partialorder %v10484_v32, 0.0 }
 0x143   : > { %v10553_v38 = vpop.eup %9888  ;;  %v1173_v1 = vmul.f32 %v10530_v17, %v1165_v35  ;;  %v10557_v43 = vpop.f32.mrb[15].mxu0  ;;  %v1253_v35 = vmul.f32 1.442695, %v1240_v56  ;;  %9906 = vpow2.f32 %v1251_v12  ;;  %vm1281_vm8 = vcmp.lt.f32.partialorder %v10491_v37, 0.0 }
 0x144   : > { %13082 = vst [vmem:[#allocation23_spill] sm:$0xff] %v10557_v43  ;;  %v10559_v2 = vpop.f32.mrb[15].mxu1  ;;  %v1158_v14 = vmul.f32 1.0614054, %v10553_v38  ;;  %v1179_v21 = vadd.f32 1.4214138, %v1171_v62  ;;  %v1172_v20 = vmul.f32 %v10538_v29, %v1164_v5  ;;  %9908 = vpow2.f32 %v1255_v19 }
 0x145   : > { %v1181_v47 = vadd.f32 1.4214138, %v1173_v1  ;;  %v10566_v31 = vpop.eup %9890  ;;  %9910 = vpow2.f32 %v1253_v35  ;;  %v1105_v37 = vmul.f32 0.5, %v10481_v28  ;;  %vm1280_vm9 = vcmp.lt.f32.partialorder %v10495_v39, 0.0 }
 0x146   : > { %v1166_v22 = vadd.f32 -1.4531521, %v1158_v14  ;;  %v1187_v50 = vmul.f32 %v10525_v10, %v1179_v21  ;;  %v10571_v0 = vpop.eup %9892  ;;  %v1180_v11 = vadd.f32 1.4214138, %v1172_v20  ;;  %v1159_v62 = vmul.f32 1.0614054, %v10566_v31 }
 0x147   : > { %v1189_v15 = vmul.f32 %v10530_v17, %v1181_v47  ;;  %v10588_v20 = vpop.eup %9894  ;;  %v1161_v19 = vmul.f32 1.0614054, %v10571_v0  ;;  %vm1282_vm10 = vcmp.lt.f32.partialorder %v10498_v40, 0.0 }
 0x148   : > { %v1174_v30 = vmul.f32 %v10553_v38, %v1166_v22  ;;  %v10574_v23 = vpop.f32.mrb[16].mxu0  ;;  %v10576_v42 = vpop.f32.mrb[16].mxu1  ;;  %v1195_v56 = vadd.f32 -0.28449672, %v1187_v50  ;;  %v1188_v5 = vmul.f32 %v10538_v29, %v1180_v11  ;;  %v1167_v47 = vadd.f32 -1.4531521, %v1159_v62 }
 0x149   : > { %13083 = vst [vmem:[#allocation24_spill] sm:$0xff] %v10574_v23  ;;  %13084 = vst [vmem:[#allocation25_spill] sm:$0xff] %v10576_v42  ;;  %v1197_v1 = vadd.f32 -0.28449672, %v1189_v15  ;;  %v10579_v52 = vpop.f32.mrb[17].mxu0  ;;  %v10581_v46 = vpop.f32.mrb[17].mxu1 }
 0x14a   : > { %13085 = vst [vmem:[#allocation26_spill] sm:$0xff] %v10579_v52  ;;  %13086 = vst [vmem:[#allocation27_spill] sm:$0xff] %v10581_v46  ;;  %v1182_v24 = vadd.f32 1.4214138, %v1174_v30  ;;  %v10584_v14 = vpop.f32.mrb[18].mxu0  ;;  %v10586_v21 = vpop.f32.mrb[18].mxu1  ;;  %v1203_v12 = vmul.f32 %v10525_v10, %v1195_v56  ;;  %v1175_v46 = vmul.f32 %v10566_v31, %v1167_v47 }
 0x14b   : > { %13087 = vst [vmem:[#allocation28_spill] sm:$0xff] %v10584_v14  ;;  %13088 = vst [vmem:[#allocation29_spill] sm:$0xff] %v10586_v21  ;;  %v1257_v22 = vmul.f32 1.442695, %v1242_v18  ;;  %v1205_v15 = vmul.f32 %v10530_v17, %v1197_v1  ;;  %v10592_v50 = vpop.f32.mrb[19].mxu0  ;;  %v10594_v42 = vpop.f32.mrb[19].mxu1 }
 0x14c   : > { %13089 = vst [vmem:[#allocation30_spill] sm:$0xff] %v10592_v50  ;;  %13090 = vst [vmem:[#allocation31_spill] sm:$0xff] %v10594_v42  ;;  %v1196_v11 = vadd.f32 -0.28449672, %v1188_v5  ;;  %v1190_v30 = vmul.f32 %v10553_v38, %v1182_v24  ;;  %v1160_v62 = vmul.f32 1.0614054, %v10588_v20  ;;  %v10600_v21 = vpop.eup %9896 }
 0x14d   : > { %v1211_v18 = vadd.f32 0.2548296, %v1203_v12  ;;  %v1213_v56 = vadd.f32 0.2548296, %v1205_v15  ;;  %v1169_v14 = vadd.f32 -1.4531521, %v1161_v19  ;;  %v9899_v1 = vpop.eup %9898  ;;  %9912 = vpow2.f32 %v1257_v22 }
 0x14e   : > { %v1204_v42 = vmul.f32 %v10538_v29, %v1196_v11  ;;  %v1198_v5 = vadd.f32 -0.28449672, %v1190_v30  ;;  %v1183_v50 = vadd.f32 1.4214138, %v1175_v46  ;;  %v1168_v24 = vadd.f32 -1.4531521, %v1160_v62  ;;  %v9901_v52 = vpop.eup %9900 }
 0x14f   : > { %v1219_v47 = vmul.f32 %v10525_v10, %v1211_v18  ;;  %v1221_v23 = vmul.f32 %v10530_v17, %v1213_v56  ;;  %v1177_v35 = vmul.f32 %v10571_v0, %v1169_v14  ;;  %v1162_v12 = vmul.f32 1.0614054, %v10600_v21  ;;  %v9903_v15 = vpop.eup %9902 }
 0x150   : > { %v1212_v19 = vadd.f32 0.2548296, %v1204_v42  ;;  %v1206_v60 = vmul.f32 %v10553_v38, %v1198_v5  ;;  %v10610_v63 = vpop.f32.mrb[20].mxu0  ;;  %v10612_v59 = vpop.f32.mrb[20].mxu1  ;;  %v1191_v46 = vmul.f32 %v10566_v31, %v1183_v50  ;;  %v1176_v11 = vmul.f32 %v10588_v20, %v1168_v24 }
 0x151   : > { %13091 = vst [vmem:[#allocation32_spill] sm:$0xff] %v10610_v63  ;;  %13092 = vst [vmem:[#allocation33_spill] sm:$0xff] %v10612_v59  ;;  %v1259_v30 = vmul.f32 %v9899_v1, %v1219_v47  ;;  %v1261_v10 = vmul.f32 %v9901_v52, %v1221_v23  ;;  %v10617_v17 = vpop.f32.mrb[21].mxu0  ;;  %v10619_v14 = vpop.f32.mrb[21].mxu1  ;;  %v1185_v62 = vadd.f32 1.4214138, %v1177_v35 }
 0x152   : > { %13093 = vst [vmem:[#allocation34_spill] sm:$0xff] %v10617_v17  ;;  %13094 = vst [vmem:[#allocation35_spill] sm:$0xff] %v10619_v14  ;;  %v1170_v42 = vadd.f32 -1.4531521, %v1162_v12  ;;  %v9905_v18 = vpop.eup %9904  ;;  %v1220_v56 = vmul.f32 %v10538_v29, %v1212_v19  ;;  %v1214_v5 = vadd.f32 0.2548296, %v1206_v60 }
 0x153   : > { %v10622_v59 = vpop.f32.mrb[22].mxu0  ;;  %v10624_v50 = vpop.f32.mrb[22].mxu1  ;;  %v1199_v24 = vadd.f32 -0.28449672, %v1191_v46  ;;  %v1267_v23 = vsub.f32 1.0, %v1259_v30  ;;  %v1269_v52 = vsub.f32 1.0, %v1261_v10  ;;  %v1193_v35 = vmul.f32 %v10571_v0, %v1185_v62 }
 0x154   : > { %13095 = vst [vmem:[#allocation36_spill] sm:$0xff] %v10622_v59  ;;  %13096 = vst [vmem:[#allocation37_spill] sm:$0xff] %v10624_v50  ;;  %v9907_v1 = vpop.eup %9906  ;;  %v10627_v47 = vpop.f32.mrb[23].mxu0  ;;  %v1184_v22 = vadd.f32 1.4214138, %v1176_v11  ;;  %v1260_v29 = vmul.f32 %v9903_v15, %v1220_v56  ;;  %v1222_v60 = vmul.f32 %v10553_v38, %v1214_v5  ;;  %v1178_v46 = vmul.f32 %v10600_v21, %v1170_v42 }
 0x155   : > { %13097 = vst [vmem:[#allocation38_spill] sm:$0xff] %v10627_v47  ;;  %v10629_v14 = vpop.f32.mrb[23].mxu1  ;;  %v9909_v12 = vpop.eup %9908  ;;  %v1207_v19 = vmul.f32 %v10566_v31, %v1199_v24  ;;  %v1283_v50 = vsub.f32 0.0, %v1267_v23  ;;  %v1285_v30 = vsub.f32 0.0, %v1269_v52  ;;  %v1201_v10 = vadd.f32 -0.28449672, %v1193_v35 }
 0x156   : > { %13098 = vst [vmem:[#allocation39_spill] sm:$0xff] %v10629_v14  ;;  %v1192_v59 = vmul.f32 %v10588_v20, %v1184_v22  ;;  %v1268_v17 = vsub.f32 1.0, %v1260_v29  ;;  %v1262_v47 = vmul.f32 %v9905_v18, %v1222_v60  ;;  %v1186_v14 = vadd.f32 1.4214138, %v1178_v46  ;;  %v9911_v43 = vpop.eup %9910 }
 0x157   : > { %v1215_v63 = vadd.f32 0.2548296, %v1207_v19  ;;  %v1291_v11 = vsel %vm1275_vm3, %v1283_v50, %v1267_v23  ;;  %v1293_v38 = vsel %vm1277_vm4, %v1285_v30, %v1269_v52  ;;  %v1209_v15 = vmul.f32 %v10571_v0, %v1201_v10 }
 0x158   : > { %v1200_v62 = vadd.f32 -0.28449672, %v1192_v59  ;;  %v1299_v42 = vadd.f32 1.0, %v1291_v11  ;;  %v1301_v56 = vadd.f32 1.0, %v1293_v38  ;;  %v1284_v5 = vsub.f32 0.0, %v1268_v17  ;;  %v10641_v35 = vpop.f32.mrb[24].mxu0 }
 0x159   : > { %v1270_v24 = vsub.f32 1.0, %v1262_v47  ;;  %13099 = vst [vmem:[#allocation40_spill] sm:$0xff] %v10641_v35  ;;  %v10643_v22 = vpop.f32.mrb[24].mxu1  ;;  %v10648_v3 = vpop.f32.mrb[25].mxu0  ;;  %v1223_v4 = vmul.f32 %v10566_v31, %v1215_v63  ;;  %v1217_v50 = vadd.f32 0.2548296, %v1209_v15  ;;  %v1194_v59 = vmul.f32 %v10600_v21, %v1186_v14 }
 0x15a   : > { %13100 = vst [vmem:[#allocation41_spill] sm:$0xff] %v10643_v22  ;;  %v10646_v18 = vpop.f32.mrb[25].mxu1  ;;  %13102 = vst [vmem:[#allocation43_spill] sm:$0xff] %v10648_v3  ;;  %v1208_v23 = vmul.f32 %v10588_v20, %v1200_v62  ;;  %v1307_v52 = vmul.f32 %v1299_v42, %v10514_v57  ;;  %v1309_v47 = vmul.f32 %v1301_v56, %v10528_v16  ;;  %v10657_v19 = vpop.f32.mrb[26].mxu0 }
 0x15b   : > { %13101 = vst [vmem:[#allocation42_spill] sm:$0xff] %v10646_v18  ;;  %v1292_v29 = vsel %vm1276_vm5, %v1284_v5, %v1268_v17  ;;  %v1286_v60 = vsub.f32 0.0, %v1270_v24  ;;  %13103 = vst [vmem:[#allocation44_spill] sm:$0xff] %v10657_v19  ;;  %v10659_v46 = vpop.f32.mrb[26].mxu1  ;;  %v10661_v10 = vpop.f32.mrb[27].mxu0  ;;  %v1263_v31 = vmul.f32 %v9907_v1, %v1223_v4  ;;  %v1225_v14 = vmul.f32 %v10571_v0, %v1217_v50 }
 0x15c   : > { %13104 = vst [vmem:[#allocation45_spill] sm:$0xff] %v10659_v46  ;;  %v1300_v30 = vadd.f32 1.0, %v1292_v29  ;;  %13105 = vst [vmem:[#allocation46_spill] sm:$0xff] %v10661_v10  ;;  %v10663_v63 = vpop.f32.mrb[27].mxu1  ;;  %v1216_v11 = vadd.f32 0.2548296, %v1208_v23  ;;  %v9913_v57 = vpop.eup %9912  ;;  %v1315_v16 = vmul.f32 %v1307_v52, %v10501_v44  ;;  %v1317_v7 = vmul.f32 %v1309_v47, %v10503_v45 }
 0x15d   : > { %13106 = vst [vmem:[#allocation47_spill] sm:$0xff] %v10663_v63  ;;  %v1294_v17 = vsel %vm1278_vm6, %v1286_v60, %v1270_v24  ;;  %v1202_v38 = vadd.f32 -0.28449672, %v1194_v59  ;;  %v1271_v42 = vsub.f32 1.0, %v1263_v31  ;;  %v1265_v56 = vmul.f32 %v9909_v12, %v1225_v14 }
 0x15e   : > { %v1308_v15 = vmul.f32 %v1300_v30, %v10546_v49  ;;  %v1302_v62 = vadd.f32 1.0, %v1294_v17  ;;  %v1323_v5 = vadd.f32 %v1315_v16, %v10516_v58  ;;  %v1325_v1 = vadd.f32 %v1317_v7, %v10518_v61 }
 0x15f   : > { %v1224_v0 = vmul.f32 %v10588_v20, %v1216_v11  ;;  %v1210_v4 = vmul.f32 %v10600_v21, %v1202_v38  ;;  %v1287_v8 = vsub.f32 0.0, %v1271_v42  ;;  %v1273_v24 = vsub.f32 1.0, %v1265_v56 }
 0x160   : > { %v1316_v44 = vmul.f32 %v1308_v15, %v10506_v48  ;;  %v1310_v45 = vmul.f32 %v1302_v62, %v10562_v13  ;;  %v10677_v50 = vpack.c.bf16 %v1323_v5, %v1323_v5  ;;  %v10679_v49 = vpack.c.bf16 %v1325_v1, %v1325_v1  ;;  %v10681_v23 = vpop.f32.mrb[28].mxu0  ;;  %v10683_v12 = vpop.f32.mrb[28].mxu1 }
 0x161   : > { %13107 = vst [vmem:[#allocation48_spill] sm:$0xff] %v10681_v23  ;;  %13108 = vst [vmem:[#allocation49_spill] sm:$0xff] %v10683_v12  ;;  %v1264_v58 = vmul.f32 %v9911_v43, %v1224_v0  ;;  %v1218_v61 = vadd.f32 0.2548296, %v1210_v4  ;;  %v10687_v52 = vpop.f32.mrb[29].mxu0  ;;  %v10689_v48 = vpop.f32.mrb[29].mxu1  ;;  %v1295_v13 = vsel %vm1279_vm7, %v1287_v8, %v1271_v42 }
 0x162   : > { %v1318_v20 = vmul.f32 %v1310_v45, %v10511_v53  ;;  %v1324_v59 = vadd.f32 %v1316_v44, %v10521_v6  ;;  %13109 = vst [vmem:[#allocation50_spill] sm:$0xff] %v10687_v52  ;;  %13110 = vst [vmem:[#allocation51_spill] sm:$0xff] %v10689_v48  ;;  %v1289_v47 = vsub.f32 0.0, %v1273_v24  ;;  %1359 = vrot.lane.b32.xlu0 %v10679_v49, %s10188_s9  ;;  %1355 = vrot.lane.b32.xlu1 %v10677_v50, %s10188_s9  ;;  %v10697_v43 = vpop.f32.mrb[30].mxu0  ;;  %v10699_v29 = vpop.f32.mrb[30].mxu1 }
 0x163   : > { %13111 = vst [vmem:[#allocation52_spill] sm:$0xff] %v10697_v43  ;;  %13112 = vst [vmem:[#allocation53_spill] sm:$0xff] %v10699_v29  ;;  %v1272_v53 = vsub.f32 1.0, %v1264_v58  ;;  %v1226_v6 = vmul.f32 %v10600_v21, %v1218_v61  ;;  %v10704_v32 = vpop.f32.mrb[31].mxu0  ;;  %v10706_v30 = vpop.f32.mrb[31].mxu1  ;;  %v1303_v31 = vadd.f32 1.0, %v1295_v13 }
 0x164   : > { %v1326_v60 = vadd.f32 %v1318_v20, %v10523_v9  ;;  %13113 = vst [vmem:[#allocation54_spill] sm:$0xff] %v10704_v32  ;;  %13114 = vst [vmem:[#allocation55_spill] sm:$0xff] %v10706_v30  ;;  %v1297_v14 = vsel %vm1281_vm8, %v1289_v47, %v1273_v24  ;;  %v10708_v11 = vpack.c.bf16 %v1324_v59, %v1324_v59  ;;  %v1103_v38 = vmul.f32 0.5, %v10479_v25 }
 0x165   : > { %v1305_v16 = vadd.f32 1.0, %v1297_v14  ;;  %v1288_v7 = vsub.f32 0.0, %v1272_v53  ;;  %v1266_v17 = vmul.f32 %v9913_v57, %v1226_v6  ;;  %v1104_v42 = vmul.f32 0.5, %v10486_v33 }
 0x166   : > { %1577 = vrot.lane.b32.xlu0 %v10708_v11, %s10189_s14  ;;  %1575 = vrot.lane.b32.xlu1 %v10677_v50, %s10189_s14  ;;  %v1311_v15 = vmul.f32 %v1303_v31, %v1103_v38  ;;  %v1106_v8 = vmul.f32 0.5, %v10488_v34  ;;  %v10722_v31 = vpack.c.bf16 %v1326_v60, %v1326_v60 }
 0x167   : > { %v1296_v9 = vsel %vm1280_vm9, %v1288_v7, %v1272_v53  ;;  %v1274_v21 = vsub.f32 1.0, %v1266_v17  ;;  %v1313_v62 = vmul.f32 %v1305_v16, %v1105_v37 }
 0x168   : > { %v1304_v56 = vadd.f32 1.0, %v1296_v9  ;;  %v947_v57 = vpop.f32.mrb[32].mxu0  ;;  %v1040_v5 = vpop.f32.mrb[32].mxu1 }
 0x169   : > { %v1290_v1 = vsub.f32 0.0, %v1274_v21  ;;  %v1319_v0 = vmul.f32 %v1311_v15, %v947_v57  ;;  %v1321_v4 = vmul.f32 %v1313_v62, %v1040_v5  ;;  %v949_v44 = vpop.f32.mrb[33].mxu0  ;;  %v1042_v45 = vpop.f32.mrb[33].mxu1 }
 0x16a   : > { %v1312_v39 = vmul.f32 %v1304_v56, %v1104_v42  ;;  %1357 = vrot.lane.b32.xlu1 %v10708_v11, %s10188_s9  ;;  %v951_v58 = vpop.f32.mrb[34].mxu0  ;;  %v1044_v61 = vpop.f32.mrb[34].mxu1 }
 0x16b   : > { %v1298_v24 = vsel %vm1282_vm10, %v1290_v1, %v1274_v21  ;;  %v1327_v13 = vadd.f32 %v1319_v0, %v951_v58  ;;  %v1329_v47 = vadd.f32 %v1321_v4, %v1044_v61  ;;  %v953_v53 = vpop.f32.mrb[35].mxu0  ;;  %v1046_v6 = vpop.f32.mrb[35].mxu1 }
 0x16c   : > { %v1320_v20 = vmul.f32 %v1312_v39, %v949_v44  ;;  %v1306_v59 = vadd.f32 1.0, %v1298_v24 }
 0x16d   : > { %v10724_v16 = vpack.c.bf16 %v1327_v13, %v1327_v13  ;;  %v10732_v38 = vpack.c.bf16 %v1329_v47, %v1329_v47 }
 0x16e   : > { %v1314_v14 = vmul.f32 %v1306_v59, %v1106_v8  ;;  %v1328_v40 = vadd.f32 %v1320_v20, %v953_v53  ;;  %1361 = vrot.lane.b32.xlu1 %v10722_v31, %s10188_s9 }
 0x16f   : > { %1363 = vrot.lane.b32.xlu0 %v10724_v16, %s10188_s9 }
 0x170   : > { %v1322_v7 = vmul.f32 %v1314_v14, %v1042_v45  ;;  %v10728_v17 = vpack.c.bf16 %v1328_v40, %v1328_v40  ;;  %v10793_v9 = vpop.f32.mrb[36].mxu0  ;;  %v10795_v21 = vpop.f32.mrb[36].mxu1 }
 0x171   : > { %v10797_v15 = vpop.f32.mrb[37].mxu0  ;;  %v10799_v62 = vpop.f32.mrb[37].mxu1 }
 0x172   : > { %v1330_v37 = vadd.f32 %v1322_v7, %v1046_v6  ;;  %1365 = vrot.lane.b32.xlu1 %v10728_v17, %s10188_s9  ;;  %v10801_v42 = vpop.f32.mrb[38].mxu0  ;;  %v10803_v56 = vpop.f32.mrb[38].mxu1 }
 0x173   : > { %1367 = vrot.lane.b32.xlu0 %v10732_v38, %s10188_s9  ;;  %v10805_v57 = vpop.f32.mrb[39].mxu0  ;;  %v10807_v5 = vpop.f32.mrb[39].mxu1 }
 0x174   : > { %2462 = vst [vmem:[#allocation2] sm:$0xff] %v1330_v37  ;;  %v10738_v60 = vpack.c.bf16 %v1330_v37, %v1330_v37 }
 0x176   : > { %1369 = vrot.lane.b32.xlu1 %v10738_v60, %s10188_s9 }
 0x177   : > { %1581 = vrot.lane.b32.xlu0 %v10722_v31, %s10189_s14 }
 0x178   : > { %v10809_v1 = vpop.f32.mrb[40].mxu0  ;;  %v10811_v0 = vpop.f32.mrb[40].mxu1 }
 0x179   : > { %13115 = vst [vmem:[#allocation56_spill] sm:$0xff] %v10809_v1  ;;  %13116 = vst [vmem:[#allocation57_spill] sm:$0xff] %v10811_v0  ;;  %v10813_v4 = vpop.f32.mrb[41].mxu0  ;;  %v10815_v44 = vpop.f32.mrb[41].mxu1 }
 0x17a   : > { %1579 = vrot.lane.b32.xlu1 %v10679_v49, %s10189_s14  ;;  %13117 = vst [vmem:[#allocation58_spill] sm:$0xff] %v10813_v4  ;;  %13118 = vst [vmem:[#allocation59_spill] sm:$0xff] %v10815_v44  ;;  %v10817_v39 = vpop.f32.mrb[42].mxu0  ;;  %v10819_v45 = vpop.f32.mrb[42].mxu1 }
 0x17b   : > { %1795 = vrot.lane.b32.xlu0 %v10677_v50, %s10190_s19  ;;  %13119 = vst [vmem:[#allocation60_spill] sm:$0xff] %v10817_v39  ;;  %13120 = vst [vmem:[#allocation61_spill] sm:$0xff] %v10819_v45  ;;  %v10821_v8 = vpop.f32.mrb[43].mxu0  ;;  %v10823_v24 = vpop.f32.mrb[43].mxu1 }
 0x17c   : > { %13121 = vst [vmem:[#allocation62_spill] sm:$0xff] %v10821_v8  ;;  %13122 = vst [vmem:[#allocation63_spill] sm:$0xff] %v10823_v24 }
 0x17e   : > { %1583 = vrot.lane.b32.xlu1 %v10724_v16, %s10189_s14 }
 0x17f   : > { %1585 = vrot.lane.b32.xlu0 %v10728_v17, %s10189_s14 }
 0x180   : > { %v10825_v58 = vpop.f32.mrb[44].mxu0  ;;  %v10827_v61 = vpop.f32.mrb[44].mxu1 }
 0x181   : > { %13123 = vst [vmem:[#allocation64_spill] sm:$0xff] %v10825_v58  ;;  %13124 = vst [vmem:[#allocation65_spill] sm:$0xff] %v10827_v61  ;;  %v10829_v20 = vpop.f32.mrb[45].mxu0  ;;  %v10831_v59 = vpop.f32.mrb[45].mxu1 }
 0x182   : > { %1587 = vrot.lane.b32.xlu1 %v10732_v38, %s10189_s14  ;;  %13125 = vst [vmem:[#allocation66_spill] sm:$0xff] %v10829_v20  ;;  %13126 = vst [vmem:[#allocation67_spill] sm:$0xff] %v10831_v59  ;;  %v10833_v13 = vpop.f32.mrb[46].mxu0  ;;  %v10835_v47 = vpop.f32.mrb[46].mxu1 }
 0x183   : > { %1589 = vrot.lane.b32.xlu0 %v10738_v60, %s10189_s14  ;;  %13127 = vst [vmem:[#allocation68_spill] sm:$0xff] %v10833_v13  ;;  %13128 = vst [vmem:[#allocation69_spill] sm:$0xff] %v10835_v47  ;;  %v10837_v53 = vpop.f32.mrb[47].mxu0  ;;  %v10839_v6 = vpop.f32.mrb[47].mxu1 }
 0x184   : > { %13129 = vst [vmem:[#allocation70_spill] sm:$0xff] %v10837_v53  ;;  %13130 = vst [vmem:[#allocation71_spill] sm:$0xff] %v10839_v6 }
 0x186   : > { %1793 = vrot.lane.b32.xlu1 %v10449_v55, %s10190_s19 }
 0x187   : > { %1799 = vrot.lane.b32.xlu0 %v10679_v49, %s10190_s19 }
 0x188   : > { %v10841_v14 = vpop.f32.mrb[48].mxu0  ;;  %v10843_v40 = vpop.f32.mrb[48].mxu1 }
 0x189   : > { %13131 = vst [vmem:[#allocation72_spill] sm:$0xff] %v10841_v14  ;;  %13132 = vst [vmem:[#allocation73_spill] sm:$0xff] %v10843_v40  ;;  %v10845_v7 = vpop.f32.mrb[49].mxu0  ;;  %v10847_v37 = vpop.f32.mrb[49].mxu1 }
 0x18a   : > { %1797 = vrot.lane.b32.xlu1 %v10708_v11, %s10190_s19  ;;  %13133 = vst [vmem:[#allocation74_spill] sm:$0xff] %v10845_v7  ;;  %13134 = vst [vmem:[#allocation75_spill] sm:$0xff] %v10847_v37  ;;  %v10851_v30 = vpop.f32.mrb[50].mxu1  ;;  %v1354_v40 = vpop.permute.xlu0 %1353 }
 0x18b   : > { %1803 = vrot.lane.b32.xlu0 %v10724_v16, %s10190_s19  ;;  %13136 = vst [vmem:[#allocation77_spill] sm:$0xff] %v10851_v30  ;;  %v10855_v48 = vpop.f32.mrb[51].mxu1 }
 0x18c   : > { %13138 = vst [vmem:[#allocation79_spill] sm:$0xff] %v10855_v48 }
 0x18e   : > { %1801 = vrot.lane.b32.xlu1 %v10722_v31, %s10190_s19  ;;  %v1574_v37 = vpop.permute.xlu0 %1573 }
 0x18f   : > { %1807 = vrot.lane.b32.xlu0 %v10732_v38, %s10190_s19 }
 0x190   : > { %v10859_v32 = vpop.f32.mrb[52].mxu1 }
 0x191   : > { %13140 = vst [vmem:[#allocation81_spill] sm:$0xff] %v10859_v32 }
 0x192   : > { %1805 = vrot.lane.b32.xlu1 %v10728_v17, %s10190_s19 }
 0x193   : > { %2021 = vrot.lane.b32.xlu0 %v10449_v55, %s10191_s23  ;;  %v2448_v55 = vld [vmem:[%s13041_s6] sm:$0xff] }
 0x196   : > { %1809 = vrot.lane.b32.xlu1 %v10738_v60, %s10190_s19 }
 0x197   : > { %2025 = vrot.lane.b32.xlu0 %v10708_v11, %s10191_s23 }
 0x19a   : > { %2023 = vrot.lane.b32.xlu1 %v10677_v50, %s10191_s23 }
 0x19b   : > { %2029 = vrot.lane.b32.xlu0 %v10722_v31, %s10191_s23 }
 0x19e   : > { %2027 = vrot.lane.b32.xlu1 %v10679_v49, %s10191_s23 }
 0x19f   : > { %2033 = vrot.lane.b32.xlu0 %v10728_v17, %s10191_s23 }
 0x1a2   : > { %2031 = vrot.lane.b32.xlu1 %v10724_v16, %s10191_s23 }
 0x1a3   : > { %2037 = vrot.lane.b32.xlu0 %v10738_v60, %s10191_s23 }
 0x1a6   : > { %2035 = vrot.lane.b32.xlu1 %v10732_v38, %s10191_s23 }
 0x1aa   : > { %2451 = vperm.xlu1 %9871, %v2448_v55   ;;  %v10849_v55 = vpop.f32.mrb[50].mxu0 }
 0x1ab   : > { %13135 = vst [vmem:[#allocation76_spill] sm:$0xff] %v10849_v55  ;;  %v10853_v29 = vpop.f32.mrb[51].mxu0 }
 0x1ac   : > { %13137 = vst [vmem:[#allocation78_spill] sm:$0xff] %v10853_v29  ;;  %v10857_v12 = vpop.f32.mrb[52].mxu0 }
 0x1ad   : > { %13139 = vst [vmem:[#allocation80_spill] sm:$0xff] %v10857_v12  ;;  %v10861_v43 = vpop.f32.mrb[53].mxu0 }
 0x1ae   : > { %13141 = vst [vmem:[#allocation82_spill] sm:$0xff] %v10861_v43  ;;  %v10863_v52 = vpop.f32.mrb[54].mxu0 }
 0x1af   : > { %13142 = vst [vmem:[#allocation83_spill] sm:$0xff] %v10863_v52  ;;  %v10865_v23 = vpop.f32.mrb[55].mxu0 }
 0x1b0   : > { %13143 = vst [vmem:[#allocation84_spill] sm:$0xff] %v10865_v23  ;;  %v9491_v23 = vld [vmem:[%s13040_s5 + $0x4] sm:$0xf] }
 0x1d4   : > { %v1356_v7 = vpop.permute.xlu1 %1355  ;;  %v1360_v55 = vpop.permute.xlu0 %1359 }
 0x1d5   : > { %v1372_v29 = vsel %vm1371_vm11, %v1354_v40, %v1356_v7 }
 0x1d6   : > { %v1386_v32 = vsel %vm1384_vm12, %v1372_v29, 0 }
 0x1d8   : > { %v1576_v30 = vpop.permute.xlu1 %1575  ;;  %v1578_v48 = vpop.permute.xlu0 %1577 }
 0x1d9   : > { %v1592_v18 = vsel %vm425_vm1, %v1574_v37, %v1576_v30 }
 0x1da   : > { %v1604_v37 = vsel %vm1384_vm12, %v1592_v18, 0  ;;  %v1341_v18 = vld [vmem:[%s13040_s5] sm:$0xf] }
 0x1dc   : > { %v1358_v14 = vpop.permute.xlu1 %1357 }
 0x1dd   : > { %v1373_v12 = vsel %vm1371_vm11, %v1356_v7, %v1358_v14  ;;  %v1374_v52 = vsel %vm1371_vm11, %v1358_v14, %v1360_v55  ;;  %v13144_v14 = vmov 0  }
 0x1de   : > { %9492 = vmatprep.subr.msk.bf16.mxu0 %vm1384_vm12, %v1373_v12  ;;  %v1392_v12 = vsel %vm1384_vm12, %v1374_v52, 0  ;;  %v1593_v52 = vsel %vm425_vm1, %v1576_v30, %v1578_v48 }
 0x1df   : > { %1410 = vmatpush1.bf16.msra.mxu0 %v1386_v32 }
 0x1e0   : > { %v1362_v43 = vpop.permute.xlu1 %1361 }
 0x1e1   : > { %v1364_v63 = vpop.permute.xlu0 %1363  ;;  %v1375_v40 = vsel %vm1371_vm11, %v1360_v55, %v1362_v43 }
 0x1e2   : > { %9493 = vmatmul.mubr.msk.bf16.vlgmr.msra.gmra.mrb[56].mxu0 %vm1380_vm13, %v9491_v23  ;;  %9494 = vmatprep.subr.msk.bf16.mxu1 %vm1384_vm12, %v1375_v40  ;;  %v1376_v29 = vsel %vm1371_vm11, %v1362_v43, %v1364_v63 }
 0x1e3   : > { %1451 = vmatpush1.bf16.msra.mxu1 %v1392_v12  ;;  %1523 = vmatprep.mubr.bf16.mxu0 %v13144_v14  ;;  %v1398_v55 = vsel %vm1384_vm12, %v1376_v29, 0 }
 0x1e4   : > { %v1366_v32 = vpop.permute.xlu1 %1365 }
 0x1e5   : > { %v1368_v7 = vpop.permute.xlu0 %1367  ;;  %v1377_v46 = vsel %vm1371_vm11, %v1364_v63, %v1366_v32 }
 0x1e6   : > { %9495 = vmatmul.mubr.msk.bf16.vlgmr.msra.gmra.mrb[56].mxu1 %vm1380_vm13, %v9491_v23  ;;  %9496 = vmatprep.subr.msk.bf16.mxu0 %vm1384_vm12, %v1377_v46  ;;  %v1378_v40 = vsel %vm1371_vm11, %v1366_v32, %v1368_v7 }
 0x1e7   : > { %1492 = vmatpush1.bf16.msra.mxu0 %v1398_v55  ;;  %1564 = vmatprep.mubr.bf16.mxu1 %v13144_v14  ;;  %v1404_v46 = vsel %vm1384_vm12, %v1378_v40, 0 }
 0x1e8   : > { %9500 = vmatprep.subr.msk.bf16.mxu0 %vm1384_vm12, %v1593_v52  ;;  %v1370_v43 = vpop.permute.xlu1 %1369 }
 0x1e9   : > { %v1379_v63 = vsel %vm1371_vm11, %v1368_v7, %v1370_v43  ;;  %v1582_v12 = vpop.permute.xlu0 %1581 }
 0x1ea   : > { %9497 = vmatmul.mubr.msk.bf16.vlgmr.msra.gmra.mrb[60].mxu0 %vm1380_vm13, %v9491_v23  ;;  %9498 = vmatprep.subr.msk.bf16.mxu1 %vm1384_vm12, %v1379_v63 }
 0x1eb   : > { %1533 = vmatpush1.bf16.msra.mxu1 %v1404_v46  ;;  %1628 = vmatpush1.bf16.msra.mxu0 %v1604_v37 }
 0x1ec   : > { %v1580_v29 = vpop.permute.xlu1 %1579  ;;  %1659 = vmatprep.mubr.bf16.mxu0 %v13144_v14 }
 0x1ed   : > { %v1594_v30 = vsel %vm425_vm1, %v1578_v48, %v1580_v29  ;;  %v1796_v32 = vpop.permute.xlu0 %1795  ;;  %v1595_v55 = vsel %vm425_vm1, %v1580_v29, %v1582_v12 }
 0x1ee   : > { %9499 = vmatmul.mubr.msk.bf16.vlgmr.msra.gmra.mrb[60].mxu1 %vm1380_vm13, %v9491_v23  ;;  %9502 = vmatprep.subr.msk.bf16.mxu1 %vm1384_vm12, %v1595_v55  ;;  %v1610_v7 = vsel %vm1384_vm12, %v1594_v30, 0 }
 0x1ef   : > { %1669 = vmatpush1.bf16.msra.mxu1 %v1610_v7  ;;  %1700 = vmatprep.mubr.bf16.mxu1 %v13144_v14 }
 0x1f0   : > { %v1584_v40 = vpop.permute.xlu1 %1583 }
 0x1f1   : > { %v1596_v52 = vsel %vm425_vm1, %v1582_v12, %v1584_v40  ;;  %v1586_v48 = vpop.permute.xlu0 %1585 }
 0x1f2   : > { %9501 = vmatmul.mubr.msk.bf16.vlgmr.msra.gmra.mrb[64].mxu0 %vm1380_vm13, %v1341_v18  ;;  %v1597_v43 = vsel %vm425_vm1, %v1584_v40, %v1586_v48  ;;  %v1616_v23 = vsel %vm1384_vm12, %v1596_v52, 0 }
 0x1f3   : > { %9504 = vmatprep.subr.msk.bf16.mxu0 %vm1384_vm12, %v1597_v43  ;;  %1741 = vmatprep.mubr.bf16.mxu0 %v13144_v14 }
 0x1f4   : > { %v1588_v63 = vpop.permute.xlu1 %1587  ;;  %1710 = vmatpush1.bf16.msra.mxu0 %v1616_v23 }
 0x1f5   : > { %v1598_v46 = vsel %vm425_vm1, %v1586_v48, %v1588_v63  ;;  %v1590_v37 = vpop.permute.xlu0 %1589 }
 0x1f6   : > { %v1599_v29 = vsel %vm425_vm1, %v1588_v63, %v1590_v37  ;;  %9503 = vmatmul.mubr.msk.bf16.vlgmr.msra.gmra.mrb[64].mxu1 %vm1380_vm13, %v1341_v18  ;;  %v1622_v12 = vsel %vm1384_vm12, %v1598_v46, 0  ;;  %v9508_v63 = vld [vmem:[%s13040_s5 + $0x8] sm:$0xf] }
 0x1f7   : > { %9506 = vmatprep.subr.msk.bf16.mxu1 %vm1384_vm12, %v1599_v29  ;;  %1782 = vmatprep.mubr.bf16.mxu1 %v13144_v14 }
 0x1f8   : > { %v1794_v30 = vpop.permute.xlu1 %1793  ;;  %1751 = vmatpush1.bf16.msra.mxu1 %v1622_v12 }
 0x1f9   : > { %v1800_v55 = vpop.permute.xlu0 %1799  ;;  %v1812_v7 = vsel %vm1811_vm14, %v1794_v30, %v1796_v32 }
 0x1fa   : > { %9505 = vmatmul.mubr.msk.bf16.vlgmr.msra.gmra.mrb[68].mxu0 %vm1380_vm13, %v1341_v18  ;;  %v1824_v43 = vsel %vm1384_vm12, %v1812_v7, 0 }
 0x1fb   : > { %1879 = vmatprep.mubr.bf16.mxu0 %v13144_v14 }
 0x1fc   : > { %v1798_v40 = vpop.permute.xlu1 %1797 }
 0x1fd   : > { %v1804_v52 = vpop.permute.xlu0 %1803  ;;  %v1813_v48 = vsel %vm1811_vm14, %v1796_v32, %v1798_v40  ;;  %v1814_v23 = vsel %vm1811_vm14, %v1798_v40, %v1800_v55 }
 0x1fe   : > { %9507 = vmatmul.mubr.msk.bf16.vlgmr.msra.gmra.mrb[68].mxu1 %vm1380_vm13, %v1341_v18  ;;  %9509 = vmatprep.subr.msk.bf16.mxu0 %vm1384_vm12, %v1813_v48  ;;  %v1830_v32 = vsel %vm1384_vm12, %v1814_v23, 0 }
 0x1ff   : > { %1848 = vmatpush1.bf16.msra.mxu0 %v1824_v43  ;;  %1920 = vmatprep.mubr.bf16.mxu1 %v13144_v14 }
 0x200   : > { %v1802_v46 = vpop.permute.xlu1 %1801 }
 0x201   : > { %v1808_v37 = vpop.permute.xlu0 %1807  ;;  %v1815_v29 = vsel %vm1811_vm14, %v1800_v55, %v1802_v46  ;;  %v1816_v18 = vsel %vm1811_vm14, %v1802_v46, %v1804_v52 }
 0x202   : > { %9510 = vmatmul.mubr.msk.bf16.vlgmr.msra.gmra.mrb[72].mxu0 %vm1380_vm13, %v9508_v63  ;;  %9511 = vmatprep.subr.msk.bf16.mxu1 %vm1384_vm12, %v1815_v29  ;;  %v1836_v55 = vsel %vm1384_vm12, %v1816_v18, 0 }
 0x203   : > { %1889 = vmatpush1.bf16.msra.mxu1 %v1830_v32  ;;  %1961 = vmatprep.mubr.bf16.mxu0 %v13144_v14 }
 0x204   : > { %v1806_v12 = vpop.permute.xlu1 %1805 }
 0x205   : > { %v2022_v30 = vpop.permute.xlu0 %2021  ;;  %v1817_v7 = vsel %vm1811_vm14, %v1804_v52, %v1806_v12  ;;  %v1818_v40 = vsel %vm1811_vm14, %v1806_v12, %v1808_v37  ;;  %v9517_v12 = vld [vmem:[%s13040_s5 + $0xc] sm:$0xf] }
 0x206   : > { %9512 = vmatmul.mubr.msk.bf16.vlgmr.msra.gmra.mrb[72].mxu1 %vm1380_vm13, %v9508_v63  ;;  %9513 = vmatprep.subr.msk.bf16.mxu0 %vm1384_vm12, %v1817_v7  ;;  %v1842_v52 = vsel %vm1384_vm12, %v1818_v40, 0 }
 0x207   : > { %1930 = vmatpush1.bf16.msra.mxu0 %v1836_v55  ;;  %2002 = vmatprep.mubr.bf16.mxu1 %v13144_v14 }
 0x208   : > { %v1810_v48 = vpop.permute.xlu1 %1809 }
 0x209   : > { %v1819_v43 = vsel %vm1811_vm14, %v1808_v37, %v1810_v48  ;;  %v2026_v23 = vpop.permute.xlu0 %2025 }
 0x20a   : > { %9514 = vmatmul.mubr.msk.bf16.vlgmr.msra.gmra.mrb[76].mxu0 %vm1380_vm13, %v9508_v63  ;;  %9515 = vmatprep.subr.msk.bf16.mxu1 %vm1384_vm12, %v1819_v43 }
 0x20b   : > { %1971 = vmatpush1.bf16.msra.mxu1 %v1842_v52  ;;  %2107 = vmatprep.mubr.bf16.mxu0 %v13144_v14 }
 0x20c   : > { %v2024_v46 = vpop.permute.xlu1 %2023 }
 0x20d   : > { %v2040_v29 = vsel %vm2039_vm15, %v2022_v30, %v2024_v46  ;;  %v2030_v32 = vpop.permute.xlu0 %2029  ;;  %v2041_v18 = vsel %vm2039_vm15, %v2024_v46, %v2026_v23 }
 0x20e   : > { %9516 = vmatmul.mubr.msk.bf16.vlgmr.msra.gmra.mrb[76].mxu1 %vm1380_vm13, %v9508_v63  ;;  %9518 = vmatprep.subr.msk.bf16.mxu0 %vm1384_vm12, %v2041_v18  ;;  %v2052_v37 = vsel %vm1384_vm12, %v2040_v29, 0 }
 0x20f   : > { %2076 = vmatpush1.bf16.msra.mxu0 %v2052_v37  ;;  %2148 = vmatprep.mubr.bf16.mxu1 %v13144_v14 }
 0x210   : > { %v2028_v7 = vpop.permute.xlu1 %2027 }
 0x211   : > { %v2042_v55 = vsel %vm2039_vm15, %v2026_v23, %v2028_v7  ;;  %v2043_v30 = vsel %vm2039_vm15, %v2028_v7, %v2030_v32  ;;  %v2034_v40 = vpop.permute.xlu0 %2033  ;;  %v2253_v7 = vsel %vm1384_vm12, %v10677_v50, 0  ;;  %v9526_v50 = vld [vmem:[%s13040_s5 + $0x10] sm:$0xf] }
 0x212   : > { %9519 = vmatmul.mubr.msk.bf16.vlgmr.msra.gmra.mrb[80].mxu0 %vm1380_vm13, %v9517_v12  ;;  %9520 = vmatprep.subr.msk.bf16.mxu1 %vm1384_vm12, %v2043_v30  ;;  %v2058_v63 = vsel %vm1384_vm12, %v2042_v55, 0  ;;  %v2704_v30 = vld [vmem:[#allocation2 + $0x8] sm:$0xff] }
 0x213   : > { %2117 = vmatpush1.bf16.msra.mxu1 %v2058_v63  ;;  %2189 = vmatprep.mubr.bf16.mxu0 %v13144_v14  ;;  %v11008_v63 = vpack.c.bf16 %v2704_v30, %v2704_v30 }
 0x214   : > { %v2032_v48 = vpop.permute.xlu1 %2031 }
 0x215   : > { %v2044_v43 = vsel %vm2039_vm15, %v2030_v32, %v2032_v48  ;;  %v2045_v52 = vsel %vm2039_vm15, %v2032_v48, %v2034_v40  ;;  %v2038_v46 = vpop.permute.xlu0 %2037  ;;  %2719 = vrot.lane.b32.xlu0 %v11008_v63, %s10188_s9  ;;  %2936 = vrot.lane.b32.xlu1 %v11008_v63, %s10189_s14 }
 0x216   : > { %9521 = vmatmul.mubr.msk.bf16.vlgmr.msra.gmra.mrb[80].mxu1 %vm1380_vm13, %v9517_v12  ;;  %9522 = vmatprep.subr.msk.bf16.mxu0 %vm1384_vm12, %v2045_v52  ;;  %v2064_v23 = vsel %vm1384_vm12, %v2044_v43, 0 }
 0x217   : > { %2158 = vmatpush1.bf16.msra.mxu0 %v2064_v23  ;;  %2230 = vmatprep.mubr.bf16.mxu1 %v13144_v14 }
 0x218   : > { %9527 = vmatprep.subr.msk.bf16.mxu0 %vm1384_vm12, %v10708_v11  ;;  %v2036_v29 = vpop.permute.xlu1 %2035  ;;  %v2259_v11 = vsel %vm1384_vm12, %v10679_v49, 0  ;;  %v2271_v49 = vsel %vm1384_vm12, %v10732_v38, 0 }
 0x219   : > { %v2046_v18 = vsel %vm2039_vm15, %v2034_v40, %v2036_v29  ;;  %v2047_v32 = vsel %vm2039_vm15, %v2036_v29, %v2038_v46 }
 0x21a   : > { %9523 = vmatmul.mubr.msk.bf16.vlgmr.msra.gmra.mrb[84].mxu0 %vm1380_vm13, %v9517_v12  ;;  %9524 = vmatprep.subr.msk.bf16.mxu1 %vm1384_vm12, %v2047_v32  ;;  %v2070_v37 = vsel %vm1384_vm12, %v2046_v18, 0 }
 0x21b   : > { %2199 = vmatpush1.bf16.msra.mxu1 %v2070_v37  ;;  %2277 = vmatpush1.bf16.msra.mxu0 %v2253_v7 }
 0x21c   : > { %9529 = vmatprep.subr.msk.bf16.mxu1 %vm1384_vm12, %v10722_v31  ;;  %9531 = vmatprep.subr.msk.bf16.mxu0 %vm1384_vm12, %v10728_v17  ;;  %v2265_v31 = vsel %vm1384_vm12, %v10724_v16, 0  ;;  %v11002_v16 = vpop.f32.mrb[53].mxu1 }
 0x21d   : > { %2308 = vmatprep.mubr.bf16.mxu0 %v13144_v14  ;;  %13145 = vst [vmem:[#allocation85_spill] sm:$0xff] %v11002_v16  ;;  %v11004_v17 = vpop.f32.mrb[54].mxu1 }
 0x21e   : > { %9525 = vmatmul.mubr.msk.bf16.vlgmr.msra.gmra.mrb[84].mxu1 %vm1380_vm13, %v9517_v12  ;;  %13146 = vst [vmem:[#allocation86_spill] sm:$0xff] %v11004_v17 }
 0x21f   : > { %2318 = vmatpush1.bf16.msra.mxu1 %v2259_v11  ;;  %2349 = vmatprep.mubr.bf16.mxu1 %v13144_v14 }
 0x220   : > { %9533 = vmatprep.subr.msk.bf16.mxu1 %vm1384_vm12, %v10738_v60  ;;  %v11006_v60 = vpop.f32.mrb[55].mxu1 }
 0x221   : > { %13147 = vst [vmem:[#allocation87_spill] sm:$0xff] %v11006_v60 }
 0x222   : > { %9528 = vmatmul.mubr.msk.bf16.vlgmr.msra.gmra.mrb[88].mxu0 %vm1380_vm13, %v9526_v50 }
 0x223   : > { %2359 = vmatpush1.bf16.msra.mxu0 %v2265_v31  ;;  %2390 = vmatprep.mubr.bf16.mxu0 %v13144_v14 }
 0x226   : > { %9530 = vmatmul.mubr.msk.bf16.vlgmr.msra.gmra.mrb[88].mxu1 %vm1380_vm13, %v9526_v50 }
 0x227   : > { %2400 = vmatpush1.bf16.msra.mxu1 %v2271_v49  ;;  %2431 = vmatprep.mubr.bf16.mxu1 %v13144_v14 }
 0x22a   : > { %9532 = vmatmul.mubr.msk.bf16.vlgmr.msra.gmra.mrb[92].mxu0 %vm1380_vm13, %v9526_v50 }
 0x22b   : > { %2804 = vmatprep.mubr.bf16.mxu0 %v13144_v14 }
 0x22e   : > { %9534 = vmatmul.mubr.msk.bf16.vlgmr.msra.gmra.mrb[92].mxu1 %vm1380_vm13, %v9526_v50 }
 0x22f   : > { %2845 = vmatprep.mubr.bf16.mxu1 %v13144_v14 }
 0x2b5   : > { %v1443_v12 = vpop.f32.mrb[56].mxu0 }
 0x2b6   : > { %v1445_v55 = vpop.f32.mrb[57].mxu0 }
 0x2b7   : > { %v1447_v38 = vpop.f32.mrb[58].mxu0 }
 0x2b8   : > { %v1448_v40 = vpop.f32.mrb[59].mxu0 }
 0x2b9   : > { %v1484_v48 = vpop.f32.mrb[56].mxu1 }
 0x2ba   : > { %v1486_v43 = vpop.f32.mrb[57].mxu1 }
 0x2bb   : > { %v1488_v52 = vpop.f32.mrb[58].mxu1 }
 0x2bc   : > { %v1489_v23 = vpop.f32.mrb[59].mxu1 }
 0x2bd   : > { %v1525_v46 = vpop.f32.mrb[60].mxu0 }
 0x2be   : > { %v1527_v29 = vpop.f32.mrb[61].mxu0 }
 0x2bf   : > { %v1529_v18 = vpop.f32.mrb[62].mxu0 }
 0x2c0   : > { %v1530_v32 = vpop.f32.mrb[63].mxu0 }
 0x2c1   : > { %v1566_v37 = vpop.f32.mrb[60].mxu1 }
 0x2c2   : > { %v1568_v7 = vpop.f32.mrb[61].mxu1 }
 0x2c3   : > { %v1570_v11 = vpop.f32.mrb[62].mxu1 }
 0x2c4   : > { %v1571_v50 = vpop.f32.mrb[63].mxu1 }
 0x2c5   : > { %v1661_v31 = vpop.f32.mrb[64].mxu0 }
 0x2c6   : > { %v1662_v49 = vadd.f32 %v1661_v31, %v1443_v12  ;;  %v1663_v38 = vpop.f32.mrb[65].mxu0 }
 0x2c7   : > { %v1664_v30 = vadd.f32 %v1663_v38, %v1445_v55  ;;  %v1665_v40 = vpop.f32.mrb[66].mxu0 }
 0x2c8   : > { %v1666_v60 = vpop.f32.mrb[67].mxu0 }
 0x2c9   : > { %v1702_v16 = vpop.f32.mrb[64].mxu1 }
 0x2ca   : > { %v1703_v17 = vadd.f32 %v1702_v16, %v1484_v48  ;;  %v1704_v22 = vpop.f32.mrb[65].mxu1 }
 0x2cb   : > { %v1705_v10 = vadd.f32 %v1704_v22, %v1486_v43  ;;  %v1706_v52 = vpop.f32.mrb[66].mxu1 }
 0x2cc   : > { %v1707_v23 = vpop.f32.mrb[67].mxu1 }
 0x2cd   : > { %v1743_v19 = vpop.f32.mrb[68].mxu0 }
 0x2ce   : > { %v1744_v3 = vadd.f32 %v1743_v19, %v1525_v46  ;;  %v1745_v18 = vpop.f32.mrb[69].mxu0 }
 0x2cf   : > { %v1746_v32 = vadd.f32 %v1745_v18, %v1527_v29  ;;  %v1747_v35 = vpop.f32.mrb[70].mxu0 }
 0x2d0   : > { %v1748_v6 = vpop.f32.mrb[71].mxu0 }
 0x2d1   : > { %v1784_v11 = vpop.f32.mrb[68].mxu1 }
 0x2d2   : > { %v1785_v50 = vadd.f32 %v1784_v11, %v1566_v37  ;;  %v1786_v59 = vpop.f32.mrb[69].mxu1 }
 0x2d3   : > { %v1787_v12 = vadd.f32 %v1786_v59, %v1568_v7  ;;  %v1788_v31 = vpop.f32.mrb[70].mxu1 }
 0x2d4   : > { %v1789_v55 = vpop.f32.mrb[71].mxu1 }
 0x2d5   : > { %v1881_v38 = vpop.f32.mrb[72].mxu0 }
 0x2d6   : > { %v2011_v60 = vadd.f32 %v1881_v38, %v1662_v49  ;;  %v1883_v40 = vpop.f32.mrb[73].mxu0 }
 0x2d7   : > { %v2012_v16 = vadd.f32 %v1883_v40, %v1664_v30  ;;  %v1885_v48 = vpop.f32.mrb[74].mxu0 }
 0x2d8   : > { %v1886_v22 = vpop.f32.mrb[75].mxu0 }
 0x2d9   : > { %v1922_v43 = vpop.f32.mrb[72].mxu1 }
 0x2da   : > { %v2013_v52 = vadd.f32 %v1922_v43, %v1703_v17  ;;  %v1924_v23 = vpop.f32.mrb[73].mxu1 }
 0x2db   : > { %v2014_v19 = vadd.f32 %v1924_v23, %v1705_v10  ;;  %v1926_v46 = vpop.f32.mrb[74].mxu1 }
 0x2dc   : > { %v1927_v29 = vpop.f32.mrb[75].mxu1 }
 0x2dd   : > { %v1963_v35 = vpop.f32.mrb[76].mxu0 }
 0x2de   : > { %v2015_v6 = vadd.f32 %v1963_v35, %v1744_v3  ;;  %v1965_v18 = vpop.f32.mrb[77].mxu0 }
 0x2df   : > { %v2016_v37 = vadd.f32 %v1965_v18, %v1746_v32  ;;  %v1967_v11 = vpop.f32.mrb[78].mxu0 }
 0x2e0   : > { %v1968_v59 = vpop.f32.mrb[79].mxu0 }
 0x2e1   : > { %v2004_v7 = vpop.f32.mrb[76].mxu1 }
 0x2e2   : > { %v2017_v31 = vadd.f32 %v2004_v7, %v1785_v50  ;;  %v2006_v55 = vpop.f32.mrb[77].mxu1 }
 0x2e3   : > { %v2018_v49 = vadd.f32 %v2006_v55, %v1787_v12  ;;  %v2008_v38 = vpop.f32.mrb[78].mxu1 }
 0x2e4   : > { %v2009_v30 = vpop.f32.mrb[79].mxu1 }
 0x2e5   : > { %v2109_v40 = vpop.f32.mrb[80].mxu0 }
 0x2e6   : > { %v2239_v48 = vadd.f32 %v2109_v40, %v2011_v60  ;;  %v2111_v22 = vpop.f32.mrb[81].mxu0 }
 0x2e7   : > { %v2240_v17 = vadd.f32 %v2111_v22, %v2012_v16  ;;  %v2113_v43 = vpop.f32.mrb[82].mxu0 }
 0x2e8   : > { %v2114_v10 = vpop.f32.mrb[83].mxu0 }
 0x2e9   : > { %v2150_v23 = vpop.f32.mrb[80].mxu1 }
 0x2ea   : > { %v2241_v46 = vadd.f32 %v2150_v23, %v2013_v52  ;;  %v2152_v29 = vpop.f32.mrb[81].mxu1  ;;  %v2452_v23 = vpop.permute.xlu1 %2451 }
 0x2eb   : > { %v2242_v3 = vadd.f32 %v2152_v29, %v2014_v19  ;;  %v2154_v35 = vpop.f32.mrb[82].mxu1 }
 0x2ec   : > { %v2155_v32 = vpop.f32.mrb[83].mxu1 }
 0x2ed   : > { %v2191_v18 = vpop.f32.mrb[84].mxu0 }
 0x2ee   : > { %v2243_v11 = vadd.f32 %v2191_v18, %v2015_v6  ;;  %v2193_v59 = vpop.f32.mrb[85].mxu0 }
 0x2ef   : > { %v2244_v50 = vadd.f32 %v2193_v59, %v2016_v37  ;;  %v2195_v7 = vpop.f32.mrb[86].mxu0 }
 0x2f0   : > { %v2196_v12 = vpop.f32.mrb[87].mxu0 }
 0x2f1   : > { %v2232_v55 = vpop.f32.mrb[84].mxu1 }
 0x2f2   : > { %v2245_v38 = vadd.f32 %v2232_v55, %v2017_v31  ;;  %v2234_v30 = vpop.f32.mrb[85].mxu1 }
 0x2f3   : > { %v2246_v60 = vadd.f32 %v2234_v30, %v2018_v49  ;;  %v2236_v40 = vpop.f32.mrb[86].mxu1 }
 0x2f4   : > { %v2237_v16 = vpop.f32.mrb[87].mxu1 }
 0x2f5   : > { %v2310_v22 = vpop.f32.mrb[88].mxu0 }
 0x2f6   : > { %v2440_v43 = vadd.f32 %v2310_v22, %v2239_v48  ;;  %v2312_v10 = vpop.f32.mrb[89].mxu0 }
 0x2f7   : > { %v2441_v52 = vadd.f32 %v2312_v10, %v2240_v17  ;;  %v2314_v19 = vpop.f32.mrb[90].mxu0 }
 0x2f8   : > { %v2315_v29 = vpop.f32.mrb[91].mxu0  ;;  %v11014_v18 = vadd.f32 %v2452_v23, %v2440_v43 }
 0x2f9   : > { %v2351_v35 = vpop.f32.mrb[88].mxu1  ;;  %v11023_v22 = vadd.f32 %v2452_v23, %v2441_v52 }
 0x2fa   : > { %v2442_v32 = vadd.f32 %v2351_v35, %v2241_v46  ;;  %v2353_v6 = vpop.f32.mrb[89].mxu1  ;;  %v11019_v17 = vmul.f32 0.70710677, %v11014_v18 }
 0x2fb   : > { %v2443_v37 = vadd.f32 %v2353_v6, %v2242_v3  ;;  %v2355_v59 = vpop.f32.mrb[90].mxu1  ;;  %v11036_v52 = vmul.f32 0.70710677, %v11023_v22 }
 0x2fc   : > { %v2456_v7 = vadd.f32 %v2452_v23, %v2442_v32  ;;  %v2356_v31 = vpop.f32.mrb[91].mxu1  ;;  %v2479_v6 = vand.u32 2147483647, %v11019_v17  ;;  %vm2639_vm6 = vcmp.lt.f32.partialorder %v11019_v17, 0.0 }
 0x2fd   : > { %v2457_v12 = vadd.f32 %v2452_v23, %v2443_v37  ;;  %v2392_v49 = vpop.f32.mrb[92].mxu0  ;;  %v2480_v13 = vand.u32 2147483647, %v11036_v52  ;;  %vm2640_vm9 = vcmp.lt.f32.partialorder %v11036_v52, 0.0 }
 0x2fe   : > { %v11016_v55 = vmul.f32 0.70710677, %v2456_v7  ;;  %v2444_v30 = vadd.f32 %v2392_v49, %v2243_v11  ;;  %v2394_v48 = vpop.f32.mrb[93].mxu0  ;;  %v2487_v47 = vmul.f32 0.3275911, %v2479_v6  ;;  %v2591_v0 = vsub.f32 0.0, %v2479_v6 }
 0x2ff   : > { %v11021_v40 = vmul.f32 0.70710677, %v2457_v12  ;;  %v2445_v16 = vadd.f32 %v2394_v48, %v2244_v50  ;;  %v2396_v46 = vpop.f32.mrb[94].mxu0 }
 0x300   : > { %v2481_v3 = vand.u32 2147483647, %v11016_v55  ;;  %v2458_v43 = vadd.f32 %v2452_v23, %v2444_v30  ;;  %v2397_v10 = vpop.f32.mrb[95].mxu0  ;;  %vm2641_vm0 = vcmp.lt.f32.partialorder %v11016_v55, 0.0 }
 0x301   : > { %v2482_v19 = vand.u32 2147483647, %v11021_v40  ;;  %v11027_v29 = vadd.f32 %v2452_v23, %v2445_v16  ;;  %v2433_v35 = vpop.f32.mrb[92].mxu1  ;;  %vm2642_vm3 = vcmp.lt.f32.partialorder %v11021_v40, 0.0 }
 0x302   : > { %v2489_v11 = vmul.f32 0.3275911, %v2481_v3  ;;  %v11029_v32 = vmul.f32 0.70710677, %v2458_v43  ;;  %v2435_v49 = vpop.f32.mrb[93].mxu1  ;;  %v2593_v61 = vsub.f32 0.0, %v2481_v3  ;;  %v2446_v24 = vadd.f32 %v2433_v35, %v2245_v38 }
 0x303   : > { %v2490_v37 = vmul.f32 0.3275911, %v2482_v19  ;;  %v11033_v50 = vmul.f32 0.70710677, %v11027_v29  ;;  %v2437_v16 = vpop.f32.mrb[94].mxu1  ;;  %v2594_v20 = vsub.f32 0.0, %v2482_v19  ;;  %v2447_v44 = vadd.f32 %v2435_v49, %v2246_v60 }
 0x304   : > { %v2497_v59 = vadd.f32 1.0, %v2489_v11  ;;  %v2483_v31 = vand.u32 2147483647, %v11029_v32  ;;  %v2438_v10 = vpop.f32.mrb[95].mxu1  ;;  %v11041_v45 = vadd.f32 %v2452_v23, %v2446_v24  ;;  %v2601_v16 = vmul.f32 %v2593_v61, %v2481_v3 }
 0x305   : > { %v2498_v30 = vadd.f32 1.0, %v2490_v37  ;;  %v2484_v48 = vand.u32 2147483647, %v11033_v50  ;;  %v2495_v37 = vadd.f32 1.0, %v2487_v47  ;;  %v2488_v10 = vmul.f32 0.3275911, %v2480_v13 }
 0x306   : > { %9914 = vrcp.f32 %v2497_v59  ;;  %v2491_v46 = vmul.f32 0.3275911, %v2483_v31  ;;  %v11043_v59 = vadd.f32 %v2452_v23, %v2447_v44  ;;  %v2602_v8 = vmul.f32 %v2594_v20, %v2482_v19 }
 0x307   : > { %9916 = vrcp.f32 %v2498_v30  ;;  %v2492_v53 = vmul.f32 0.3275911, %v2484_v48  ;;  %v2595_v30 = vsub.f32 0.0, %v2483_v31  ;;  %v11046_v39 = vmul.f32 0.70710677, %v11041_v45 }
 0x308   : > { %v2499_v58 = vadd.f32 1.0, %v2491_v46  ;;  %v11049_v46 = vmul.f32 0.70710677, %v11043_v59  ;;  %v11051_v38 = vmul.f32 0.5, %v2456_v7  ;;  %v11053_v24 = vmul.f32 0.5, %v2457_v12 }
 0x309   : > { %v2500_v11 = vadd.f32 1.0, %v2492_v53  ;;  %v2496_v53 = vadd.f32 1.0, %v2488_v10  ;;  %v2611_v61 = vmul.f32 1.442695, %v2601_v16  ;;  %v2596_v44 = vsub.f32 0.0, %v2484_v48 }
 0x30a   : > { %9918 = vrcp.f32 %v2499_v58  ;;  %v2485_v58 = vand.u32 2147483647, %v11046_v39  ;;  %v2486_v47 = vand.u32 2147483647, %v11049_v46  ;;  %v2599_v20 = vmul.f32 %v2591_v0, %v2479_v6 }
 0x30b   : > { %9920 = vrcp.f32 %v2500_v11  ;;  %v2613_v23 = vmul.f32 1.442695, %v2602_v8  ;;  %v2603_v3 = vmul.f32 %v2595_v30, %v2483_v31  ;;  %v11062_v12 = vmul.f32 0.5, %v2458_v43 }
 0x30c   : > { %9922 = vrcp.f32 %v2495_v37  ;;  %v2493_v19 = vmul.f32 0.3275911, %v2485_v58  ;;  %v2494_v49 = vmul.f32 0.3275911, %v2486_v47  ;;  %v2592_v11 = vsub.f32 0.0, %v2480_v13 }
 0x30d   : > { %9924 = vrcp.f32 %v2496_v53  ;;  %v2597_v10 = vsub.f32 0.0, %v2485_v58  ;;  %v2598_v4 = vsub.f32 0.0, %v2486_v47  ;;  %v2604_v6 = vmul.f32 %v2596_v44, %v2484_v48 }
 0x30e   : > { %v2501_v16 = vadd.f32 1.0, %v2493_v19  ;;  %9926 = vpow2.f32 %v2611_v61  ;;  %v2502_v8 = vadd.f32 1.0, %v2494_v49  ;;  %v2615_v53 = vmul.f32 1.442695, %v2603_v3 }
 0x30f   : > { %v11068_v1 = vmul.f32 0.5, %v11027_v29  ;;  %v2600_v28 = vmul.f32 %v2592_v11, %v2480_v13  ;;  %v2605_v44 = vmul.f32 %v2597_v10, %v2485_v58  ;;  %v2617_v29 = vmul.f32 1.442695, %v2604_v6 }
 0x310   : > { %v11057_v60 = vpop.eup %9914  ;;  %9928 = vrcp.f32 %v2501_v16  ;;  %vm2643_vm4 = vcmp.lt.f32.partialorder %v11029_v32, 0.0  ;;  %vm2644_vm5 = vcmp.lt.f32.partialorder %v11033_v50, 0.0  ;;  %vm2645_vm7 = vcmp.lt.f32.partialorder %v11046_v39, 0.0 }
 0x311   : > { %v11059_v35 = vpop.eup %9916  ;;  %v2521_v7 = vmul.f32 1.0614054, %v11057_v60  ;;  %9930 = vrcp.f32 %v2502_v8  ;;  %v2609_v8 = vmul.f32 1.442695, %v2600_v28  ;;  %v2619_v58 = vmul.f32 1.442695, %v2605_v44 }
 0x312   : > { %v2522_v37 = vmul.f32 1.0614054, %v11059_v35  ;;  %9932 = vpow2.f32 %v2613_v23  ;;  %vm2646_vm8 = vcmp.lt.f32.partialorder %v11049_v46, 0.0  ;;  %v2464_v39 = vmul.f32 0.5, %v11023_v22  ;;  %v13148_v22 = vld [vmem:[#allocation23_spill] sm:$0xff] }
 0x313   : > { %v2529_v0 = vadd.f32 -1.4531521, %v2521_v7  ;;  %v2606_v7 = vmul.f32 %v2598_v4, %v2486_v47  ;;  %9934 = vpow2.f32 %v2615_v53 }
 0x314   : > { %v11065_v31 = vpop.eup %9918  ;;  %v2530_v30 = vadd.f32 -1.4531521, %v2522_v37  ;;  %9936 = vpow2.f32 %v2617_v29 }
 0x315   : > { %v11070_v43 = vpop.eup %9920  ;;  %v2537_v34 = vmul.f32 %v11057_v60, %v2529_v0  ;;  %v2523_v19 = vmul.f32 1.0614054, %v11065_v31  ;;  %v2607_v0 = vmul.f32 1.442695, %v2599_v20  ;;  %v2621_v47 = vmul.f32 1.442695, %v2606_v7 }
 0x316   : > { %v2538_v61 = vmul.f32 %v11059_v35, %v2530_v30  ;;  %v2524_v48 = vmul.f32 1.0614054, %v11070_v43  ;;  %v11076_v37 = vpop.eup %9922 }
 0x317   : > { %v2545_v49 = vadd.f32 1.4214138, %v2537_v34  ;;  %v2531_v3 = vadd.f32 -1.4531521, %v2523_v19  ;;  %v2519_v11 = vmul.f32 1.0614054, %v11076_v37  ;;  %v11081_v30 = vpop.eup %9924  ;;  %9938 = vpow2.f32 %v2607_v0 }
 0x318   : > { %v2546_v16 = vadd.f32 1.4214138, %v2538_v61  ;;  %v2532_v33 = vadd.f32 -1.4531521, %v2524_v48  ;;  %v2520_v19 = vmul.f32 1.0614054, %v11081_v30  ;;  %v9927_v61 = vpop.eup %9926  ;;  %9940 = vpow2.f32 %v2609_v8 }
 0x319   : > { %v2553_v25 = vmul.f32 %v11057_v60, %v2545_v49  ;;  %v2539_v13 = vmul.f32 %v11065_v31, %v2531_v3  ;;  %v2527_v6 = vadd.f32 -1.4531521, %v2519_v11  ;;  %9942 = vpow2.f32 %v2619_v58 }
 0x31a   : > { %v2554_v34 = vmul.f32 %v11059_v35, %v2546_v16  ;;  %v2540_v4 = vmul.f32 %v11070_v43, %v2532_v33  ;;  %v11089_v33 = vpop.eup %9928  ;;  %v2528_v7 = vadd.f32 -1.4531521, %v2520_v19  ;;  %9944 = vpow2.f32 %v2621_v47 }
 0x31b   : > { %v2561_v23 = vadd.f32 -0.28449672, %v2553_v25  ;;  %v2547_v10 = vadd.f32 1.4214138, %v2539_v13  ;;  %v2535_v49 = vmul.f32 %v11076_v37, %v2527_v6  ;;  %v11093_v3 = vpop.eup %9930  ;;  %v2525_v0 = vmul.f32 1.0614054, %v11089_v33 }
 0x31c   : > { %v2562_v20 = vadd.f32 -0.28449672, %v2554_v34  ;;  %v2548_v53 = vadd.f32 1.4214138, %v2540_v4  ;;  %v2526_v8 = vmul.f32 1.0614054, %v11093_v3  ;;  %v2536_v34 = vmul.f32 %v11081_v30, %v2528_v7  ;;  %v9933_v4 = vpop.eup %9932 }
 0x31d   : > { %v2569_v28 = vmul.f32 %v11057_v60, %v2561_v23  ;;  %v2555_v48 = vmul.f32 %v11065_v31, %v2547_v10  ;;  %v2533_v10 = vadd.f32 -1.4531521, %v2525_v0  ;;  %v2543_v6 = vadd.f32 1.4214138, %v2535_v49 }
 0x31e   : > { %v2570_v25 = vmul.f32 %v11059_v35, %v2562_v20  ;;  %v2556_v44 = vmul.f32 %v11070_v43, %v2548_v53  ;;  %v9935_v20 = vpop.eup %9934  ;;  %v2534_v19 = vadd.f32 -1.4531521, %v2526_v8 }
 0x31f   : > { %v2577_v29 = vadd.f32 0.2548296, %v2569_v28  ;;  %v2563_v16 = vadd.f32 -0.28449672, %v2555_v48  ;;  %v2544_v28 = vadd.f32 1.4214138, %v2536_v34  ;;  %v2551_v7 = vmul.f32 %v11076_v37, %v2543_v6  ;;  %v9937_v0 = vpop.eup %9936 }
 0x320   : > { %v2578_v13 = vadd.f32 0.2548296, %v2570_v25  ;;  %v2564_v11 = vadd.f32 -0.28449672, %v2556_v44  ;;  %v2541_v44 = vmul.f32 %v11089_v33, %v2533_v10 }
 0x321   : > { %v2585_v23 = vmul.f32 %v11057_v60, %v2577_v29  ;;  %v2571_v58 = vmul.f32 %v11065_v31, %v2563_v16  ;;  %v2542_v16 = vmul.f32 %v11093_v3, %v2534_v19  ;;  %v2552_v49 = vmul.f32 %v11081_v30, %v2544_v28  ;;  %v9939_v8 = vpop.eup %9938 }
 0x322   : > { %v2586_v47 = vmul.f32 %v11059_v35, %v2578_v13  ;;  %v2572_v53 = vmul.f32 %v11070_v43, %v2564_v11  ;;  %v2559_v11 = vadd.f32 -0.28449672, %v2551_v7  ;;  %v9941_v10 = vpop.eup %9940 }
 0x323   : > { %v2625_v48 = vmul.f32 %v9927_v61, %v2585_v23  ;;  %v2579_v25 = vadd.f32 0.2548296, %v2571_v58  ;;  %v2549_v61 = vadd.f32 1.4214138, %v2541_v44  ;;  %v2560_v58 = vadd.f32 -0.28449672, %v2552_v49  ;;  %v9943_v28 = vpop.eup %9942 }
 0x324   : > { %v2626_v60 = vmul.f32 %v9933_v4, %v2586_v47  ;;  %v2580_v29 = vadd.f32 0.2548296, %v2572_v53  ;;  %v2550_v4 = vadd.f32 1.4214138, %v2542_v16  ;;  %v2567_v19 = vmul.f32 %v11076_v37, %v2559_v11  ;;  %v9945_v7 = vpop.eup %9944 }
 0x325   : > { %v2633_v35 = vsub.f32 1.0, %v2625_v48  ;;  %v2587_v13 = vmul.f32 %v11065_v31, %v2579_v25  ;;  %v2557_v53 = vmul.f32 %v11089_v33, %v2549_v61  ;;  %v2568_v44 = vmul.f32 %v11081_v30, %v2560_v58 }
 0x326   : > { %v2634_v34 = vsub.f32 1.0, %v2626_v60  ;;  %v2588_v23 = vmul.f32 %v11070_v43, %v2580_v29  ;;  %v2558_v25 = vmul.f32 %v11093_v3, %v2550_v4  ;;  %v2575_v16 = vadd.f32 0.2548296, %v2567_v19 }
 0x327   : > { %v2649_v6 = vsub.f32 0.0, %v2633_v35  ;;  %v2627_v47 = vmul.f32 %v9935_v20, %v2587_v13  ;;  %v2565_v29 = vadd.f32 -0.28449672, %v2557_v53 }
 0x328   : > { %v2650_v48 = vsub.f32 0.0, %v2634_v34  ;;  %v2628_v31 = vmul.f32 %v9937_v0, %v2588_v23  ;;  %v2566_v61 = vadd.f32 -0.28449672, %v2558_v25  ;;  %v2583_v23 = vmul.f32 %v11076_v37, %v2575_v16 }
 0x329   : > { %v2657_v43 = vsel %vm2641_vm0, %v2649_v6, %v2633_v35  ;;  %v2635_v60 = vsub.f32 1.0, %v2627_v47  ;;  %v2573_v0 = vmul.f32 %v11089_v33, %v2565_v29  ;;  %v2576_v35 = vadd.f32 0.2548296, %v2568_v44 }
 0x32a   : > { %v2665_v49 = vadd.f32 1.0, %v2657_v43  ;;  %v2658_v20 = vsel %vm2642_vm3, %v2650_v48, %v2634_v34  ;;  %v2636_v13 = vsub.f32 1.0, %v2628_v31  ;;  %v2574_v55 = vmul.f32 %v11093_v3, %v2566_v61 }
 0x32b   : > { %v2666_v11 = vadd.f32 1.0, %v2658_v20  ;;  %v2651_v14 = vsub.f32 0.0, %v2635_v60  ;;  %v2581_v34 = vadd.f32 0.2548296, %v2573_v0  ;;  %v2623_v47 = vmul.f32 %v9939_v8, %v2583_v23 }
 0x32c   : > { %v2673_v4 = vmul.f32 %v2665_v49, %v11051_v38  ;;  %v2652_v58 = vsub.f32 0.0, %v2636_v13  ;;  %v2582_v37 = vadd.f32 0.2548296, %v2574_v55  ;;  %v2584_v8 = vmul.f32 %v11081_v30, %v2576_v35 }
 0x32d   : > { %v2674_v6 = vmul.f32 %v2666_v11, %v11053_v24  ;;  %v2659_v40 = vsel %vm2643_vm4, %v2651_v14, %v2635_v60  ;;  %v2589_v25 = vmul.f32 %v11089_v33, %v2581_v34  ;;  %v2631_v44 = vsub.f32 1.0, %v2623_v47  ;;  %v2720_v34 = vpop.permute.xlu0 %2719  ;;  %v2937_v47 = vpop.permute.xlu1 %2936 }
 0x32e   : > { %v2681_v53 = vmul.f32 %v2673_v4, %v10536_v27  ;;  %v2667_v19 = vadd.f32 1.0, %v2659_v40  ;;  %v2660_v48 = vsel %vm2644_vm5, %v2652_v58, %v2636_v13  ;;  %v2590_v14 = vmul.f32 %v11093_v3, %v2582_v37 }
 0x32f   : > { %v2682_v38 = vmul.f32 %v2674_v6, %v10542_v41  ;;  %v2668_v31 = vadd.f32 1.0, %v2660_v48  ;;  %v2629_v43 = vmul.f32 %v9943_v28, %v2589_v25  ;;  %v2647_v60 = vsub.f32 0.0, %v2631_v44 }
 0x330   : > { %v2689_v24 = vadd.f32 %v2681_v53, %v10551_v54  ;;  %v2675_v32 = vmul.f32 %v2667_v19, %v11062_v12  ;;  %v2630_v29 = vmul.f32 %v9945_v7, %v2590_v14  ;;  %v2624_v33 = vmul.f32 %v9941_v10, %v2584_v8 }
 0x331   : > { %v2690_v27 = vadd.f32 %v2682_v38, %v10559_v2  ;;  %v2676_v50 = vmul.f32 %v2668_v31, %v11068_v1  ;;  %v2637_v16 = vsub.f32 1.0, %v2629_v43  ;;  %v2463_v12 = vmul.f32 0.5, %v11014_v18 }
 0x332   : > { %v2683_v41 = vmul.f32 %v2675_v32, %v10793_v9  ;;  %v2655_v3 = vsel %vm2639_vm6, %v2647_v60, %v2631_v44  ;;  %v2638_v49 = vsub.f32 1.0, %v2630_v29  ;;  %v2632_v20 = vsub.f32 1.0, %v2624_v33  ;;  %v9536_v32 = vld [vmem:[%s13040_s5 + $0x18] sm:$0xf] }
 0x333   : > { %v2684_v54 = vmul.f32 %v2676_v50, %v10797_v15  ;;  %v2663_v2 = vadd.f32 1.0, %v2655_v3  ;;  %v2653_v28 = vsub.f32 0.0, %v2637_v16  ;;  %v2469_v10 = vmul.f32 0.5, %v11041_v45 }
 0x334   : > { %v2691_v30 = vadd.f32 %v2683_v41, %v10801_v42  ;;  %v2654_v9 = vsub.f32 0.0, %v2638_v49  ;;  %v2648_v17 = vsub.f32 0.0, %v2632_v20  ;;  %v11157_v35 = vpack.c.bf16 %v2689_v24, %v2689_v24 }
 0x335   : > { %v2692_v1 = vadd.f32 %v2684_v54, %v10805_v57  ;;  %v2671_v7 = vmul.f32 %v2663_v2, %v2463_v12  ;;  %v2661_v15 = vsel %vm2645_vm7, %v2653_v28, %v2637_v16  ;;  %v2470_v57 = vmul.f32 0.5, %v11043_v59 }
 0x336   : > { %v2669_v18 = vadd.f32 1.0, %v2661_v15  ;;  %v2662_v42 = vsel %vm2646_vm8, %v2654_v9, %v2638_v49  ;;  %v2656_v61 = vsel %vm2640_vm9, %v2648_v17, %v2632_v20  ;;  %v13149_v43 = vmov 0   ;;  %v9535_v15 = vld [vmem:[%s13040_s5 + $0x14] sm:$0xf] }
 0x337   : > { %v2679_v13 = vmul.f32 %v2671_v7, %v10534_v26  ;;  %v2670_v11 = vadd.f32 1.0, %v2662_v42  ;;  %v2664_v0 = vadd.f32 1.0, %v2656_v61  ;;  %vm4106_vm7 = vcmask 48128  }
 0x338   : > { %v2677_v23 = vmul.f32 %v2669_v18, %v2469_v10 }
 0x339   : > { %v2687_v4 = vadd.f32 %v2679_v13, %v10549_v51  ;;  %v2678_v45 = vmul.f32 %v2670_v11, %v2470_v57  ;;  %v2672_v58 = vmul.f32 %v2664_v0, %v2464_v39 }
 0x33a   : > { %v2685_v46 = vmul.f32 %v2677_v23, %v10795_v21 }
 0x33b   : > { %v11153_v55 = vpack.c.bf16 %v2687_v4, %v2687_v4  ;;  %v2686_v52 = vmul.f32 %v2678_v45, %v10799_v62  ;;  %v2680_v26 = vmul.f32 %v2672_v58, %v10540_v36  ;;  %v11172_v36 = vpack.c.bf16 %v2690_v27, %v2690_v27 }
 0x33c   : > { %v2693_v59 = vadd.f32 %v2685_v46, %v10803_v56  ;;  %v11178_v62 = vpack.c.bf16 %v2691_v30, %v2691_v30  ;;  %v11180_v56 = vpack.c.bf16 %v2692_v1, %v2692_v1 }
 0x33d   : > { %2938 = vrot.lane.b32.xlu0 %v11153_v55, %s10189_s14  ;;  %2721 = vrot.lane.b32.xlu1 %v11153_v55, %s10188_s9  ;;  %v2694_v51 = vadd.f32 %v2686_v52, %v10807_v5  ;;  %v2688_v21 = vadd.f32 %v2680_v26, %v13148_v22 }
 0x33e   : > { %v11186_v5 = vpack.c.bf16 %v2693_v59, %v2693_v59 }
 0x33f   : > { %3831 = vst [vmem:[#allocation2 + $0x8] sm:$0xff] %v2694_v51  ;;  %v11166_v6 = vpack.c.bf16 %v2688_v21, %v2688_v21  ;;  %v11188_v40 = vpack.c.bf16 %v2694_v51, %v2694_v51  ;;  %v9553_v21 = vld [vmem:[%s13040_s5 + $0x1c] sm:$0xf] }
 0x341   : > { %2725 = vrot.lane.b32.xlu1 %v11157_v35, %s10188_s9  ;;  %2723 = vrot.lane.b32.xlu0 %v11166_v6, %s10188_s9 }
 0x345   : > { %2940 = vrot.lane.b32.xlu1 %v11166_v6, %s10189_s14  ;;  %2727 = vrot.lane.b32.xlu0 %v11172_v36, %s10188_s9 }
 0x349   : > { %2729 = vrot.lane.b32.xlu1 %v11178_v62, %s10188_s9  ;;  %2731 = vrot.lane.b32.xlu0 %v11180_v56, %s10188_s9 }
 0x34d   : > { %2733 = vrot.lane.b32.xlu1 %v11186_v5, %s10188_s9  ;;  %2735 = vrot.lane.b32.xlu0 %v11188_v40, %s10188_s9 }
 0x351   : > { %2944 = vrot.lane.b32.xlu1 %v11172_v36, %s10189_s14  ;;  %2942 = vrot.lane.b32.xlu0 %v11157_v35, %s10189_s14 }
 0x355   : > { %3157 = vrot.lane.b32.xlu1 %v11153_v55, %s10190_s19  ;;  %2946 = vrot.lane.b32.xlu0 %v11178_v62, %s10189_s14 }
 0x359   : > { %2948 = vrot.lane.b32.xlu1 %v11180_v56, %s10189_s14  ;;  %2950 = vrot.lane.b32.xlu0 %v11186_v5, %s10189_s14 }
 0x35d   : > { %2952 = vrot.lane.b32.xlu1 %v11188_v40, %s10189_s14  ;;  %3155 = vrot.lane.b32.xlu0 %v11008_v63, %s10190_s19 }
 0x361   : > { %3161 = vrot.lane.b32.xlu1 %v11157_v35, %s10190_s19  ;;  %3159 = vrot.lane.b32.xlu0 %v11166_v6, %s10190_s19 }
 0x365   : > { %3165 = vrot.lane.b32.xlu1 %v11178_v62, %s10190_s19  ;;  %3163 = vrot.lane.b32.xlu0 %v11172_v36, %s10190_s19 }
 0x369   : > { %3169 = vrot.lane.b32.xlu1 %v11186_v5, %s10190_s19  ;;  %3167 = vrot.lane.b32.xlu0 %v11180_v56, %s10190_s19 }
 0x36d   : > { %3382 = vrot.lane.b32.xlu1 %v11008_v63, %s10191_s23  ;;  %3171 = vrot.lane.b32.xlu0 %v11188_v40, %s10190_s19  ;;  %v9580_v63 = vld [vmem:[%s13041_s6 + $0x8] sm:$0xff] }
 0x371   : > { %3386 = vrot.lane.b32.xlu1 %v11166_v6, %s10191_s23  ;;  %3384 = vrot.lane.b32.xlu0 %v11153_v55, %s10191_s23 }
 0x375   : > { %3390 = vrot.lane.b32.xlu1 %v11172_v36, %s10191_s23  ;;  %3388 = vrot.lane.b32.xlu0 %v11157_v35, %s10191_s23 }
 0x379   : > { %3394 = vrot.lane.b32.xlu1 %v11180_v56, %s10191_s23  ;;  %3392 = vrot.lane.b32.xlu0 %v11178_v62, %s10191_s23 }
 0x37d   : > { %3398 = vrot.lane.b32.xlu1 %v11188_v40, %s10191_s23  ;;  %3396 = vrot.lane.b32.xlu0 %v11186_v5, %s10191_s23 }
 0x381   : > { %3812 = vperm.xlu0 %9870, %v9580_v63  }
 0x3af   : > { %v2939_v53 = vpop.permute.xlu0 %2938  ;;  %v2722_v19 = vpop.permute.xlu1 %2721 }
 0x3b0   : > { %v2737_v48 = vsel %vm1371_vm11, %v2720_v34, %v2722_v19  ;;  %v2954_v54 = vsel %vm425_vm1, %v2937_v47, %v2939_v53 }
 0x3b1   : > { %v2749_v25 = vsel %vm1384_vm12, %v2737_v48, 0  ;;  %v2966_v20 = vsel %vm1384_vm12, %v2954_v54, 0 }
 0x3b3   : > { %v2726_v37 = vpop.permute.xlu1 %2725  ;;  %v2724_v38 = vpop.permute.xlu0 %2723 }
 0x3b4   : > { %v2738_v31 = vsel %vm1371_vm11, %v2722_v19, %v2724_v38  ;;  %v2739_v44 = vsel %vm1371_vm11, %v2724_v38, %v2726_v37 }
 0x3b5   : > { %9537 = vmatprep.subr.msk.bf16.mxu0 %vm1384_vm12, %v2738_v31  ;;  %v2755_v27 = vsel %vm1384_vm12, %v2739_v44, 0 }
 0x3b6   : > { %2773 = vmatpush1.bf16.msra.mxu0 %v2749_v25 }
 0x3b7   : > { %v2941_v24 = vpop.permute.xlu1 %2940  ;;  %v2728_v14 = vpop.permute.xlu0 %2727 }
 0x3b8   : > { %v2740_v8 = vsel %vm1371_vm11, %v2726_v37, %v2728_v14  ;;  %v2955_v12 = vsel %vm425_vm1, %v2939_v53, %v2941_v24 }
 0x3b9   : > { %9538 = vmatmul.mubr.msk.bf16.vlgmr.msra.gmra.mrb[96].mxu0 %vm1380_vm13, %v9536_v32  ;;  %9539 = vmatprep.subr.msk.bf16.mxu1 %vm1384_vm12, %v2740_v8 }
 0x3ba   : > { %2814 = vmatpush1.bf16.msra.mxu1 %v2755_v27  ;;  %2886 = vmatprep.mubr.bf16.mxu0 %v13149_v43 }
 0x3bb   : > { %v2730_v50 = vpop.permute.xlu1 %2729  ;;  %v2732_v41 = vpop.permute.xlu0 %2731 }
 0x3bc   : > { %v2741_v60 = vsel %vm1371_vm11, %v2728_v14, %v2730_v50  ;;  %v2742_v29 = vsel %vm1371_vm11, %v2730_v50, %v2732_v41 }
 0x3bd   : > { %v2761_v33 = vsel %vm1384_vm12, %v2741_v60, 0  ;;  %9540 = vmatmul.mubr.msk.bf16.vlgmr.msra.gmra.mrb[96].mxu1 %vm1380_vm13, %v9536_v32  ;;  %9541 = vmatprep.subr.msk.bf16.mxu0 %vm1384_vm12, %v2742_v29  ;;  %v9562_v29 = vld [vmem:[%s13040_s5 + $0x20] sm:$0xf] }
 0x3be   : > { %2855 = vmatpush1.bf16.msra.mxu0 %v2761_v33  ;;  %2927 = vmatprep.mubr.bf16.mxu1 %v13149_v43 }
 0x3bf   : > { %v2734_v16 = vpop.permute.xlu1 %2733  ;;  %9545 = vmatprep.subr.msk.bf16.mxu0 %vm1384_vm12, %v2955_v12  ;;  %v2736_v30 = vpop.permute.xlu0 %2735 }
 0x3c0   : > { %v2743_v3 = vsel %vm1371_vm11, %v2732_v41, %v2734_v16  ;;  %v2744_v49 = vsel %vm1371_vm11, %v2734_v16, %v2736_v30 }
 0x3c1   : > { %v2767_v2 = vsel %vm1384_vm12, %v2743_v3, 0  ;;  %9542 = vmatmul.mubr.msk.bf16.vlgmr.msra.gmra.mrb[100].mxu0 %vm1380_vm13, %v9536_v32  ;;  %9543 = vmatprep.subr.msk.bf16.mxu1 %vm1384_vm12, %v2744_v49 }
 0x3c2   : > { %2896 = vmatpush1.bf16.msra.mxu1 %v2767_v2  ;;  %2990 = vmatpush1.bf16.msra.mxu0 %v2966_v20 }
 0x3c3   : > { %v2945_v1 = vpop.permute.xlu1 %2944  ;;  %v2943_v28 = vpop.permute.xlu0 %2942  ;;  %3021 = vmatprep.mubr.bf16.mxu0 %v13149_v43 }
 0x3c4   : > { %v2956_v9 = vsel %vm425_vm1, %v2941_v24, %v2943_v28  ;;  %v2957_v7 = vsel %vm425_vm1, %v2943_v28, %v2945_v1 }
 0x3c5   : > { %9544 = vmatmul.mubr.msk.bf16.vlgmr.msra.gmra.mrb[100].mxu1 %vm1380_vm13, %v9536_v32  ;;  %9547 = vmatprep.subr.msk.bf16.mxu1 %vm1384_vm12, %v2957_v7  ;;  %v2972_v17 = vsel %vm1384_vm12, %v2956_v9, 0 }
 0x3c6   : > { %3031 = vmatpush1.bf16.msra.mxu1 %v2972_v17  ;;  %3062 = vmatprep.mubr.bf16.mxu1 %v13149_v43 }
 0x3c7   : > { %v3158_v10 = vpop.permute.xlu1 %3157  ;;  %v2947_v18 = vpop.permute.xlu0 %2946 }
 0x3c8   : > { %v2958_v42 = vsel %vm425_vm1, %v2945_v1, %v2947_v18 }
 0x3c9   : > { %9546 = vmatmul.mubr.msk.bf16.vlgmr.msra.gmra.mrb[104].mxu0 %vm1380_vm13, %v9535_v15  ;;  %v2978_v11 = vsel %vm1384_vm12, %v2958_v42, 0 }
 0x3ca   : > { %3103 = vmatprep.mubr.bf16.mxu0 %v13149_v43 }
 0x3cb   : > { %v2949_v13 = vpop.permute.xlu1 %2948  ;;  %v2951_v61 = vpop.permute.xlu0 %2950 }
 0x3cc   : > { %v2959_v57 = vsel %vm425_vm1, %v2947_v18, %v2949_v13  ;;  %v2960_v39 = vsel %vm425_vm1, %v2949_v13, %v2951_v61 }
 0x3cd   : > { %9549 = vmatprep.subr.msk.bf16.mxu0 %vm1384_vm12, %v2959_v57  ;;  %9548 = vmatmul.mubr.msk.bf16.vlgmr.msra.gmra.mrb[104].mxu1 %vm1380_vm13, %v9535_v15  ;;  %v2984_v45 = vsel %vm1384_vm12, %v2960_v39, 0 }
 0x3ce   : > { %3072 = vmatpush1.bf16.msra.mxu0 %v2978_v11  ;;  %3144 = vmatprep.mubr.bf16.mxu1 %v13149_v43 }
 0x3cf   : > { %v2953_v0 = vpop.permute.xlu1 %2952  ;;  %v3156_v4 = vpop.permute.xlu0 %3155 }
 0x3d0   : > { %v2961_v23 = vsel %vm425_vm1, %v2951_v61, %v2953_v0  ;;  %v3173_v58 = vsel %vm1811_vm14, %v3156_v4, %v3158_v10  ;;  %v4073_v61 = vld [vmem:[#allocation2 + $0x10] sm:$0xff] }
 0x3d1   : > { %9551 = vmatprep.subr.msk.bf16.mxu1 %vm1384_vm12, %v2961_v23  ;;  %9550 = vmatmul.mubr.msk.bf16.vlgmr.msra.gmra.mrb[108].mxu0 %vm1380_vm13, %v9535_v15  ;;  %v3185_v59 = vsel %vm1384_vm12, %v3173_v58, 0  ;;  %v11380_v57 = vpack.c.bf16 %v4073_v61, %v4073_v61 }
 0x3d2   : > { %3113 = vmatpush1.bf16.msra.mxu1 %v2984_v45  ;;  %3240 = vmatprep.mubr.bf16.mxu0 %v13149_v43 }
 0x3d3   : > { %v3162_v46 = vpop.permute.xlu1 %3161  ;;  %v3160_v52 = vpop.permute.xlu0 %3159  ;;  %4088 = vrot.lane.b32.xlu1 %v11380_v57, %s10192_s29  ;;  %4306 = vrot.lane.b32.xlu0 %v11380_v57, %s10193_s8 }
 0x3d4   : > { %v3174_v26 = vsel %vm1811_vm14, %v3158_v10, %v3160_v52  ;;  %v3175_v51 = vsel %vm1811_vm14, %v3160_v52, %v3162_v46  ;;  %v3613_v10 = vsel %vm1384_vm12, %v11153_v55, 0  ;;  %v9571_v55 = vld [vmem:[%s13040_s5 + $0x24] sm:$0xf] }
 0x3d5   : > { %9552 = vmatmul.mubr.msk.bf16.vlgmr.msra.gmra.mrb[108].mxu1 %vm1380_vm13, %v9535_v15  ;;  %9554 = vmatprep.subr.msk.bf16.mxu0 %vm1384_vm12, %v3174_v26  ;;  %v3191_v47 = vsel %vm1384_vm12, %v3175_v51, 0 }
 0x3d6   : > { %3209 = vmatpush1.bf16.msra.mxu0 %v3185_v59  ;;  %3281 = vmatprep.mubr.bf16.mxu1 %v13149_v43 }
 0x3d7   : > { %v3166_v22 = vpop.permute.xlu1 %3165  ;;  %v3164_v63 = vpop.permute.xlu0 %3163 }
 0x3d8   : > { %v3176_v34 = vsel %vm1811_vm14, %v3162_v46, %v3164_v63  ;;  %v3177_v53 = vsel %vm1811_vm14, %v3164_v63, %v3166_v22 }
 0x3d9   : > { %9555 = vmatmul.mubr.msk.bf16.vlgmr.msra.gmra.mrb[112].mxu0 %vm1380_vm13, %v9553_v21  ;;  %9556 = vmatprep.subr.msk.bf16.mxu1 %vm1384_vm12, %v3176_v34  ;;  %v3197_v38 = vsel %vm1384_vm12, %v3177_v53, 0 }
 0x3da   : > { %3250 = vmatpush1.bf16.msra.mxu1 %v3191_v47  ;;  %3322 = vmatprep.mubr.bf16.mxu0 %v13149_v43 }
 0x3db   : > { %v3170_v19 = vpop.permute.xlu1 %3169  ;;  %v3168_v48 = vpop.permute.xlu0 %3167 }
 0x3dc   : > { %v3178_v37 = vsel %vm1811_vm14, %v3166_v22, %v3168_v48  ;;  %v3179_v31 = vsel %vm1811_vm14, %v3168_v48, %v3170_v19 }
 0x3dd   : > { %9557 = vmatmul.mubr.msk.bf16.vlgmr.msra.gmra.mrb[112].mxu1 %vm1380_vm13, %v9553_v21  ;;  %9558 = vmatprep.subr.msk.bf16.mxu0 %vm1384_vm12, %v3178_v37  ;;  %v3203_v32 = vsel %vm1384_vm12, %v3179_v31, 0 }
 0x3de   : > { %3291 = vmatpush1.bf16.msra.mxu0 %v3197_v38  ;;  %3363 = vmatprep.mubr.bf16.mxu1 %v13149_v43 }
 0x3df   : > { %v3383_v25 = vpop.permute.xlu1 %3382  ;;  %v3172_v44 = vpop.permute.xlu0 %3171 }
 0x3e0   : > { %v3180_v24 = vsel %vm1811_vm14, %v3170_v19, %v3172_v44 }
 0x3e1   : > { %9559 = vmatmul.mubr.msk.bf16.vlgmr.msra.gmra.mrb[116].mxu0 %vm1380_vm13, %v9553_v21  ;;  %9560 = vmatprep.subr.msk.bf16.mxu1 %vm1384_vm12, %v3180_v24 }
 0x3e2   : > { %3332 = vmatpush1.bf16.msra.mxu1 %v3203_v32  ;;  %3467 = vmatprep.mubr.bf16.mxu0 %v13149_v43 }
 0x3e3   : > { %v3387_v14 = vpop.permute.xlu1 %3386  ;;  %v3385_v8 = vpop.permute.xlu0 %3384 }
 0x3e4   : > { %v3400_v27 = vsel %vm2039_vm15, %v3383_v25, %v3385_v8  ;;  %v3401_v50 = vsel %vm2039_vm15, %v3385_v8, %v3387_v14 }
 0x3e5   : > { %9561 = vmatmul.mubr.msk.bf16.vlgmr.msra.gmra.mrb[116].mxu1 %vm1380_vm13, %v9553_v21  ;;  %9563 = vmatprep.subr.msk.bf16.mxu0 %vm1384_vm12, %v3401_v50  ;;  %v3412_v60 = vsel %vm1384_vm12, %v3400_v27, 0 }
 0x3e6   : > { %3436 = vmatpush1.bf16.msra.mxu0 %v3412_v60  ;;  %3508 = vmatprep.mubr.bf16.mxu1 %v13149_v43 }
 0x3e7   : > { %v3391_v41 = vpop.permute.xlu1 %3390  ;;  %v3389_v33 = vpop.permute.xlu0 %3388 }
 0x3e8   : > { %v3402_v54 = vsel %vm2039_vm15, %v3387_v14, %v3389_v33  ;;  %v3403_v16 = vsel %vm2039_vm15, %v3389_v33, %v3391_v41 }
 0x3e9   : > { %9564 = vmatmul.mubr.msk.bf16.vlgmr.msra.gmra.mrb[120].mxu0 %vm1380_vm13, %v9562_v29  ;;  %9565 = vmatprep.subr.msk.bf16.mxu1 %vm1384_vm12, %v3403_v16  ;;  %v3418_v12 = vsel %vm1384_vm12, %v3402_v54, 0 }
 0x3ea   : > { %3477 = vmatpush1.bf16.msra.mxu1 %v3418_v12  ;;  %3549 = vmatprep.mubr.bf16.mxu0 %v13149_v43 }
 0x3eb   : > { %v3395_v3 = vpop.permute.xlu1 %3394  ;;  %v3393_v30 = vpop.permute.xlu0 %3392 }
 0x3ec   : > { %v3404_v49 = vsel %vm2039_vm15, %v3391_v41, %v3393_v30  ;;  %v3405_v2 = vsel %vm2039_vm15, %v3393_v30, %v3395_v3 }
 0x3ed   : > { %9566 = vmatmul.mubr.msk.bf16.vlgmr.msra.gmra.mrb[120].mxu1 %vm1380_vm13, %v9562_v29  ;;  %9567 = vmatprep.subr.msk.bf16.mxu0 %vm1384_vm12, %v3405_v2  ;;  %v3424_v20 = vsel %vm1384_vm12, %v3404_v49, 0 }
 0x3ee   : > { %3518 = vmatpush1.bf16.msra.mxu0 %v3424_v20  ;;  %3590 = vmatprep.mubr.bf16.mxu1 %v13149_v43 }
 0x3ef   : > { %v3399_v1 = vpop.permute.xlu1 %3398  ;;  %9572 = vmatprep.subr.msk.bf16.mxu0 %vm1384_vm12, %v11166_v6  ;;  %v3397_v28 = vpop.permute.xlu0 %3396  ;;  %v3619_v6 = vsel %vm1384_vm12, %v11157_v35, 0  ;;  %v3631_v35 = vsel %vm1384_vm12, %v11186_v5, 0 }
 0x3f0   : > { %v3406_v9 = vsel %vm2039_vm15, %v3395_v3, %v3397_v28  ;;  %v3407_v7 = vsel %vm2039_vm15, %v3397_v28, %v3399_v1 }
 0x3f1   : > { %9568 = vmatmul.mubr.msk.bf16.vlgmr.msra.gmra.mrb[124].mxu0 %vm1380_vm13, %v9562_v29  ;;  %9569 = vmatprep.subr.msk.bf16.mxu1 %vm1384_vm12, %v3407_v7  ;;  %v3430_v17 = vsel %vm1384_vm12, %v3406_v9, 0 }
 0x3f2   : > { %3559 = vmatpush1.bf16.msra.mxu1 %v3430_v17  ;;  %3637 = vmatpush1.bf16.msra.mxu0 %v3613_v10 }
 0x3f3   : > { %9574 = vmatprep.subr.msk.bf16.mxu1 %vm1384_vm12, %v11172_v36  ;;  %9576 = vmatprep.subr.msk.bf16.mxu0 %vm1384_vm12, %v11180_v56  ;;  %v3625_v36 = vsel %vm1384_vm12, %v11178_v62, 0 }
 0x3f4   : > { %3668 = vmatprep.mubr.bf16.mxu0 %v13149_v43 }
 0x3f5   : > { %9570 = vmatmul.mubr.msk.bf16.vlgmr.msra.gmra.mrb[124].mxu1 %vm1380_vm13, %v9562_v29 }
 0x3f6   : > { %3678 = vmatpush1.bf16.msra.mxu1 %v3619_v6  ;;  %3709 = vmatprep.mubr.bf16.mxu1 %v13149_v43 }
 0x3f7   : > { %9578 = vmatprep.subr.msk.bf16.mxu1 %vm1384_vm12, %v11188_v40 }
 0x3f9   : > { %9573 = vmatmul.mubr.msk.bf16.vlgmr.msra.gmra.mrb[128].mxu0 %vm1380_vm13, %v9571_v55 }
 0x3fa   : > { %3719 = vmatpush1.bf16.msra.mxu0 %v3625_v36  ;;  %3750 = vmatprep.mubr.bf16.mxu0 %v13149_v43 }
 0x3fd   : > { %9575 = vmatmul.mubr.msk.bf16.vlgmr.msra.gmra.mrb[128].mxu1 %vm1380_vm13, %v9571_v55 }
 0x3fe   : > { %3760 = vmatpush1.bf16.msra.mxu1 %v3631_v35  ;;  %3791 = vmatprep.mubr.bf16.mxu1 %v13149_v43 }
 0x401   : > { %9577 = vmatmul.mubr.msk.bf16.vlgmr.msra.gmra.mrb[132].mxu0 %vm1380_vm13, %v9571_v55 }
 0x402   : > { %4174 = vmatprep.mubr.bf16.mxu0 %v13149_v43 }
 0x405   : > { %9579 = vmatmul.mubr.msk.bf16.vlgmr.msra.gmra.mrb[132].mxu1 %vm1380_vm13, %v9571_v55 }
 0x406   : > { %4215 = vmatprep.mubr.bf16.mxu1 %v13149_v43 }
 0x48c   : > { %v2806_v62 = vpop.f32.mrb[96].mxu0 }
 0x48d   : > { %v2808_v56 = vpop.f32.mrb[97].mxu0 }
 0x48e   : > { %v2810_v40 = vpop.f32.mrb[98].mxu0 }
 0x48f   : > { %v2811_v15 = vpop.f32.mrb[99].mxu0 }
 0x490   : > { %v2847_v18 = vpop.f32.mrb[96].mxu1 }
 0x491   : > { %v2849_v42 = vpop.f32.mrb[97].mxu1 }
 0x492   : > { %v2851_v13 = vpop.f32.mrb[98].mxu1 }
 0x493   : > { %v2852_v5 = vpop.f32.mrb[99].mxu1 }
 0x494   : > { %v2888_v11 = vpop.f32.mrb[100].mxu0 }
 0x495   : > { %v2890_v39 = vpop.f32.mrb[101].mxu0 }
 0x496   : > { %v2892_v0 = vpop.f32.mrb[102].mxu0 }
 0x497   : > { %v2893_v23 = vpop.f32.mrb[103].mxu0 }
 0x498   : > { %v2929_v4 = vpop.f32.mrb[100].mxu1 }
 0x499   : > { %v2931_v45 = vpop.f32.mrb[101].mxu1 }
 0x49a   : > { %v2933_v58 = vpop.f32.mrb[102].mxu1 }
 0x49b   : > { %v2934_v46 = vpop.f32.mrb[103].mxu1 }
 0x49c   : > { %v3023_v52 = vpop.f32.mrb[104].mxu0 }
 0x49d   : > { %v3024_v26 = vadd.f32 %v3023_v52, %v2806_v62  ;;  %v3025_v59 = vpop.f32.mrb[105].mxu0 }
 0x49e   : > { %v3026_v51 = vadd.f32 %v3025_v59, %v2808_v56  ;;  %v3027_v22 = vpop.f32.mrb[106].mxu0 }
 0x49f   : > { %v3028_v21 = vpop.f32.mrb[107].mxu0 }
 0x4a0   : > { %v3064_v63 = vpop.f32.mrb[104].mxu1 }
 0x4a1   : > { %v3065_v34 = vadd.f32 %v3064_v63, %v2847_v18  ;;  %v3066_v47 = vpop.f32.mrb[105].mxu1 }
 0x4a2   : > { %v3067_v53 = vadd.f32 %v3066_v47, %v2849_v42  ;;  %v3068_v19 = vpop.f32.mrb[106].mxu1 }
 0x4a3   : > { %v3069_v48 = vpop.f32.mrb[107].mxu1 }
 0x4a4   : > { %v3105_v37 = vpop.f32.mrb[108].mxu0 }
 0x4a5   : > { %v3106_v38 = vadd.f32 %v3105_v37, %v2888_v11  ;;  %v3107_v31 = vpop.f32.mrb[109].mxu0 }
 0x4a6   : > { %v3108_v25 = vadd.f32 %v3107_v31, %v2890_v39  ;;  %v3109_v44 = vpop.f32.mrb[110].mxu0 }
 0x4a7   : > { %v3110_v24 = vpop.f32.mrb[111].mxu0 }
 0x4a8   : > { %v3146_v32 = vpop.f32.mrb[108].mxu1 }
 0x4a9   : > { %v3147_v14 = vadd.f32 %v3146_v32, %v2929_v4  ;;  %v3148_v8 = vpop.f32.mrb[109].mxu1 }
 0x4aa   : > { %v3149_v27 = vadd.f32 %v3148_v8, %v2931_v45  ;;  %v3150_v50 = vpop.f32.mrb[110].mxu1  ;;  %v13150_v8 = vld [vmem:[#allocation15_spill] sm:$0xff] }
 0x4ab   : > { %v3151_v60 = vpop.f32.mrb[111].mxu1 }
 0x4ac   : > { %v3242_v41 = vpop.f32.mrb[112].mxu0 }
 0x4ad   : > { %v3372_v29 = vadd.f32 %v3242_v41, %v3024_v26  ;;  %v3244_v33 = vpop.f32.mrb[113].mxu0  ;;  %v13151_v41 = vld [vmem:[#allocation17_spill] sm:$0xff] }
 0x4ae   : > { %v3373_v54 = vadd.f32 %v3244_v33, %v3026_v51  ;;  %v3246_v16 = vpop.f32.mrb[114].mxu0 }
 0x4af   : > { %v3247_v12 = vpop.f32.mrb[115].mxu0 }
 0x4b0   : > { %v3283_v3 = vpop.f32.mrb[112].mxu1 }
 0x4b1   : > { %v3374_v30 = vadd.f32 %v3283_v3, %v3065_v34  ;;  %v3285_v49 = vpop.f32.mrb[113].mxu1 }
 0x4b2   : > { %v3375_v2 = vadd.f32 %v3285_v49, %v3067_v53  ;;  %v3287_v20 = vpop.f32.mrb[114].mxu1 }
 0x4b3   : > { %v3288_v1 = vpop.f32.mrb[115].mxu1 }
 0x4b4   : > { %v3324_v28 = vpop.f32.mrb[116].mxu0  ;;  %v13152_v1 = vld [vmem:[#allocation16_spill] sm:$0xff] }
 0x4b5   : > { %v3376_v9 = vadd.f32 %v3324_v28, %v3106_v38  ;;  %v3326_v7 = vpop.f32.mrb[117].mxu0  ;;  %v11388_v38 = vpop.permute.xlu0 %3812 }
 0x4b6   : > { %v3377_v17 = vadd.f32 %v3326_v7, %v3108_v25  ;;  %v3328_v10 = vpop.f32.mrb[118].mxu0 }
 0x4b7   : > { %v3329_v6 = vpop.f32.mrb[119].mxu0  ;;  %v13153_v10 = vld [vmem:[#allocation18_spill] sm:$0xff] }
 0x4b8   : > { %v3365_v55 = vpop.f32.mrb[116].mxu1 }
 0x4b9   : > { %v3378_v36 = vadd.f32 %v3365_v55, %v3147_v14  ;;  %v3367_v35 = vpop.f32.mrb[117].mxu1 }
 0x4ba   : > { %v3379_v62 = vadd.f32 %v3367_v35, %v3149_v27  ;;  %v3369_v56 = vpop.f32.mrb[118].mxu1 }
 0x4bb   : > { %v3370_v40 = vpop.f32.mrb[119].mxu1 }
 0x4bc   : > { %v3469_v15 = vpop.f32.mrb[120].mxu0 }
 0x4bd   : > { %v3599_v18 = vadd.f32 %v3469_v15, %v3372_v29  ;;  %v3471_v42 = vpop.f32.mrb[121].mxu0 }
 0x4be   : > { %v3600_v13 = vadd.f32 %v3471_v42, %v3373_v54  ;;  %v3473_v61 = vpop.f32.mrb[122].mxu0 }
 0x4bf   : > { %v3474_v5 = vpop.f32.mrb[123].mxu0 }
 0x4c0   : > { %v3510_v11 = vpop.f32.mrb[120].mxu1 }
 0x4c1   : > { %v3601_v39 = vadd.f32 %v3510_v11, %v3374_v30  ;;  %v3512_v0 = vpop.f32.mrb[121].mxu1 }
 0x4c2   : > { %v3602_v23 = vadd.f32 %v3512_v0, %v3375_v2  ;;  %v3514_v4 = vpop.f32.mrb[122].mxu1 }
 0x4c3   : > { %v3515_v45 = vpop.f32.mrb[123].mxu1 }
 0x4c4   : > { %v3551_v58 = vpop.f32.mrb[124].mxu0 }
 0x4c5   : > { %v3603_v46 = vadd.f32 %v3551_v58, %v3376_v9  ;;  %v3553_v52 = vpop.f32.mrb[125].mxu0 }
 0x4c6   : > { %v3604_v26 = vadd.f32 %v3553_v52, %v3377_v17  ;;  %v3555_v59 = vpop.f32.mrb[126].mxu0 }
 0x4c7   : > { %v3556_v51 = vpop.f32.mrb[127].mxu0 }
 0x4c8   : > { %v3592_v22 = vpop.f32.mrb[124].mxu1 }
 0x4c9   : > { %v3605_v21 = vadd.f32 %v3592_v22, %v3378_v36  ;;  %v3594_v63 = vpop.f32.mrb[125].mxu1 }
 0x4ca   : > { %v11386_v34 = vadd.f32 %v3594_v63, %v3379_v62  ;;  %v3596_v47 = vpop.f32.mrb[126].mxu1  ;;  %v13154_v63 = vld [vmem:[#allocation19_spill] sm:$0xff] }
 0x4cb   : > { %v3597_v53 = vpop.f32.mrb[127].mxu1 }
 0x4cc   : > { %v3670_v19 = vpop.f32.mrb[128].mxu0 }
 0x4cd   : > { %v3800_v48 = vadd.f32 %v3670_v19, %v3599_v18  ;;  %v3672_v37 = vpop.f32.mrb[129].mxu0  ;;  %v13155_v19 = vld [vmem:[#allocation21_spill] sm:$0xff] }
 0x4ce   : > { %v3801_v31 = vadd.f32 %v3672_v37, %v3600_v13  ;;  %v3674_v25 = vpop.f32.mrb[130].mxu0 }
 0x4cf   : > { %v3815_v44 = vadd.f32 %v11388_v38, %v3800_v48  ;;  %v3675_v24 = vpop.f32.mrb[131].mxu0 }
 0x4d0   : > { %v3816_v32 = vadd.f32 %v11388_v38, %v3801_v31  ;;  %v3711_v14 = vpop.f32.mrb[128].mxu1 }
 0x4d1   : > { %v11393_v27 = vadd.f32 %v3815_v44, %v13150_v8  ;;  %v3802_v50 = vadd.f32 %v3711_v14, %v3601_v39  ;;  %v3713_v60 = vpop.f32.mrb[129].mxu1 }
 0x4d2   : > { %v11396_v29 = vadd.f32 %v3816_v32, %v13151_v41  ;;  %v3803_v33 = vadd.f32 %v3713_v60, %v3602_v23  ;;  %v3715_v54 = vpop.f32.mrb[130].mxu1 }
 0x4d3   : > { %v11399_v16 = vmul.f32 0.70710677, %v11393_v27  ;;  %v3817_v12 = vadd.f32 %v11388_v38, %v3802_v50  ;;  %v3716_v3 = vpop.f32.mrb[131].mxu1  ;;  %v11443_v60 = vmul.f32 0.5, %v11393_v27 }
 0x4d4   : > { %v11403_v30 = vmul.f32 0.70710677, %v11396_v29  ;;  %v3818_v49 = vadd.f32 %v11388_v38, %v3803_v33  ;;  %v3752_v2 = vpop.f32.mrb[132].mxu0 }
 0x4d5   : > { %v3848_v20 = vand.u32 2147483647, %v11399_v16  ;;  %v11408_v28 = vadd.f32 %v3817_v12, %v13152_v1  ;;  %v3804_v9 = vadd.f32 %v3752_v2, %v3603_v46  ;;  %v3754_v7 = vpop.f32.mrb[133].mxu0  ;;  %vm4008_vm10 = vcmp.lt.f32.partialorder %v11399_v16, 0.0 }
 0x4d6   : > { %v3849_v17 = vand.u32 2147483647, %v11403_v30  ;;  %v11412_v6 = vadd.f32 %v3818_v49, %v13153_v10  ;;  %v3805_v55 = vadd.f32 %v3754_v7, %v3604_v26  ;;  %v3756_v36 = vpop.f32.mrb[134].mxu0  ;;  %vm4009_vm11 = vcmp.lt.f32.partialorder %v11403_v30, 0.0 }
 0x4d7   : > { %v3856_v35 = vmul.f32 0.3275911, %v3848_v20  ;;  %v11415_v62 = vmul.f32 0.70710677, %v11408_v28  ;;  %v3757_v13 = vpop.f32.mrb[135].mxu0  ;;  %v3960_v61 = vsub.f32 0.0, %v3848_v20  ;;  %v3819_v52 = vadd.f32 %v11388_v38, %v3804_v9 }
 0x4d8   : > { %v3857_v56 = vmul.f32 0.3275911, %v3849_v17  ;;  %v11418_v40 = vmul.f32 0.70710677, %v11412_v6  ;;  %v3793_v42 = vpop.f32.mrb[132].mxu1  ;;  %v3961_v0 = vsub.f32 0.0, %v3849_v17  ;;  %v3820_v51 = vadd.f32 %v11388_v38, %v3805_v55 }
 0x4d9   : > { %v3864_v15 = vadd.f32 1.0, %v3856_v35  ;;  %v3850_v18 = vand.u32 2147483647, %v11415_v62  ;;  %v3795_v39 = vpop.f32.mrb[133].mxu1  ;;  %v3968_v26 = vmul.f32 %v3960_v61, %v3848_v20  ;;  %v11425_v47 = vadd.f32 %v3819_v52, %v13154_v63  ;;  %v13157_v61 = vld [vmem:[#allocation22_spill] sm:$0xff] }
 0x4da   : > { %v3865_v5 = vadd.f32 1.0, %v3857_v56  ;;  %v3851_v11 = vand.u32 2147483647, %v11418_v40  ;;  %v3797_v4 = vpop.f32.mrb[134].mxu1  ;;  %v3969_v22 = vmul.f32 %v3961_v0, %v3849_v17  ;;  %v3806_v53 = vadd.f32 %v3793_v42, %v3605_v21  ;;  %v13156_v21 = vld [vmem:[#allocation20_spill] sm:$0xff] }
 0x4db   : > { %9946 = vrcp.f32 %v3864_v15  ;;  %v3858_v23 = vmul.f32 0.3275911, %v3850_v18  ;;  %v3798_v58 = vpop.f32.mrb[135].mxu1  ;;  %v11428_v48 = vadd.f32 %v3820_v51, %v13155_v19  ;;  %v3807_v37 = vadd.f32 %v3795_v39, %v11386_v34 }
 0x4dc   : > { %9948 = vrcp.f32 %v3865_v5  ;;  %v3859_v45 = vmul.f32 0.3275911, %v3851_v11  ;;  %v11432_v31 = vmul.f32 0.70710677, %v11425_v47  ;;  %v3821_v25 = vadd.f32 %v11388_v38, %v3806_v53 }
 0x4dd   : > { %v3866_v46 = vadd.f32 1.0, %v3858_v23  ;;  %v3976_v44 = vmul.f32 1.442695, %v3968_v26  ;;  %v3962_v24 = vsub.f32 0.0, %v3850_v18  ;;  %v11436_v32 = vmul.f32 0.70710677, %v11428_v48 }
 0x4de   : > { %v3867_v59 = vadd.f32 1.0, %v3859_v45  ;;  %v3978_v14 = vmul.f32 1.442695, %v3969_v22  ;;  %v3852_v8 = vand.u32 2147483647, %v11432_v31  ;;  %v11440_v50 = vadd.f32 %v3821_v25, %v13156_v21 }
 0x4df   : > { %9950 = vrcp.f32 %v3866_v46  ;;  %v11446_v34 = vmul.f32 0.5, %v11396_v29  ;;  %v3963_v41 = vsub.f32 0.0, %v3851_v11  ;;  %v3853_v33 = vand.u32 2147483647, %v11436_v32 }
 0x4e0   : > { %9952 = vrcp.f32 %v3867_v59  ;;  %v11452_v12 = vmul.f32 0.5, %v11408_v28  ;;  %v3860_v3 = vmul.f32 0.3275911, %v3852_v8  ;;  %v11455_v49 = vmul.f32 0.70710677, %v11440_v50 }
 0x4e1   : > { %v3822_v2 = vadd.f32 %v11388_v38, %v3807_v37  ;;  %9954 = vpow2.f32 %v3976_v44  ;;  %v3970_v9 = vmul.f32 %v3962_v24, %v3850_v18  ;;  %v3861_v7 = vmul.f32 0.3275911, %v3853_v33 }
 0x4e2   : > { %9956 = vpow2.f32 %v3978_v14  ;;  %v3868_v10 = vadd.f32 1.0, %v3860_v3  ;;  %v3854_v55 = vand.u32 2147483647, %v11455_v49  ;;  %v3971_v35 = vmul.f32 %v3963_v41, %v3851_v11 }
 0x4e3   : > { %v3964_v56 = vsub.f32 0.0, %v3852_v8  ;;  %v3869_v15 = vadd.f32 1.0, %v3861_v7  ;;  %v11466_v5 = vadd.f32 %v3822_v2, %v13157_v61  ;;  %v3965_v23 = vsub.f32 0.0, %v3853_v33 }
 0x4e4   : > { %9958 = vrcp.f32 %v3868_v10  ;;  %v3862_v13 = vmul.f32 0.3275911, %v3854_v55  ;;  %v3980_v4 = vmul.f32 1.442695, %v3970_v9  ;;  %v3982_v26 = vmul.f32 1.442695, %v3971_v35 }
 0x4e5   : > { %v11449_v54 = vpop.eup %9946  ;;  %9960 = vrcp.f32 %v3869_v15  ;;  %v3972_v59 = vmul.f32 %v3964_v56, %v3852_v8  ;;  %v11475_v63 = vmul.f32 0.70710677, %v11466_v5  ;;  %v3973_v37 = vmul.f32 %v3965_v23, %v3853_v33 }
 0x4e6   : > { %v11458_v20 = vpop.eup %9948  ;;  %v3888_v1 = vmul.f32 1.0614054, %v11449_v54  ;;  %v3870_v58 = vadd.f32 1.0, %v3862_v13  ;;  %v3966_v25 = vsub.f32 0.0, %v3854_v55  ;;  %v11481_v24 = vmul.f32 0.5, %v11412_v6 }
 0x4e7   : > { %v3889_v17 = vmul.f32 1.0614054, %v11458_v20  ;;  %v3855_v8 = vand.u32 2147483647, %v11475_v63  ;;  %v3984_v2 = vmul.f32 1.442695, %v3972_v59 }
 0x4e8   : > { %v3896_v36 = vadd.f32 -1.4531521, %v3888_v1  ;;  %9962 = vrcp.f32 %v3870_v58  ;;  %v3974_v35 = vmul.f32 %v3966_v25, %v3854_v55  ;;  %vm4010_vm15 = vcmp.lt.f32.partialorder %v11415_v62, 0.0 }
 0x4e9   : > { %v11463_v42 = vpop.eup %9950  ;;  %v3897_v38 = vadd.f32 -1.4531521, %v3889_v17  ;;  %9964 = vpow2.f32 %v3980_v4  ;;  %v3863_v33 = vmul.f32 0.3275911, %v3855_v8  ;;  %v3967_v61 = vsub.f32 0.0, %v3855_v8 }
 0x4ea   : > { %v11468_v18 = vpop.eup %9952  ;;  %v3904_v39 = vmul.f32 %v11449_v54, %v3896_v36  ;;  %v3890_v0 = vmul.f32 1.0614054, %v11463_v42  ;;  %9966 = vpow2.f32 %v3982_v26  ;;  %v3986_v36 = vmul.f32 1.442695, %v3973_v37 }
 0x4eb   : > { %v3905_v11 = vmul.f32 %v11458_v20, %v3897_v38  ;;  %v3891_v45 = vmul.f32 1.0614054, %v11468_v18  ;;  %v9955_v21 = vpop.eup %9954  ;;  %v3871_v13 = vadd.f32 1.0, %v3863_v33  ;;  %9968 = vpow2.f32 %v3984_v2 }
 0x4ec   : > { %v3912_v46 = vadd.f32 1.4214138, %v3904_v39  ;;  %v3898_v52 = vadd.f32 -1.4531521, %v3890_v0  ;;  %v9957_v1 = vpop.eup %9956  ;;  %vm4011_vm0 = vcmp.lt.f32.partialorder %v11418_v40, 0.0  ;;  %vm4012_vm3 = vcmp.lt.f32.partialorder %v11432_v31, 0.0 }
 0x4ed   : > { %v3913_v51 = vadd.f32 1.4214138, %v3905_v11  ;;  %v3899_v22 = vadd.f32 -1.4531521, %v3891_v45  ;;  %9970 = vrcp.f32 %v3871_v13  ;;  %vm4013_vm4 = vcmp.lt.f32.partialorder %v11436_v32, 0.0 }
 0x4ee   : > { %v3920_v53 = vmul.f32 %v11449_v54, %v3912_v46  ;;  %v3906_v19 = vmul.f32 %v11463_v42, %v3898_v52  ;;  %v11487_v56 = vpop.eup %9958  ;;  %9972 = vpow2.f32 %v3986_v36  ;;  %vm4014_vm5 = vcmp.lt.f32.partialorder %v11455_v49, 0.0 }
 0x4ef   : > { %v3921_v44 = vmul.f32 %v11458_v20, %v3913_v51  ;;  %v3907_v14 = vmul.f32 %v11468_v18, %v3899_v22  ;;  %v11491_v39 = vpop.eup %9960  ;;  %v3892_v11 = vmul.f32 1.0614054, %v11487_v56  ;;  %vm4015_vm6 = vcmp.lt.f32.partialorder %v11475_v63, 0.0 }
 0x4f0   : > { %v3928_v41 = vadd.f32 -0.28449672, %v3920_v53  ;;  %v3914_v3 = vadd.f32 1.4214138, %v3906_v19  ;;  %v3893_v55 = vmul.f32 1.0614054, %v11491_v39 }
 0x4f1   : > { %v3929_v9 = vadd.f32 -0.28449672, %v3921_v44  ;;  %v3915_v7 = vadd.f32 1.4214138, %v3907_v14  ;;  %v3900_v52 = vadd.f32 -1.4531521, %v3892_v11 }
 0x4f2   : > { %v3936_v17 = vmul.f32 %v11449_v54, %v3928_v41  ;;  %v3922_v10 = vmul.f32 %v11463_v42, %v3914_v3  ;;  %v11499_v26 = vpop.eup %9962  ;;  %v3901_v22 = vadd.f32 -1.4531521, %v3893_v55  ;;  %v3988_v53 = vmul.f32 1.442695, %v3974_v35 }
 0x4f3   : > { %v3937_v15 = vmul.f32 %v11458_v20, %v3929_v9  ;;  %v3923_v38 = vmul.f32 %v11468_v18, %v3915_v7  ;;  %v3908_v25 = vmul.f32 %v11487_v56, %v3900_v52  ;;  %v3975_v3 = vmul.f32 %v3967_v61, %v3855_v8  ;;  %v9965_v2 = vpop.eup %9964 }
 0x4f4   : > { %v3944_v0 = vadd.f32 0.2548296, %v3936_v17  ;;  %v3930_v23 = vadd.f32 -0.28449672, %v3922_v10  ;;  %v3909_v41 = vmul.f32 %v11491_v39, %v3901_v22  ;;  %v9967_v33 = vpop.eup %9966  ;;  %9974 = vpow2.f32 %v3988_v53 }
 0x4f5   : > { %v3945_v4 = vadd.f32 0.2548296, %v3937_v15  ;;  %v3931_v45 = vadd.f32 -0.28449672, %v3923_v38  ;;  %v3916_v7 = vadd.f32 1.4214138, %v3908_v25 }
 0x4f6   : > { %v3952_v58 = vmul.f32 %v11449_v54, %v3944_v0  ;;  %v3938_v46 = vmul.f32 %v11463_v42, %v3930_v23  ;;  %v3894_v54 = vmul.f32 1.0614054, %v11499_v26  ;;  %v3917_v36 = vadd.f32 1.4214138, %v3909_v41  ;;  %v9969_v0 = vpop.eup %9968 }
 0x4f7   : > { %v3953_v59 = vmul.f32 %v11458_v20, %v3945_v4  ;;  %v3939_v51 = vmul.f32 %v11468_v18, %v3931_v45  ;;  %v3924_v15 = vmul.f32 %v11487_v56, %v3916_v7  ;;  %v3990_v61 = vmul.f32 1.442695, %v3975_v3  ;;  %v11515_v45 = vpop.eup %9970  ;;  %v13158_v3 = vld [vmem:[#allocation24_spill] sm:$0xff] }
 0x4f8   : > { %v3992_v19 = vmul.f32 %v9955_v21, %v3952_v58  ;;  %v3946_v37 = vadd.f32 0.2548296, %v3938_v46  ;;  %v3902_v21 = vadd.f32 -1.4531521, %v3894_v54  ;;  %v3895_v54 = vmul.f32 1.0614054, %v11515_v45 }
 0x4f9   : > { %v3993_v44 = vmul.f32 %v9957_v1, %v3953_v59  ;;  %v3947_v14 = vadd.f32 0.2548296, %v3939_v51  ;;  %v3932_v4 = vadd.f32 -0.28449672, %v3924_v15  ;;  %v9973_v59 = vpop.eup %9972  ;;  %9976 = vpow2.f32 %v3990_v61 }
 0x4fa   : > { %v4000_v9 = vsub.f32 1.0, %v3992_v19  ;;  %v3954_v20 = vmul.f32 %v11463_v42, %v3946_v37  ;;  %v3910_v8 = vmul.f32 %v11499_v26, %v3902_v21  ;;  %v3925_v42 = vmul.f32 %v11491_v39, %v3917_v36 }
 0x4fb   : > { %v4001_v17 = vsub.f32 1.0, %v3993_v44  ;;  %v3955_v10 = vmul.f32 %v11468_v18, %v3947_v14  ;;  %v3940_v53 = vmul.f32 %v11487_v56, %v3932_v4  ;;  %v3837_v61 = vmul.f32 0.5, %v11428_v48 }
 0x4fc   : > { %v4016_v1 = vsub.f32 0.0, %v4000_v9  ;;  %v3994_v35 = vmul.f32 %v9965_v2, %v3954_v20  ;;  %v3918_v18 = vadd.f32 1.4214138, %v3910_v8  ;;  %v3933_v52 = vadd.f32 -0.28449672, %v3925_v42 }
 0x4fd   : > { %v4017_v38 = vsub.f32 0.0, %v4001_v17  ;;  %v3995_v13 = vmul.f32 %v9967_v33, %v3955_v10  ;;  %v3948_v14 = vadd.f32 0.2548296, %v3940_v53 }
 0x4fe   : > { %v4024_v23 = vsel %vm4008_vm10, %v4016_v1, %v4000_v9  ;;  %v4002_v11 = vsub.f32 1.0, %v3994_v35  ;;  %v3926_v19 = vmul.f32 %v11499_v26, %v3918_v18  ;;  %v3941_v25 = vmul.f32 %v11491_v39, %v3933_v52  ;;  %v13160_v35 = vld [vmem:[#allocation28_spill] sm:$0xff] }
 0x4ff   : > { %v4032_v55 = vadd.f32 1.0, %v4024_v23  ;;  %v4025_v58 = vsel %vm4009_vm11, %v4017_v38, %v4001_v17  ;;  %v4003_v46 = vsub.f32 1.0, %v3995_v13  ;;  %v3956_v17 = vmul.f32 %v11487_v56, %v3948_v14  ;;  %v13161_v13 = vld [vmem:[#allocation30_spill] sm:$0xff]  ;;  %v13162_v23 = vld [vmem:[#allocation25_spill] sm:$0xff] }
 0x500   : > { %v4033_v51 = vadd.f32 1.0, %v4025_v58  ;;  %v4018_v22 = vsub.f32 0.0, %v4002_v11  ;;  %v3934_v41 = vadd.f32 -0.28449672, %v3926_v19  ;;  %v3949_v7 = vadd.f32 0.2548296, %v3941_v25 }
 0x501   : > { %v4040_v16 = vmul.f32 %v4032_v55, %v11443_v60  ;;  %v4019_v37 = vsub.f32 0.0, %v4003_v46  ;;  %v13159_v60 = vld [vmem:[#allocation26_spill] sm:$0xff]  ;;  %v3903_v1 = vadd.f32 -1.4531521, %v3895_v54  ;;  %v3996_v40 = vmul.f32 %v9969_v0, %v3956_v17  ;;  %v13163_v55 = vld [vmem:[#allocation27_spill] sm:$0xff]  ;;  %v13164_v0 = vld [vmem:[#allocation29_spill] sm:$0xff] }
 0x502   : > { %v4041_v44 = vmul.f32 %v4033_v51, %v11446_v34  ;;  %v4026_v30 = vsel %vm4010_vm15, %v4018_v22, %v4002_v11  ;;  %v3942_v10 = vmul.f32 %v11499_v26, %v3934_v41  ;;  %v9975_v34 = vpop.eup %9974  ;;  %v3957_v36 = vmul.f32 %v11491_v39, %v3949_v7  ;;  %v13165_v22 = vld [vmem:[#allocation31_spill] sm:$0xff] }
 0x503   : > { %v4048_v2 = vmul.f32 %v4040_v16, %v13158_v3  ;;  %v4034_v9 = vadd.f32 1.0, %v4026_v30  ;;  %v4027_v20 = vsel %vm4011_vm0, %v4019_v37, %v4003_v46  ;;  %v3911_v56 = vmul.f32 %v11515_v45, %v3903_v1  ;;  %v13168_v1 = vld [vmem:[#allocation60_spill] sm:$0xff] }
 0x504   : > { %v4049_v21 = vmul.f32 %v4041_v44, %v13159_v60  ;;  %v4035_v33 = vadd.f32 1.0, %v4027_v20  ;;  %v3950_v38 = vadd.f32 0.2548296, %v3942_v10  ;;  %v3997_v4 = vmul.f32 %v9973_v59, %v3957_v36  ;;  %v13166_v60 = vld [vmem:[#allocation56_spill] sm:$0xff] }
 0x505   : > { %v4042_v62 = vmul.f32 %v4034_v9, %v11452_v12  ;;  %v4056_v15 = vadd.f32 %v4048_v2, %v13160_v35  ;;  %v4004_v58 = vsub.f32 1.0, %v3996_v40  ;;  %v3836_v54 = vmul.f32 0.5, %v11425_v47 }
 0x506   : > { %v4043_v8 = vmul.f32 %v4035_v33, %v11481_v24  ;;  %v4057_v42 = vadd.f32 %v4049_v21, %v13161_v13  ;;  %v3958_v39 = vmul.f32 %v11499_v26, %v3950_v38  ;;  %v4005_v46 = vsub.f32 1.0, %v3997_v4  ;;  %v13170_v38 = vld [vmem:[#allocation57_spill] sm:$0xff] }
 0x507   : > { %v4050_v11 = vmul.f32 %v4042_v62, %v13162_v23  ;;  %v11540_v18 = vpack.c.bf16 %v4056_v15, %v4056_v15  ;;  %v3919_v24 = vadd.f32 1.4214138, %v3911_v56  ;;  %v4020_v59 = vsub.f32 0.0, %v4004_v58  ;;  %v9977_v15 = vpop.eup %9976  ;;  %v13171_v56 = vld [vmem:[#allocation61_spill] sm:$0xff] }
 0x508   : > { %v4051_v12 = vmul.f32 %v4043_v8, %v13163_v55  ;;  %v3998_v51 = vmul.f32 %v9975_v34, %v3958_v39  ;;  %v4021_v19 = vsub.f32 0.0, %v4005_v46  ;;  %v11552_v16 = vpack.c.bf16 %v4057_v42, %v4057_v42  ;;  %v13167_v34 = vld [vmem:[#allocation58_spill] sm:$0xff] }
 0x509   : > { %4308 = vrot.lane.b32.xlu1 %v11540_v18, %s10193_s8  ;;  %4090 = vrot.lane.b32.xlu0 %v11540_v18, %s10192_s29  ;;  %v4058_v52 = vadd.f32 %v4050_v11, %v13164_v0  ;;  %v3927_v26 = vmul.f32 %v11515_v45, %v3919_v24  ;;  %v4028_v37 = vsel %vm4012_vm3, %v4020_v59, %v4004_v58  ;;  %v3838_v33 = vmul.f32 0.5, %v11440_v50  ;;  %v13169_v8 = vld [vmem:[#allocation62_spill] sm:$0xff]  ;;  %v13172_v0 = vld [vmem:[#allocation59_spill] sm:$0xff] }
 0x50a   : > { %v4059_v53 = vadd.f32 %v4051_v12, %v13165_v22  ;;  %v4006_v25 = vsub.f32 1.0, %v3998_v51  ;;  %v4036_v44 = vadd.f32 1.0, %v4028_v37  ;;  %v4029_v30 = vsel %vm4013_vm4, %v4021_v19, %v4005_v46  ;;  %v13173_v59 = vld [vmem:[#allocation63_spill] sm:$0xff]  ;;  %v4089_v22 = vpop.permute.xlu1 %4088 }
 0x50b   : > { %v11554_v31 = vpack.c.bf16 %v4058_v52, %v4058_v52  ;;  %v3935_v14 = vadd.f32 -0.28449672, %v3927_v26  ;;  %v4037_v41 = vadd.f32 1.0, %v4029_v30  ;;  %v3839_v39 = vmul.f32 0.5, %v11466_v5 }
 0x50c   : > { %v4022_v3 = vsub.f32 0.0, %v4006_v25  ;;  %v4044_v2 = vmul.f32 %v4036_v44, %v3836_v54  ;;  %v11565_v9 = vpack.c.bf16 %v4059_v53, %v4059_v53  ;;  %v4307_v53 = vpop.permute.xlu0 %4306 }
 0x50d   : > { %4092 = vrot.lane.b32.xlu1 %v11552_v16, %s10192_s29  ;;  %4094 = vrot.lane.b32.xlu0 %v11554_v31, %s10192_s29  ;;  %v3943_v32 = vmul.f32 %v11515_v45, %v3935_v14  ;;  %v4045_v20 = vmul.f32 %v4037_v41, %v3837_v61  ;;  %v9582_v61 = vld [vmem:[%s13040_s5 + $0x2c] sm:$0xf] }
 0x50e   : > { %v4030_v7 = vsel %vm4014_vm5, %v4022_v3, %v4006_v25  ;;  %v4052_v21 = vmul.f32 %v4044_v2, %v13166_v60 }
 0x50f   : > { %v4038_v17 = vadd.f32 1.0, %v4030_v7  ;;  %v3951_v10 = vadd.f32 0.2548296, %v3943_v32  ;;  %v4053_v49 = vmul.f32 %v4045_v20, %v13167_v34 }
 0x510   : > { %v4060_v35 = vadd.f32 %v4052_v21, %v13168_v1 }
 0x511   : > { %4096 = vrot.lane.b32.xlu1 %v11565_v9, %s10192_s29  ;;  %4310 = vrot.lane.b32.xlu0 %v11552_v16, %s10193_s8  ;;  %v4046_v62 = vmul.f32 %v4038_v17, %v3838_v33  ;;  %v3959_v36 = vmul.f32 %v11515_v45, %v3951_v10  ;;  %v4061_v40 = vadd.f32 %v4053_v49, %v13169_v8 }
 0x512   : > { %v11578_v23 = vpack.c.bf16 %v4060_v35, %v4060_v35  ;;  %v9581_v35 = vld [vmem:[%s13040_s5 + $0x28] sm:$0xf] }
 0x513   : > { %v4054_v13 = vmul.f32 %v4046_v62, %v13170_v38  ;;  %v3999_v42 = vmul.f32 %v9977_v15, %v3959_v36  ;;  %v11580_v11 = vpack.c.bf16 %v4061_v40, %v4061_v40 }
 0x515   : > { %v4007_v4 = vsub.f32 1.0, %v3999_v42  ;;  %4098 = vrot.lane.b32.xlu0 %v11578_v23, %s10192_s29  ;;  %v4062_v55 = vadd.f32 %v4054_v13, %v13171_v56  ;;  %4100 = vrot.lane.b32.xlu1 %v11580_v11, %s10192_s29 }
 0x517   : > { %v4023_v45 = vsub.f32 0.0, %v4007_v4  ;;  %v11587_v12 = vpack.c.bf16 %v4062_v55, %v4062_v55 }
 0x519   : > { %v4031_v58 = vsel %vm4015_vm6, %v4023_v45, %v4007_v4  ;;  %4102 = vrot.lane.b32.xlu0 %v11587_v12, %s10192_s29 }
 0x51a   : > { %v4039_v46 = vadd.f32 1.0, %v4031_v58 }
 0x51c   : > { %v4047_v24 = vmul.f32 %v4039_v46, %v3839_v39 }
 0x51d   : > { %4314 = vrot.lane.b32.xlu0 %v11565_v9, %s10193_s8 }
 0x51e   : > { %v4055_v52 = vmul.f32 %v4047_v24, %v13172_v0 }
 0x520   : > { %v4063_v51 = vadd.f32 %v4055_v52, %v13173_v59 }
 0x521   : > { %4528 = vrot.lane.b32.xlu0 %v11540_v18, %s10189_s14 }
 0x522   : > { %5194 = vst [vmem:[#allocation2 + $0x10] sm:$0xff] %v4063_v51  ;;  %v11599_v63 = vpack.c.bf16 %v4063_v51, %v4063_v51 }
 0x524   : > { %4104 = vrot.lane.b32.xlu1 %v11599_v63, %s10192_s29 }
 0x525   : > { %4318 = vrot.lane.b32.xlu0 %v11580_v11, %s10193_s8 }
 0x528   : > { %4312 = vrot.lane.b32.xlu1 %v11554_v31, %s10193_s8 }
 0x529   : > { %4322 = vrot.lane.b32.xlu0 %v11599_v63, %s10193_s8 }
 0x52c   : > { %4316 = vrot.lane.b32.xlu1 %v11578_v23, %s10193_s8 }
 0x52d   : > { %4532 = vrot.lane.b32.xlu0 %v11554_v31, %s10189_s14 }
 0x530   : > { %4320 = vrot.lane.b32.xlu1 %v11587_v12, %s10193_s8 }
 0x531   : > { %4536 = vrot.lane.b32.xlu0 %v11578_v23, %s10189_s14 }
 0x534   : > { %4526 = vrot.lane.b32.xlu1 %v11380_v57, %s10189_s14 }
 0x535   : > { %4540 = vrot.lane.b32.xlu0 %v11587_v12, %s10189_s14 }
 0x538   : > { %4530 = vrot.lane.b32.xlu1 %v11552_v16, %s10189_s14 }
 0x539   : > { %4753 = vrot.lane.b32.xlu0 %v11380_v57, %s10190_s19  ;;  %v9626_v57 = vld [vmem:[%s13041_s6 + $0x10] sm:$0xff] }
 0x53c   : > { %4534 = vrot.lane.b32.xlu1 %v11565_v9, %s10189_s14 }
 0x53d   : > { %4757 = vrot.lane.b32.xlu0 %v11552_v16, %s10190_s19 }
 0x540   : > { %4538 = vrot.lane.b32.xlu1 %v11580_v11, %s10189_s14 }
 0x541   : > { %4761 = vrot.lane.b32.xlu0 %v11565_v9, %s10190_s19 }
 0x544   : > { %4542 = vrot.lane.b32.xlu1 %v11599_v63, %s10189_s14 }
 0x545   : > { %4765 = vrot.lane.b32.xlu0 %v11580_v11, %s10190_s19 }
 0x548   : > { %4755 = vrot.lane.b32.xlu1 %v11540_v18, %s10190_s19 }
 0x549   : > { %4769 = vrot.lane.b32.xlu0 %v11599_v63, %s10190_s19 }
 0x54c   : > { %4759 = vrot.lane.b32.xlu1 %v11554_v31, %s10190_s19 }
 0x550   : > { %4763 = vrot.lane.b32.xlu1 %v11578_v23, %s10190_s19 }
 0x554   : > { %4767 = vrot.lane.b32.xlu1 %v11587_v12, %s10190_s19 }
 0x558   : > { %5183 = vperm.xlu1 %9871, %v9626_v57  }
 0x57b   : > { %v4309_v19 = vpop.permute.xlu1 %4308  ;;  %v4091_v26 = vpop.permute.xlu0 %4090 }
 0x57c   : > { %v4107_v37 = vsel %vm4106_vm7, %v4089_v22, %v4091_v26  ;;  %v4325_v17 = vsel %vm1380_vm13, %v4307_v53, %v4309_v19 }
 0x57d   : > { %v4119_v30 = vsel %vm1384_vm12, %v4107_v37, 0  ;;  %v4337_v49 = vsel %vm1384_vm12, %v4325_v17, 0 }
 0x57f   : > { %v4093_v25 = vpop.permute.xlu1 %4092  ;;  %v4095_v54 = vpop.permute.xlu0 %4094 }
 0x580   : > { %v4108_v44 = vsel %vm4106_vm7, %v4091_v26, %v4093_v25  ;;  %v4109_v14 = vsel %vm4106_vm7, %v4093_v25, %v4095_v54 }
 0x581   : > { %9583 = vmatprep.subr.msk.bf16.mxu0 %vm1384_vm12, %v4108_v44  ;;  %v4125_v32 = vsel %vm1384_vm12, %v4109_v14, 0 }
 0x582   : > { %4143 = vmatpush1.bf16.msra.mxu0 %v4119_v30  ;;  %v9599_v30 = vld [vmem:[%s13040_s5 + $0x30] sm:$0xf] }
 0x583   : > { %v4097_v41 = vpop.permute.xlu1 %4096  ;;  %v4311_v3 = vpop.permute.xlu0 %4310 }
 0x584   : > { %v4110_v2 = vsel %vm4106_vm7, %v4095_v54, %v4097_v41  ;;  %v4326_v10 = vsel %vm1380_vm13, %v4309_v19, %v4311_v3 }
 0x585   : > { %9584 = vmatmul.mubr.msk.bf16.vlgmr.msra.gmra.mrb[136].mxu0 %vm1380_vm13, %v9582_v61  ;;  %9585 = vmatprep.subr.msk.bf16.mxu1 %vm1384_vm12, %v4110_v2 }
 0x586   : > { %4184 = vmatpush1.bf16.msra.mxu1 %v4125_v32  ;;  %4256 = vmatprep.mubr.bf16.mxu0 %v13149_v43 }
 0x587   : > { %v4099_v20 = vpop.permute.xlu0 %4098  ;;  %v4101_v7 = vpop.permute.xlu1 %4100 }
 0x588   : > { %v4111_v60 = vsel %vm4106_vm7, %v4097_v41, %v4099_v20  ;;  %v4112_v21 = vsel %vm4106_vm7, %v4099_v20, %v4101_v7 }
 0x589   : > { %9586 = vmatmul.mubr.msk.bf16.vlgmr.msra.gmra.mrb[136].mxu1 %vm1380_vm13, %v9582_v61  ;;  %v4131_v33 = vsel %vm1384_vm12, %v4111_v60, 0  ;;  %9587 = vmatprep.subr.msk.bf16.mxu0 %vm1384_vm12, %v4112_v21 }
 0x58a   : > { %4297 = vmatprep.mubr.bf16.mxu1 %v13149_v43  ;;  %4225 = vmatpush1.bf16.msra.mxu0 %v4131_v33 }
 0x58b   : > { %v4103_v34 = vpop.permute.xlu0 %4102  ;;  %9591 = vmatprep.subr.msk.bf16.mxu0 %vm1384_vm12, %v4326_v10 }
 0x58c   : > { %v4113_v36 = vsel %vm4106_vm7, %v4101_v7, %v4103_v34 }
 0x58d   : > { %9588 = vmatmul.mubr.msk.bf16.vlgmr.msra.gmra.mrb[140].mxu0 %vm1380_vm13, %v9582_v61  ;;  %v4137_v8 = vsel %vm1384_vm12, %v4113_v36, 0 }
 0x58e   : > { %4361 = vmatpush1.bf16.msra.mxu0 %v4337_v49  ;;  %4392 = vmatprep.mubr.bf16.mxu0 %v13149_v43 }
 0x58f   : > { %v4315_v62 = vpop.permute.xlu0 %4314 }
 0x593   : > { %v4529_v1 = vpop.permute.xlu0 %4528 }
 0x595   : > { %9592 = vmatmul.mubr.msk.bf16.vlgmr.msra.gmra.mrb[144].mxu0 %vm1380_vm13, %v9581_v35 }
 0x596   : > { %v4105_v15 = vpop.permute.xlu1 %4104  ;;  %4474 = vmatprep.mubr.bf16.mxu0 %v13149_v43 }
 0x597   : > { %v4114_v40 = vsel %vm4106_vm7, %v4103_v34, %v4105_v15  ;;  %v4319_v38 = vpop.permute.xlu0 %4318 }
 0x598   : > { %9589 = vmatprep.subr.msk.bf16.mxu1 %vm1384_vm12, %v4114_v40 }
 0x599   : > { %4266 = vmatpush1.bf16.msra.mxu1 %v4137_v8 }
 0x59a   : > { %v4313_v13 = vpop.permute.xlu1 %4312 }
 0x59b   : > { %v4327_v42 = vsel %vm1380_vm13, %v4311_v3, %v4313_v13  ;;  %v4328_v4 = vsel %vm1380_vm13, %v4313_v13, %v4315_v62  ;;  %v4323_v56 = vpop.permute.xlu0 %4322 }
 0x59c   : > { %9590 = vmatmul.mubr.msk.bf16.vlgmr.msra.gmra.mrb[140].mxu1 %vm1380_vm13, %v9582_v61  ;;  %9593 = vmatprep.subr.msk.bf16.mxu1 %vm1384_vm12, %v4328_v4  ;;  %v4343_v55 = vsel %vm1384_vm12, %v4327_v42, 0 }
 0x59d   : > { %4402 = vmatpush1.bf16.msra.mxu1 %v4343_v55  ;;  %4433 = vmatprep.mubr.bf16.mxu1 %v13149_v43 }
 0x59e   : > { %v4317_v45 = vpop.permute.xlu1 %4316 }
 0x59f   : > { %v4329_v58 = vsel %vm1380_vm13, %v4315_v62, %v4317_v45  ;;  %v4330_v39 = vsel %vm1380_vm13, %v4317_v45, %v4319_v38  ;;  %v4533_v46 = vpop.permute.xlu0 %4532 }
 0x5a0   : > { %9595 = vmatprep.subr.msk.bf16.mxu0 %vm1384_vm12, %v4330_v39  ;;  %v4349_v24 = vsel %vm1384_vm12, %v4329_v58, 0 }
 0x5a1   : > { %4443 = vmatpush1.bf16.msra.mxu0 %v4349_v24  ;;  %v4984_v24 = vsel %vm1384_vm12, %v11540_v18, 0  ;;  %v9617_v18 = vld [vmem:[%s13040_s5 + $0x38] sm:$0xf] }
 0x5a2   : > { %v4321_v0 = vpop.permute.xlu1 %4320 }
 0x5a3   : > { %v4331_v52 = vsel %vm1380_vm13, %v4319_v38, %v4321_v0  ;;  %v4332_v59 = vsel %vm1380_vm13, %v4321_v0, %v4323_v56  ;;  %v4537_v51 = vpop.permute.xlu0 %4536 }
 0x5a4   : > { %9594 = vmatmul.mubr.msk.bf16.vlgmr.msra.gmra.mrb[144].mxu1 %vm1380_vm13, %v9581_v35  ;;  %9596 = vmatmul.mubr.msk.bf16.vlgmr.msra.gmra.mrb[148].mxu0 %vm1380_vm13, %v9581_v35  ;;  %v4355_v57 = vsel %vm1384_vm12, %v4331_v52, 0 }
 0x5a5   : > { %9597 = vmatprep.subr.msk.bf16.mxu1 %vm1384_vm12, %v4332_v59  ;;  %4515 = vmatprep.mubr.bf16.mxu1 %v13149_v43 }
 0x5a6   : > { %v4527_v22 = vpop.permute.xlu1 %4526  ;;  %4484 = vmatpush1.bf16.msra.mxu1 %v4355_v57  ;;  %4611 = vmatprep.mubr.bf16.mxu0 %v13149_v43 }
 0x5a7   : > { %v4541_v53 = vpop.permute.xlu0 %4540  ;;  %v4544_v19 = vsel %vm425_vm1, %v4527_v22, %v4529_v1 }
 0x5a8   : > { %v4556_v25 = vsel %vm1384_vm12, %v4544_v19, 0 }
 0x5aa   : > { %v4531_v26 = vpop.permute.xlu1 %4530 }
 0x5ab   : > { %v4545_v37 = vsel %vm425_vm1, %v4529_v1, %v4531_v26  ;;  %v4754_v54 = vpop.permute.xlu0 %4753  ;;  %v4546_v44 = vsel %vm425_vm1, %v4531_v26, %v4533_v46  ;;  %v9608_v1 = vld [vmem:[%s13040_s5 + $0x34] sm:$0xf]  ;;  %v5436_v26 = vld [vmem:[#allocation2 + $0x18] sm:$0xff] }
 0x5ac   : > { %9598 = vmatmul.mubr.msk.bf16.vlgmr.msra.gmra.mrb[148].mxu1 %vm1380_vm13, %v9581_v35  ;;  %9600 = vmatprep.subr.msk.bf16.mxu0 %vm1384_vm12, %v4545_v37  ;;  %v4562_v41 = vsel %vm1384_vm12, %v4546_v44, 0  ;;  %v11785_v37 = vpack.c.bf16 %v5436_v26, %v5436_v26 }
 0x5ad   : > { %4580 = vmatpush1.bf16.msra.mxu0 %v4556_v25  ;;  %4652 = vmatprep.mubr.bf16.mxu1 %v13149_v43 }
 0x5ae   : > { %v4535_v14 = vpop.permute.xlu1 %4534  ;;  %5668 = vrot.lane.b32.xlu1 %v11785_v37, %s10193_s8  ;;  %5451 = vrot.lane.b32.xlu0 %v11785_v37, %s10192_s29 }
 0x5af   : > { %v4547_v61 = vsel %vm425_vm1, %v4533_v46, %v4535_v14  ;;  %v4548_v3 = vsel %vm425_vm1, %v4535_v14, %v4537_v51  ;;  %v4758_v32 = vpop.permute.xlu0 %4757 }
 0x5b0   : > { %9601 = vmatmul.mubr.msk.bf16.vlgmr.msra.gmra.mrb[152].mxu0 %vm1380_vm13, %v9599_v30  ;;  %9602 = vmatprep.subr.msk.bf16.mxu1 %vm1384_vm12, %v4547_v61  ;;  %v4568_v7 = vsel %vm1384_vm12, %v4548_v3, 0 }
 0x5b1   : > { %4621 = vmatpush1.bf16.msra.mxu1 %v4562_v41  ;;  %4693 = vmatprep.mubr.bf16.mxu0 %v13149_v43 }
 0x5b2   : > { %v4539_v2 = vpop.permute.xlu1 %4538 }
 0x5b3   : > { %v4549_v20 = vsel %vm425_vm1, %v4537_v51, %v4539_v2  ;;  %v4550_v60 = vsel %vm425_vm1, %v4539_v2, %v4541_v53  ;;  %v4762_v10 = vpop.permute.xlu0 %4761 }
 0x5b4   : > { %9603 = vmatmul.mubr.msk.bf16.vlgmr.msra.gmra.mrb[152].mxu1 %vm1380_vm13, %v9599_v30  ;;  %9604 = vmatprep.subr.msk.bf16.mxu0 %vm1384_vm12, %v4549_v20  ;;  %v4574_v17 = vsel %vm1384_vm12, %v4550_v60, 0 }
 0x5b5   : > { %4662 = vmatpush1.bf16.msra.mxu0 %v4568_v7  ;;  %4734 = vmatprep.mubr.bf16.mxu1 %v13149_v43 }
 0x5b6   : > { %v4543_v21 = vpop.permute.xlu1 %4542 }
 0x5b7   : > { %v4551_v33 = vsel %vm425_vm1, %v4541_v53, %v4543_v21  ;;  %v4766_v15 = vpop.permute.xlu0 %4765 }
 0x5b8   : > { %9605 = vmatmul.mubr.msk.bf16.vlgmr.msra.gmra.mrb[156].mxu0 %vm1380_vm13, %v9599_v30  ;;  %9606 = vmatprep.subr.msk.bf16.mxu1 %vm1384_vm12, %v4551_v33 }
 0x5b9   : > { %4703 = vmatpush1.bf16.msra.mxu1 %v4574_v17  ;;  %4838 = vmatprep.mubr.bf16.mxu0 %v13149_v43 }
 0x5ba   : > { %v4756_v34 = vpop.permute.xlu1 %4755 }
 0x5bb   : > { %v4771_v49 = vsel %vm1811_vm14, %v4754_v54, %v4756_v34  ;;  %v4772_v62 = vsel %vm1811_vm14, %v4756_v34, %v4758_v32  ;;  %v4770_v55 = vpop.permute.xlu0 %4769 }
 0x5bc   : > { %9607 = vmatmul.mubr.msk.bf16.vlgmr.msra.gmra.mrb[156].mxu1 %vm1380_vm13, %v9599_v30  ;;  %9609 = vmatprep.subr.msk.bf16.mxu0 %vm1384_vm12, %v4772_v62  ;;  %v4783_v36 = vsel %vm1384_vm12, %v4771_v49, 0 }
 0x5bd   : > { %4807 = vmatpush1.bf16.msra.mxu0 %v4783_v36  ;;  %4879 = vmatprep.mubr.bf16.mxu1 %v13149_v43 }
 0x5be   : > { %v4760_v35 = vpop.permute.xlu1 %4759 }
 0x5bf   : > { %v4773_v8 = vsel %vm1811_vm14, %v4758_v32, %v4760_v35  ;;  %v4774_v40 = vsel %vm1811_vm14, %v4760_v35, %v4762_v10 }
 0x5c0   : > { %9610 = vmatmul.mubr.msk.bf16.vlgmr.msra.gmra.mrb[160].mxu0 %vm1380_vm13, %v9608_v1  ;;  %9611 = vmatprep.subr.msk.bf16.mxu1 %vm1384_vm12, %v4774_v40  ;;  %v4789_v38 = vsel %vm1384_vm12, %v4773_v8, 0 }
 0x5c1   : > { %4848 = vmatpush1.bf16.msra.mxu1 %v4789_v38  ;;  %4920 = vmatprep.mubr.bf16.mxu0 %v13149_v43 }
 0x5c2   : > { %v4764_v13 = vpop.permute.xlu1 %4763 }
 0x5c3   : > { %v4775_v42 = vsel %vm1811_vm14, %v4762_v10, %v4764_v13  ;;  %v4776_v4 = vsel %vm1811_vm14, %v4764_v13, %v4766_v15 }
 0x5c4   : > { %9612 = vmatmul.mubr.msk.bf16.vlgmr.msra.gmra.mrb[160].mxu1 %vm1380_vm13, %v9608_v1  ;;  %9613 = vmatprep.subr.msk.bf16.mxu0 %vm1384_vm12, %v4776_v4  ;;  %v4795_v56 = vsel %vm1384_vm12, %v4775_v42, 0 }
 0x5c5   : > { %4889 = vmatpush1.bf16.msra.mxu0 %v4795_v56  ;;  %4961 = vmatprep.mubr.bf16.mxu1 %v13149_v43 }
 0x5c6   : > { %v4768_v45 = vpop.permute.xlu1 %4767  ;;  %9618 = vmatprep.subr.msk.bf16.mxu0 %vm1384_vm12, %v11552_v16  ;;  %v4990_v16 = vsel %vm1384_vm12, %v11554_v31, 0  ;;  %v5002_v31 = vsel %vm1384_vm12, %v11587_v12, 0 }
 0x5c7   : > { %v4777_v58 = vsel %vm1811_vm14, %v4766_v15, %v4768_v45  ;;  %v4778_v39 = vsel %vm1811_vm14, %v4768_v45, %v4770_v55 }
 0x5c8   : > { %9614 = vmatmul.mubr.msk.bf16.vlgmr.msra.gmra.mrb[164].mxu0 %vm1380_vm13, %v9608_v1  ;;  %9615 = vmatprep.subr.msk.bf16.mxu1 %vm1384_vm12, %v4778_v39  ;;  %v4801_v46 = vsel %vm1384_vm12, %v4777_v58, 0 }
 0x5c9   : > { %4930 = vmatpush1.bf16.msra.mxu1 %v4801_v46  ;;  %5008 = vmatpush1.bf16.msra.mxu0 %v4984_v24 }
 0x5ca   : > { %9620 = vmatprep.subr.msk.bf16.mxu1 %vm1384_vm12, %v11565_v9  ;;  %9622 = vmatprep.subr.msk.bf16.mxu0 %vm1384_vm12, %v11580_v11  ;;  %v4996_v9 = vsel %vm1384_vm12, %v11578_v23, 0 }
 0x5cb   : > { %5039 = vmatprep.mubr.bf16.mxu0 %v13149_v43 }
 0x5cc   : > { %9616 = vmatmul.mubr.msk.bf16.vlgmr.msra.gmra.mrb[164].mxu1 %vm1380_vm13, %v9608_v1 }
 0x5cd   : > { %5049 = vmatpush1.bf16.msra.mxu1 %v4990_v16  ;;  %5080 = vmatprep.mubr.bf16.mxu1 %v13149_v43 }
 0x5ce   : > { %9624 = vmatprep.subr.msk.bf16.mxu1 %vm1384_vm12, %v11599_v63 }
 0x5d0   : > { %9619 = vmatmul.mubr.msk.bf16.vlgmr.msra.gmra.mrb[168].mxu0 %vm1380_vm13, %v9617_v18 }
 0x5d1   : > { %5090 = vmatpush1.bf16.msra.mxu0 %v4996_v9  ;;  %5121 = vmatprep.mubr.bf16.mxu0 %v13149_v43 }
 0x5d4   : > { %9621 = vmatmul.mubr.msk.bf16.vlgmr.msra.gmra.mrb[168].mxu1 %vm1380_vm13, %v9617_v18 }
 0x5d5   : > { %5131 = vmatpush1.bf16.msra.mxu1 %v5002_v31  ;;  %5162 = vmatprep.mubr.bf16.mxu1 %v13149_v43 }
 0x5d8   : > { %9623 = vmatmul.mubr.msk.bf16.vlgmr.msra.gmra.mrb[172].mxu0 %vm1380_vm13, %v9617_v18 }
 0x5d9   : > { %5536 = vmatprep.mubr.bf16.mxu0 %v13149_v43 }
 0x5dc   : > { %9625 = vmatmul.mubr.msk.bf16.vlgmr.msra.gmra.mrb[172].mxu1 %vm1380_vm13, %v9617_v18 }
 0x5dd   : > { %5577 = vmatprep.mubr.bf16.mxu1 %v13149_v43 }
 0x658   : > { %v4176_v23 = vpop.f32.mrb[136].mxu0 }
 0x659   : > { %v4178_v11 = vpop.f32.mrb[137].mxu0 }
 0x65a   : > { %v4180_v63 = vpop.f32.mrb[138].mxu0 }
 0x65b   : > { %v4181_v0 = vpop.f32.mrb[139].mxu0 }
 0x65c   : > { %v4217_v52 = vpop.f32.mrb[136].mxu1 }
 0x65d   : > { %v4219_v59 = vpop.f32.mrb[137].mxu1 }
 0x65e   : > { %v4221_v51 = vpop.f32.mrb[138].mxu1 }
 0x65f   : > { %v4222_v57 = vpop.f32.mrb[139].mxu1 }
 0x660   : > { %v4258_v12 = vpop.f32.mrb[140].mxu0 }
 0x661   : > { %v4260_v22 = vpop.f32.mrb[141].mxu0 }
 0x662   : > { %v4262_v53 = vpop.f32.mrb[142].mxu0 }
 0x663   : > { %v4263_v19 = vpop.f32.mrb[143].mxu0 }
 0x668   : > { %v4394_v25 = vpop.f32.mrb[144].mxu0 }
 0x669   : > { %v4395_v54 = vadd.f32 %v4394_v25, %v4176_v23  ;;  %v4396_v44 = vpop.f32.mrb[145].mxu0 }
 0x66a   : > { %v4397_v30 = vadd.f32 %v4396_v44, %v4178_v11  ;;  %v4398_v14 = vpop.f32.mrb[146].mxu0 }
 0x66b   : > { %v4399_v61 = vpop.f32.mrb[147].mxu0 }
 0x66f   : > { %v4299_v41 = vpop.f32.mrb[140].mxu1 }
 0x670   : > { %v4301_v3 = vpop.f32.mrb[141].mxu1 }
 0x671   : > { %v4303_v2 = vpop.f32.mrb[142].mxu1 }
 0x672   : > { %v4304_v32 = vpop.f32.mrb[143].mxu1 }
 0x677   : > { %v4435_v20 = vpop.f32.mrb[144].mxu1  ;;  %v4476_v7 = vpop.f32.mrb[148].mxu0 }
 0x678   : > { %v4436_v60 = vadd.f32 %v4435_v20, %v4217_v52  ;;  %v4477_v21 = vadd.f32 %v4476_v7, %v4258_v12  ;;  %v4437_v33 = vpop.f32.mrb[145].mxu1  ;;  %v4478_v17 = vpop.f32.mrb[149].mxu0 }
 0x679   : > { %v4438_v10 = vadd.f32 %v4437_v33, %v4219_v59  ;;  %v4479_v34 = vadd.f32 %v4478_v17, %v4260_v22  ;;  %v4439_v49 = vpop.f32.mrb[146].mxu1  ;;  %v4480_v62 = vpop.f32.mrb[150].mxu0 }
 0x67a   : > { %v4440_v36 = vpop.f32.mrb[147].mxu1  ;;  %v4481_v1 = vpop.f32.mrb[151].mxu0 }
 0x67f   : > { %v4517_v35 = vpop.f32.mrb[148].mxu1 }
 0x680   : > { %v4518_v15 = vadd.f32 %v4517_v35, %v4299_v41  ;;  %v4519_v8 = vpop.f32.mrb[149].mxu1 }
 0x681   : > { %v4520_v40 = vadd.f32 %v4519_v8, %v4301_v3  ;;  %v4521_v38 = vpop.f32.mrb[150].mxu1 }
 0x682   : > { %v4522_v13 = vpop.f32.mrb[151].mxu1 }
 0x683   : > { %v4613_v42 = vpop.f32.mrb[152].mxu0 }
 0x684   : > { %v4743_v4 = vadd.f32 %v4613_v42, %v4395_v54  ;;  %v4615_v56 = vpop.f32.mrb[153].mxu0 }
 0x685   : > { %v4744_v55 = vadd.f32 %v4615_v56, %v4397_v30  ;;  %v4617_v45 = vpop.f32.mrb[154].mxu0 }
 0x686   : > { %v4618_v58 = vpop.f32.mrb[155].mxu0 }
 0x687   : > { %v4654_v39 = vpop.f32.mrb[152].mxu1 }
 0x688   : > { %v4745_v46 = vadd.f32 %v4654_v39, %v4436_v60  ;;  %v4656_v24 = vpop.f32.mrb[153].mxu1 }
 0x689   : > { %v4746_v16 = vadd.f32 %v4656_v24, %v4438_v10  ;;  %v4658_v18 = vpop.f32.mrb[154].mxu1 }
 0x68a   : > { %v4659_v9 = vpop.f32.mrb[155].mxu1 }
 0x68b   : > { %v4695_v31 = vpop.f32.mrb[156].mxu0 }
 0x68c   : > { %v4747_v23 = vadd.f32 %v4695_v31, %v4477_v21  ;;  %v4697_v11 = vpop.f32.mrb[157].mxu0 }
 0x68d   : > { %v4748_v63 = vadd.f32 %v4697_v11, %v4479_v34  ;;  %v4699_v0 = vpop.f32.mrb[158].mxu0 }
 0x68e   : > { %v4700_v52 = vpop.f32.mrb[159].mxu0 }
 0x68f   : > { %v4736_v59 = vpop.f32.mrb[156].mxu1 }
 0x690   : > { %v4749_v51 = vadd.f32 %v4736_v59, %v4518_v15  ;;  %v4738_v57 = vpop.f32.mrb[157].mxu1 }
 0x691   : > { %v4750_v12 = vadd.f32 %v4738_v57, %v4520_v40  ;;  %v4740_v22 = vpop.f32.mrb[158].mxu1  ;;  %v11791_v40 = vpop.permute.xlu1 %5183 }
 0x692   : > { %v4741_v53 = vpop.f32.mrb[159].mxu1 }
 0x693   : > { %v4840_v19 = vpop.f32.mrb[160].mxu0 }
 0x694   : > { %v4970_v26 = vadd.f32 %v4840_v19, %v4743_v4  ;;  %v4842_v25 = vpop.f32.mrb[161].mxu0 }
 0x695   : > { %v4971_v54 = vadd.f32 %v4842_v25, %v4744_v55  ;;  %v4844_v44 = vpop.f32.mrb[162].mxu0 }
 0x696   : > { %v4845_v30 = vpop.f32.mrb[163].mxu0 }
 0x697   : > { %v4881_v14 = vpop.f32.mrb[160].mxu1 }
 0x698   : > { %v4972_v61 = vadd.f32 %v4881_v14, %v4745_v46  ;;  %v4883_v41 = vpop.f32.mrb[161].mxu1 }
 0x699   : > { %v4973_v3 = vadd.f32 %v4883_v41, %v4746_v16  ;;  %v4885_v2 = vpop.f32.mrb[162].mxu1 }
 0x69a   : > { %v4886_v32 = vpop.f32.mrb[163].mxu1 }
 0x69b   : > { %v4922_v20 = vpop.f32.mrb[164].mxu0 }
 0x69c   : > { %v4974_v7 = vadd.f32 %v4922_v20, %v4747_v23  ;;  %v4924_v60 = vpop.f32.mrb[165].mxu0 }
 0x69d   : > { %v4975_v21 = vadd.f32 %v4924_v60, %v4748_v63  ;;  %v4926_v33 = vpop.f32.mrb[166].mxu0 }
 0x69e   : > { %v4927_v17 = vpop.f32.mrb[167].mxu0 }
 0x69f   : > { %v4963_v10 = vpop.f32.mrb[164].mxu1 }
 0x6a0   : > { %v4976_v34 = vadd.f32 %v4963_v10, %v4749_v51  ;;  %v4965_v49 = vpop.f32.mrb[165].mxu1 }
 0x6a1   : > { %v4977_v62 = vadd.f32 %v4965_v49, %v4750_v12  ;;  %v4967_v36 = vpop.f32.mrb[166].mxu1 }
 0x6a2   : > { %v4968_v1 = vpop.f32.mrb[167].mxu1 }
 0x6a3   : > { %v5041_v35 = vpop.f32.mrb[168].mxu0 }
 0x6a4   : > { %v5171_v15 = vadd.f32 %v5041_v35, %v4970_v26  ;;  %v5043_v8 = vpop.f32.mrb[169].mxu0 }
 0x6a5   : > { %v5172_v38 = vadd.f32 %v5043_v8, %v4971_v54  ;;  %v5045_v13 = vpop.f32.mrb[170].mxu0 }
 0x6a6   : > { %v5186_v42 = vadd.f32 %v11791_v40, %v5171_v15  ;;  %v5046_v4 = vpop.f32.mrb[171].mxu0 }
 0x6a7   : > { %v5187_v56 = vadd.f32 %v11791_v40, %v5172_v38  ;;  %v5082_v55 = vpop.f32.mrb[168].mxu1 }
 0x6a8   : > { %v11795_v45 = vmul.f32 0.70710677, %v5186_v42  ;;  %v5173_v58 = vadd.f32 %v5082_v55, %v4972_v61  ;;  %v5084_v39 = vpop.f32.mrb[169].mxu1 }
 0x6a9   : > { %v11797_v46 = vmul.f32 0.70710677, %v5187_v56  ;;  %v5174_v24 = vadd.f32 %v5084_v39, %v4973_v3  ;;  %v5086_v16 = vpop.f32.mrb[170].mxu1 }
 0x6aa   : > { %v5211_v18 = vand.u32 2147483647, %v11795_v45  ;;  %v5188_v9 = vadd.f32 %v11791_v40, %v5173_v58  ;;  %v5087_v31 = vpop.f32.mrb[171].mxu1  ;;  %vm5371_vm8 = vcmp.lt.f32.partialorder %v11795_v45, 0.0 }
 0x6ab   : > { %v5212_v23 = vand.u32 2147483647, %v11797_v46  ;;  %v11803_v11 = vadd.f32 %v11791_v40, %v5174_v24  ;;  %v5123_v63 = vpop.f32.mrb[172].mxu0  ;;  %vm5372_vm9 = vcmp.lt.f32.partialorder %v11797_v46, 0.0 }
 0x6ac   : > { %v5219_v0 = vmul.f32 0.3275911, %v5211_v18  ;;  %v11805_v52 = vmul.f32 0.70710677, %v5188_v9  ;;  %v5125_v22 = vpop.f32.mrb[173].mxu0  ;;  %v5323_v30 = vsub.f32 0.0, %v5211_v18  ;;  %v5175_v2 = vadd.f32 %v5123_v63, %v4974_v7 }
 0x6ad   : > { %v5220_v59 = vmul.f32 0.3275911, %v5212_v23  ;;  %v11808_v51 = vmul.f32 0.70710677, %v11803_v11  ;;  %v5127_v25 = vpop.f32.mrb[174].mxu0  ;;  %v5324_v41 = vsub.f32 0.0, %v5212_v23  ;;  %v5176_v33 = vadd.f32 %v5125_v22, %v4975_v21 }
 0x6ae   : > { %v5227_v57 = vadd.f32 1.0, %v5219_v0  ;;  %v5213_v12 = vand.u32 2147483647, %v11805_v52  ;;  %v5128_v61 = vpop.f32.mrb[175].mxu0  ;;  %v11813_v10 = vadd.f32 %v11791_v40, %v5175_v2  ;;  %v5331_v36 = vmul.f32 %v5323_v30, %v5211_v18 }
 0x6af   : > { %v5228_v53 = vadd.f32 1.0, %v5220_v59  ;;  %v5214_v19 = vand.u32 2147483647, %v11808_v51  ;;  %v5164_v26 = vpop.f32.mrb[172].mxu1  ;;  %v11816_v1 = vadd.f32 %v11791_v40, %v5176_v33  ;;  %v5332_v15 = vmul.f32 %v5324_v41, %v5212_v23 }
 0x6b0   : > { %9978 = vrcp.f32 %v5227_v57  ;;  %v5221_v54 = vmul.f32 0.3275911, %v5213_v12  ;;  %v5166_v44 = vpop.f32.mrb[173].mxu1  ;;  %v5325_v20 = vsub.f32 0.0, %v5213_v12  ;;  %v5177_v49 = vadd.f32 %v5164_v26, %v4976_v34 }
 0x6b1   : > { %9980 = vrcp.f32 %v5228_v53  ;;  %v5222_v14 = vmul.f32 0.3275911, %v5214_v19  ;;  %v5168_v32 = vpop.f32.mrb[174].mxu1  ;;  %v5178_v35 = vadd.f32 %v5166_v44, %v4977_v62  ;;  %v11819_v8 = vmul.f32 0.70710677, %v11813_v10 }
 0x6b2   : > { %v5229_v3 = vadd.f32 1.0, %v5221_v54  ;;  %v5169_v17 = vpop.f32.mrb[175].mxu1  ;;  %v11822_v7 = vadd.f32 %v11791_v40, %v5177_v49  ;;  %v11824_v21 = vmul.f32 0.5, %v5186_v42  ;;  %v5333_v38 = vmul.f32 %v5325_v20, %v5213_v12 }
 0x6b3   : > { %v5230_v60 = vadd.f32 1.0, %v5222_v14  ;;  %v11827_v13 = vmul.f32 0.70710677, %v11816_v1  ;;  %v11829_v34 = vmul.f32 0.5, %v5187_v56  ;;  %v5326_v4 = vsub.f32 0.0, %v5214_v19 }
 0x6b4   : > { %9982 = vrcp.f32 %v5229_v3  ;;  %v5215_v55 = vand.u32 2147483647, %v11819_v8  ;;  %v11833_v62 = vmul.f32 0.70710677, %v11822_v7  ;;  %v5339_v58 = vmul.f32 1.442695, %v5331_v36 }
 0x6b5   : > { %9984 = vrcp.f32 %v5230_v60  ;;  %v11835_v39 = vmul.f32 0.5, %v5188_v9  ;;  %v5216_v24 = vand.u32 2147483647, %v11827_v13  ;;  %v11839_v42 = vadd.f32 %v11791_v40, %v5178_v35 }
 0x6b6   : > { %v5341_v18 = vmul.f32 1.442695, %v5332_v15  ;;  %v5223_v31 = vmul.f32 0.3275911, %v5215_v55  ;;  %v5217_v56 = vand.u32 2147483647, %v11833_v62  ;;  %v5334_v57 = vmul.f32 %v5326_v4, %v5214_v19 }
 0x6b7   : > { %v5343_v0 = vmul.f32 1.442695, %v5333_v38  ;;  %v5224_v59 = vmul.f32 0.3275911, %v5216_v24  ;;  %9986 = vpow2.f32 %v5339_v58  ;;  %v11849_v26 = vmul.f32 0.70710677, %v11839_v42 }
 0x6b8   : > { %v5231_v12 = vadd.f32 1.0, %v5223_v31  ;;  %v5225_v22 = vmul.f32 0.3275911, %v5217_v56  ;;  %v5327_v44 = vsub.f32 0.0, %v5215_v55  ;;  %v5328_v41 = vsub.f32 0.0, %v5216_v24 }
 0x6b9   : > { %v5232_v40 = vadd.f32 1.0, %v5224_v59  ;;  %v5345_v32 = vmul.f32 1.442695, %v5334_v57  ;;  %v5329_v20 = vsub.f32 0.0, %v5217_v56  ;;  %v5218_v17 = vand.u32 2147483647, %v11849_v26 }
 0x6ba   : > { %v11841_v16 = vpop.eup %9978  ;;  %9988 = vrcp.f32 %v5231_v12  ;;  %v5233_v30 = vadd.f32 1.0, %v5225_v22  ;;  %v5335_v35 = vmul.f32 %v5327_v44, %v5215_v55  ;;  %v5336_v4 = vmul.f32 %v5328_v41, %v5216_v24 }
 0x6bb   : > { %v11844_v23 = vpop.eup %9980  ;;  %v5251_v63 = vmul.f32 1.0614054, %v11841_v16  ;;  %9990 = vrcp.f32 %v5232_v40  ;;  %v5226_v58 = vmul.f32 0.3275911, %v5218_v17  ;;  %v5337_v59 = vmul.f32 %v5329_v20, %v5217_v56 }
 0x6bc   : > { %v5252_v9 = vmul.f32 1.0614054, %v11844_v23  ;;  %9992 = vpow2.f32 %v5341_v18  ;;  %v5349_v44 = vmul.f32 1.442695, %v5336_v4  ;;  %vm5373_vm10 = vcmp.lt.f32.partialorder %v11805_v52, 0.0 }
 0x6bd   : > { %v5259_v53 = vadd.f32 -1.4531521, %v5251_v63  ;;  %9994 = vrcp.f32 %v5233_v30  ;;  %v11864_v63 = vmul.f32 0.5, %v11803_v11  ;;  %v5234_v12 = vadd.f32 1.0, %v5226_v58 }
 0x6be   : > { %v11851_v25 = vpop.eup %9982  ;;  %v5260_v54 = vadd.f32 -1.4531521, %v5252_v9  ;;  %9996 = vpow2.f32 %v5343_v0  ;;  %v5330_v0 = vsub.f32 0.0, %v5218_v17  ;;  %vm5374_vm11 = vcmp.lt.f32.partialorder %v11808_v51, 0.0 }
 0x6bf   : > { %v11853_v14 = vpop.eup %9984  ;;  %v5267_v61 = vmul.f32 %v11841_v16, %v5259_v53  ;;  %v5253_v19 = vmul.f32 1.0614054, %v11851_v25  ;;  %9998 = vpow2.f32 %v5345_v32  ;;  %v5347_v53 = vmul.f32 1.442695, %v5335_v35 }
 0x6c0   : > { %v5268_v3 = vmul.f32 %v11844_v23, %v5260_v54  ;;  %v5254_v2 = vmul.f32 1.0614054, %v11853_v14  ;;  %10000 = vrcp.f32 %v5234_v12  ;;  %vm5375_vm15 = vcmp.lt.f32.partialorder %v11819_v8, 0.0 }
 0x6c1   : > { %v5275_v60 = vadd.f32 1.4214138, %v5267_v61  ;;  %v5261_v33 = vadd.f32 -1.4531521, %v5253_v19  ;;  %v9987_v40 = vpop.eup %9986  ;;  %v5351_v61 = vmul.f32 1.442695, %v5337_v59  ;;  %10002 = vpow2.f32 %v5347_v53 }
 0x6c2   : > { %v5276_v49 = vadd.f32 1.4214138, %v5268_v3  ;;  %v5262_v36 = vadd.f32 -1.4531521, %v5254_v2  ;;  %10004 = vpow2.f32 %v5349_v44  ;;  %vm5376_vm0 = vcmp.lt.f32.partialorder %v11827_v13, 0.0 }
 0x6c3   : > { %v5283_v15 = vmul.f32 %v11841_v16, %v5275_v60  ;;  %v5269_v38 = vmul.f32 %v11851_v25, %v5261_v33  ;;  %10006 = vpow2.f32 %v5351_v61  ;;  %v5200_v8 = vmul.f32 0.5, %v11816_v1 }
 0x6c4   : > { %v5284_v31 = vmul.f32 %v11844_v23, %v5276_v49  ;;  %v5270_v18 = vmul.f32 %v11853_v14, %v5262_v36  ;;  %v11869_v11 = vpop.eup %9988  ;;  %vm5377_vm3 = vcmp.lt.f32.partialorder %v11833_v62, 0.0  ;;  %v13184_v62 = vld [vmem:[#allocation68_spill] sm:$0xff]  ;;  %vm5378_vm4 = vcmp.lt.f32.partialorder %v11849_v26, 0.0 }
 0x6c5   : > { %v5291_v9 = vadd.f32 -0.28449672, %v5283_v15  ;;  %v5277_v57 = vadd.f32 1.4214138, %v5269_v38  ;;  %v11873_v19 = vpop.eup %9990  ;;  %v5255_v2 = vmul.f32 1.0614054, %v11869_v11 }
 0x6c6   : > { %v5292_v55 = vadd.f32 -0.28449672, %v5284_v31  ;;  %v5278_v22 = vadd.f32 1.4214138, %v5270_v18  ;;  %v5256_v60 = vmul.f32 1.0614054, %v11873_v19  ;;  %v9993_v33 = vpop.eup %9992  ;;  %v5338_v31 = vmul.f32 %v5330_v0, %v5218_v17 }
 0x6c7   : > { %v5299_v24 = vmul.f32 %v11841_v16, %v5291_v9  ;;  %v5285_v54 = vmul.f32 %v11851_v25, %v5277_v57  ;;  %v5263_v35 = vadd.f32 -1.4531521, %v5255_v2  ;;  %v11881_v15 = vpop.eup %9994 }
 0x6c8   : > { %v5300_v30 = vmul.f32 %v11844_v23, %v5292_v55  ;;  %v5286_v56 = vmul.f32 %v11853_v14, %v5278_v22  ;;  %v5264_v58 = vadd.f32 -1.4531521, %v5256_v60  ;;  %v9997_v22 = vpop.eup %9996 }
 0x6c9   : > { %v5307_v41 = vadd.f32 0.2548296, %v5299_v24  ;;  %v5293_v3 = vadd.f32 -0.28449672, %v5285_v54  ;;  %v5271_v9 = vmul.f32 %v11869_v11, %v5263_v35  ;;  %v9999_v24 = vpop.eup %9998 }
 0x6ca   : > { %v5308_v32 = vadd.f32 0.2548296, %v5300_v30  ;;  %v5294_v20 = vadd.f32 -0.28449672, %v5286_v56  ;;  %v5272_v55 = vmul.f32 %v11873_v19, %v5264_v58  ;;  %v5353_v56 = vmul.f32 1.442695, %v5338_v31  ;;  %v11892_v0 = vpop.eup %10000 }
 0x6cb   : > { %v5315_v49 = vmul.f32 %v11841_v16, %v5307_v41  ;;  %v5301_v36 = vmul.f32 %v11851_v25, %v5293_v3  ;;  %v5257_v16 = vmul.f32 1.0614054, %v11881_v15  ;;  %v5279_v17 = vadd.f32 1.4214138, %v5271_v9  ;;  %v10003_v35 = vpop.eup %10002 }
 0x6cc   : > { %v5316_v38 = vmul.f32 %v11844_v23, %v5308_v32  ;;  %v5302_v4 = vmul.f32 %v11853_v14, %v5294_v20  ;;  %v5280_v30 = vadd.f32 1.4214138, %v5272_v55  ;;  %v5258_v60 = vmul.f32 1.0614054, %v11892_v0 }
 0x6cd   : > { %v5355_v18 = vmul.f32 %v9987_v40, %v5315_v49  ;;  %v5309_v59 = vadd.f32 0.2548296, %v5301_v36  ;;  %v5265_v40 = vadd.f32 -1.4531521, %v5257_v16  ;;  %v5287_v61 = vmul.f32 %v11869_v11, %v5279_v17 }
 0x6ce   : > { %v5356_v57 = vmul.f32 %v9993_v33, %v5316_v38  ;;  %v5310_v12 = vadd.f32 0.2548296, %v5302_v4  ;;  %v5288_v20 = vmul.f32 %v11873_v19, %v5280_v30  ;;  %10008 = vpow2.f32 %v5353_v56 }
 0x6cf   : > { %v5363_v53 = vsub.f32 1.0, %v5355_v18  ;;  %v5317_v23 = vmul.f32 %v11851_v25, %v5309_v59  ;;  %v5273_v2 = vmul.f32 %v11881_v15, %v5265_v40  ;;  %v5295_v49 = vadd.f32 -0.28449672, %v5287_v61  ;;  %v10005_v18 = vpop.eup %10004 }
 0x6d0   : > { %v5364_v54 = vsub.f32 1.0, %v5356_v57  ;;  %v5318_v44 = vmul.f32 %v11853_v14, %v5310_v12  ;;  %v5296_v31 = vadd.f32 -0.28449672, %v5288_v20  ;;  %v10007_v40 = vpop.eup %10006 }
 0x6d1   : > { %v5379_v41 = vsub.f32 0.0, %v5363_v53  ;;  %v5357_v3 = vmul.f32 %v9997_v22, %v5317_v23  ;;  %v5281_v36 = vadd.f32 1.4214138, %v5273_v2  ;;  %v5303_v16 = vmul.f32 %v11869_v11, %v5295_v49 }
 0x6d2   : > { %v5380_v32 = vsub.f32 0.0, %v5364_v54  ;;  %v5358_v25 = vmul.f32 %v9999_v24, %v5318_v44  ;;  %v5304_v55 = vmul.f32 %v11873_v19, %v5296_v31  ;;  %v5266_v22 = vadd.f32 -1.4531521, %v5258_v60  ;;  %v13174_v24 = vld [vmem:[#allocation32_spill] sm:$0xff] }
 0x6d3   : > { %v5387_v33 = vsel %vm5371_vm8, %v5379_v41, %v5363_v53  ;;  %v5365_v14 = vsub.f32 1.0, %v5357_v3  ;;  %v5289_v57 = vmul.f32 %v11881_v15, %v5281_v36  ;;  %v5311_v23 = vadd.f32 0.2548296, %v5303_v16 }
 0x6d4   : > { %v5395_v38 = vadd.f32 1.0, %v5387_v33  ;;  %v5388_v4 = vsel %vm5372_vm9, %v5380_v32, %v5364_v54  ;;  %v5366_v58 = vsub.f32 1.0, %v5358_v25  ;;  %v5312_v41 = vadd.f32 0.2548296, %v5304_v55  ;;  %v13176_v32 = vld [vmem:[#allocation36_spill] sm:$0xff]  ;;  %v13177_v33 = vld [vmem:[#allocation38_spill] sm:$0xff] }
 0x6d5   : > { %v5396_v59 = vadd.f32 1.0, %v5388_v4  ;;  %v5381_v9 = vsub.f32 0.0, %v5365_v14  ;;  %v5297_v17 = vadd.f32 -0.28449672, %v5289_v57  ;;  %v5319_v2 = vmul.f32 %v11869_v11, %v5311_v23  ;;  %v13178_v4 = vld [vmem:[#allocation33_spill] sm:$0xff] }
 0x6d6   : > { %v5403_v45 = vmul.f32 %v5395_v38, %v11824_v21  ;;  %v5382_v12 = vsub.f32 0.0, %v5366_v58  ;;  %v13175_v21 = vld [vmem:[#allocation34_spill] sm:$0xff]  ;;  %v5320_v20 = vmul.f32 %v11873_v19, %v5312_v41  ;;  %v5274_v60 = vmul.f32 %v11892_v0, %v5266_v22  ;;  %v13180_v19 = vld [vmem:[#allocation37_spill] sm:$0xff] }
 0x6d7   : > { %v5404_v53 = vmul.f32 %v5396_v59, %v11829_v34  ;;  %v5389_v46 = vsel %vm5373_vm10, %v5381_v9, %v5365_v14  ;;  %v5305_v34 = vmul.f32 %v11881_v15, %v5297_v17  ;;  %v5359_v49 = vmul.f32 %v10003_v35, %v5319_v2  ;;  %v13179_v59 = vld [vmem:[#allocation35_spill] sm:$0xff] }
 0x6d8   : > { %v5411_v54 = vmul.f32 %v5403_v45, %v13174_v24  ;;  %v5397_v44 = vadd.f32 1.0, %v5389_v46  ;;  %v5390_v30 = vsel %vm5374_vm11, %v5382_v12, %v5366_v58  ;;  %v5360_v58 = vmul.f32 %v10005_v18, %v5320_v20  ;;  %v10009_v1 = vpop.eup %10008 }
 0x6d9   : > { %v5412_v3 = vmul.f32 %v5404_v53, %v13175_v21  ;;  %v5398_v61 = vadd.f32 1.0, %v5390_v30  ;;  %v5313_v36 = vadd.f32 0.2548296, %v5305_v34  ;;  %v5282_v31 = vadd.f32 1.4214138, %v5274_v60 }
 0x6da   : > { %v5419_v52 = vadd.f32 %v5411_v54, %v13176_v32  ;;  %v5405_v25 = vmul.f32 %v5397_v44, %v11835_v39  ;;  %v5367_v16 = vsub.f32 1.0, %v5359_v49  ;;  %v5368_v45 = vsub.f32 1.0, %v5360_v58  ;;  %v13187_v58 = vld [vmem:[#allocation69_spill] sm:$0xff] }
 0x6db   : > { %v5420_v14 = vadd.f32 %v5412_v3, %v13177_v33  ;;  %v5406_v51 = vmul.f32 %v5398_v61, %v11864_v63  ;;  %v5321_v39 = vmul.f32 %v11881_v15, %v5313_v36  ;;  %v5290_v12 = vmul.f32 %v11892_v0, %v5282_v31  ;;  %v13181_v63 = vld [vmem:[#allocation39_spill] sm:$0xff]  ;;  %v13182_v61 = vld [vmem:[#allocation64_spill] sm:$0xff] }
 0x6dc   : > { %v11921_v38 = vpack.c.bf16 %v5419_v52, %v5419_v52  ;;  %v5413_v11 = vmul.f32 %v5405_v25, %v13178_v4  ;;  %v5383_v18 = vsub.f32 0.0, %v5367_v16  ;;  %v5384_v56 = vsub.f32 0.0, %v5368_v45  ;;  %v13183_v25 = vld [vmem:[#allocation66_spill] sm:$0xff] }
 0x6dd   : > { %v5414_v9 = vmul.f32 %v5406_v51, %v13179_v59  ;;  %v5361_v55 = vmul.f32 %v10007_v40, %v5321_v39  ;;  %v11934_v22 = vpack.c.bf16 %v5420_v14, %v5420_v14  ;;  %v5298_v53 = vadd.f32 -0.28449672, %v5290_v12  ;;  %v13185_v51 = vld [vmem:[#allocation70_spill] sm:$0xff] }
 0x6de   : > { %v5421_v57 = vadd.f32 %v5413_v11, %v13180_v19  ;;  %5670 = vrot.lane.b32.xlu0 %v11921_v38, %s10193_s8  ;;  %5453 = vrot.lane.b32.xlu1 %v11921_v38, %s10192_s29  ;;  %v5391_v46 = vsel %vm5375_vm15, %v5383_v18, %v5367_v16  ;;  %v5199_v17 = vmul.f32 0.5, %v11813_v10  ;;  %v5392_v54 = vsel %vm5376_vm0, %v5384_v56, %v5368_v45  ;;  %v13188_v45 = vld [vmem:[#allocation67_spill] sm:$0xff]  ;;  %v5452_v18 = vpop.permute.xlu0 %5451 }
 0x6df   : > { %v5422_v35 = vadd.f32 %v5414_v9, %v13181_v63  ;;  %v5369_v23 = vsub.f32 1.0, %v5361_v55  ;;  %v5399_v24 = vadd.f32 1.0, %v5391_v46  ;;  %v5306_v44 = vmul.f32 %v11892_v0, %v5298_v53  ;;  %v13189_v63 = vld [vmem:[#allocation71_spill] sm:$0xff] }
 0x6e0   : > { %v11936_v15 = vpack.c.bf16 %v5421_v57, %v5421_v57  ;;  %v5400_v40 = vadd.f32 1.0, %v5392_v54  ;;  %v5201_v34 = vmul.f32 0.5, %v11822_v7  ;;  %v13186_v7 = vld [vmem:[#allocation65_spill] sm:$0xff]  ;;  %v5202_v39 = vmul.f32 0.5, %v11839_v42  ;;  %v5669_v42 = vpop.permute.xlu1 %5668 }
 0x6e1   : > { %v5385_v30 = vsub.f32 0.0, %v5369_v23  ;;  %v11946_v41 = vpack.c.bf16 %v5422_v35, %v5422_v35  ;;  %v5407_v13 = vmul.f32 %v5399_v24, %v5199_v17  ;;  %v5314_v10 = vadd.f32 0.2548296, %v5306_v44  ;;  %v9628_v44 = vld [vmem:[%s13040_s5 + $0x40] sm:$0xf] }
 0x6e2   : > { %5457 = vrot.lane.b32.xlu1 %v11936_v15, %s10192_s29  ;;  %5455 = vrot.lane.b32.xlu0 %v11934_v22, %s10192_s29  ;;  %v5408_v21 = vmul.f32 %v5400_v40, %v5200_v8  ;;  %vm6838_vm15 = vcmask 97280  }
 0x6e3   : > { %v5393_v3 = vsel %vm5377_vm3, %v5385_v30, %v5369_v23  ;;  %v5415_v2 = vmul.f32 %v5407_v13, %v13182_v61  ;;  %v5322_v52 = vmul.f32 %v11892_v0, %v5314_v10 }
 0x6e4   : > { %v5401_v32 = vadd.f32 1.0, %v5393_v3  ;;  %v5416_v20 = vmul.f32 %v5408_v21, %v13183_v25 }
 0x6e5   : > { %v5423_v60 = vadd.f32 %v5415_v2, %v13184_v62  ;;  %v5362_v14 = vmul.f32 %v10009_v1, %v5322_v52 }
 0x6e6   : > { %5672 = vrot.lane.b32.xlu1 %v11934_v22, %s10193_s8  ;;  %5459 = vrot.lane.b32.xlu0 %v11946_v41, %s10192_s29  ;;  %v5409_v33 = vmul.f32 %v5401_v32, %v5201_v34  ;;  %v5424_v49 = vadd.f32 %v5416_v20, %v13185_v51 }
 0x6e7   : > { %v11959_v36 = vpack.c.bf16 %v5423_v60, %v5423_v60  ;;  %v5370_v0 = vsub.f32 1.0, %v5362_v14  ;;  %v9627_v60 = vld [vmem:[%s13040_s5 + $0x3c] sm:$0xf] }
 0x6e8   : > { %v5417_v4 = vmul.f32 %v5409_v33, %v13186_v7  ;;  %v11962_v11 = vpack.c.bf16 %v5424_v49, %v5424_v49 }
 0x6e9   : > { %v5386_v59 = vsub.f32 0.0, %v5370_v0 }
 0x6ea   : > { %v5425_v31 = vadd.f32 %v5417_v4, %v13187_v58  ;;  %5461 = vrot.lane.b32.xlu1 %v11959_v36, %s10192_s29  ;;  %5463 = vrot.lane.b32.xlu0 %v11962_v11, %s10192_s29 }
 0x6eb   : > { %v5394_v16 = vsel %vm5378_vm4, %v5386_v59, %v5370_v0 }
 0x6ec   : > { %v11970_v9 = vpack.c.bf16 %v5425_v31, %v5425_v31  ;;  %v5402_v19 = vadd.f32 1.0, %v5394_v16 }
 0x6ee   : > { %5465 = vrot.lane.b32.xlu1 %v11970_v9, %s10192_s29  ;;  %v5410_v57 = vmul.f32 %v5402_v19, %v5202_v39 }
 0x6f0   : > { %v5418_v12 = vmul.f32 %v5410_v57, %v13188_v45 }
 0x6f2   : > { %5676 = vrot.lane.b32.xlu1 %v11946_v41, %s10193_s8  ;;  %v5426_v26 = vadd.f32 %v5418_v12, %v13189_v63 }
 0x6f4   : > { %6563 = vst [vmem:[#allocation2 + $0x18] sm:$0xff] %v5426_v26  ;;  %v11979_v35 = vpack.c.bf16 %v5426_v26, %v5426_v26 }
 0x6f6   : > { %5889 = vrot.lane.b32.xlu1 %v11921_v38, %s10189_s14  ;;  %5467 = vrot.lane.b32.xlu0 %v11979_v35, %s10192_s29  ;;  %s10196_s29 = smov [#allocation4]  }
 0x6f7   : > { %s10078_s9 = sshll.u32 %s10196_s29, 4  ;;  %s10079_s9 = int_to_ptr.vmem [resolvable:$false] %s10078_s9 }
 0x6f8   : > { %p10081_p9 = scmp.lt.s32.totalorder %s12974_s27, %s10079_s9 }
 0x6fa   : > { %5680 = vrot.lane.b32.xlu1 %v11962_v11, %s10193_s8  ;;  %5674 = vrot.lane.b32.xlu0 %v11936_v15, %s10193_s8 }
 0x6fe   : > { %5684 = vrot.lane.b32.xlu1 %v11979_v35, %s10193_s8  ;;  %5678 = vrot.lane.b32.xlu0 %v11959_v36, %s10193_s8 }
 0x702   : > { %5893 = vrot.lane.b32.xlu1 %v11936_v15, %s10189_s14  ;;  %5682 = vrot.lane.b32.xlu0 %v11970_v9, %s10193_s8 }
 0x706   : > { %5897 = vrot.lane.b32.xlu1 %v11959_v36, %s10189_s14  ;;  %5887 = vrot.lane.b32.xlu0 %v11785_v37, %s10189_s14 }
 0x70a   : > { %5901 = vrot.lane.b32.xlu1 %v11970_v9, %s10189_s14  ;;  %5891 = vrot.lane.b32.xlu0 %v11934_v22, %s10189_s14 }
 0x70e   : > { %6114 = vrot.lane.b32.xlu1 %v11785_v37, %s10190_s19  ;;  %5895 = vrot.lane.b32.xlu0 %v11946_v41, %s10189_s14  ;;  %v9672_v37 = vld [vmem:[%s13041_s6 + $0x18] sm:$0xff] }
 0x712   : > { %6118 = vrot.lane.b32.xlu1 %v11934_v22, %s10190_s19  ;;  %5899 = vrot.lane.b32.xlu0 %v11962_v11, %s10189_s14 }
 0x716   : > { %6122 = vrot.lane.b32.xlu1 %v11946_v41, %s10190_s19  ;;  %5903 = vrot.lane.b32.xlu0 %v11979_v35, %s10189_s14 }
 0x71a   : > { %6126 = vrot.lane.b32.xlu1 %v11962_v11, %s10190_s19  ;;  %6116 = vrot.lane.b32.xlu0 %v11921_v38, %s10190_s19 }
 0x71e   : > { %6130 = vrot.lane.b32.xlu1 %v11979_v35, %s10190_s19  ;;  %6120 = vrot.lane.b32.xlu0 %v11936_v15, %s10190_s19 }
 0x722   : > { %6124 = vrot.lane.b32.xlu0 %v11959_v36, %s10190_s19 }
 0x726   : > { %6128 = vrot.lane.b32.xlu0 %v11970_v9, %s10190_s19  ;;  %s10080_s19 = scalar_lea.vmem %s10079_s9, 2048 }
 0x72a   : > { %6544 = vperm.xlu0 %9870, %v9672_v37  }
 0x750   : > { %v5671_v55 = vpop.permute.xlu0 %5670  ;;  %v5454_v56 = vpop.permute.xlu1 %5453 }
 0x751   : > { %v5469_v53 = vsel %vm4106_vm7, %v5452_v18, %v5454_v56  ;;  %v5686_v34 = vsel %vm1380_vm13, %v5669_v42, %v5671_v55 }
 0x752   : > { %v5481_v24 = vsel %vm1384_vm12, %v5469_v53, 0  ;;  %v5698_v1 = vsel %vm1384_vm12, %v5686_v34, 0 }
 0x754   : > { %v5458_v46 = vpop.permute.xlu1 %5457  ;;  %v5456_v23 = vpop.permute.xlu0 %5455 }
 0x755   : > { %v5470_v17 = vsel %vm4106_vm7, %v5454_v56, %v5456_v23  ;;  %v5471_v54 = vsel %vm4106_vm7, %v5456_v23, %v5458_v46 }
 0x756   : > { %9629 = vmatprep.subr.msk.bf16.mxu0 %vm1384_vm12, %v5470_v17  ;;  %v5487_v13 = vsel %vm1384_vm12, %v5471_v54, 0  ;;  %v9645_v17 = vld [vmem:[%s13040_s5 + $0x44] sm:$0xf] }
 0x757   : > { %5505 = vmatpush1.bf16.msra.mxu0 %v5481_v24 }
 0x758   : > { %v5673_v8 = vpop.permute.xlu1 %5672  ;;  %v5460_v40 = vpop.permute.xlu0 %5459 }
 0x759   : > { %v5472_v30 = vsel %vm4106_vm7, %v5458_v46, %v5460_v40  ;;  %v5687_v52 = vsel %vm1380_vm13, %v5671_v55, %v5673_v8 }
 0x75a   : > { %9630 = vmatmul.mubr.msk.bf16.vlgmr.msra.gmra.mrb[176].mxu0 %vm1380_vm13, %v9628_v44  ;;  %9631 = vmatprep.subr.msk.bf16.mxu1 %vm1384_vm12, %v5472_v30 }
 0x75b   : > { %5546 = vmatpush1.bf16.msra.mxu1 %v5487_v13  ;;  %5618 = vmatprep.mubr.bf16.mxu0 %v13149_v43 }
 0x75c   : > { %v5462_v10 = vpop.permute.xlu1 %5461  ;;  %v5464_v3 = vpop.permute.xlu0 %5463 }
 0x75d   : > { %v5473_v21 = vsel %vm4106_vm7, %v5460_v40, %v5462_v10  ;;  %v5474_v61 = vsel %vm4106_vm7, %v5462_v10, %v5464_v3 }
 0x75e   : > { %9632 = vmatmul.mubr.msk.bf16.vlgmr.msra.gmra.mrb[176].mxu1 %vm1380_vm13, %v9628_v44  ;;  %v5493_v2 = vsel %vm1384_vm12, %v5473_v21, 0  ;;  %9633 = vmatprep.subr.msk.bf16.mxu0 %vm1384_vm12, %v5474_v61 }
 0x75f   : > { %5659 = vmatprep.mubr.bf16.mxu1 %v13149_v43  ;;  %5587 = vmatpush1.bf16.msra.mxu0 %v5493_v2 }
 0x760   : > { %v5466_v32 = vpop.permute.xlu1 %5465  ;;  %9637 = vmatprep.subr.msk.bf16.mxu0 %vm1384_vm12, %v5687_v52 }
 0x761   : > { %v5475_v20 = vsel %vm4106_vm7, %v5464_v3, %v5466_v32 }
 0x762   : > { %9634 = vmatmul.mubr.msk.bf16.vlgmr.msra.gmra.mrb[180].mxu0 %vm1380_vm13, %v9628_v44  ;;  %v5499_v14 = vsel %vm1384_vm12, %v5475_v20, 0 }
 0x763   : > { %5722 = vmatpush1.bf16.msra.mxu0 %v5698_v1  ;;  %5753 = vmatprep.mubr.bf16.mxu0 %v13149_v43 }
 0x764   : > { %v5677_v25 = vpop.permute.xlu1 %5676 }
 0x768   : > { %v5890_v62 = vpop.permute.xlu1 %5889  ;;  %v5468_v33 = vpop.permute.xlu0 %5467 }
 0x769   : > { %v5476_v51 = vsel %vm4106_vm7, %v5466_v32, %v5468_v33 }
 0x76a   : > { %9635 = vmatprep.subr.msk.bf16.mxu1 %vm1384_vm12, %v5476_v51  ;;  %9638 = vmatmul.mubr.msk.bf16.vlgmr.msra.gmra.mrb[184].mxu0 %vm1380_vm13, %v9627_v60 }
 0x76b   : > { %5628 = vmatpush1.bf16.msra.mxu1 %v5499_v14  ;;  %5835 = vmatprep.mubr.bf16.mxu0 %v13149_v43 }
 0x76c   : > { %v5681_v49 = vpop.permute.xlu1 %5680  ;;  %v5675_v7 = vpop.permute.xlu0 %5674 }
 0x76d   : > { %v5688_v4 = vsel %vm1380_vm13, %v5673_v8, %v5675_v7  ;;  %v5689_v0 = vsel %vm1380_vm13, %v5675_v7, %v5677_v25 }
 0x76e   : > { %9636 = vmatmul.mubr.msk.bf16.vlgmr.msra.gmra.mrb[180].mxu1 %vm1380_vm13, %v9628_v44  ;;  %9639 = vmatprep.subr.msk.bf16.mxu1 %vm1384_vm12, %v5689_v0  ;;  %v5704_v58 = vsel %vm1384_vm12, %v5688_v4, 0 }
 0x76f   : > { %5763 = vmatpush1.bf16.msra.mxu1 %v5704_v58  ;;  %5794 = vmatprep.mubr.bf16.mxu1 %v13149_v43 }
 0x770   : > { %v5685_v31 = vpop.permute.xlu1 %5684  ;;  %v5679_v59 = vpop.permute.xlu0 %5678 }
 0x771   : > { %v5690_v16 = vsel %vm1380_vm13, %v5677_v25, %v5679_v59  ;;  %v5691_v39 = vsel %vm1380_vm13, %v5679_v59, %v5681_v49 }
 0x772   : > { %v5710_v19 = vsel %vm1384_vm12, %v5690_v16, 0  ;;  %9641 = vmatprep.subr.msk.bf16.mxu0 %vm1384_vm12, %v5691_v39 }
 0x773   : > { %5804 = vmatpush1.bf16.msra.mxu0 %v5710_v19 }
 0x774   : > { %v5894_v57 = vpop.permute.xlu1 %5893  ;;  %v5683_v45 = vpop.permute.xlu0 %5682 }
 0x775   : > { %v5692_v12 = vsel %vm1380_vm13, %v5681_v49, %v5683_v45  ;;  %v5693_v63 = vsel %vm1380_vm13, %v5683_v45, %v5685_v31 }
 0x776   : > { %9640 = vmatmul.mubr.msk.bf16.vlgmr.msra.gmra.mrb[184].mxu1 %vm1380_vm13, %v9627_v60  ;;  %9642 = vmatmul.mubr.msk.bf16.vlgmr.msra.gmra.mrb[188].mxu0 %vm1380_vm13, %v9627_v60  ;;  %v5716_v26 = vsel %vm1384_vm12, %v5692_v12, 0 }
 0x777   : > { %9643 = vmatprep.subr.msk.bf16.mxu1 %vm1384_vm12, %v5693_v63  ;;  %5876 = vmatprep.mubr.bf16.mxu1 %v13149_v43 }
 0x778   : > { %v5898_v37 = vpop.permute.xlu1 %5897  ;;  %v5888_v42 = vpop.permute.xlu0 %5887  ;;  %5845 = vmatpush1.bf16.msra.mxu1 %v5716_v26  ;;  %5972 = vmatprep.mubr.bf16.mxu0 %v13149_v43 }
 0x779   : > { %v5905_v18 = vsel %vm425_vm1, %v5888_v42, %v5890_v62 }
 0x77a   : > { %v5917_v46 = vsel %vm1384_vm12, %v5905_v18, 0 }
 0x77c   : > { %v5902_v55 = vpop.permute.xlu1 %5901  ;;  %v5892_v56 = vpop.permute.xlu0 %5891 }
 0x77d   : > { %v5906_v53 = vsel %vm425_vm1, %v5890_v62, %v5892_v56  ;;  %v5907_v23 = vsel %vm425_vm1, %v5892_v56, %v5894_v57  ;;  %v9654_v62 = vld [vmem:[%s13040_s5 + $0x48] sm:$0xf]  ;;  %v6805_v56 = vld [vmem:[#allocation2 + $0x20] sm:$0xff] }
 0x77e   : > { %9644 = vmatmul.mubr.msk.bf16.vlgmr.msra.gmra.mrb[188].mxu1 %vm1380_vm13, %v9627_v60  ;;  %9646 = vmatprep.subr.msk.bf16.mxu0 %vm1384_vm12, %v5906_v53  ;;  %v5923_v8 = vsel %vm1384_vm12, %v5907_v23, 0  ;;  %v12167_v53 = vpack.c.bf16 %v6805_v56, %v6805_v56 }
 0x77f   : > { %5941 = vmatpush1.bf16.msra.mxu0 %v5917_v46  ;;  %6013 = vmatprep.mubr.bf16.mxu1 %v13149_v43 }
 0x780   : > { %v6115_v24 = vpop.permute.xlu1 %6114  ;;  %v5896_v54 = vpop.permute.xlu0 %5895  ;;  %6820 = vrot.lane.b32.xlu1 %v12167_v53, %s10194_s2  ;;  %7038 = vrot.lane.b32.xlu0 %v12167_v53, %s10195_s28 }
 0x781   : > { %v5908_v44 = vsel %vm425_vm1, %v5894_v57, %v5896_v54  ;;  %v5909_v40 = vsel %vm425_vm1, %v5896_v54, %v5898_v37  ;;  %v6345_v57 = vsel %vm1384_vm12, %v11921_v38, 0  ;;  %v9663_v38 = vld [vmem:[%s13040_s5 + $0x4c] sm:$0xf] }
 0x782   : > { %9647 = vmatmul.mubr.msk.bf16.vlgmr.msra.gmra.mrb[192].mxu0 %vm1380_vm13, %v9645_v17  ;;  %9648 = vmatprep.subr.msk.bf16.mxu1 %vm1384_vm12, %v5908_v44  ;;  %v5929_v21 = vsel %vm1384_vm12, %v5909_v40, 0 }
 0x783   : > { %5982 = vmatpush1.bf16.msra.mxu1 %v5923_v8  ;;  %6054 = vmatprep.mubr.bf16.mxu0 %v13149_v43 }
 0x784   : > { %v5900_v30 = vpop.permute.xlu0 %5899  ;;  %v6119_v13 = vpop.permute.xlu1 %6118 }
 0x785   : > { %v5910_v10 = vsel %vm425_vm1, %v5898_v37, %v5900_v30  ;;  %v5911_v3 = vsel %vm425_vm1, %v5900_v30, %v5902_v55 }
 0x786   : > { %9649 = vmatmul.mubr.msk.bf16.vlgmr.msra.gmra.mrb[192].mxu1 %vm1380_vm13, %v9645_v17  ;;  %9650 = vmatprep.subr.msk.bf16.mxu0 %vm1384_vm12, %v5910_v10  ;;  %v5935_v34 = vsel %vm1384_vm12, %v5911_v3, 0 }
 0x787   : > { %6023 = vmatpush1.bf16.msra.mxu0 %v5929_v21  ;;  %6095 = vmatprep.mubr.bf16.mxu1 %v13149_v43 }
 0x788   : > { %v5904_v61 = vpop.permute.xlu0 %5903  ;;  %v6123_v32 = vpop.permute.xlu1 %6122 }
 0x789   : > { %v5912_v2 = vsel %vm425_vm1, %v5902_v55, %v5904_v61 }
 0x78a   : > { %9651 = vmatmul.mubr.msk.bf16.vlgmr.msra.gmra.mrb[196].mxu0 %vm1380_vm13, %v9645_v17  ;;  %9652 = vmatprep.subr.msk.bf16.mxu1 %vm1384_vm12, %v5912_v2 }
 0x78b   : > { %6064 = vmatpush1.bf16.msra.mxu1 %v5935_v34  ;;  %6199 = vmatprep.mubr.bf16.mxu0 %v13149_v43 }
 0x78c   : > { %v6117_v52 = vpop.permute.xlu0 %6116  ;;  %v6127_v33 = vpop.permute.xlu1 %6126 }
 0x78d   : > { %v6132_v1 = vsel %vm1811_vm14, %v6115_v24, %v6117_v52  ;;  %v6133_v25 = vsel %vm1811_vm14, %v6117_v52, %v6119_v13 }
 0x78e   : > { %v6144_v20 = vsel %vm1384_vm12, %v6132_v1, 0  ;;  %9653 = vmatmul.mubr.msk.bf16.vlgmr.msra.gmra.mrb[196].mxu1 %vm1380_vm13, %v9645_v17  ;;  %9655 = vmatprep.subr.msk.bf16.mxu0 %vm1384_vm12, %v6133_v25 }
 0x78f   : > { %6168 = vmatpush1.bf16.msra.mxu0 %v6144_v20  ;;  %6240 = vmatprep.mubr.bf16.mxu1 %v13149_v43 }
 0x790   : > { %v6121_v60 = vpop.permute.xlu0 %6120  ;;  %v6131_v31 = vpop.permute.xlu1 %6130 }
 0x791   : > { %v6134_v14 = vsel %vm1811_vm14, %v6119_v13, %v6121_v60  ;;  %v6135_v51 = vsel %vm1811_vm14, %v6121_v60, %v6123_v32 }
 0x792   : > { %v6150_v49 = vsel %vm1384_vm12, %v6134_v14, 0  ;;  %9656 = vmatmul.mubr.msk.bf16.vlgmr.msra.gmra.mrb[200].mxu0 %vm1380_vm13, %v9654_v62  ;;  %9657 = vmatprep.subr.msk.bf16.mxu1 %vm1384_vm12, %v6135_v51 }
 0x793   : > { %6209 = vmatpush1.bf16.msra.mxu1 %v6150_v49  ;;  %6281 = vmatprep.mubr.bf16.mxu0 %v13149_v43 }
 0x794   : > { %v6125_v7 = vpop.permute.xlu0 %6124 }
 0x795   : > { %v6136_v4 = vsel %vm1811_vm14, %v6123_v32, %v6125_v7  ;;  %v6137_v0 = vsel %vm1811_vm14, %v6125_v7, %v6127_v33 }
 0x796   : > { %v6156_v58 = vsel %vm1384_vm12, %v6136_v4, 0  ;;  %9658 = vmatmul.mubr.msk.bf16.vlgmr.msra.gmra.mrb[200].mxu1 %vm1380_vm13, %v9654_v62  ;;  %9659 = vmatprep.subr.msk.bf16.mxu0 %vm1384_vm12, %v6137_v0 }
 0x797   : > { %6250 = vmatpush1.bf16.msra.mxu0 %v6156_v58  ;;  %6322 = vmatprep.mubr.bf16.mxu1 %v13149_v43 }
 0x798   : > { %9664 = vmatprep.subr.msk.bf16.mxu0 %vm1384_vm12, %v11934_v22  ;;  %v6129_v59 = vpop.permute.xlu0 %6128  ;;  %v6351_v22 = vsel %vm1384_vm12, %v11936_v15, 0  ;;  %v6363_v15 = vsel %vm1384_vm12, %v11970_v9, 0 }
 0x799   : > { %v6138_v16 = vsel %vm1811_vm14, %v6127_v33, %v6129_v59  ;;  %v6139_v39 = vsel %vm1811_vm14, %v6129_v59, %v6131_v31 }
 0x79a   : > { %v6162_v19 = vsel %vm1384_vm12, %v6138_v16, 0  ;;  %9660 = vmatmul.mubr.msk.bf16.vlgmr.msra.gmra.mrb[204].mxu0 %vm1380_vm13, %v9654_v62  ;;  %9661 = vmatprep.subr.msk.bf16.mxu1 %vm1384_vm12, %v6139_v39 }
 0x79b   : > { %6291 = vmatpush1.bf16.msra.mxu1 %v6162_v19  ;;  %6369 = vmatpush1.bf16.msra.mxu0 %v6345_v57 }
 0x79c   : > { %9666 = vmatprep.subr.msk.bf16.mxu1 %vm1384_vm12, %v11946_v41  ;;  %9668 = vmatprep.subr.msk.bf16.mxu0 %vm1384_vm12, %v11962_v11  ;;  %v6357_v41 = vsel %vm1384_vm12, %v11959_v36, 0 }
 0x79d   : > { %6400 = vmatprep.mubr.bf16.mxu0 %v13149_v43 }
 0x79e   : > { %9662 = vmatmul.mubr.msk.bf16.vlgmr.msra.gmra.mrb[204].mxu1 %vm1380_vm13, %v9654_v62 }
 0x79f   : > { %6410 = vmatpush1.bf16.msra.mxu1 %v6351_v22  ;;  %6441 = vmatprep.mubr.bf16.mxu1 %v13149_v43 }
 0x7a0   : > { %9670 = vmatprep.subr.msk.bf16.mxu1 %vm1384_vm12, %v11979_v35 }
 0x7a2   : > { %9665 = vmatmul.mubr.msk.bf16.vlgmr.msra.gmra.mrb[208].mxu0 %vm1380_vm13, %v9663_v38 }
 0x7a3   : > { %6451 = vmatpush1.bf16.msra.mxu0 %v6357_v41  ;;  %6482 = vmatprep.mubr.bf16.mxu0 %v13149_v43 }
 0x7a6   : > { %9667 = vmatmul.mubr.msk.bf16.vlgmr.msra.gmra.mrb[208].mxu1 %vm1380_vm13, %v9663_v38 }
 0x7a7   : > { %6492 = vmatpush1.bf16.msra.mxu1 %v6363_v15  ;;  %6523 = vmatprep.mubr.bf16.mxu1 %v13149_v43 }
 0x7aa   : > { %9669 = vmatmul.mubr.msk.bf16.vlgmr.msra.gmra.mrb[212].mxu0 %vm1380_vm13, %v9663_v38 }
 0x7ab   : > { %6906 = vmatprep.mubr.bf16.mxu0 %v13149_v43 }
 0x7ae   : > { %9671 = vmatmul.mubr.msk.bf16.vlgmr.msra.gmra.mrb[212].mxu1 %vm1380_vm13, %v9663_v38 }
 0x7af   : > { %6947 = vmatprep.mubr.bf16.mxu1 %v13149_v43 }
 0x82d   : > { %v5538_v36 = vpop.f32.mrb[176].mxu0 }
 0x82e   : > { %v5540_v11 = vpop.f32.mrb[177].mxu0 }
 0x82f   : > { %v5542_v35 = vpop.f32.mrb[178].mxu0 }
 0x830   : > { %v5543_v45 = vpop.f32.mrb[179].mxu0 }
 0x831   : > { %v5579_v12 = vpop.f32.mrb[176].mxu1 }
 0x832   : > { %v5581_v63 = vpop.f32.mrb[177].mxu1 }
 0x833   : > { %v5583_v26 = vpop.f32.mrb[178].mxu1 }
 0x834   : > { %v5584_v37 = vpop.f32.mrb[179].mxu1 }
 0x835   : > { %v5620_v9 = vpop.f32.mrb[180].mxu0 }
 0x836   : > { %v5622_v42 = vpop.f32.mrb[181].mxu0 }
 0x837   : > { %v5624_v18 = vpop.f32.mrb[182].mxu0 }
 0x838   : > { %v5625_v55 = vpop.f32.mrb[183].mxu0 }
 0x83d   : > { %v5755_v46 = vpop.f32.mrb[184].mxu0 }
 0x83e   : > { %v5756_v23 = vadd.f32 %v5755_v46, %v5538_v36  ;;  %v5757_v17 = vpop.f32.mrb[185].mxu0 }
 0x83f   : > { %v5758_v24 = vadd.f32 %v5757_v17, %v5540_v11  ;;  %v5759_v54 = vpop.f32.mrb[186].mxu0 }
 0x840   : > { %v5760_v44 = vpop.f32.mrb[187].mxu0 }
 0x841   : > { %v5661_v8 = vpop.f32.mrb[180].mxu1 }
 0x842   : > { %v5663_v40 = vpop.f32.mrb[181].mxu1 }
 0x843   : > { %v5665_v30 = vpop.f32.mrb[182].mxu1 }
 0x844   : > { %v5666_v13 = vpop.f32.mrb[183].mxu1 }
 0x849   : > { %v5796_v10 = vpop.f32.mrb[184].mxu1  ;;  %v5837_v21 = vpop.f32.mrb[188].mxu0 }
 0x84a   : > { %v5797_v3 = vadd.f32 %v5796_v10, %v5579_v12  ;;  %v5838_v61 = vadd.f32 %v5837_v21, %v5620_v9  ;;  %v5798_v2 = vpop.f32.mrb[185].mxu1  ;;  %v5839_v34 = vpop.f32.mrb[189].mxu0 }
 0x84b   : > { %v5799_v32 = vadd.f32 %v5798_v2, %v5581_v63  ;;  %v5840_v52 = vadd.f32 %v5839_v34, %v5622_v42  ;;  %v5800_v1 = vpop.f32.mrb[186].mxu1  ;;  %v5841_v25 = vpop.f32.mrb[190].mxu0 }
 0x84c   : > { %v5801_v20 = vpop.f32.mrb[187].mxu1  ;;  %v5842_v62 = vpop.f32.mrb[191].mxu0 }
 0x851   : > { %v5878_v60 = vpop.f32.mrb[188].mxu1 }
 0x852   : > { %v5879_v33 = vadd.f32 %v5878_v60, %v5661_v8  ;;  %v5880_v14 = vpop.f32.mrb[189].mxu1 }
 0x853   : > { %v5881_v51 = vadd.f32 %v5880_v14, %v5663_v40  ;;  %v5882_v49 = vpop.f32.mrb[190].mxu1 }
 0x854   : > { %v5883_v7 = vpop.f32.mrb[191].mxu1 }
 0x855   : > { %v5974_v4 = vpop.f32.mrb[192].mxu0 }
 0x856   : > { %v6104_v0 = vadd.f32 %v5974_v4, %v5756_v23  ;;  %v5976_v58 = vpop.f32.mrb[193].mxu0 }
 0x857   : > { %v6105_v31 = vadd.f32 %v5976_v58, %v5758_v24  ;;  %v5978_v59 = vpop.f32.mrb[194].mxu0 }
 0x858   : > { %v5979_v16 = vpop.f32.mrb[195].mxu0 }
 0x859   : > { %v6015_v39 = vpop.f32.mrb[192].mxu1 }
 0x85a   : > { %v6106_v19 = vadd.f32 %v6015_v39, %v5797_v3  ;;  %v6017_v57 = vpop.f32.mrb[193].mxu1 }
 0x85b   : > { %v6107_v22 = vadd.f32 %v6017_v57, %v5799_v32  ;;  %v6019_v38 = vpop.f32.mrb[194].mxu1 }
 0x85c   : > { %v6020_v41 = vpop.f32.mrb[195].mxu1 }
 0x85d   : > { %v6056_v15 = vpop.f32.mrb[196].mxu0 }
 0x85e   : > { %v6108_v36 = vadd.f32 %v6056_v15, %v5838_v61  ;;  %v6058_v11 = vpop.f32.mrb[197].mxu0 }
 0x85f   : > { %v6109_v35 = vadd.f32 %v6058_v11, %v5840_v52  ;;  %v6060_v45 = vpop.f32.mrb[198].mxu0 }
 0x860   : > { %v6061_v12 = vpop.f32.mrb[199].mxu0 }
 0x861   : > { %v6097_v63 = vpop.f32.mrb[196].mxu1 }
 0x862   : > { %v6110_v26 = vadd.f32 %v6097_v63, %v5879_v33  ;;  %v6099_v37 = vpop.f32.mrb[197].mxu1 }
 0x863   : > { %v6111_v9 = vadd.f32 %v6099_v37, %v5881_v51  ;;  %v6101_v42 = vpop.f32.mrb[198].mxu1  ;;  %v12175_v51 = vpop.permute.xlu0 %6544 }
 0x864   : > { %v6102_v18 = vpop.f32.mrb[199].mxu1 }
 0x865   : > { %v6201_v55 = vpop.f32.mrb[200].mxu0 }
 0x866   : > { %v6331_v56 = vadd.f32 %v6201_v55, %v6104_v0  ;;  %v6203_v46 = vpop.f32.mrb[201].mxu0 }
 0x867   : > { %v6332_v23 = vadd.f32 %v6203_v46, %v6105_v31  ;;  %v6205_v17 = vpop.f32.mrb[202].mxu0 }
 0x868   : > { %v6206_v24 = vpop.f32.mrb[203].mxu0 }
 0x869   : > { %v6242_v54 = vpop.f32.mrb[200].mxu1 }
 0x86a   : > { %v6333_v44 = vadd.f32 %v6242_v54, %v6106_v19  ;;  %v6244_v8 = vpop.f32.mrb[201].mxu1 }
 0x86b   : > { %v6334_v40 = vadd.f32 %v6244_v8, %v6107_v22  ;;  %v6246_v30 = vpop.f32.mrb[202].mxu1 }
 0x86c   : > { %v6247_v13 = vpop.f32.mrb[203].mxu1 }
 0x86d   : > { %v6283_v10 = vpop.f32.mrb[204].mxu0 }
 0x86e   : > { %v6335_v21 = vadd.f32 %v6283_v10, %v6108_v36  ;;  %v6285_v3 = vpop.f32.mrb[205].mxu0 }
 0x86f   : > { %v6336_v61 = vadd.f32 %v6285_v3, %v6109_v35  ;;  %v6287_v2 = vpop.f32.mrb[206].mxu0 }
 0x870   : > { %v6288_v34 = vpop.f32.mrb[207].mxu0 }
 0x871   : > { %v6324_v32 = vpop.f32.mrb[204].mxu1 }
 0x872   : > { %v6337_v52 = vadd.f32 %v6324_v32, %v6110_v26  ;;  %v6326_v1 = vpop.f32.mrb[205].mxu1 }
 0x873   : > { %v12173_v25 = vadd.f32 %v6326_v1, %v6111_v9  ;;  %v6328_v20 = vpop.f32.mrb[206].mxu1 }
 0x874   : > { %v6329_v62 = vpop.f32.mrb[207].mxu1 }
 0x875   : > { %v6402_v60 = vpop.f32.mrb[208].mxu0 }
 0x876   : > { %v6532_v33 = vadd.f32 %v6402_v60, %v6331_v56  ;;  %v6404_v14 = vpop.f32.mrb[209].mxu0 }
 0x877   : > { %v6533_v49 = vadd.f32 %v6404_v14, %v6332_v23  ;;  %v6406_v7 = vpop.f32.mrb[210].mxu0 }
 0x878   : > { %v6547_v4 = vadd.f32 %v12175_v51, %v6532_v33  ;;  %v6407_v0 = vpop.f32.mrb[211].mxu0 }
 0x879   : > { %v6548_v58 = vadd.f32 %v12175_v51, %v6533_v49  ;;  %v6443_v31 = vpop.f32.mrb[208].mxu1 }
 0x87a   : > { %v12180_v59 = vadd.f32 %v6547_v4, %v11393_v27  ;;  %v6534_v16 = vadd.f32 %v6443_v31, %v6333_v44  ;;  %v6445_v39 = vpop.f32.mrb[209].mxu1 }
 0x87b   : > { %v12183_v19 = vadd.f32 %v6548_v58, %v11396_v29  ;;  %v6535_v57 = vadd.f32 %v6445_v39, %v6334_v40  ;;  %v6447_v22 = vpop.f32.mrb[210].mxu1 }
 0x87c   : > { %v12186_v38 = vmul.f32 0.70710677, %v12180_v59  ;;  %v6549_v41 = vadd.f32 %v12175_v51, %v6534_v16  ;;  %v6448_v15 = vpop.f32.mrb[211].mxu1 }
 0x87d   : > { %v12190_v36 = vmul.f32 0.70710677, %v12183_v19  ;;  %v6550_v11 = vadd.f32 %v12175_v51, %v6535_v57  ;;  %v6484_v27 = vpop.f32.mrb[212].mxu0 }
 0x87e   : > { %v6580_v35 = vand.u32 2147483647, %v12186_v38  ;;  %v12195_v45 = vadd.f32 %v6549_v41, %v11408_v28  ;;  %v6536_v29 = vadd.f32 %v6484_v27, %v6335_v21  ;;  %v6486_v12 = vpop.f32.mrb[213].mxu0  ;;  %vm6740_vm14 = vcmp.lt.f32.partialorder %v12186_v38, 0.0 }
 0x87f   : > { %v6581_v63 = vand.u32 2147483647, %v12190_v36  ;;  %v12199_v26 = vadd.f32 %v6550_v11, %v11412_v6  ;;  %v6537_v37 = vadd.f32 %v6486_v12, %v6336_v61  ;;  %v6488_v9 = vpop.f32.mrb[214].mxu0  ;;  %vm6741_vm5 = vcmp.lt.f32.partialorder %v12190_v36, 0.0 }
 0x880   : > { %v6588_v42 = vmul.f32 0.3275911, %v6580_v35  ;;  %v12202_v18 = vmul.f32 0.70710677, %v12195_v45  ;;  %v6489_v17 = vpop.f32.mrb[215].mxu0  ;;  %v6692_v24 = vsub.f32 0.0, %v6580_v35  ;;  %v6551_v3 = vadd.f32 %v12175_v51, %v6536_v29 }
 0x881   : > { %v6589_v55 = vmul.f32 0.3275911, %v6581_v63  ;;  %v12205_v56 = vmul.f32 0.70710677, %v12199_v26  ;;  %v6525_v23 = vpop.f32.mrb[212].mxu1  ;;  %v6693_v8 = vsub.f32 0.0, %v6581_v63  ;;  %v6552_v34 = vadd.f32 %v12175_v51, %v6537_v37 }
 0x882   : > { %v6596_v46 = vadd.f32 1.0, %v6588_v42  ;;  %v6582_v28 = vand.u32 2147483647, %v12202_v18  ;;  %v6527_v44 = vpop.f32.mrb[213].mxu1  ;;  %v6700_v61 = vmul.f32 %v6692_v24, %v6580_v35  ;;  %v12212_v1 = vadd.f32 %v6551_v3, %v11425_v47 }
 0x883   : > { %v6597_v54 = vadd.f32 1.0, %v6589_v55  ;;  %v6583_v6 = vand.u32 2147483647, %v12205_v56  ;;  %v6529_v30 = vpop.f32.mrb[214].mxu1  ;;  %v6701_v32 = vmul.f32 %v6693_v8, %v6581_v63  ;;  %v6538_v20 = vadd.f32 %v6525_v23, %v6337_v52 }
 0x884   : > { %10010 = vrcp.f32 %v6596_v46  ;;  %v6590_v40 = vmul.f32 0.3275911, %v6582_v28  ;;  %v6530_v10 = vpop.f32.mrb[215].mxu1  ;;  %v12215_v62 = vadd.f32 %v6552_v34, %v11428_v48  ;;  %v6539_v60 = vadd.f32 %v6527_v44, %v12173_v25 }
 0x885   : > { %10012 = vrcp.f32 %v6597_v54  ;;  %v6591_v13 = vmul.f32 0.3275911, %v6583_v6  ;;  %v12219_v33 = vmul.f32 0.70710677, %v12212_v1  ;;  %v6553_v14 = vadd.f32 %v12175_v51, %v6538_v20 }
 0x886   : > { %v6598_v21 = vadd.f32 1.0, %v6590_v40  ;;  %v6708_v49 = vmul.f32 1.442695, %v6700_v61  ;;  %v6694_v7 = vsub.f32 0.0, %v6582_v28  ;;  %v12223_v4 = vmul.f32 0.70710677, %v12215_v62 }
 0x887   : > { %v6599_v2 = vadd.f32 1.0, %v6591_v13  ;;  %v6710_v0 = vmul.f32 1.442695, %v6701_v32  ;;  %v6584_v47 = vand.u32 2147483647, %v12219_v33  ;;  %v12227_v52 = vadd.f32 %v6553_v14, %v11440_v50 }
 0x888   : > { %10014 = vrcp.f32 %v6598_v21  ;;  %v12230_v48 = vmul.f32 0.5, %v12180_v59  ;;  %v12233_v25 = vmul.f32 0.5, %v12183_v19  ;;  %v6695_v58 = vsub.f32 0.0, %v6583_v6 }
 0x889   : > { %10016 = vrcp.f32 %v6599_v2  ;;  %v6585_v31 = vand.u32 2147483647, %v12223_v4  ;;  %v12239_v39 = vmul.f32 0.5, %v12195_v45  ;;  %v6592_v57 = vmul.f32 0.3275911, %v6584_v47 }
 0x88a   : > { %v12242_v22 = vmul.f32 0.70710677, %v12227_v52  ;;  %v6554_v50 = vadd.f32 %v12175_v51, %v6539_v60  ;;  %10018 = vpow2.f32 %v6708_v49  ;;  %v6702_v11 = vmul.f32 %v6694_v7, %v6582_v28 }
 0x88b   : > { %v6593_v27 = vmul.f32 0.3275911, %v6585_v31  ;;  %10020 = vpow2.f32 %v6710_v0  ;;  %v6600_v29 = vadd.f32 1.0, %v6592_v57  ;;  %v6703_v37 = vmul.f32 %v6695_v58, %v6583_v6 }
 0x88c   : > { %v6586_v12 = vand.u32 2147483647, %v12242_v22  ;;  %v6696_v9 = vsub.f32 0.0, %v6584_v47  ;;  %v12253_v23 = vadd.f32 %v6554_v50, %v11466_v5  ;;  %v6697_v54 = vsub.f32 0.0, %v6585_v31 }
 0x88d   : > { %v6601_v42 = vadd.f32 1.0, %v6593_v27  ;;  %10022 = vrcp.f32 %v6600_v29  ;;  %v6712_v44 = vmul.f32 1.442695, %v6702_v11  ;;  %v6714_v10 = vmul.f32 1.442695, %v6703_v37 }
 0x88e   : > { %v12236_v16 = vpop.eup %10010  ;;  %v6594_v46 = vmul.f32 0.3275911, %v6586_v12  ;;  %v6704_v21 = vmul.f32 %v6696_v9, %v6584_v47  ;;  %v12262_v61 = vmul.f32 0.70710677, %v12253_v23  ;;  %v6705_v32 = vmul.f32 %v6697_v54, %v6585_v31 }
 0x88f   : > { %v12245_v41 = vpop.eup %10012  ;;  %v6620_v15 = vmul.f32 1.0614054, %v12236_v16  ;;  %10024 = vrcp.f32 %v6601_v42  ;;  %v6698_v20 = vsub.f32 0.0, %v6586_v12  ;;  %v12268_v14 = vmul.f32 0.5, %v12199_v26 }
 0x890   : > { %v6621_v35 = vmul.f32 1.0614054, %v12245_v41  ;;  %v6602_v40 = vadd.f32 1.0, %v6594_v46  ;;  %v6587_v7 = vand.u32 2147483647, %v12262_v61  ;;  %vm6742_vm6 = vcmp.lt.f32.partialorder %v12202_v18, 0.0 }
 0x891   : > { %v6628_v63 = vadd.f32 -1.4531521, %v6620_v15  ;;  %v6716_v57 = vmul.f32 1.442695, %v6704_v21  ;;  %v6718_v29 = vmul.f32 1.442695, %v6705_v32 }
 0x892   : > { %v12250_v55 = vpop.eup %10014  ;;  %v6629_v51 = vadd.f32 -1.4531521, %v6621_v35  ;;  %10026 = vrcp.f32 %v6602_v40  ;;  %v6595_v31 = vmul.f32 0.3275911, %v6587_v7  ;;  %v6699_v46 = vsub.f32 0.0, %v6587_v7 }
 0x893   : > { %v12255_v28 = vpop.eup %10016  ;;  %v6636_v17 = vmul.f32 %v12236_v16, %v6628_v63  ;;  %v6622_v24 = vmul.f32 1.0614054, %v12250_v55  ;;  %10028 = vpow2.f32 %v6712_v44  ;;  %v6706_v63 = vmul.f32 %v6698_v20, %v6586_v12 }
 0x894   : > { %v6637_v6 = vmul.f32 %v12245_v41, %v6629_v51  ;;  %v6623_v8 = vmul.f32 1.0614054, %v12255_v28  ;;  %v10019_v0 = vpop.eup %10018  ;;  %10030 = vpow2.f32 %v6714_v10  ;;  %v6603_v51 = vadd.f32 1.0, %v6595_v31 }
 0x895   : > { %v6644_v30 = vadd.f32 1.4214138, %v6636_v17  ;;  %v6630_v13 = vadd.f32 -1.4531521, %v6622_v24  ;;  %v10021_v50 = vpop.eup %10020  ;;  %10032 = vpow2.f32 %v6716_v57  ;;  %vm6743_vm7 = vcmp.lt.f32.partialorder %v12205_v56, 0.0 }
 0x896   : > { %v6645_v5 = vadd.f32 1.4214138, %v6637_v6  ;;  %v6631_v3 = vadd.f32 -1.4531521, %v6623_v8  ;;  %10034 = vrcp.f32 %v6603_v51  ;;  %vm6744_vm8 = vcmp.lt.f32.partialorder %v12219_v33, 0.0 }
 0x897   : > { %v6652_v2 = vmul.f32 %v12236_v16, %v6644_v30  ;;  %v6638_v34 = vmul.f32 %v12250_v55, %v6630_v13  ;;  %v12274_v37 = vpop.eup %10022  ;;  %10036 = vpow2.f32 %v6718_v29  ;;  %vm6745_vm9 = vcmp.lt.f32.partialorder %v12223_v4, 0.0 }
 0x898   : > { %v6653_v60 = vmul.f32 %v12245_v41, %v6645_v5  ;;  %v6639_v49 = vmul.f32 %v12255_v28, %v6631_v3  ;;  %v6624_v6 = vmul.f32 1.0614054, %v12274_v37  ;;  %vm6746_vm10 = vcmp.lt.f32.partialorder %v12242_v22, 0.0 }
 0x899   : > { %v6660_v47 = vadd.f32 -0.28449672, %v6652_v2  ;;  %v6646_v58 = vadd.f32 1.4214138, %v6638_v34  ;;  %v12278_v17 = vpop.eup %10024  ;;  %v6720_v2 = vmul.f32 1.442695, %v6706_v63 }
 0x89a   : > { %v6661_v15 = vadd.f32 -0.28449672, %v6653_v60  ;;  %v6647_v11 = vadd.f32 1.4214138, %v6639_v49  ;;  %v6625_v12 = vmul.f32 1.0614054, %v12278_v17 }
 0x89b   : > { %v6668_v27 = vmul.f32 %v12236_v16, %v6660_v47  ;;  %v6654_v35 = vmul.f32 %v12250_v55, %v6646_v58  ;;  %v6632_v13 = vadd.f32 -1.4531521, %v6624_v6  ;;  %v6707_v58 = vmul.f32 %v6699_v46, %v6587_v7 }
 0x89c   : > { %v6669_v9 = vmul.f32 %v12245_v41, %v6661_v15  ;;  %v6655_v42 = vmul.f32 %v12255_v28, %v6647_v11  ;;  %v12286_v10 = vpop.eup %10026  ;;  %v6633_v3 = vadd.f32 -1.4531521, %v6625_v12  ;;  %10038 = vpow2.f32 %v6720_v2 }
 0x89d   : > { %v6676_v24 = vadd.f32 0.2548296, %v6668_v27  ;;  %v6662_v54 = vadd.f32 -0.28449672, %v6654_v35  ;;  %v6640_v20 = vmul.f32 %v12274_v37, %v6632_v13  ;;  %v10029_v57 = vpop.eup %10028  ;;  %v6722_v46 = vmul.f32 1.442695, %v6707_v58 }
 0x89e   : > { %v6677_v44 = vadd.f32 0.2548296, %v6669_v9  ;;  %v6663_v8 = vadd.f32 -0.28449672, %v6655_v42  ;;  %v6641_v47 = vmul.f32 %v12278_v17, %v6633_v3  ;;  %v10031_v31 = vpop.eup %10030  ;;  %v13190_v58 = vld [vmem:[#allocation40_spill] sm:$0xff]  ;;  %vm6747_vm11 = vcmp.lt.f32.partialorder %v12262_v61, 0.0 }
 0x89f   : > { %v6684_v40 = vmul.f32 %v12236_v16, %v6676_v24  ;;  %v6670_v30 = vmul.f32 %v12250_v55, %v6662_v54  ;;  %v6626_v16 = vmul.f32 1.0614054, %v12286_v10  ;;  %v6648_v11 = vadd.f32 1.4214138, %v6640_v20  ;;  %v10033_v24 = vpop.eup %10032 }
 0x8a0   : > { %v6685_v21 = vmul.f32 %v12245_v41, %v6677_v44  ;;  %v6671_v5 = vmul.f32 %v12255_v28, %v6663_v8  ;;  %v6649_v29 = vadd.f32 1.4214138, %v6641_v47  ;;  %v12302_v8 = vpop.eup %10034  ;;  %10040 = vpow2.f32 %v6722_v46 }
 0x8a1   : > { %v6724_v34 = vmul.f32 %v10019_v0, %v6684_v40  ;;  %v6678_v32 = vadd.f32 0.2548296, %v6670_v30  ;;  %v6634_v0 = vadd.f32 -1.4531521, %v6626_v16  ;;  %v6656_v9 = vmul.f32 %v12274_v37, %v6648_v11 }
 0x8a2   : > { %v6725_v60 = vmul.f32 %v10021_v50, %v6685_v21  ;;  %v6679_v49 = vadd.f32 0.2548296, %v6671_v5  ;;  %v10037_v21 = vpop.eup %10036  ;;  %v6627_v16 = vmul.f32 1.0614054, %v12302_v8  ;;  %v6569_v46 = vmul.f32 0.5, %v12215_v62 }
 0x8a3   : > { %v6732_v15 = vsub.f32 1.0, %v6724_v34  ;;  %v6686_v41 = vmul.f32 %v12250_v55, %v6678_v32  ;;  %v6642_v7 = vmul.f32 %v12286_v10, %v6634_v0  ;;  %v6657_v55 = vmul.f32 %v12278_v17, %v6649_v29 }
 0x8a4   : > { %v6733_v27 = vsub.f32 1.0, %v6725_v60  ;;  %v6687_v35 = vmul.f32 %v12255_v28, %v6679_v49  ;;  %v6664_v44 = vadd.f32 -0.28449672, %v6656_v9 }
 0x8a5   : > { %v6748_v50 = vsub.f32 0.0, %v6732_v15  ;;  %v6726_v63 = vmul.f32 %v10029_v57, %v6686_v41  ;;  %v6650_v28 = vadd.f32 1.4214138, %v6642_v7  ;;  %v6665_v13 = vadd.f32 -0.28449672, %v6657_v55 }
 0x8a6   : > { %v6749_v42 = vsub.f32 0.0, %v6733_v27  ;;  %v6727_v51 = vmul.f32 %v10031_v31, %v6687_v35  ;;  %v6672_v2 = vmul.f32 %v12274_v37, %v6664_v44 }
 0x8a7   : > { %v6756_v54 = vsel %vm6740_vm14, %v6748_v50, %v6732_v15  ;;  %v6734_v6 = vsub.f32 1.0, %v6726_v63  ;;  %v6658_v34 = vmul.f32 %v12286_v10, %v6650_v28  ;;  %v6673_v20 = vmul.f32 %v12278_v17, %v6665_v13  ;;  %v13192_v63 = vld [vmem:[#allocation44_spill] sm:$0xff] }
 0x8a8   : > { %v6764_v12 = vadd.f32 1.0, %v6756_v54  ;;  %v6757_v40 = vsel %vm6741_vm5, %v6749_v42, %v6733_v27  ;;  %v6735_v30 = vsub.f32 1.0, %v6727_v51  ;;  %v6680_v49 = vadd.f32 0.2548296, %v6672_v2  ;;  %v13193_v51 = vld [vmem:[#allocation46_spill] sm:$0xff]  ;;  %v13194_v54 = vld [vmem:[#allocation41_spill] sm:$0xff] }
 0x8a9   : > { %v6765_v5 = vadd.f32 1.0, %v6757_v40  ;;  %v6750_v3 = vsub.f32 0.0, %v6734_v6  ;;  %v6666_v47 = vadd.f32 -0.28449672, %v6658_v34  ;;  %v6681_v11 = vadd.f32 0.2548296, %v6673_v20 }
 0x8aa   : > { %v6772_v38 = vmul.f32 %v6764_v12, %v12230_v48  ;;  %v6751_v32 = vsub.f32 0.0, %v6735_v30  ;;  %v13191_v48 = vld [vmem:[#allocation43_spill] sm:$0xff]  ;;  %v6688_v27 = vmul.f32 %v12274_v37, %v6680_v49  ;;  %v6635_v50 = vadd.f32 -1.4531521, %v6627_v16  ;;  %v13195_v12 = vld [vmem:[#allocation42_spill] sm:$0xff] }
 0x8ab   : > { %v6773_v60 = vmul.f32 %v6765_v5, %v12233_v25  ;;  %v6758_v36 = vsel %vm6742_vm6, %v6750_v3, %v6734_v6  ;;  %v6674_v35 = vmul.f32 %v12286_v10, %v6666_v47  ;;  %v10039_v25 = vpop.eup %10038  ;;  %v6689_v29 = vmul.f32 %v12278_v17, %v6681_v11  ;;  %v13197_v3 = vld [vmem:[#allocation47_spill] sm:$0xff] }
 0x8ac   : > { %v6780_v57 = vmul.f32 %v6772_v38, %v13190_v58  ;;  %v6766_v15 = vadd.f32 1.0, %v6758_v36  ;;  %v6759_v41 = vsel %vm6743_vm7, %v6751_v32, %v6735_v30  ;;  %v6728_v56 = vmul.f32 %v10033_v24, %v6688_v27  ;;  %v13196_v24 = vld [vmem:[#allocation45_spill] sm:$0xff] }
 0x8ad   : > { %v6781_v0 = vmul.f32 %v6773_v60, %v13191_v48  ;;  %v6767_v31 = vadd.f32 1.0, %v6759_v41  ;;  %v6682_v42 = vadd.f32 0.2548296, %v6674_v35  ;;  %v6729_v44 = vmul.f32 %v10037_v21, %v6689_v29  ;;  %v13198_v48 = vld [vmem:[#allocation72_spill] sm:$0xff] }
 0x8ae   : > { %v6774_v18 = vmul.f32 %v6766_v15, %v12239_v39  ;;  %v6788_v9 = vadd.f32 %v6780_v57, %v13192_v63  ;;  %v6643_v37 = vmul.f32 %v12302_v8, %v6635_v50  ;;  %v6736_v40 = vsub.f32 1.0, %v6728_v56  ;;  %v13200_v50 = vld [vmem:[#allocation76_spill] sm:$0xff] }
 0x8af   : > { %v6775_v7 = vmul.f32 %v6767_v31, %v12268_v14  ;;  %v6789_v55 = vadd.f32 %v6781_v0, %v13193_v51  ;;  %v6690_v17 = vmul.f32 %v12286_v10, %v6682_v42  ;;  %v6737_v30 = vsub.f32 1.0, %v6729_v44  ;;  %v13202_v42 = vld [vmem:[#allocation73_spill] sm:$0xff] }
 0x8b0   : > { %v6782_v6 = vmul.f32 %v6774_v18, %v13194_v54  ;;  %v12327_v28 = vpack.c.bf16 %v6788_v9, %v6788_v9  ;;  %v6651_v14 = vadd.f32 1.4214138, %v6643_v37  ;;  %v6752_v21 = vsub.f32 0.0, %v6736_v40  ;;  %v10041_v9 = vpop.eup %10040  ;;  %v13203_v37 = vld [vmem:[#allocation77_spill] sm:$0xff] }
 0x8b1   : > { %v6783_v39 = vmul.f32 %v6775_v7, %v13195_v12  ;;  %v6730_v5 = vmul.f32 %v10039_v25, %v6690_v17  ;;  %v6753_v34 = vsub.f32 0.0, %v6737_v30  ;;  %v12339_v38 = vpack.c.bf16 %v6789_v55, %v6789_v55  ;;  %v13199_v25 = vld [vmem:[#allocation74_spill] sm:$0xff] }
 0x8b2   : > { %7040 = vrot.lane.b32.xlu1 %v12327_v28, %s10195_s28  ;;  %6822 = vrot.lane.b32.xlu0 %v12327_v28, %s10194_s2  ;;  %v6790_v13 = vadd.f32 %v6782_v6, %v13196_v24  ;;  %v6659_v10 = vmul.f32 %v12302_v8, %v6651_v14  ;;  %v6760_v32 = vsel %vm6744_vm8, %v6752_v21, %v6736_v40  ;;  %v6568_v16 = vmul.f32 0.5, %v12212_v1  ;;  %v13201_v7 = vld [vmem:[#allocation78_spill] sm:$0xff]  ;;  %v13204_v24 = vld [vmem:[#allocation75_spill] sm:$0xff] }
 0x8b3   : > { %v6791_v2 = vadd.f32 %v6783_v39, %v13197_v3  ;;  %v6738_v20 = vsub.f32 1.0, %v6730_v5  ;;  %v6768_v60 = vadd.f32 1.0, %v6760_v32  ;;  %v6761_v36 = vsel %vm6745_vm9, %v6753_v34, %v6737_v30  ;;  %v13205_v21 = vld [vmem:[#allocation79_spill] sm:$0xff]  ;;  %v6821_v3 = vpop.permute.xlu1 %6820 }
 0x8b4   : > { %v12341_v33 = vpack.c.bf16 %v6790_v13, %v6790_v13  ;;  %v6667_v49 = vadd.f32 -0.28449672, %v6659_v10  ;;  %v6769_v47 = vadd.f32 1.0, %v6761_v36  ;;  %v6570_v31 = vmul.f32 0.5, %v12227_v52 }
 0x8b5   : > { %v6754_v58 = vsub.f32 0.0, %v6738_v20  ;;  %v6776_v57 = vmul.f32 %v6768_v60, %v6568_v16  ;;  %v12352_v15 = vpack.c.bf16 %v6791_v2, %v6791_v2  ;;  %v6571_v17 = vmul.f32 0.5, %v12253_v23  ;;  %v7039_v2 = vpop.permute.xlu0 %7038 }
 0x8b6   : > { %6824 = vrot.lane.b32.xlu1 %v12339_v38, %s10194_s2  ;;  %6826 = vrot.lane.b32.xlu0 %v12341_v33, %s10194_s2  ;;  %v6675_v4 = vmul.f32 %v12302_v8, %v6667_v49  ;;  %v6777_v41 = vmul.f32 %v6769_v47, %v6569_v46  ;;  %v9674_v46 = vld [vmem:[%s13040_s5 + $0x54] sm:$0xf] }
 0x8b7   : > { %v6762_v11 = vsel %vm6746_vm10, %v6754_v58, %v6738_v20  ;;  %v6784_v0 = vmul.f32 %v6776_v57, %v13198_v48 }
 0x8b8   : > { %v6770_v27 = vadd.f32 1.0, %v6762_v11  ;;  %v6683_v35 = vadd.f32 0.2548296, %v6675_v4  ;;  %v6785_v22 = vmul.f32 %v6777_v41, %v13199_v25 }
 0x8b9   : > { %v6792_v63 = vadd.f32 %v6784_v0, %v13200_v50 }
 0x8ba   : > { %6828 = vrot.lane.b32.xlu1 %v12352_v15, %s10194_s2  ;;  %7042 = vrot.lane.b32.xlu0 %v12339_v38, %s10195_s28  ;;  %v6778_v18 = vmul.f32 %v6770_v27, %v6570_v31  ;;  %v6691_v29 = vmul.f32 %v12302_v8, %v6683_v35  ;;  %v6793_v56 = vadd.f32 %v6785_v22, %v13201_v7 }
 0x8bb   : > { %v12365_v54 = vpack.c.bf16 %v6792_v63, %v6792_v63  ;;  %v9673_v63 = vld [vmem:[%s13040_s5 + $0x50] sm:$0xf] }
 0x8bc   : > { %v6786_v51 = vmul.f32 %v6778_v18, %v13202_v42  ;;  %v6731_v55 = vmul.f32 %v10041_v9, %v6691_v29  ;;  %v12367_v6 = vpack.c.bf16 %v6793_v56, %v6793_v56 }
 0x8be   : > { %v6739_v44 = vsub.f32 1.0, %v6731_v55  ;;  %6830 = vrot.lane.b32.xlu0 %v12365_v54, %s10194_s2  ;;  %v6794_v12 = vadd.f32 %v6786_v51, %v13203_v37  ;;  %6832 = vrot.lane.b32.xlu1 %v12367_v6, %s10194_s2 }
 0x8c0   : > { %v6755_v8 = vsub.f32 0.0, %v6739_v44  ;;  %v12374_v39 = vpack.c.bf16 %v6794_v12, %v6794_v12 }
 0x8c2   : > { %v6763_v40 = vsel %vm6747_vm11, %v6755_v8, %v6739_v44  ;;  %6834 = vrot.lane.b32.xlu0 %v12374_v39, %s10194_s2 }
 0x8c3   : > { %v6771_v30 = vadd.f32 1.0, %v6763_v40 }
 0x8c5   : > { %v6779_v14 = vmul.f32 %v6771_v30, %v6571_v17 }
 0x8c6   : > { %7046 = vrot.lane.b32.xlu0 %v12352_v15, %s10195_s28 }
 0x8c7   : > { %v6787_v13 = vmul.f32 %v6779_v14, %v13204_v24 }
 0x8c9   : > { %v6795_v5 = vadd.f32 %v6787_v13, %v13205_v21 }
 0x8ca   : > { %7260 = vrot.lane.b32.xlu0 %v12327_v28, %s10193_s8 }
 0x8cb   : > { %7926 = vst [vmem:[#allocation2 + $0x20] sm:$0xff] %v6795_v5  ;;  %v12386_v61 = vpack.c.bf16 %v6795_v5, %v6795_v5 }
 0x8cd   : > { %6836 = vrot.lane.b32.xlu1 %v12386_v61, %s10194_s2 }
 0x8ce   : > { %7050 = vrot.lane.b32.xlu0 %v12367_v6, %s10195_s28 }
 0x8d1   : > { %7044 = vrot.lane.b32.xlu1 %v12341_v33, %s10195_s28 }
 0x8d2   : > { %7054 = vrot.lane.b32.xlu0 %v12386_v61, %s10195_s28 }
 0x8d5   : > { %7048 = vrot.lane.b32.xlu1 %v12365_v54, %s10195_s28 }
 0x8d6   : > { %7264 = vrot.lane.b32.xlu0 %v12341_v33, %s10193_s8 }
 0x8d9   : > { %7052 = vrot.lane.b32.xlu1 %v12374_v39, %s10195_s28 }
 0x8da   : > { %7268 = vrot.lane.b32.xlu0 %v12365_v54, %s10193_s8 }
 0x8dd   : > { %7258 = vrot.lane.b32.xlu1 %v12167_v53, %s10193_s8 }
 0x8de   : > { %7272 = vrot.lane.b32.xlu0 %v12374_v39, %s10193_s8 }
 0x8e1   : > { %7262 = vrot.lane.b32.xlu1 %v12339_v38, %s10193_s8 }
 0x8e2   : > { %7485 = vrot.lane.b32.xlu0 %v12167_v53, %s10189_s14  ;;  %v9718_v53 = vld [vmem:[%s13041_s6 + $0x20] sm:$0xff] }
 0x8e5   : > { %7266 = vrot.lane.b32.xlu1 %v12352_v15, %s10193_s8 }
 0x8e6   : > { %7489 = vrot.lane.b32.xlu0 %v12339_v38, %s10189_s14 }
 0x8e9   : > { %7270 = vrot.lane.b32.xlu1 %v12367_v6, %s10193_s8 }
 0x8ea   : > { %7493 = vrot.lane.b32.xlu0 %v12352_v15, %s10189_s14 }
 0x8ed   : > { %7274 = vrot.lane.b32.xlu1 %v12386_v61, %s10193_s8 }
 0x8ee   : > { %7497 = vrot.lane.b32.xlu0 %v12367_v6, %s10189_s14 }
 0x8f1   : > { %7487 = vrot.lane.b32.xlu1 %v12327_v28, %s10189_s14 }
 0x8f2   : > { %7501 = vrot.lane.b32.xlu0 %v12386_v61, %s10189_s14 }
 0x8f5   : > { %7491 = vrot.lane.b32.xlu1 %v12341_v33, %s10189_s14 }
 0x8f9   : > { %7495 = vrot.lane.b32.xlu1 %v12365_v54, %s10189_s14 }
 0x8fd   : > { %7499 = vrot.lane.b32.xlu1 %v12374_v39, %s10189_s14 }
 0x901   : > { %7915 = vperm.xlu1 %9871, %v9718_v53  }
 0x924   : > { %v7041_v34 = vpop.permute.xlu1 %7040  ;;  %v6823_v10 = vpop.permute.xlu0 %6822 }
 0x925   : > { %v6839_v32 = vsel %vm6838_vm15, %v6821_v3, %v6823_v10  ;;  %v7057_v27 = vsel %vm708_vm2, %v7039_v2, %v7041_v34 }
 0x926   : > { %v6851_v36 = vsel %vm1384_vm12, %v6839_v32, 0  ;;  %v7069_v22 = vsel %vm1384_vm12, %v7057_v27, 0 }
 0x928   : > { %v6825_v20 = vpop.permute.xlu1 %6824  ;;  %v6827_v16 = vpop.permute.xlu0 %6826 }
 0x929   : > { %v6840_v60 = vsel %vm6838_vm15, %v6823_v10, %v6825_v20  ;;  %v6841_v49 = vsel %vm6838_vm15, %v6825_v20, %v6827_v16 }
 0x92a   : > { %9675 = vmatprep.subr.msk.bf16.mxu0 %vm1384_vm12, %v6840_v60  ;;  %v6857_v4 = vsel %vm1384_vm12, %v6841_v49, 0 }
 0x92b   : > { %6875 = vmatpush1.bf16.msra.mxu0 %v6851_v36  ;;  %v9691_v36 = vld [vmem:[%s13040_s5 + $0x58] sm:$0xf] }
 0x92c   : > { %v6829_v47 = vpop.permute.xlu1 %6828  ;;  %v7043_v58 = vpop.permute.xlu0 %7042 }
 0x92d   : > { %v6842_v57 = vsel %vm6838_vm15, %v6827_v16, %v6829_v47  ;;  %v7058_v35 = vsel %vm708_vm2, %v7041_v34, %v7043_v58 }
 0x92e   : > { %9676 = vmatmul.mubr.msk.bf16.vlgmr.msra.gmra.mrb[216].mxu0 %vm1380_vm13, %v9674_v46  ;;  %9677 = vmatprep.subr.msk.bf16.mxu1 %vm1384_vm12, %v6842_v57 }
 0x92f   : > { %6916 = vmatpush1.bf16.msra.mxu1 %v6857_v4  ;;  %6988 = vmatprep.mubr.bf16.mxu0 %v13149_v43 }
 0x930   : > { %v6831_v41 = vpop.permute.xlu0 %6830  ;;  %v6833_v11 = vpop.permute.xlu1 %6832 }
 0x931   : > { %v6843_v48 = vsel %vm6838_vm15, %v6829_v47, %v6831_v41  ;;  %v6844_v0 = vsel %vm6838_vm15, %v6831_v41, %v6833_v11 }
 0x932   : > { %9678 = vmatmul.mubr.msk.bf16.vlgmr.msra.gmra.mrb[216].mxu1 %vm1380_vm13, %v9674_v46  ;;  %v6863_v31 = vsel %vm1384_vm12, %v6843_v48, 0  ;;  %9679 = vmatprep.subr.msk.bf16.mxu0 %vm1384_vm12, %v6844_v0 }
 0x933   : > { %7029 = vmatprep.mubr.bf16.mxu1 %v13149_v43  ;;  %6957 = vmatpush1.bf16.msra.mxu0 %v6863_v31 }
 0x934   : > { %v6835_v25 = vpop.permute.xlu0 %6834  ;;  %9683 = vmatprep.subr.msk.bf16.mxu0 %vm1384_vm12, %v7058_v35 }
 0x935   : > { %v6845_v29 = vsel %vm6838_vm15, %v6833_v11, %v6835_v25 }
 0x936   : > { %9680 = vmatmul.mubr.msk.bf16.vlgmr.msra.gmra.mrb[220].mxu0 %vm1380_vm13, %v9674_v46  ;;  %v6869_v7 = vsel %vm1384_vm12, %v6845_v29, 0 }
 0x937   : > { %7093 = vmatpush1.bf16.msra.mxu0 %v7069_v22  ;;  %7124 = vmatprep.mubr.bf16.mxu0 %v13149_v43 }
 0x938   : > { %v7047_v18 = vpop.permute.xlu0 %7046 }
 0x93c   : > { %v7261_v50 = vpop.permute.xlu0 %7260 }
 0x93e   : > { %9684 = vmatmul.mubr.msk.bf16.vlgmr.msra.gmra.mrb[224].mxu0 %vm1380_vm13, %v9673_v63 }
 0x93f   : > { %v6837_v9 = vpop.permute.xlu1 %6836  ;;  %7206 = vmatprep.mubr.bf16.mxu0 %v13149_v43 }
 0x940   : > { %v6846_v56 = vsel %vm6838_vm15, %v6835_v25, %v6837_v9  ;;  %v7051_v42 = vpop.permute.xlu0 %7050 }
 0x941   : > { %9681 = vmatprep.subr.msk.bf16.mxu1 %vm1384_vm12, %v6846_v56 }
 0x942   : > { %6998 = vmatpush1.bf16.msra.mxu1 %v6869_v7 }
 0x943   : > { %v7045_v51 = vpop.permute.xlu1 %7044 }
 0x944   : > { %v7059_v55 = vsel %vm708_vm2, %v7043_v58, %v7045_v51  ;;  %v7060_v44 = vsel %vm708_vm2, %v7045_v51, %v7047_v18  ;;  %v7055_v37 = vpop.permute.xlu0 %7054 }
 0x945   : > { %v7075_v12 = vsel %vm1384_vm12, %v7059_v55, 0  ;;  %9682 = vmatmul.mubr.msk.bf16.vlgmr.msra.gmra.mrb[220].mxu1 %vm1380_vm13, %v9674_v46  ;;  %9685 = vmatprep.subr.msk.bf16.mxu1 %vm1384_vm12, %v7060_v44 }
 0x946   : > { %7134 = vmatpush1.bf16.msra.mxu1 %v7075_v12  ;;  %7165 = vmatprep.mubr.bf16.mxu1 %v13149_v43 }
 0x947   : > { %v7049_v8 = vpop.permute.xlu1 %7048 }
 0x948   : > { %v7061_v40 = vsel %vm708_vm2, %v7047_v18, %v7049_v8  ;;  %v7062_v17 = vsel %vm708_vm2, %v7049_v8, %v7051_v42  ;;  %v7265_v30 = vpop.permute.xlu0 %7264 }
 0x949   : > { %v7081_v14 = vsel %vm1384_vm12, %v7061_v40, 0  ;;  %9687 = vmatprep.subr.msk.bf16.mxu0 %vm1384_vm12, %v7062_v17 }
 0x94a   : > { %7175 = vmatpush1.bf16.msra.mxu0 %v7081_v14  ;;  %v7716_v14 = vsel %vm1384_vm12, %v12327_v28, 0  ;;  %v9709_v28 = vld [vmem:[%s13040_s5 + $0x60] sm:$0xf] }
 0x94b   : > { %v7053_v24 = vpop.permute.xlu1 %7052 }
 0x94c   : > { %v7063_v13 = vsel %vm708_vm2, %v7051_v42, %v7053_v24  ;;  %v7064_v21 = vsel %vm708_vm2, %v7053_v24, %v7055_v37  ;;  %v7269_v5 = vpop.permute.xlu0 %7268 }
 0x94d   : > { %9686 = vmatmul.mubr.msk.bf16.vlgmr.msra.gmra.mrb[224].mxu1 %vm1380_vm13, %v9673_v63  ;;  %9688 = vmatmul.mubr.msk.bf16.vlgmr.msra.gmra.mrb[228].mxu0 %vm1380_vm13, %v9673_v63  ;;  %v7087_v53 = vsel %vm1384_vm12, %v7063_v13, 0 }
 0x94e   : > { %9689 = vmatprep.subr.msk.bf16.mxu1 %vm1384_vm12, %v7064_v21  ;;  %7247 = vmatprep.mubr.bf16.mxu1 %v13149_v43 }
 0x94f   : > { %v7259_v3 = vpop.permute.xlu1 %7258  ;;  %7216 = vmatpush1.bf16.msra.mxu1 %v7087_v53  ;;  %7343 = vmatprep.mubr.bf16.mxu0 %v13149_v43 }
 0x950   : > { %v7273_v2 = vpop.permute.xlu0 %7272  ;;  %v7276_v34 = vsel %vm1380_vm13, %v7259_v3, %v7261_v50 }
 0x951   : > { %v7288_v20 = vsel %vm1384_vm12, %v7276_v34, 0 }
 0x953   : > { %v7263_v10 = vpop.permute.xlu1 %7262 }
 0x954   : > { %v7277_v32 = vsel %vm1380_vm13, %v7261_v50, %v7263_v10  ;;  %v7486_v16 = vpop.permute.xlu0 %7485  ;;  %v7278_v60 = vsel %vm1380_vm13, %v7263_v10, %v7265_v30  ;;  %v9700_v50 = vld [vmem:[%s13040_s5 + $0x5c] sm:$0xf]  ;;  %v8168_v10 = vld [vmem:[#allocation2 + $0x28] sm:$0xff] }
 0x955   : > { %9690 = vmatmul.mubr.msk.bf16.vlgmr.msra.gmra.mrb[228].mxu1 %vm1380_vm13, %v9673_v63  ;;  %9692 = vmatprep.subr.msk.bf16.mxu0 %vm1384_vm12, %v7277_v32  ;;  %v7294_v47 = vsel %vm1384_vm12, %v7278_v60, 0  ;;  %v12572_v32 = vpack.c.bf16 %v8168_v10, %v8168_v10 }
 0x956   : > { %7312 = vmatpush1.bf16.msra.mxu0 %v7288_v20  ;;  %7384 = vmatprep.mubr.bf16.mxu1 %v13149_v43 }
 0x957   : > { %v7267_v49 = vpop.permute.xlu1 %7266  ;;  %8400 = vrot.lane.b32.xlu1 %v12572_v32, %s10195_s28  ;;  %8183 = vrot.lane.b32.xlu0 %v12572_v32, %s10194_s2 }
 0x958   : > { %v7279_v46 = vsel %vm1380_vm13, %v7265_v30, %v7267_v49  ;;  %v7280_v58 = vsel %vm1380_vm13, %v7267_v49, %v7269_v5  ;;  %v7490_v4 = vpop.permute.xlu0 %7489 }
 0x959   : > { %9693 = vmatmul.mubr.msk.bf16.vlgmr.msra.gmra.mrb[232].mxu0 %vm1380_vm13, %v9691_v36  ;;  %9694 = vmatprep.subr.msk.bf16.mxu1 %vm1384_vm12, %v7279_v46  ;;  %v7300_v11 = vsel %vm1384_vm12, %v7280_v58, 0 }
 0x95a   : > { %7353 = vmatpush1.bf16.msra.mxu1 %v7294_v47  ;;  %7425 = vmatprep.mubr.bf16.mxu0 %v13149_v43 }
 0x95b   : > { %v7271_v57 = vpop.permute.xlu1 %7270 }
 0x95c   : > { %v7281_v41 = vsel %vm1380_vm13, %v7269_v5, %v7271_v57  ;;  %v7282_v48 = vsel %vm1380_vm13, %v7271_v57, %v7273_v2  ;;  %v7494_v35 = vpop.permute.xlu0 %7493 }
 0x95d   : > { %9695 = vmatmul.mubr.msk.bf16.vlgmr.msra.gmra.mrb[232].mxu1 %vm1380_vm13, %v9691_v36  ;;  %9696 = vmatprep.subr.msk.bf16.mxu0 %vm1384_vm12, %v7281_v41  ;;  %v7306_v27 = vsel %vm1384_vm12, %v7282_v48, 0 }
 0x95e   : > { %7394 = vmatpush1.bf16.msra.mxu0 %v7300_v11  ;;  %7466 = vmatprep.mubr.bf16.mxu1 %v13149_v43 }
 0x95f   : > { %v7275_v0 = vpop.permute.xlu1 %7274 }
 0x960   : > { %v7283_v31 = vsel %vm1380_vm13, %v7273_v2, %v7275_v0  ;;  %v7498_v9 = vpop.permute.xlu0 %7497 }
 0x961   : > { %9697 = vmatmul.mubr.msk.bf16.vlgmr.msra.gmra.mrb[236].mxu0 %vm1380_vm13, %v9691_v36  ;;  %9698 = vmatprep.subr.msk.bf16.mxu1 %vm1384_vm12, %v7283_v31 }
 0x962   : > { %7435 = vmatpush1.bf16.msra.mxu1 %v7306_v27  ;;  %7570 = vmatprep.mubr.bf16.mxu0 %v13149_v43 }
 0x963   : > { %v7488_v25 = vpop.permute.xlu1 %7487 }
 0x964   : > { %v7503_v22 = vsel %vm425_vm1, %v7486_v16, %v7488_v25  ;;  %v7504_v18 = vsel %vm425_vm1, %v7488_v25, %v7490_v4  ;;  %v7502_v12 = vpop.permute.xlu0 %7501 }
 0x965   : > { %v7515_v29 = vsel %vm1384_vm12, %v7503_v22, 0  ;;  %9699 = vmatmul.mubr.msk.bf16.vlgmr.msra.gmra.mrb[236].mxu1 %vm1380_vm13, %v9691_v36  ;;  %9701 = vmatprep.subr.msk.bf16.mxu0 %vm1384_vm12, %v7504_v18 }
 0x966   : > { %7539 = vmatpush1.bf16.msra.mxu0 %v7515_v29  ;;  %7611 = vmatprep.mubr.bf16.mxu1 %v13149_v43 }
 0x967   : > { %v7492_v63 = vpop.permute.xlu1 %7491 }
 0x968   : > { %v7505_v7 = vsel %vm425_vm1, %v7490_v4, %v7492_v63  ;;  %v7506_v56 = vsel %vm425_vm1, %v7492_v63, %v7494_v35 }
 0x969   : > { %v7521_v42 = vsel %vm1384_vm12, %v7505_v7, 0  ;;  %9702 = vmatmul.mubr.msk.bf16.vlgmr.msra.gmra.mrb[240].mxu0 %vm1380_vm13, %v9700_v50  ;;  %9703 = vmatprep.subr.msk.bf16.mxu1 %vm1384_vm12, %v7506_v56 }
 0x96a   : > { %7580 = vmatpush1.bf16.msra.mxu1 %v7521_v42  ;;  %7652 = vmatprep.mubr.bf16.mxu0 %v13149_v43 }
 0x96b   : > { %v7496_v51 = vpop.permute.xlu1 %7495 }
 0x96c   : > { %v7507_v55 = vsel %vm425_vm1, %v7494_v35, %v7496_v51  ;;  %v7508_v44 = vsel %vm425_vm1, %v7496_v51, %v7498_v9 }
 0x96d   : > { %v7527_v37 = vsel %vm1384_vm12, %v7507_v55, 0  ;;  %9704 = vmatmul.mubr.msk.bf16.vlgmr.msra.gmra.mrb[240].mxu1 %vm1380_vm13, %v9700_v50  ;;  %9705 = vmatprep.subr.msk.bf16.mxu0 %vm1384_vm12, %v7508_v44 }
 0x96e   : > { %7621 = vmatpush1.bf16.msra.mxu0 %v7527_v37  ;;  %7693 = vmatprep.mubr.bf16.mxu1 %v13149_v43 }
 0x96f   : > { %v7500_v8 = vpop.permute.xlu1 %7499  ;;  %9710 = vmatprep.subr.msk.bf16.mxu0 %vm1384_vm12, %v12339_v38  ;;  %v7722_v38 = vsel %vm1384_vm12, %v12341_v33, 0  ;;  %v7734_v33 = vsel %vm1384_vm12, %v12374_v39, 0 }
 0x970   : > { %v7509_v40 = vsel %vm425_vm1, %v7498_v9, %v7500_v8  ;;  %v7510_v17 = vsel %vm425_vm1, %v7500_v8, %v7502_v12 }
 0x971   : > { %v7533_v30 = vsel %vm1384_vm12, %v7509_v40, 0  ;;  %9706 = vmatmul.mubr.msk.bf16.vlgmr.msra.gmra.mrb[244].mxu0 %vm1380_vm13, %v9700_v50  ;;  %9707 = vmatprep.subr.msk.bf16.mxu1 %vm1384_vm12, %v7510_v17 }
 0x972   : > { %7662 = vmatpush1.bf16.msra.mxu1 %v7533_v30  ;;  %7740 = vmatpush1.bf16.msra.mxu0 %v7716_v14 }
 0x973   : > { %9712 = vmatprep.subr.msk.bf16.mxu1 %vm1384_vm12, %v12352_v15  ;;  %9714 = vmatprep.subr.msk.bf16.mxu0 %vm1384_vm12, %v12367_v6  ;;  %v7728_v15 = vsel %vm1384_vm12, %v12365_v54, 0 }
 0x974   : > { %7771 = vmatprep.mubr.bf16.mxu0 %v13149_v43 }
 0x975   : > { %9708 = vmatmul.mubr.msk.bf16.vlgmr.msra.gmra.mrb[244].mxu1 %vm1380_vm13, %v9700_v50 }
 0x976   : > { %7781 = vmatpush1.bf16.msra.mxu1 %v7722_v38  ;;  %7812 = vmatprep.mubr.bf16.mxu1 %v13149_v43 }
 0x977   : > { %9716 = vmatprep.subr.msk.bf16.mxu1 %vm1384_vm12, %v12386_v61 }
 0x979   : > { %9711 = vmatmul.mubr.msk.bf16.vlgmr.msra.gmra.mrb[248].mxu0 %vm1380_vm13, %v9709_v28 }
 0x97a   : > { %7822 = vmatpush1.bf16.msra.mxu0 %v7728_v15  ;;  %7853 = vmatprep.mubr.bf16.mxu0 %v13149_v43 }
 0x97d   : > { %9713 = vmatmul.mubr.msk.bf16.vlgmr.msra.gmra.mrb[248].mxu1 %vm1380_vm13, %v9709_v28 }
 0x97e   : > { %7863 = vmatpush1.bf16.msra.mxu1 %v7734_v33  ;;  %7894 = vmatprep.mubr.bf16.mxu1 %v13149_v43 }
 0x981   : > { %9715 = vmatmul.mubr.msk.bf16.vlgmr.msra.gmra.mrb[252].mxu0 %vm1380_vm13, %v9709_v28 }
 0x982   : > { %8268 = vmatprep.mubr.bf16.mxu0 %v13149_v43 }
 0x985   : > { %9717 = vmatmul.mubr.msk.bf16.vlgmr.msra.gmra.mrb[252].mxu1 %vm1380_vm13, %v9709_v28 }
 0x986   : > { %8309 = vmatprep.mubr.bf16.mxu1 %v13149_v43 }
 0xa01   : > { %v6908_v54 = vpop.f32.mrb[216].mxu0 }
 0xa02   : > { %v6910_v6 = vpop.f32.mrb[217].mxu0 }
 0xa03   : > { %v6912_v61 = vpop.f32.mrb[218].mxu0 }
 0xa04   : > { %v6913_v24 = vpop.f32.mrb[219].mxu0 }
 0xa05   : > { %v6949_v13 = vpop.f32.mrb[216].mxu1 }
 0xa06   : > { %v6951_v21 = vpop.f32.mrb[217].mxu1 }
 0xa07   : > { %v6953_v5 = vpop.f32.mrb[218].mxu1 }
 0xa08   : > { %v6954_v53 = vpop.f32.mrb[219].mxu1 }
 0xa09   : > { %v6990_v39 = vpop.f32.mrb[220].mxu0 }
 0xa0a   : > { %v6992_v3 = vpop.f32.mrb[221].mxu0 }
 0xa0b   : > { %v6994_v2 = vpop.f32.mrb[222].mxu0 }
 0xa0c   : > { %v6995_v34 = vpop.f32.mrb[223].mxu0 }
 0xa11   : > { %v7126_v20 = vpop.f32.mrb[224].mxu0 }
 0xa12   : > { %v7127_v16 = vadd.f32 %v7126_v20, %v6908_v54  ;;  %v7128_v60 = vpop.f32.mrb[225].mxu0 }
 0xa13   : > { %v7129_v36 = vadd.f32 %v7128_v60, %v6910_v6  ;;  %v7130_v49 = vpop.f32.mrb[226].mxu0 }
 0xa14   : > { %v7131_v46 = vpop.f32.mrb[227].mxu0 }
 0xa18   : > { %v7031_v47 = vpop.f32.mrb[220].mxu1 }
 0xa19   : > { %v7033_v58 = vpop.f32.mrb[221].mxu1 }
 0xa1a   : > { %v7035_v57 = vpop.f32.mrb[222].mxu1 }
 0xa1b   : > { %v7036_v4 = vpop.f32.mrb[223].mxu1 }
 0xa20   : > { %v7167_v41 = vpop.f32.mrb[224].mxu1  ;;  %v7208_v11 = vpop.f32.mrb[228].mxu0 }
 0xa21   : > { %v7168_v48 = vadd.f32 %v7167_v41, %v6949_v13  ;;  %v7209_v0 = vadd.f32 %v7208_v11, %v6990_v39  ;;  %v7169_v31 = vpop.f32.mrb[225].mxu1  ;;  %v7210_v27 = vpop.f32.mrb[229].mxu0 }
 0xa22   : > { %v7170_v35 = vadd.f32 %v7169_v31, %v6951_v21  ;;  %v7211_v25 = vadd.f32 %v7210_v27, %v6992_v3  ;;  %v7171_v22 = vpop.f32.mrb[226].mxu1  ;;  %v7212_v18 = vpop.f32.mrb[230].mxu0 }
 0xa23   : > { %v7172_v29 = vpop.f32.mrb[227].mxu1  ;;  %v7213_v50 = vpop.f32.mrb[231].mxu0 }
 0xa28   : > { %v7249_v63 = vpop.f32.mrb[228].mxu1 }
 0xa29   : > { %v7250_v9 = vadd.f32 %v7249_v63, %v7031_v47  ;;  %v7251_v7 = vpop.f32.mrb[229].mxu1 }
 0xa2a   : > { %v7252_v56 = vadd.f32 %v7251_v7, %v7033_v58  ;;  %v7253_v42 = vpop.f32.mrb[230].mxu1 }
 0xa2b   : > { %v7254_v51 = vpop.f32.mrb[231].mxu1 }
 0xa2c   : > { %v7345_v55 = vpop.f32.mrb[232].mxu0 }
 0xa2d   : > { %v7475_v44 = vadd.f32 %v7345_v55, %v7127_v16  ;;  %v7347_v37 = vpop.f32.mrb[233].mxu0 }
 0xa2e   : > { %v7476_v12 = vadd.f32 %v7347_v37, %v7129_v36  ;;  %v7349_v8 = vpop.f32.mrb[234].mxu0 }
 0xa2f   : > { %v7350_v40 = vpop.f32.mrb[235].mxu0 }
 0xa30   : > { %v7386_v17 = vpop.f32.mrb[232].mxu1 }
 0xa31   : > { %v7477_v30 = vadd.f32 %v7386_v17, %v7168_v48  ;;  %v7388_v14 = vpop.f32.mrb[233].mxu1 }
 0xa32   : > { %v7478_v38 = vadd.f32 %v7388_v14, %v7170_v35  ;;  %v7390_v28 = vpop.f32.mrb[234].mxu1 }
 0xa33   : > { %v7391_v15 = vpop.f32.mrb[235].mxu1 }
 0xa34   : > { %v7427_v33 = vpop.f32.mrb[236].mxu0 }
 0xa35   : > { %v7479_v54 = vadd.f32 %v7427_v33, %v7209_v0  ;;  %v7429_v6 = vpop.f32.mrb[237].mxu0 }
 0xa36   : > { %v7480_v61 = vadd.f32 %v7429_v6, %v7211_v25  ;;  %v7431_v24 = vpop.f32.mrb[238].mxu0 }
 0xa37   : > { %v7432_v13 = vpop.f32.mrb[239].mxu0 }
 0xa38   : > { %v7468_v21 = vpop.f32.mrb[236].mxu1 }
 0xa39   : > { %v7481_v5 = vadd.f32 %v7468_v21, %v7250_v9  ;;  %v7470_v53 = vpop.f32.mrb[237].mxu1 }
 0xa3a   : > { %v7482_v39 = vadd.f32 %v7470_v53, %v7252_v56  ;;  %v7472_v3 = vpop.f32.mrb[238].mxu1  ;;  %v12578_v56 = vpop.permute.xlu1 %7915 }
 0xa3b   : > { %v7473_v2 = vpop.f32.mrb[239].mxu1 }
 0xa3c   : > { %v7572_v34 = vpop.f32.mrb[240].mxu0 }
 0xa3d   : > { %v7702_v10 = vadd.f32 %v7572_v34, %v7475_v44  ;;  %v7574_v20 = vpop.f32.mrb[241].mxu0 }
 0xa3e   : > { %v7703_v16 = vadd.f32 %v7574_v20, %v7476_v12  ;;  %v7576_v60 = vpop.f32.mrb[242].mxu0 }
 0xa3f   : > { %v7577_v36 = vpop.f32.mrb[243].mxu0 }
 0xa40   : > { %v7613_v49 = vpop.f32.mrb[240].mxu1 }
 0xa41   : > { %v7704_v46 = vadd.f32 %v7613_v49, %v7477_v30  ;;  %v7615_v47 = vpop.f32.mrb[241].mxu1 }
 0xa42   : > { %v7705_v58 = vadd.f32 %v7615_v47, %v7478_v38  ;;  %v7617_v57 = vpop.f32.mrb[242].mxu1 }
 0xa43   : > { %v7618_v4 = vpop.f32.mrb[243].mxu1 }
 0xa44   : > { %v7654_v41 = vpop.f32.mrb[244].mxu0 }
 0xa45   : > { %v7706_v11 = vadd.f32 %v7654_v41, %v7479_v54  ;;  %v7656_v48 = vpop.f32.mrb[245].mxu0 }
 0xa46   : > { %v7707_v0 = vadd.f32 %v7656_v48, %v7480_v61  ;;  %v7658_v31 = vpop.f32.mrb[246].mxu0 }
 0xa47   : > { %v7659_v27 = vpop.f32.mrb[247].mxu0 }
 0xa48   : > { %v7695_v35 = vpop.f32.mrb[244].mxu1 }
 0xa49   : > { %v7708_v25 = vadd.f32 %v7695_v35, %v7481_v5  ;;  %v7697_v22 = vpop.f32.mrb[245].mxu1 }
 0xa4a   : > { %v7709_v18 = vadd.f32 %v7697_v22, %v7482_v39  ;;  %v7699_v29 = vpop.f32.mrb[246].mxu1 }
 0xa4b   : > { %v7700_v50 = vpop.f32.mrb[247].mxu1 }
 0xa4c   : > { %v7773_v63 = vpop.f32.mrb[248].mxu0 }
 0xa4d   : > { %v7903_v9 = vadd.f32 %v7773_v63, %v7702_v10  ;;  %v7775_v7 = vpop.f32.mrb[249].mxu0 }
 0xa4e   : > { %v7904_v42 = vadd.f32 %v7775_v7, %v7703_v16  ;;  %v7777_v51 = vpop.f32.mrb[250].mxu0 }
 0xa4f   : > { %v7918_v55 = vadd.f32 %v12578_v56, %v7903_v9  ;;  %v7778_v44 = vpop.f32.mrb[251].mxu0 }
 0xa50   : > { %v7919_v37 = vadd.f32 %v12578_v56, %v7904_v42  ;;  %v7814_v12 = vpop.f32.mrb[248].mxu1 }
 0xa51   : > { %v12582_v8 = vmul.f32 0.70710677, %v7918_v55  ;;  %v7905_v40 = vadd.f32 %v7814_v12, %v7704_v46  ;;  %v7816_v17 = vpop.f32.mrb[249].mxu1 }
 0xa52   : > { %v12584_v30 = vmul.f32 0.70710677, %v7919_v37  ;;  %v7906_v14 = vadd.f32 %v7816_v17, %v7705_v58  ;;  %v7818_v38 = vpop.f32.mrb[250].mxu1 }
 0xa53   : > { %v7943_v28 = vand.u32 2147483647, %v12582_v8  ;;  %v7920_v15 = vadd.f32 %v12578_v56, %v7905_v40  ;;  %v7819_v33 = vpop.f32.mrb[251].mxu1  ;;  %vm8103_vm0 = vcmp.lt.f32.partialorder %v12582_v8, 0.0 }
 0xa54   : > { %v7944_v54 = vand.u32 2147483647, %v12584_v30  ;;  %v12590_v6 = vadd.f32 %v12578_v56, %v7906_v14  ;;  %v7855_v61 = vpop.f32.mrb[252].mxu0  ;;  %vm8104_vm3 = vcmp.lt.f32.partialorder %v12584_v30, 0.0 }
 0xa55   : > { %v7951_v24 = vmul.f32 0.3275911, %v7943_v28  ;;  %v12592_v13 = vmul.f32 0.70710677, %v7920_v15  ;;  %v7857_v3 = vpop.f32.mrb[253].mxu0  ;;  %v8055_v36 = vsub.f32 0.0, %v7943_v28  ;;  %v7907_v57 = vadd.f32 %v7855_v61, %v7706_v11 }
 0xa56   : > { %v7952_v21 = vmul.f32 0.3275911, %v7944_v54  ;;  %v12595_v5 = vmul.f32 0.70710677, %v12590_v6  ;;  %v7859_v20 = vpop.f32.mrb[254].mxu0  ;;  %v8056_v47 = vsub.f32 0.0, %v7944_v54  ;;  %v7908_v31 = vadd.f32 %v7857_v3, %v7707_v0 }
 0xa57   : > { %v7959_v53 = vadd.f32 1.0, %v7951_v24  ;;  %v7945_v39 = vand.u32 2147483647, %v12592_v13  ;;  %v7860_v46 = vpop.f32.mrb[255].mxu0  ;;  %v12600_v35 = vadd.f32 %v12578_v56, %v7907_v57  ;;  %v8063_v29 = vmul.f32 %v8055_v36, %v7943_v28 }
 0xa58   : > { %v7960_v2 = vadd.f32 1.0, %v7952_v21  ;;  %v7946_v34 = vand.u32 2147483647, %v12595_v5  ;;  %v7896_v10 = vpop.f32.mrb[252].mxu1  ;;  %v12603_v50 = vadd.f32 %v12578_v56, %v7908_v31  ;;  %v8064_v9 = vmul.f32 %v8056_v47, %v7944_v54 }
 0xa59   : > { %10042 = vrcp.f32 %v7959_v53  ;;  %v7953_v16 = vmul.f32 0.3275911, %v7945_v39  ;;  %v7898_v60 = vpop.f32.mrb[253].mxu1  ;;  %v8057_v41 = vsub.f32 0.0, %v7945_v39  ;;  %v7909_v22 = vadd.f32 %v7896_v10, %v7708_v25 }
 0xa5a   : > { %10044 = vrcp.f32 %v7960_v2  ;;  %v7954_v49 = vmul.f32 0.3275911, %v7946_v34  ;;  %v7900_v4 = vpop.f32.mrb[254].mxu1  ;;  %v7910_v63 = vadd.f32 %v7898_v60, %v7709_v18  ;;  %v12606_v7 = vmul.f32 0.70710677, %v12600_v35 }
 0xa5b   : > { %v7961_v58 = vadd.f32 1.0, %v7953_v16  ;;  %v7901_v27 = vpop.f32.mrb[255].mxu1  ;;  %v12609_v11 = vadd.f32 %v12578_v56, %v7909_v22  ;;  %v12611_v0 = vmul.f32 0.5, %v7918_v55  ;;  %v8065_v42 = vmul.f32 %v8057_v41, %v7945_v39 }
 0xa5c   : > { %v7962_v48 = vadd.f32 1.0, %v7954_v49  ;;  %v12614_v51 = vmul.f32 0.70710677, %v12603_v50  ;;  %v12616_v25 = vmul.f32 0.5, %v7919_v37  ;;  %v8058_v44 = vsub.f32 0.0, %v7946_v34 }
 0xa5d   : > { %10046 = vrcp.f32 %v7961_v58  ;;  %v7947_v12 = vand.u32 2147483647, %v12606_v7  ;;  %v12620_v18 = vmul.f32 0.70710677, %v12609_v11  ;;  %v8071_v40 = vmul.f32 1.442695, %v8063_v29 }
 0xa5e   : > { %10048 = vrcp.f32 %v7962_v48  ;;  %v12622_v17 = vmul.f32 0.5, %v7920_v15  ;;  %v7948_v14 = vand.u32 2147483647, %v12614_v51  ;;  %v12626_v55 = vadd.f32 %v12578_v56, %v7910_v63 }
 0xa5f   : > { %v8073_v28 = vmul.f32 1.442695, %v8064_v9  ;;  %v7955_v33 = vmul.f32 0.3275911, %v7947_v12  ;;  %v7949_v37 = vand.u32 2147483647, %v12620_v18  ;;  %v8066_v53 = vmul.f32 %v8058_v44, %v7946_v34 }
 0xa60   : > { %v8075_v24 = vmul.f32 1.442695, %v8065_v42  ;;  %v7956_v21 = vmul.f32 0.3275911, %v7948_v14  ;;  %10050 = vpow2.f32 %v8071_v40  ;;  %v12636_v10 = vmul.f32 0.70710677, %v12626_v55 }
 0xa61   : > { %v7963_v39 = vadd.f32 1.0, %v7955_v33  ;;  %v7957_v3 = vmul.f32 0.3275911, %v7949_v37  ;;  %v8059_v60 = vsub.f32 0.0, %v7947_v12  ;;  %v8060_v47 = vsub.f32 0.0, %v7948_v14 }
 0xa62   : > { %v7964_v56 = vadd.f32 1.0, %v7956_v21  ;;  %v8077_v4 = vmul.f32 1.442695, %v8066_v53  ;;  %v8061_v41 = vsub.f32 0.0, %v7949_v37  ;;  %v7950_v27 = vand.u32 2147483647, %v12636_v10 }
 0xa63   : > { %v12628_v38 = vpop.eup %10042  ;;  %10052 = vrcp.f32 %v7963_v39  ;;  %v7965_v36 = vadd.f32 1.0, %v7957_v3  ;;  %v8067_v63 = vmul.f32 %v8059_v60, %v7947_v12  ;;  %v8068_v44 = vmul.f32 %v8060_v47, %v7948_v14 }
 0xa64   : > { %v12631_v54 = vpop.eup %10044  ;;  %v7983_v61 = vmul.f32 1.0614054, %v12628_v38  ;;  %10054 = vrcp.f32 %v7964_v56  ;;  %v7958_v40 = vmul.f32 0.3275911, %v7950_v27  ;;  %v8069_v21 = vmul.f32 %v8061_v41, %v7949_v37 }
 0xa65   : > { %v7984_v15 = vmul.f32 1.0614054, %v12631_v54  ;;  %10056 = vpow2.f32 %v8073_v28  ;;  %v8081_v60 = vmul.f32 1.442695, %v8068_v44  ;;  %vm8105_vm4 = vcmp.lt.f32.partialorder %v12592_v13, 0.0 }
 0xa66   : > { %v7991_v2 = vadd.f32 -1.4531521, %v7983_v61  ;;  %10058 = vrcp.f32 %v7965_v36  ;;  %v12651_v61 = vmul.f32 0.5, %v12590_v6  ;;  %v7966_v39 = vadd.f32 1.0, %v7958_v40 }
 0xa67   : > { %v12638_v20 = vpop.eup %10046  ;;  %v7992_v16 = vadd.f32 -1.4531521, %v7984_v15  ;;  %10060 = vpow2.f32 %v8075_v24  ;;  %v8062_v24 = vsub.f32 0.0, %v7950_v27  ;;  %vm8106_vm14 = vcmp.lt.f32.partialorder %v12595_v5, 0.0 }
 0xa68   : > { %v12640_v49 = vpop.eup %10048  ;;  %v7999_v46 = vmul.f32 %v12628_v38, %v7991_v2  ;;  %v7985_v34 = vmul.f32 1.0614054, %v12638_v20  ;;  %10062 = vpow2.f32 %v8077_v4  ;;  %v8079_v2 = vmul.f32 1.442695, %v8067_v63 }
 0xa69   : > { %v8000_v58 = vmul.f32 %v12631_v54, %v7992_v16  ;;  %v7986_v57 = vmul.f32 1.0614054, %v12640_v49  ;;  %10064 = vrcp.f32 %v7966_v39  ;;  %vm8107_vm5 = vcmp.lt.f32.partialorder %v12606_v7, 0.0 }
 0xa6a   : > { %v8007_v48 = vadd.f32 1.4214138, %v7999_v46  ;;  %v7993_v31 = vadd.f32 -1.4531521, %v7985_v34  ;;  %v10051_v56 = vpop.eup %10050  ;;  %v8083_v46 = vmul.f32 1.442695, %v8069_v21  ;;  %10066 = vpow2.f32 %v8079_v2 }
 0xa6b   : > { %v8008_v22 = vadd.f32 1.4214138, %v8000_v58  ;;  %v7994_v29 = vadd.f32 -1.4531521, %v7986_v57  ;;  %10068 = vpow2.f32 %v8081_v60  ;;  %vm8108_vm6 = vcmp.lt.f32.partialorder %v12614_v51, 0.0 }
 0xa6c   : > { %v8015_v9 = vmul.f32 %v12628_v38, %v8007_v48  ;;  %v8001_v42 = vmul.f32 %v12638_v20, %v7993_v31  ;;  %10070 = vpow2.f32 %v8083_v46  ;;  %v7932_v7 = vmul.f32 0.5, %v12603_v50 }
 0xa6d   : > { %v8016_v33 = vmul.f32 %v12631_v54, %v8008_v22  ;;  %v8002_v28 = vmul.f32 %v12640_v49, %v7994_v29  ;;  %v12656_v6 = vpop.eup %10052  ;;  %vm8109_vm7 = vcmp.lt.f32.partialorder %v12620_v18, 0.0  ;;  %v13216_v18 = vld [vmem:[#allocation83_spill] sm:$0xff]  ;;  %vm8110_vm8 = vcmp.lt.f32.partialorder %v12636_v10, 0.0 }
 0xa6e   : > { %v8023_v15 = vadd.f32 -0.28449672, %v8015_v9  ;;  %v8009_v53 = vadd.f32 1.4214138, %v8001_v42  ;;  %v12660_v34 = vpop.eup %10054  ;;  %v7987_v57 = vmul.f32 1.0614054, %v12656_v6 }
 0xa6f   : > { %v8024_v12 = vadd.f32 -0.28449672, %v8016_v33  ;;  %v8010_v3 = vadd.f32 1.4214138, %v8002_v28  ;;  %v7988_v48 = vmul.f32 1.0614054, %v12660_v34  ;;  %v10057_v31 = vpop.eup %10056  ;;  %v8070_v33 = vmul.f32 %v8062_v24, %v7950_v27 }
 0xa70   : > { %v8031_v14 = vmul.f32 %v12628_v38, %v8023_v15  ;;  %v8017_v16 = vmul.f32 %v12638_v20, %v8009_v53  ;;  %v7995_v63 = vadd.f32 -1.4531521, %v7987_v57  ;;  %v12668_v9 = vpop.eup %10058 }
 0xa71   : > { %v8032_v36 = vmul.f32 %v12631_v54, %v8024_v12  ;;  %v8018_v37 = vmul.f32 %v12640_v49, %v8010_v3  ;;  %v7996_v40 = vadd.f32 -1.4531521, %v7988_v48  ;;  %v10061_v3 = vpop.eup %10060 }
 0xa72   : > { %v8039_v47 = vadd.f32 0.2548296, %v8031_v14  ;;  %v8025_v58 = vadd.f32 -0.28449672, %v8017_v16  ;;  %v8003_v15 = vmul.f32 %v12656_v6, %v7995_v63  ;;  %v10063_v14 = vpop.eup %10062 }
 0xa73   : > { %v8040_v4 = vadd.f32 0.2548296, %v8032_v36  ;;  %v8026_v41 = vadd.f32 -0.28449672, %v8018_v37  ;;  %v8004_v12 = vmul.f32 %v12660_v34, %v7996_v40  ;;  %v8085_v37 = vmul.f32 1.442695, %v8070_v33  ;;  %v12679_v24 = vpop.eup %10064 }
 0xa74   : > { %v8047_v22 = vmul.f32 %v12628_v38, %v8039_v47  ;;  %v8033_v29 = vmul.f32 %v12638_v20, %v8025_v58  ;;  %v7989_v38 = vmul.f32 1.0614054, %v12668_v9  ;;  %v8011_v27 = vadd.f32 1.4214138, %v8003_v15  ;;  %v10067_v63 = vpop.eup %10066 }
 0xa75   : > { %v8048_v42 = vmul.f32 %v12631_v54, %v8040_v4  ;;  %v8034_v44 = vmul.f32 %v12640_v49, %v8026_v41  ;;  %v8012_v36 = vadd.f32 1.4214138, %v8004_v12  ;;  %v7990_v48 = vmul.f32 1.0614054, %v12679_v24 }
 0xa76   : > { %v8087_v28 = vmul.f32 %v10051_v56, %v8047_v22  ;;  %v8041_v21 = vadd.f32 0.2548296, %v8033_v29  ;;  %v7997_v56 = vadd.f32 -1.4531521, %v7989_v38  ;;  %v8019_v46 = vmul.f32 %v12656_v6, %v8011_v27 }
 0xa77   : > { %v8088_v53 = vmul.f32 %v10057_v31, %v8048_v42  ;;  %v8042_v39 = vadd.f32 0.2548296, %v8034_v44  ;;  %v8020_v41 = vmul.f32 %v12660_v34, %v8012_v36  ;;  %10072 = vpow2.f32 %v8085_v37 }
 0xa78   : > { %v8095_v2 = vsub.f32 1.0, %v8087_v28  ;;  %v8049_v54 = vmul.f32 %v12638_v20, %v8041_v21  ;;  %v8005_v57 = vmul.f32 %v12668_v9, %v7997_v56  ;;  %v8027_v22 = vadd.f32 -0.28449672, %v8019_v46  ;;  %v10069_v28 = vpop.eup %10068 }
 0xa79   : > { %v8096_v16 = vsub.f32 1.0, %v8088_v53  ;;  %v8050_v60 = vmul.f32 %v12640_v49, %v8042_v39  ;;  %v8028_v33 = vadd.f32 -0.28449672, %v8020_v41  ;;  %v10071_v56 = vpop.eup %10070 }
 0xa7a   : > { %v8111_v47 = vsub.f32 0.0, %v8095_v2  ;;  %v8089_v58 = vmul.f32 %v10061_v3, %v8049_v54  ;;  %v8013_v29 = vadd.f32 1.4214138, %v8005_v57  ;;  %v8035_v38 = vmul.f32 %v12656_v6, %v8027_v22 }
 0xa7b   : > { %v8112_v4 = vsub.f32 0.0, %v8096_v16  ;;  %v8090_v20 = vmul.f32 %v10063_v14, %v8050_v60  ;;  %v8036_v12 = vmul.f32 %v12660_v34, %v8028_v33  ;;  %v7998_v3 = vadd.f32 -1.4531521, %v7990_v48  ;;  %v13206_v14 = vld [vmem:[#allocation48_spill] sm:$0xff] }
 0xa7c   : > { %v8119_v31 = vsel %vm8103_vm0, %v8111_v47, %v8095_v2  ;;  %v8097_v49 = vsub.f32 1.0, %v8089_v58  ;;  %v8021_v53 = vmul.f32 %v12668_v9, %v8013_v29  ;;  %v8043_v54 = vadd.f32 0.2548296, %v8035_v38 }
 0xa7d   : > { %v8127_v42 = vadd.f32 1.0, %v8119_v31  ;;  %v8120_v44 = vsel %vm8104_vm3, %v8112_v4, %v8096_v16  ;;  %v8098_v40 = vsub.f32 1.0, %v8090_v20  ;;  %v8044_v47 = vadd.f32 0.2548296, %v8036_v12  ;;  %v13208_v4 = vld [vmem:[#allocation52_spill] sm:$0xff]  ;;  %v13209_v31 = vld [vmem:[#allocation54_spill] sm:$0xff] }
 0xa7e   : > { %v8128_v21 = vadd.f32 1.0, %v8120_v44  ;;  %v8113_v15 = vsub.f32 0.0, %v8097_v49  ;;  %v8029_v27 = vadd.f32 -0.28449672, %v8021_v53  ;;  %v8051_v57 = vmul.f32 %v12656_v6, %v8043_v54  ;;  %v13210_v44 = vld [vmem:[#allocation49_spill] sm:$0xff] }
 0xa7f   : > { %v8135_v8 = vmul.f32 %v8127_v42, %v12611_v0  ;;  %v8114_v39 = vsub.f32 0.0, %v8098_v40  ;;  %v13207_v0 = vld [vmem:[#allocation50_spill] sm:$0xff]  ;;  %v8052_v41 = vmul.f32 %v12660_v34, %v8044_v47  ;;  %v8006_v48 = vmul.f32 %v12679_v24, %v7998_v3  ;;  %v13212_v34 = vld [vmem:[#allocation53_spill] sm:$0xff] }
 0xa80   : > { %v8136_v2 = vmul.f32 %v8128_v21, %v12616_v25  ;;  %v8121_v30 = vsel %vm8105_vm4, %v8113_v15, %v8097_v49  ;;  %v8037_v25 = vmul.f32 %v12668_v9, %v8029_v27  ;;  %v8091_v22 = vmul.f32 %v10067_v63, %v8051_v57  ;;  %v13211_v21 = vld [vmem:[#allocation51_spill] sm:$0xff] }
 0xa81   : > { %v8143_v16 = vmul.f32 %v8135_v8, %v13206_v14  ;;  %v8129_v60 = vadd.f32 1.0, %v8121_v30  ;;  %v8122_v36 = vsel %vm8106_vm14, %v8114_v39, %v8098_v40  ;;  %v8092_v40 = vmul.f32 %v10069_v28, %v8052_v41  ;;  %v10073_v50 = vpop.eup %10072 }
 0xa82   : > { %v8144_v58 = vmul.f32 %v8136_v2, %v13207_v0  ;;  %v8130_v46 = vadd.f32 1.0, %v8122_v36  ;;  %v8045_v29 = vadd.f32 0.2548296, %v8037_v25  ;;  %v8014_v33 = vadd.f32 1.4214138, %v8006_v48 }
 0xa83   : > { %v8151_v13 = vadd.f32 %v8143_v16, %v13208_v4  ;;  %v8137_v20 = vmul.f32 %v8129_v60, %v12622_v17  ;;  %v8099_v38 = vsub.f32 1.0, %v8091_v22  ;;  %v8100_v8 = vsub.f32 1.0, %v8092_v40  ;;  %v13219_v40 = vld [vmem:[#allocation86_spill] sm:$0xff] }
 0xa84   : > { %v8152_v49 = vadd.f32 %v8144_v58, %v13209_v31  ;;  %v8138_v5 = vmul.f32 %v8130_v46, %v12651_v61  ;;  %v8053_v17 = vmul.f32 %v12668_v9, %v8045_v29  ;;  %v8022_v39 = vmul.f32 %v12679_v24, %v8014_v33  ;;  %v13213_v61 = vld [vmem:[#allocation55_spill] sm:$0xff]  ;;  %v13214_v46 = vld [vmem:[#allocation80_spill] sm:$0xff] }
 0xa85   : > { %v12708_v42 = vpack.c.bf16 %v8151_v13, %v8151_v13  ;;  %v8145_v6 = vmul.f32 %v8137_v20, %v13210_v44  ;;  %v8115_v28 = vsub.f32 0.0, %v8099_v38  ;;  %v8116_v37 = vsub.f32 0.0, %v8100_v8  ;;  %v13215_v20 = vld [vmem:[#allocation82_spill] sm:$0xff] }
 0xa86   : > { %v8146_v15 = vmul.f32 %v8138_v5, %v13211_v21  ;;  %v8093_v12 = vmul.f32 %v10071_v56, %v8053_v17  ;;  %v12721_v3 = vpack.c.bf16 %v8152_v49, %v8152_v49  ;;  %v8030_v2 = vadd.f32 -0.28449672, %v8022_v39  ;;  %v13217_v5 = vld [vmem:[#allocation84_spill] sm:$0xff] }
 0xa87   : > { %v8153_v53 = vadd.f32 %v8145_v6, %v13212_v34  ;;  %8402 = vrot.lane.b32.xlu0 %v12708_v42, %s10195_s28  ;;  %8185 = vrot.lane.b32.xlu1 %v12708_v42, %s10194_s2  ;;  %v8123_v30 = vsel %vm8107_vm5, %v8115_v28, %v8099_v38  ;;  %v7931_v27 = vmul.f32 0.5, %v12600_v35  ;;  %v8124_v16 = vsel %vm8108_vm6, %v8116_v37, %v8100_v8  ;;  %v13220_v8 = vld [vmem:[#allocation85_spill] sm:$0xff]  ;;  %v8184_v28 = vpop.permute.xlu0 %8183 }
 0xa88   : > { %v8154_v63 = vadd.f32 %v8146_v15, %v13213_v61  ;;  %v8101_v54 = vsub.f32 1.0, %v8093_v12  ;;  %v8131_v14 = vadd.f32 1.0, %v8123_v30  ;;  %v8038_v60 = vmul.f32 %v12679_v24, %v8030_v2  ;;  %v13221_v61 = vld [vmem:[#allocation87_spill] sm:$0xff] }
 0xa89   : > { %v12723_v9 = vpack.c.bf16 %v8153_v53, %v8153_v53  ;;  %v8132_v56 = vadd.f32 1.0, %v8124_v16  ;;  %v7933_v25 = vmul.f32 0.5, %v12609_v11  ;;  %v13218_v11 = vld [vmem:[#allocation81_spill] sm:$0xff]  ;;  %v7934_v17 = vmul.f32 0.5, %v12626_v55  ;;  %v8401_v55 = vpop.permute.xlu1 %8400 }
 0xa8a   : > { %v8117_v36 = vsub.f32 0.0, %v8101_v54  ;;  %v12733_v47 = vpack.c.bf16 %v8154_v63, %v8154_v63  ;;  %v8139_v51 = vmul.f32 %v8131_v14, %v7931_v27  ;;  %v8046_v35 = vadd.f32 0.2548296, %v8038_v60  ;;  %v9720_v60 = vld [vmem:[%s13040_s5 + $0x68] sm:$0xf] }
 0xa8b   : > { %8189 = vrot.lane.b32.xlu1 %v12723_v9, %s10194_s2  ;;  %8187 = vrot.lane.b32.xlu0 %v12721_v3, %s10194_s2  ;;  %v8140_v0 = vmul.f32 %v8132_v56, %v7932_v7 }
 0xa8c   : > { %v8125_v58 = vsel %vm8109_vm7, %v8117_v36, %v8101_v54  ;;  %v8147_v57 = vmul.f32 %v8139_v51, %v13214_v46  ;;  %v8054_v13 = vmul.f32 %v12679_v24, %v8046_v35 }
 0xa8d   : > { %v8133_v4 = vadd.f32 1.0, %v8125_v58  ;;  %v8148_v41 = vmul.f32 %v8140_v0, %v13215_v20 }
 0xa8e   : > { %v8155_v48 = vadd.f32 %v8147_v57, %v13216_v18  ;;  %v8094_v49 = vmul.f32 %v10073_v50, %v8054_v13 }
 0xa8f   : > { %8404 = vrot.lane.b32.xlu1 %v12721_v3, %s10195_s28  ;;  %8191 = vrot.lane.b32.xlu0 %v12733_v47, %s10194_s2  ;;  %v8141_v31 = vmul.f32 %v8133_v4, %v7933_v25  ;;  %v8156_v22 = vadd.f32 %v8148_v41, %v13217_v5 }
 0xa90   : > { %v12746_v29 = vpack.c.bf16 %v8155_v48, %v8155_v48  ;;  %v8102_v24 = vsub.f32 1.0, %v8094_v49  ;;  %v9719_v48 = vld [vmem:[%s13040_s5 + $0x64] sm:$0xf] }
 0xa91   : > { %v8149_v44 = vmul.f32 %v8141_v31, %v13218_v11  ;;  %v12749_v6 = vpack.c.bf16 %v8156_v22, %v8156_v22 }
 0xa92   : > { %v8118_v21 = vsub.f32 0.0, %v8102_v24 }
 0xa93   : > { %v8157_v33 = vadd.f32 %v8149_v44, %v13219_v40  ;;  %8193 = vrot.lane.b32.xlu1 %v12746_v29, %s10194_s2  ;;  %8195 = vrot.lane.b32.xlu0 %v12749_v6, %s10194_s2 }
 0xa94   : > { %v8126_v38 = vsel %vm8110_vm8, %v8118_v21, %v8102_v24 }
 0xa95   : > { %v12757_v15 = vpack.c.bf16 %v8157_v33, %v8157_v33  ;;  %v8134_v34 = vadd.f32 1.0, %v8126_v38 }
 0xa97   : > { %8197 = vrot.lane.b32.xlu1 %v12757_v15, %s10194_s2  ;;  %v8142_v53 = vmul.f32 %v8134_v34, %v7934_v17 }
 0xa99   : > { %v8150_v39 = vmul.f32 %v8142_v53, %v13220_v8 }
 0xa9b   : > { %8408 = vrot.lane.b32.xlu1 %v12733_v47, %s10195_s28  ;;  %v8158_v10 = vadd.f32 %v8150_v39, %v13221_v61 }
 0xa9d   : > { %9295 = vst [vmem:[#allocation2 + $0x28] sm:$0xff] %v8158_v10  ;;  %v12766_v63 = vpack.c.bf16 %v8158_v10, %v8158_v10 }
 0xa9f   : > { %8621 = vrot.lane.b32.xlu1 %v12708_v42, %s10193_s8  ;;  %8199 = vrot.lane.b32.xlu0 %v12766_v63, %s10194_s2  ;;  %s12972_s2 = scalar_lea.hbm %s13042_s7, %s9768_s30 }
 0xaa3   : > { %8412 = vrot.lane.b32.xlu1 %v12749_v6, %s10195_s28  ;;  %8406 = vrot.lane.b32.xlu0 %v12723_v9, %s10195_s28 }
 0xaa7   : > { %8416 = vrot.lane.b32.xlu1 %v12766_v63, %s10195_s28  ;;  %8410 = vrot.lane.b32.xlu0 %v12746_v29, %s10195_s28 }
 0xaab   : > { %8625 = vrot.lane.b32.xlu1 %v12723_v9, %s10193_s8  ;;  %8414 = vrot.lane.b32.xlu0 %v12757_v15, %s10195_s28  ;;  %s10074_s28 = scalar_lea.vmem %s12974_s27, 1024 }
 0xaac   : > { %p10075_p6 = scmp.ne.s32.totalorder %s12974_s27, %s10074_s28  ;;  %p10082_p11 = scmp.lt.s32.totalorder %s10080_s19, %s10074_s28 }
 0xaae   : > { %p10076_p7 = pnand %p10075_p6, %p10316_p10  ;;  %p10083_p13 = por %p10082_p11, %p10081_p9 }
 0xaaf   : > { %8629 = vrot.lane.b32.xlu1 %v12746_v29, %s10193_s8  ;;  %8619 = vrot.lane.b32.xlu0 %v12572_v32, %s10193_s8 }
 0xab0   : > { %p10077_p8 = pneg %p10076_p7 }
 0xab2   : > { %p10084_p0 = pnand %p10083_p13, %p10077_p8 }
 0xab3   : > { %8633 = vrot.lane.b32.xlu1 %v12757_v15, %s10193_s8  ;;  %8623 = vrot.lane.b32.xlu0 %v12721_v3, %s10193_s8 }
 0xab7   : > { %8846 = vrot.lane.b32.xlu1 %v12572_v32, %s10189_s14  ;;  %8627 = vrot.lane.b32.xlu0 %v12733_v47, %s10193_s8  ;;  %v9764_v32 = vld [vmem:[%s13041_s6 + $0x28] sm:$0xff] }
 0xabb   : > { %8850 = vrot.lane.b32.xlu1 %v12721_v3, %s10189_s14  ;;  %8631 = vrot.lane.b32.xlu0 %v12749_v6, %s10193_s8 }
 0xabf   : > { %8854 = vrot.lane.b32.xlu1 %v12733_v47, %s10189_s14  ;;  %8635 = vrot.lane.b32.xlu0 %v12766_v63, %s10193_s8  ;;  %s13222_s8 = sand.u32 1, %s10152_s25  }
 0xac3   : > { %8858 = vrot.lane.b32.xlu1 %v12749_v6, %s10189_s14  ;;  %8848 = vrot.lane.b32.xlu0 %v12708_v42, %s10189_s14 }
 0xac7   : > { %8862 = vrot.lane.b32.xlu1 %v12766_v63, %s10189_s14  ;;  %8852 = vrot.lane.b32.xlu0 %v12723_v9, %s10189_s14 }
 0xacb   : > { %8856 = vrot.lane.b32.xlu0 %v12746_v29, %s10189_s14 }
 0xacf   : > { %8860 = vrot.lane.b32.xlu0 %v12757_v15, %s10189_s14  ;;  %s9305_s14 = scalar_lea.sflag [#allocation5], %s13222_s8 }
 0xad3   : > { %9276 = vperm.xlu0 %9870, %v9764_v32  }
 0xaf9   : > { %v8403_v12 = vpop.permute.xlu0 %8402  ;;  %v8186_v37 = vpop.permute.xlu1 %8185 }
 0xafa   : > { %v8201_v2 = vsel %vm6838_vm15, %v8184_v28, %v8186_v37  ;;  %v8418_v25 = vsel %vm708_vm2, %v8401_v55, %v8403_v12 }
 0xafb   : > { %v8213_v14 = vsel %vm1384_vm12, %v8201_v2, 0  ;;  %v8430_v50 = vsel %vm1384_vm12, %v8418_v25, 0 }
 0xafd   : > { %v8190_v30 = vpop.permute.xlu1 %8189  ;;  %v8188_v54 = vpop.permute.xlu0 %8187 }
 0xafe   : > { %v8202_v27 = vsel %vm6838_vm15, %v8186_v37, %v8188_v54  ;;  %v8203_v16 = vsel %vm6838_vm15, %v8188_v54, %v8190_v30 }
 0xaff   : > { %9721 = vmatprep.subr.msk.bf16.mxu0 %vm1384_vm12, %v8202_v27  ;;  %v8219_v51 = vsel %vm1384_vm12, %v8203_v16, 0  ;;  %v9737_v27 = vld [vmem:[%s13040_s5 + $0x6c] sm:$0xf] }
 0xb00   : > { %8237 = vmatpush1.bf16.msra.mxu0 %v8213_v14 }
 0xb01   : > { %v8405_v7 = vpop.permute.xlu1 %8404  ;;  %v8192_v56 = vpop.permute.xlu0 %8191 }
 0xb02   : > { %v8204_v36 = vsel %vm6838_vm15, %v8190_v30, %v8192_v56  ;;  %v8419_v4 = vsel %vm708_vm2, %v8403_v12, %v8405_v7 }
 0xb03   : > { %9722 = vmatmul.mubr.msk.bf16.vlgmr.msra.gmra.mrb[0].mxu0 %vm1380_vm13, %v9720_v60  ;;  %9723 = vmatprep.subr.msk.bf16.mxu1 %vm1384_vm12, %v8204_v36 }
 0xb04   : > { %8278 = vmatpush1.bf16.msra.mxu1 %v8219_v51  ;;  %8350 = vmatprep.mubr.bf16.mxu0 %v13149_v43 }
 0xb05   : > { %v8194_v35 = vpop.permute.xlu1 %8193  ;;  %v8196_v58 = vpop.permute.xlu0 %8195 }
 0xb06   : > { %v8205_v0 = vsel %vm6838_vm15, %v8192_v56, %v8194_v35  ;;  %v8206_v57 = vsel %vm6838_vm15, %v8194_v35, %v8196_v58 }
 0xb07   : > { %9724 = vmatmul.mubr.msk.bf16.vlgmr.msra.gmra.mrb[0].mxu1 %vm1380_vm13, %v9720_v60  ;;  %v8225_v46 = vsel %vm1384_vm12, %v8205_v0, 0  ;;  %9725 = vmatprep.subr.msk.bf16.mxu0 %vm1384_vm12, %v8206_v57 }
 0xb08   : > { %8391 = vmatprep.mubr.bf16.mxu1 %v13149_v43  ;;  %8319 = vmatpush1.bf16.msra.mxu0 %v8225_v46 }
 0xb09   : > { %v8198_v13 = vpop.permute.xlu1 %8197  ;;  %9729 = vmatprep.subr.msk.bf16.mxu0 %vm1384_vm12, %v8419_v4 }
 0xb0a   : > { %v8207_v41 = vsel %vm6838_vm15, %v8196_v58, %v8198_v13 }
 0xb0b   : > { %9726 = vmatmul.mubr.msk.bf16.vlgmr.msra.gmra.mrb[4].mxu0 %vm1380_vm13, %v9720_v60  ;;  %v8231_v31 = vsel %vm1384_vm12, %v8207_v41, 0 }
 0xb0c   : > { %8454 = vmatpush1.bf16.msra.mxu0 %v8430_v50  ;;  %8485 = vmatprep.mubr.bf16.mxu0 %v13149_v43 }
 0xb0d   : > { %v8409_v20 = vpop.permute.xlu1 %8408 }
 0xb11   : > { %v8622_v18 = vpop.permute.xlu1 %8621  ;;  %v8200_v49 = vpop.permute.xlu0 %8199 }
 0xb12   : > { %v8208_v5 = vsel %vm6838_vm15, %v8198_v13, %v8200_v49 }
 0xb13   : > { %9727 = vmatprep.subr.msk.bf16.mxu1 %vm1384_vm12, %v8208_v5  ;;  %9730 = vmatmul.mubr.msk.bf16.vlgmr.msra.gmra.mrb[8].mxu0 %vm1380_vm13, %v9719_v48 }
 0xb14   : > { %8360 = vmatpush1.bf16.msra.mxu1 %v8231_v31  ;;  %8567 = vmatprep.mubr.bf16.mxu0 %v13149_v43 }
 0xb15   : > { %v8413_v22 = vpop.permute.xlu1 %8412  ;;  %v8407_v11 = vpop.permute.xlu0 %8406 }
 0xb16   : > { %v8420_v44 = vsel %vm708_vm2, %v8405_v7, %v8407_v11  ;;  %v8421_v24 = vsel %vm708_vm2, %v8407_v11, %v8409_v20 }
 0xb17   : > { %v8436_v40 = vsel %vm1384_vm12, %v8420_v44, 0  ;;  %9728 = vmatmul.mubr.msk.bf16.vlgmr.msra.gmra.mrb[4].mxu1 %vm1380_vm13, %v9720_v60  ;;  %9731 = vmatprep.subr.msk.bf16.mxu1 %vm1384_vm12, %v8421_v24 }
 0xb18   : > { %8495 = vmatpush1.bf16.msra.mxu1 %v8436_v40  ;;  %8526 = vmatprep.mubr.bf16.mxu1 %v13149_v43 }
 0xb19   : > { %v8417_v33 = vpop.permute.xlu1 %8416  ;;  %v8411_v21 = vpop.permute.xlu0 %8410 }
 0xb1a   : > { %v8422_v38 = vsel %vm708_vm2, %v8409_v20, %v8411_v21  ;;  %v8423_v17 = vsel %vm708_vm2, %v8411_v21, %v8413_v22 }
 0xb1b   : > { %v8442_v34 = vsel %vm1384_vm12, %v8422_v38, 0  ;;  %9733 = vmatprep.subr.msk.bf16.mxu0 %vm1384_vm12, %v8423_v17 }
 0xb1c   : > { %8536 = vmatpush1.bf16.msra.mxu0 %v8442_v34 }
 0xb1d   : > { %v8626_v53 = vpop.permute.xlu1 %8625  ;;  %v8415_v8 = vpop.permute.xlu0 %8414 }
 0xb1e   : > { %v8424_v39 = vsel %vm708_vm2, %v8413_v22, %v8415_v8  ;;  %v8425_v61 = vsel %vm708_vm2, %v8415_v8, %v8417_v33 }
 0xb1f   : > { %9732 = vmatmul.mubr.msk.bf16.vlgmr.msra.gmra.mrb[8].mxu1 %vm1380_vm13, %v9719_v48  ;;  %9734 = vmatmul.mubr.msk.bf16.vlgmr.msra.gmra.mrb[12].mxu0 %vm1380_vm13, %v9719_v48  ;;  %v8448_v10 = vsel %vm1384_vm12, %v8424_v39, 0 }
 0xb20   : > { %9735 = vmatprep.subr.msk.bf16.mxu1 %vm1384_vm12, %v8425_v61  ;;  %8608 = vmatprep.mubr.bf16.mxu1 %v13149_v43 }
 0xb21   : > { %v8630_v32 = vpop.permute.xlu1 %8629  ;;  %v8620_v55 = vpop.permute.xlu0 %8619  ;;  %8577 = vmatpush1.bf16.msra.mxu1 %v8448_v10  ;;  %8704 = vmatprep.mubr.bf16.mxu0 %v13149_v43 }
 0xb22   : > { %v8637_v28 = vsel %vm1380_vm13, %v8620_v55, %v8622_v18 }
 0xb23   : > { %v8649_v30 = vsel %vm1384_vm12, %v8637_v28, 0 }
 0xb25   : > { %v8634_v12 = vpop.permute.xlu1 %8633  ;;  %v8624_v37 = vpop.permute.xlu0 %8623 }
 0xb26   : > { %v8638_v2 = vsel %vm1380_vm13, %v8622_v18, %v8624_v37  ;;  %v8639_v54 = vsel %vm1380_vm13, %v8624_v37, %v8626_v53  ;;  %v9746_v18 = vld [vmem:[%s13040_s5 + $0x70] sm:$0xf] }
 0xb27   : > { %9736 = vmatmul.mubr.msk.bf16.vlgmr.msra.gmra.mrb[12].mxu1 %vm1380_vm13, %v9719_v48  ;;  %9738 = vmatprep.subr.msk.bf16.mxu0 %vm1384_vm12, %v8638_v2  ;;  %v8655_v7 = vsel %vm1384_vm12, %v8639_v54, 0 }
 0xb28   : > { %8673 = vmatpush1.bf16.msra.mxu0 %v8649_v30  ;;  %8745 = vmatprep.mubr.bf16.mxu1 %v13149_v43 }
 0xb29   : > { %v8847_v14 = vpop.permute.xlu1 %8846  ;;  %v8628_v16 = vpop.permute.xlu0 %8627 }
 0xb2a   : > { %v8640_v60 = vsel %vm1380_vm13, %v8626_v53, %v8628_v16  ;;  %v8641_v56 = vsel %vm1380_vm13, %v8628_v16, %v8630_v32  ;;  %v9077_v53 = vsel %vm1384_vm12, %v12708_v42, 0  ;;  %v9755_v42 = vld [vmem:[%s13040_s5 + $0x74] sm:$0xf] }
 0xb2b   : > { %9739 = vmatmul.mubr.msk.bf16.vlgmr.msra.gmra.mrb[16].mxu0 %vm1380_vm13, %v9737_v27  ;;  %9740 = vmatprep.subr.msk.bf16.mxu1 %vm1384_vm12, %v8640_v60  ;;  %v8661_v0 = vsel %vm1384_vm12, %v8641_v56, 0 }
 0xb2c   : > { %8714 = vmatpush1.bf16.msra.mxu1 %v8655_v7  ;;  %8786 = vmatprep.mubr.bf16.mxu0 %v13149_v43 }
 0xb2d   : > { %v8632_v36 = vpop.permute.xlu0 %8631  ;;  %v8851_v51 = vpop.permute.xlu1 %8850 }
 0xb2e   : > { %v8642_v35 = vsel %vm1380_vm13, %v8630_v32, %v8632_v36  ;;  %v8643_v58 = vsel %vm1380_vm13, %v8632_v36, %v8634_v12 }
 0xb2f   : > { %9741 = vmatmul.mubr.msk.bf16.vlgmr.msra.gmra.mrb[16].mxu1 %vm1380_vm13, %v9737_v27  ;;  %9742 = vmatprep.subr.msk.bf16.mxu0 %vm1384_vm12, %v8642_v35  ;;  %v8667_v25 = vsel %vm1384_vm12, %v8643_v58, 0 }
 0xb30   : > { %8755 = vmatpush1.bf16.msra.mxu0 %v8661_v0  ;;  %8827 = vmatprep.mubr.bf16.mxu1 %v13149_v43 }
 0xb31   : > { %v8636_v46 = vpop.permute.xlu0 %8635  ;;  %v8855_v4 = vpop.permute.xlu1 %8854 }
 0xb32   : > { %v8644_v57 = vsel %vm1380_vm13, %v8634_v12, %v8636_v46 }
 0xb33   : > { %9743 = vmatmul.mubr.msk.bf16.vlgmr.msra.gmra.mrb[20].mxu0 %vm1380_vm13, %v9737_v27  ;;  %9744 = vmatprep.subr.msk.bf16.mxu1 %vm1384_vm12, %v8644_v57 }
 0xb34   : > { %8796 = vmatpush1.bf16.msra.mxu1 %v8667_v25  ;;  %8931 = vmatprep.mubr.bf16.mxu0 %v13149_v43 }
 0xb35   : > { %v8849_v13 = vpop.permute.xlu0 %8848  ;;  %v8859_v31 = vpop.permute.xlu1 %8858 }
 0xb36   : > { %v8864_v50 = vsel %vm425_vm1, %v8847_v14, %v8849_v13  ;;  %v8865_v20 = vsel %vm425_vm1, %v8849_v13, %v8851_v51 }
 0xb37   : > { %v8876_v41 = vsel %vm1384_vm12, %v8864_v50, 0  ;;  %9745 = vmatmul.mubr.msk.bf16.vlgmr.msra.gmra.mrb[20].mxu1 %vm1380_vm13, %v9737_v27  ;;  %9747 = vmatprep.subr.msk.bf16.mxu0 %vm1384_vm12, %v8865_v20 }
 0xb38   : > { %8900 = vmatpush1.bf16.msra.mxu0 %v8876_v41  ;;  %8972 = vmatprep.mubr.bf16.mxu1 %v13149_v43 }
 0xb39   : > { %v8853_v48 = vpop.permute.xlu0 %8852  ;;  %v8863_v33 = vpop.permute.xlu1 %8862 }
 0xb3a   : > { %v8866_v49 = vsel %vm425_vm1, %v8851_v51, %v8853_v48  ;;  %v8867_v5 = vsel %vm425_vm1, %v8853_v48, %v8855_v4 }
 0xb3b   : > { %v8882_v22 = vsel %vm1384_vm12, %v8866_v49, 0  ;;  %9748 = vmatmul.mubr.msk.bf16.vlgmr.msra.gmra.mrb[24].mxu0 %vm1380_vm13, %v9746_v18  ;;  %9749 = vmatprep.subr.msk.bf16.mxu1 %vm1384_vm12, %v8867_v5 }
 0xb3c   : > { %8941 = vmatpush1.bf16.msra.mxu1 %v8882_v22  ;;  %9013 = vmatprep.mubr.bf16.mxu0 %v13149_v43 }
 0xb3d   : > { %v8857_v11 = vpop.permute.xlu0 %8856 }
 0xb3e   : > { %v8868_v44 = vsel %vm425_vm1, %v8855_v4, %v8857_v11  ;;  %v8869_v24 = vsel %vm425_vm1, %v8857_v11, %v8859_v31 }
 0xb3f   : > { %v8888_v40 = vsel %vm1384_vm12, %v8868_v44, 0  ;;  %9750 = vmatmul.mubr.msk.bf16.vlgmr.msra.gmra.mrb[24].mxu1 %vm1380_vm13, %v9746_v18  ;;  %9751 = vmatprep.subr.msk.bf16.mxu0 %vm1384_vm12, %v8869_v24 }
 0xb40   : > { %8982 = vmatpush1.bf16.msra.mxu0 %v8888_v40  ;;  %9054 = vmatprep.mubr.bf16.mxu1 %v13149_v43 }
 0xb41   : > { %9756 = vmatprep.subr.msk.bf16.mxu0 %vm1384_vm12, %v12721_v3  ;;  %v8861_v21 = vpop.permute.xlu0 %8860  ;;  %v9083_v3 = vsel %vm1384_vm12, %v12723_v9, 0  ;;  %v9095_v9 = vsel %vm1384_vm12, %v12757_v15, 0 }
 0xb42   : > { %v8870_v38 = vsel %vm425_vm1, %v8859_v31, %v8861_v21  ;;  %v8871_v17 = vsel %vm425_vm1, %v8861_v21, %v8863_v33 }
 0xb43   : > { %v8894_v34 = vsel %vm1384_vm12, %v8870_v38, 0  ;;  %9752 = vmatmul.mubr.msk.bf16.vlgmr.msra.gmra.mrb[28].mxu0 %vm1380_vm13, %v9746_v18  ;;  %9753 = vmatprep.subr.msk.bf16.mxu1 %vm1384_vm12, %v8871_v17 }
 0xb44   : > { %9023 = vmatpush1.bf16.msra.mxu1 %v8894_v34  ;;  %9101 = vmatpush1.bf16.msra.mxu0 %v9077_v53 }
 0xb45   : > { %9758 = vmatprep.subr.msk.bf16.mxu1 %vm1384_vm12, %v12733_v47  ;;  %9760 = vmatprep.subr.msk.bf16.mxu0 %vm1384_vm12, %v12749_v6  ;;  %v9089_v47 = vsel %vm1384_vm12, %v12746_v29, 0 }
 0xb46   : > { %9132 = vmatprep.mubr.bf16.mxu0 %v13149_v43 }
 0xb47   : > { %9754 = vmatmul.mubr.msk.bf16.vlgmr.msra.gmra.mrb[28].mxu1 %vm1380_vm13, %v9746_v18 }
 0xb48   : > { %9142 = vmatpush1.bf16.msra.mxu1 %v9083_v3  ;;  %9173 = vmatprep.mubr.bf16.mxu1 %v13149_v43 }
 0xb49   : > { %9762 = vmatprep.subr.msk.bf16.mxu1 %vm1384_vm12, %v12766_v63 }
 0xb4b   : > { %9757 = vmatmul.mubr.msk.bf16.vlgmr.msra.gmra.mrb[32].mxu0 %vm1380_vm13, %v9755_v42 }
 0xb4c   : > { %9183 = vmatpush1.bf16.msra.mxu0 %v9089_v47  ;;  %9214 = vmatprep.mubr.bf16.mxu0 %v13149_v43 }
 0xb4f   : > { %9759 = vmatmul.mubr.msk.bf16.vlgmr.msra.gmra.mrb[32].mxu1 %vm1380_vm13, %v9755_v42 }
 0xb50   : > { %9224 = vmatpush1.bf16.msra.mxu1 %v9095_v9  ;;  %9255 = vmatprep.mubr.bf16.mxu1 %v13149_v43 }
 0xb53   : > { %9761 = vmatmul.mubr.msk.bf16.vlgmr.msra.gmra.mrb[36].mxu0 %vm1380_vm13, %v9755_v42 }
 0xb57   : > { %9763 = vmatmul.mubr.msk.bf16.vlgmr.msra.gmra.mrb[36].mxu1 %vm1380_vm13, %v9755_v42 }
 0xbd6   : > { %v8270_v6 = vpop.f32.mrb[0].mxu0 }
 0xbd7   : > { %v8272_v63 = vpop.f32.mrb[1].mxu0 }
 0xbd8   : > { %v8274_v8 = vpop.f32.mrb[2].mxu0 }
 0xbd9   : > { %v8275_v39 = vpop.f32.mrb[3].mxu0 }
 0xbda   : > { %v8311_v29 = vpop.f32.mrb[0].mxu1 }
 0xbdb   : > { %v8313_v61 = vpop.f32.mrb[1].mxu1 }
 0xbdc   : > { %v8315_v10 = vpop.f32.mrb[2].mxu1 }
 0xbdd   : > { %v8316_v32 = vpop.f32.mrb[3].mxu1 }
 0xbde   : > { %v8352_v55 = vpop.f32.mrb[4].mxu0 }
 0xbdf   : > { %v8354_v28 = vpop.f32.mrb[5].mxu0 }
 0xbe0   : > { %v8356_v12 = vpop.f32.mrb[6].mxu0 }
 0xbe1   : > { %v8357_v37 = vpop.f32.mrb[7].mxu0 }
 0xbe6   : > { %v8487_v15 = vpop.f32.mrb[8].mxu0 }
 0xbe7   : > { %v8488_v2 = vadd.f32 %v8487_v15, %v8270_v6  ;;  %v8489_v30 = vpop.f32.mrb[9].mxu0 }
 0xbe8   : > { %v8490_v43 = vadd.f32 %v8489_v30, %v8272_v63  ;;  %v8491_v54 = vpop.f32.mrb[10].mxu0 }
 0xbe9   : > { %v8492_v27 = vpop.f32.mrb[11].mxu0 }
 0xbea   : > { %v8393_v14 = vpop.f32.mrb[4].mxu1 }
 0xbeb   : > { %v8395_v16 = vpop.f32.mrb[5].mxu1 }
 0xbec   : > { %v8397_v60 = vpop.f32.mrb[6].mxu1 }
 0xbed   : > { %v8398_v7 = vpop.f32.mrb[7].mxu1 }
 0xbf2   : > { %v8528_v56 = vpop.f32.mrb[8].mxu1  ;;  %v8569_v36 = vpop.f32.mrb[12].mxu0 }
 0xbf3   : > { %v8529_v51 = vadd.f32 %v8528_v56, %v8311_v29  ;;  %v8530_v35 = vpop.f32.mrb[9].mxu1  ;;  %v8570_v0 = vadd.f32 %v8569_v36, %v8352_v55  ;;  %v8571_v58 = vpop.f32.mrb[13].mxu0 }
 0xbf4   : > { %v8531_v46 = vadd.f32 %v8530_v35, %v8313_v61  ;;  %v8532_v57 = vpop.f32.mrb[10].mxu1  ;;  %v8572_v25 = vadd.f32 %v8571_v58, %v8354_v28  ;;  %v8573_v4 = vpop.f32.mrb[14].mxu0 }
 0xbf5   : > { %v8533_v13 = vpop.f32.mrb[11].mxu1  ;;  %v8574_v50 = vpop.f32.mrb[15].mxu0 }
 0xbfa   : > { %v8610_v20 = vpop.f32.mrb[12].mxu1 }
 0xbfb   : > { %v8611_v41 = vadd.f32 %v8610_v20, %v8393_v14  ;;  %v8612_v18 = vpop.f32.mrb[13].mxu1 }
 0xbfc   : > { %v8613_v48 = vadd.f32 %v8612_v18, %v8395_v16  ;;  %v8614_v31 = vpop.f32.mrb[14].mxu1 }
 0xbfd   : > { %v8615_v49 = vpop.f32.mrb[15].mxu1 }
 0xbfe   : > { %v8706_v5 = vpop.f32.mrb[16].mxu0 }
 0xbff   : > { %v8836_v22 = vadd.f32 %v8706_v5, %v8488_v2  ;;  %v8708_v11 = vpop.f32.mrb[17].mxu0 }
 0xc00   : > { %v8837_v44 = vadd.f32 %v8708_v11, %v8490_v43  ;;  %v8710_v24 = vpop.f32.mrb[18].mxu0 }
 0xc01   : > { %v8711_v40 = vpop.f32.mrb[19].mxu0 }
 0xc02   : > { %v8747_v33 = vpop.f32.mrb[16].mxu1 }
 0xc03   : > { %v8838_v21 = vadd.f32 %v8747_v33, %v8529_v51  ;;  %v8749_v38 = vpop.f32.mrb[17].mxu1 }
 0xc04   : > { %v8839_v17 = vadd.f32 %v8749_v38, %v8531_v46  ;;  %v8751_v34 = vpop.f32.mrb[18].mxu1 }
 0xc05   : > { %v8752_v53 = vpop.f32.mrb[19].mxu1 }
 0xc06   : > { %v8788_v3 = vpop.f32.mrb[20].mxu0 }
 0xc07   : > { %v8840_v42 = vadd.f32 %v8788_v3, %v8570_v0  ;;  %v8790_v47 = vpop.f32.mrb[21].mxu0 }
 0xc08   : > { %v8841_v9 = vadd.f32 %v8790_v47, %v8572_v25  ;;  %v8792_v6 = vpop.f32.mrb[22].mxu0 }
 0xc09   : > { %v8793_v63 = vpop.f32.mrb[23].mxu0 }
 0xc0a   : > { %v8829_v8 = vpop.f32.mrb[20].mxu1 }
 0xc0b   : > { %v8842_v39 = vadd.f32 %v8829_v8, %v8611_v41  ;;  %v8831_v29 = vpop.f32.mrb[21].mxu1  ;;  %v9277_v41 = vpop.permute.xlu0 %9276 }
 0xc0c   : > { %v8843_v61 = vadd.f32 %v8831_v29, %v8613_v48  ;;  %v8833_v10 = vpop.f32.mrb[22].mxu1 }
 0xc0d   : > { %v8834_v32 = vpop.f32.mrb[23].mxu1 }
 0xc0e   : > { %v8933_v55 = vpop.f32.mrb[24].mxu0 }
 0xc0f   : > { %v9063_v28 = vadd.f32 %v8933_v55, %v8836_v22  ;;  %v8935_v12 = vpop.f32.mrb[25].mxu0 }
 0xc10   : > { %v9064_v37 = vadd.f32 %v8935_v12, %v8837_v44  ;;  %v8937_v15 = vpop.f32.mrb[26].mxu0 }
 0xc11   : > { %v8938_v2 = vpop.f32.mrb[27].mxu0 }
 0xc12   : > { %v8974_v30 = vpop.f32.mrb[24].mxu1 }
 0xc13   : > { %v9065_v43 = vadd.f32 %v8974_v30, %v8838_v21  ;;  %v8976_v54 = vpop.f32.mrb[25].mxu1 }
 0xc14   : > { %v9066_v27 = vadd.f32 %v8976_v54, %v8839_v17  ;;  %v8978_v14 = vpop.f32.mrb[26].mxu1 }
 0xc15   : > { %v8979_v16 = vpop.f32.mrb[27].mxu1 }
 0xc16   : > { %v9015_v60 = vpop.f32.mrb[28].mxu0 }
 0xc17   : > { %v9067_v7 = vadd.f32 %v9015_v60, %v8840_v42  ;;  %v9017_v56 = vpop.f32.mrb[29].mxu0 }
 0xc18   : > { %v9068_v36 = vadd.f32 %v9017_v56, %v8841_v9  ;;  %v9019_v51 = vpop.f32.mrb[30].mxu0 }
 0xc19   : > { %v9020_v35 = vpop.f32.mrb[31].mxu0 }
 0xc1a   : > { %v9056_v0 = vpop.f32.mrb[28].mxu1 }
 0xc1b   : > { %v9069_v58 = vadd.f32 %v9056_v0, %v8842_v39  ;;  %v9058_v46 = vpop.f32.mrb[29].mxu1 }
 0xc1c   : > { %v9070_v57 = vadd.f32 %v9058_v46, %v8843_v61  ;;  %v9060_v25 = vpop.f32.mrb[30].mxu1 }
 0xc1d   : > { %v9061_v4 = vpop.f32.mrb[31].mxu1 }
 0xc1e   : > { %v9134_v13 = vpop.f32.mrb[32].mxu0 }
 0xc1f   : > { %v9264_v50 = vadd.f32 %v9134_v13, %v9063_v28  ;;  %v9136_v20 = vpop.f32.mrb[33].mxu0 }
 0xc20   : > { %v9265_v18 = vadd.f32 %v9136_v20, %v9064_v37  ;;  %v9138_v48 = vpop.f32.mrb[34].mxu0 }
 0xc21   : > { %v9279_v31 = vadd.f32 %v9277_v41, %v9264_v50  ;;  %v9139_v49 = vpop.f32.mrb[35].mxu0 }
 0xc22   : > { %v9280_v5 = vadd.f32 %v9277_v41, %v9265_v18  ;;  %v9175_v22 = vpop.f32.mrb[32].mxu1 }
 0xc23   : > { %v9287_v11 = vadd.f32 %v9279_v31, %v12180_v59  ;;  %v9266_v44 = vadd.f32 %v9175_v22, %v9065_v43  ;;  %v9177_v24 = vpop.f32.mrb[33].mxu1 }
 0xc24   : > { %v9288_v40 = vadd.f32 %v9280_v5, %v12183_v19  ;;  %v9267_v33 = vadd.f32 %v9177_v24, %v9066_v27  ;;  %v9179_v21 = vpop.f32.mrb[34].mxu1 }
 0xc25   : > { %9296 = vst [vmem:[%s10358_s26] sm:$0xff] %v9287_v11  ;;  %v9281_v38 = vadd.f32 %v9277_v41, %v9266_v44  ;;  %v9180_v17 = vpop.f32.mrb[35].mxu1 }
 0xc26   : > { %9297 = vst [vmem:[%s10358_s26 + $0x8] sm:$0xff] %v9288_v40  ;;  %v9282_v34 = vadd.f32 %v9277_v41, %v9267_v33  ;;  %v9216_v53 = vpop.f32.mrb[36].mxu0 }
 0xc27   : > { %v9289_v3 = vadd.f32 %v9281_v38, %v12195_v45  ;;  %v9268_v42 = vadd.f32 %v9216_v53, %v9067_v7  ;;  %v9218_v47 = vpop.f32.mrb[37].mxu0 }
 0xc28   : > { %v9290_v59 = vadd.f32 %v9282_v34, %v12199_v26  ;;  %v9269_v19 = vadd.f32 %v9218_v47, %v9068_v36  ;;  %v9220_v9 = vpop.f32.mrb[38].mxu0 }
 0xc29   : > { %9298 = vst [vmem:[%s10358_s26 + $0x10] sm:$0xff] %v9289_v3  ;;  %v9283_v6 = vadd.f32 %v9277_v41, %v9268_v42  ;;  %v9221_v63 = vpop.f32.mrb[39].mxu0 }
 0xc2a   : > { %9299 = vst [vmem:[%s10358_s26 + $0x18] sm:$0xff] %v9290_v59  ;;  %v9284_v8 = vadd.f32 %v9277_v41, %v9269_v19  ;;  %v9257_v39 = vpop.f32.mrb[36].mxu1 }
 0xc2b   : > { %v9291_v29 = vadd.f32 %v9283_v6, %v12212_v1  ;;  %v9270_v45 = vadd.f32 %v9257_v39, %v9069_v58  ;;  %v9259_v61 = vpop.f32.mrb[37].mxu1 }
 0xc2c   : > { %v9292_v26 = vadd.f32 %v9284_v8, %v12215_v62  ;;  %v9271_v10 = vadd.f32 %v9259_v61, %v9070_v57  ;;  %v9261_v32 = vpop.f32.mrb[38].mxu1 }
 0xc2d   : > { %9300 = vst [vmem:[%s10358_s26 + $0x20] sm:$0xff] %v9291_v29  ;;  %v9285_v55 = vadd.f32 %v9277_v41, %v9270_v45  ;;  %v9262_v28 = vpop.f32.mrb[39].mxu1 }
 0xc2e   : > { %9301 = vst [vmem:[%s10358_s26 + $0x28] sm:$0xff] %v9292_v26  ;;  %v9286_v12 = vadd.f32 %v9277_v41, %v9271_v10 }
 0xc2f   : > { %v9293_v37 = vadd.f32 %v9285_v55, %v12227_v52 }
 0xc30   : > { %v9294_v1 = vadd.f32 %v9286_v12, %v12253_v23 }
 0xc31   : > { %9302 = vst [vmem:[%s10358_s26 + $0x30] sm:$0xff] %v9293_v37 }
 0xc32   : > { %9303 = vst [vmem:[%s10358_s26 + $0x38] sm:$0xff] %v9294_v1 }
 0xc33   : > { %10087 = shalt.err (!%p10084_p0)
}
 0xc34   : > { %s10088_s26 = scalar_lea.hbm %s12972_s2, 1024  ;;  %s10092_s15 = scalar_lea.hbm %s13042_s7, 4096 }
 0xc35   : > { %p10089_p1 = scmp.ne.s32.totalorder %s12972_s2, %s10088_s26  ;;  %p10093_p4 = scmp.lt.u32.totalorder %s12972_s2, %s13042_s7 }
 0xc36   : > { %p10094_p5 = scmp.lt.u32.totalorder %s10092_s15, %s10088_s26  ;;  %p10096_p7 = scmp.lt.u32.totalorder %s10088_s26, %s12972_s2 }
 0xc37   : > { %p10090_p2 = pnand %p10089_p1, %p10316_p10 }
 0xc38   : > { %p10095_p6 = por %p10094_p5, %p10093_p4 }
 0xc39   : > { %p10091_p3 = pneg %p10090_p2 }
 0xc3a   : > { %p10097_p8 = por %p10096_p7, %p10095_p6 }
 0xc3c   : > { %p10098_p9 = pnand %p10097_p8, %p10091_p3 }
 0xc3e   : > { %10101 = shalt.err (!%p10098_p9)
}
 0xc3f   : > { %9773 = dma.vmem_to_hbm [thread:$0]  (%p10316_p10), %s12974_s27, 1024, %s12972_s2, %s9305_s14  }
 0xc40 PF: > { %p9779_p11 = scmp.ge.s32.totalorder %s10184_s10, 2  ;;  %s9333_s12 = sand.u32 1, %s10148_s24  }
 0xc41   : > { %s9334_s18 = scalar_lea.sflag [#allocation5], %s9333_s12 }
 0xc42   : > { %p9776_p13 = pnand %p9779_p11, %p10323_p12 }
 0xc44   : > { %10143 = dma.done.wait (!%p9776_p13), %s9334_s18, 1024  }
 0xc45   : > { %10145 = vsyncadd (!%p9776_p13), %s9334_s18, 4294966272  ;;  %s20_s10 = sadd.s32 1, %s10184_s10   ;;  %s13223_s30 = sld [smem:[#allocation7_spill]] }
 0xc46   : > { %p17_p0 = scmp.ge.s32.totalorder %s20_s10, 6   ;;  %s13224_s26 = sld [smem:[#allocation14_spill]] }
 0xc47   : > { %s13225_s27 = sld [smem:[#allocation8_spill]]  ;;  %s13226_s28 = sld [smem:[#allocation13_spill]] }
 0xc48   : > { %s13227_s29 = sld [smem:[#allocation9_spill]]  ;;  %s13228_s22 = sld [smem:[#allocation10_spill]] }
 0xc49   : > { %s13229_s8 = sld [smem:[#allocation11_spill]]  ;;  %s13230_s9 = sld [smem:[#allocation12_spill]] }
 0xc4a   : > { %s13231_s24 = smov %s10152_s25  ;;  %19 = sbr.rel (!%p17_p0) target bundleno = 8 (0x8), region = 160 }
 0xc4b   : > { %s13232_s25 = smov %s13223_s30 }
 0xc4e   : > { %s13233_s30 = smov %s13228_s22 }
 0xc51   :  { %9339 = vsyncpa [#allocation5], 1 }
 0xc52   :  { %9341 = vsyncpa [#allocation5 + $0x1], 1 }

</bundles_post_ra>
